<compile_context>
chip_gen: v7x
topology: tpu7x:2x2x1
jax: 0.10.0
libtpu: 0.0.40
codegen_flags: <defaults>
</compile_context>

<pallas_src>
import jax
import jax.numpy as jnp
from jax.experimental import pallas as pl
from jax.experimental.pallas import tpu as pltpu

FINAL_TOTAL_CLASS = 101
LATENT_DIM = 300 + 100                           # 400
IN_FEATURES = LATENT_DIM + FINAL_TOTAL_CLASS     # 501
IN_FEATURES_PAD = 512                            # layer-0 K padded to a lane-friendly size
OUT_FEATURES = 2048
BN_EPS = 0.8                                     # nn.BatchNorm1d(out_feat, 0.8) -> eps=0.8
LEAKY_SLOPE = 0.2


def _generator_kernel(x_ref,
                      w0_ref, b0_ref,
                      w1_ref, b1_ref, g1_ref, be1_ref,
                      w2_ref, b2_ref, g2_ref, be2_ref,
                      w3_ref, b3_ref, g3_ref, be3_ref,
                      w4_ref, b4_ref,
                      o_ref):
    """Entire 5-layer generator MLP; every ref is fully resident in VMEM."""

    def dot(h, w_ref):
        # bf16 activations x bf16 weights -> f32 accumulation on the MXU.
        return jnp.dot(h.astype(jnp.bfloat16), w_ref[...],
                       preferred_element_type=jnp.float32)

    def leaky(y):
        return jnp.where(y > 0, y, LEAKY_SLOPE * y)

    def batchnorm(y, g_ref, be_ref):
        # Training-mode BatchNorm1d over the full batch axis (biased variance).
        # Correct by construction: the whole batch is in this one VMEM block.
        m = jnp.mean(y, axis=0, keepdims=True)
        v = jnp.mean((y - m) ** 2, axis=0, keepdims=True)
        return (y - m) * jax.lax.rsqrt(v + BN_EPS) * g_ref[...] + be_ref[...]

    h = leaky(dot(x_ref[...], w0_ref) + b0_ref[...])                      # 512  -> 128
    h = leaky(batchnorm(dot(h, w1_ref) + b1_ref[...], g1_ref, be1_ref))   # 128  -> 256
    h = leaky(batchnorm(dot(h, w2_ref) + b2_ref[...], g2_ref, be2_ref))   # 256  -> 512
    h = leaky(batchnorm(dot(h, w3_ref) + b3_ref[...], g3_ref, be3_ref))   # 512  -> 1024
    o_ref[...] = jnp.tanh(dot(h, w4_ref) + b4_ref[...])                   # 1024 -> 2048


def init_params(key):
    """Deterministic synthetic parameters matching the module's shapes."""
    dims = [(IN_FEATURES, 128), (128, 256), (256, 512), (512, 1024),
            (1024, OUT_FEATURES)]
    params = {}
    key, ek = jax.random.split(key)
    # nn.Embedding default init: N(0, 1)
    params["label_emb"] = jax.random.normal(
        ek, (FINAL_TOTAL_CLASS, FINAL_TOTAL_CLASS), jnp.float32)
    for i, (fin, fout) in enumerate(dims):
        key, wk, bk = jax.random.split(key, 3)
        bound = 1.0 / (fin ** 0.5)
        w = jax.random.uniform(wk, (fin, fout), jnp.float32, -bound, bound)
        if i == 0:
            # Pre-pad the reduction dim ONCE (501 -> 512); padded rows are zero
            # and meet zero-padded input columns, so the result is unchanged.
            w = jnp.pad(w, ((0, IN_FEATURES_PAD - fin), (0, 0)))
        params[f"w{i}"] = w.astype(jnp.bfloat16)
        params[f"b{i}"] = jax.random.uniform(bk, (fout,), jnp.float32, -bound, bound)
        # BatchNorm affine params (init: gamma=1, beta=0)
        params[f"g{i}"] = jnp.ones((fout,), jnp.float32)
        params[f"beta{i}"] = jnp.zeros((fout,), jnp.float32)
    return params


def generator_forward(params, noise, labels):
    B = noise.shape[0]
    # Embedding lookup + concat + pad are glue (plain JAX, tiny).
    emb = jnp.take(params["label_emb"], labels, axis=0)               # (B, 101)
    x = jnp.concatenate([emb, noise], axis=-1)                        # (B, 501)
    x = jnp.pad(x, ((0, 0), (0, IN_FEATURES_PAD - IN_FEATURES)))      # (B, 512)

    def row(v):  # (N,) -> (1, N): lane-major, broadcasts cleanly in-kernel
        return v.reshape(1, -1)

    inputs = (
        x,
        params["w0"], row(params["b0"]),
        params["w1"], row(params["b1"]), row(params["g1"]), row(params["beta1"]),
        params["w2"], row(params["b2"]), row(params["g2"]), row(params["beta2"]),
        params["w3"], row(params["b3"]), row(params["g3"]), row(params["beta3"]),
        params["w4"], row(params["b4"]),
    )

    def vmem_spec():
        return pl.BlockSpec(memory_space=pltpu.MemorySpace.VMEM)

    # VMEM budget: weights ~5.5 MiB bf16 + <0.1 MiB vectors + (B, 2048) f32
    # activations/output -- comfortably under the scoped limit on v5e/v6e/v7x.
    return pl.pallas_call(
        _generator_kernel,
        out_shape=jax.ShapeDtypeStruct((B, OUT_FEATURES), jnp.float32),
        in_specs=[vmem_spec() for _ in inputs],
        out_specs=vmem_spec(),
        compiler_params=pltpu.CompilerParams(
            vmem_limit_bytes=32 * 1024 * 1024),
    )(*inputs)


def generator_reference(params, noise, labels):
    """Pure-JAX reference mirroring the kernel math (same bf16 weights)."""
    emb = jnp.take(params["label_emb"], labels, axis=0)
    x = jnp.concatenate([emb, noise], axis=-1)
    x = jnp.pad(x, ((0, 0), (0, IN_FEATURES_PAD - IN_FEATURES)))

    def dot(h, w):
        return jnp.dot(h.astype(jnp.bfloat16), w,
                       preferred_element_type=jnp.float32)

    def layer(h, i, bn, act):
        y = dot(h, params[f"w{i}"]) + params[f"b{i}"]
        if bn:
            m = jnp.mean(y, axis=0, keepdims=True)
            v = jnp.mean((y - m) ** 2, axis=0, keepdims=True)
            y = (y - m) * jax.lax.rsqrt(v + BN_EPS)
            y = y * params[f"g{i}"] + params[f"beta{i}"]
        if act == "leaky":
            y = jnp.where(y > 0, y, LEAKY_SLOPE * y)
        else:
            y = jnp.tanh(y)
        return y

    x = layer(x, 0, False, "leaky")
    x = layer(x, 1, True, "leaky")
    x = layer(x, 2, True, "leaky")
    x = layer(x, 3, True, "leaky")
    return layer(x, 4, False, "tanh")


if __name__ == "__main__":
    key = jax.random.PRNGKey(0)
    pkey, nkey, lkey = jax.random.split(key, 3)

    B = 8  # batch; whole batch is resident in VMEM (required for BN statistics)
    params = init_params(pkey)
    noise = jax.random.normal(nkey, (B, LATENT_DIM), jnp.float32)
    labels = jax.random.randint(lkey, (B,), 0, FINAL_TOTAL_CLASS, jnp.int32)

    img = jax.jit(generator_forward)(params, noise, labels)
    jax.block_until_ready(img)

    ref = generator_reference(params, noise, labels)
    assert img.shape == (B, OUT_FEATURES)
    assert jnp.allclose(img, ref, atol=1e-3, rtol=1e-3), (
        "max abs err = %g" % float(jnp.max(jnp.abs(img - ref))))

    print("KERNEL_OK")
</pallas_src>

<mosaic_0001>
module attributes {stable_mosaic.version = 11 : i64} {
  func.func @_generator_kernel(%arg0: memref<8x512xf32, #tpu.memory_space<vmem>>, %arg1: memref<512x128xbf16, #tpu.memory_space<vmem>>, %arg2: memref<1x128xf32, #tpu.memory_space<vmem>>, %arg3: memref<128x256xbf16, #tpu.memory_space<vmem>>, %arg4: memref<1x256xf32, #tpu.memory_space<vmem>>, %arg5: memref<1x256xf32, #tpu.memory_space<vmem>>, %arg6: memref<1x256xf32, #tpu.memory_space<vmem>>, %arg7: memref<256x512xbf16, #tpu.memory_space<vmem>>, %arg8: memref<1x512xf32, #tpu.memory_space<vmem>>, %arg9: memref<1x512xf32, #tpu.memory_space<vmem>>, %arg10: memref<1x512xf32, #tpu.memory_space<vmem>>, %arg11: memref<512x1024xbf16, #tpu.memory_space<vmem>>, %arg12: memref<1x1024xf32, #tpu.memory_space<vmem>>, %arg13: memref<1x1024xf32, #tpu.memory_space<vmem>>, %arg14: memref<1x1024xf32, #tpu.memory_space<vmem>>, %arg15: memref<1024x2048xbf16, #tpu.memory_space<vmem>>, %arg16: memref<1x2048xf32, #tpu.memory_space<vmem>>, %arg17: memref<8x2048xf32, #tpu.memory_space<vmem>>) attributes {dimension_semantics = [], scalar_prefetch = 0 : i64, scratch_operands = 0 : i64, tpu.core_type = #tpu.core_type<tc>} {
    %c0 = arith.constant 0 : index
    %c0_0 = arith.constant 0 : index
    %0 = vector.load %arg0[%c0, %c0_0] : memref<8x512xf32, #tpu.memory_space<vmem>>, vector<8x512xf32>
    %1 = arith.truncf %0 : vector<8x512xf32> to vector<8x512xbf16>
    %c0_1 = arith.constant 0 : index
    %c0_2 = arith.constant 0 : index
    %2 = vector.load %arg1[%c0_1, %c0_2] : memref<512x128xbf16, #tpu.memory_space<vmem>>, vector<512x128xbf16>
    %cst = arith.constant dense<0.000000e+00> : vector<8x128xf32>
    %3 = tpu.matmul %1, %2, %cst {dimension_numbers = #tpu.dot_dimension_numbers<[1], [0], [0], [1], [0, 0, 1, 1], [], []>} : vector<8x512xbf16>, vector<512x128xbf16>, vector<8x128xf32> -> vector<8x128xf32>
    %c0_3 = arith.constant 0 : index
    %c0_4 = arith.constant 0 : index
    %4 = vector.load %arg2[%c0_3, %c0_4] : memref<1x128xf32, #tpu.memory_space<vmem>>, vector<1x128xf32>
    %5 = vector.broadcast %4 : vector<1x128xf32> to vector<8x128xf32>
    %6 = arith.addf %3, %5 : vector<8x128xf32>
    %cst_5 = arith.constant 0.000000e+00 : f32
    %7 = vector.broadcast %cst_5 : f32 to vector<8x128xf32>
    %8 = arith.cmpf ogt, %6, %7 : vector<8x128xf32>
    %cst_6 = arith.constant 2.000000e-01 : f32
    %9 = vector.broadcast %cst_6 : f32 to vector<8x128xf32>
    %10 = arith.mulf %9, %6 : vector<8x128xf32>
    %11 = arith.select %8, %6, %10 : vector<8x128xi1>, vector<8x128xf32>
    %12 = arith.truncf %11 : vector<8x128xf32> to vector<8x128xbf16>
    %c0_7 = arith.constant 0 : index
    %c0_8 = arith.constant 0 : index
    %13 = vector.load %arg3[%c0_7, %c0_8] : memref<128x256xbf16, #tpu.memory_space<vmem>>, vector<128x256xbf16>
    %cst_9 = arith.constant dense<0.000000e+00> : vector<8x256xf32>
    %14 = tpu.matmul %12, %13, %cst_9 {dimension_numbers = #tpu.dot_dimension_numbers<[1], [0], [0], [1], [0, 0, 1, 1], [], []>} : vector<8x128xbf16>, vector<128x256xbf16>, vector<8x256xf32> -> vector<8x256xf32>
    %c0_10 = arith.constant 0 : index
    %c0_11 = arith.constant 0 : index
    %15 = vector.load %arg4[%c0_10, %c0_11] : memref<1x256xf32, #tpu.memory_space<vmem>>, vector<1x256xf32>
    %16 = vector.broadcast %15 : vector<1x256xf32> to vector<8x256xf32>
    %17 = arith.addf %14, %16 : vector<8x256xf32>
    %cst_12 = arith.constant dense<0.000000e+00> : vector<256xf32>
    %18 = vector.multi_reduction <add>, %17, %cst_12 [0] : vector<8x256xf32> to vector<256xf32>
    %19 = vector.shape_cast %18 : vector<256xf32> to vector<1x256xf32>
    %cst_13 = arith.constant 8.000000e+00 : f32
    %20 = vector.broadcast %cst_13 : f32 to vector<1x256xf32>
    %21 = arith.divf %19, %20 : vector<1x256xf32>
    %22 = vector.broadcast %21 : vector<1x256xf32> to vector<8x256xf32>
    %23 = arith.subf %17, %22 : vector<8x256xf32>
    %24 = arith.mulf %23, %23 : vector<8x256xf32>
    %cst_14 = arith.constant dense<0.000000e+00> : vector<256xf32>
    %25 = vector.multi_reduction <add>, %24, %cst_14 [0] : vector<8x256xf32> to vector<256xf32>
    %26 = vector.shape_cast %25 : vector<256xf32> to vector<1x256xf32>
    %cst_15 = arith.constant 8.000000e+00 : f32
    %27 = vector.broadcast %cst_15 : f32 to vector<1x256xf32>
    %28 = arith.divf %26, %27 : vector<1x256xf32>
    %29 = vector.broadcast %21 : vector<1x256xf32> to vector<8x256xf32>
    %30 = arith.subf %17, %29 : vector<8x256xf32>
    %cst_16 = arith.constant 8.000000e-01 : f32
    %31 = vector.broadcast %cst_16 : f32 to vector<1x256xf32>
    %32 = arith.addf %28, %31 : vector<1x256xf32>
    %33 = math.rsqrt %32 : vector<1x256xf32>
    %34 = vector.broadcast %33 : vector<1x256xf32> to vector<8x256xf32>
    %35 = arith.mulf %30, %34 : vector<8x256xf32>
    %c0_17 = arith.constant 0 : index
    %c0_18 = arith.constant 0 : index
    %36 = vector.load %arg5[%c0_17, %c0_18] : memref<1x256xf32, #tpu.memory_space<vmem>>, vector<1x256xf32>
    %37 = vector.broadcast %36 : vector<1x256xf32> to vector<8x256xf32>
    %38 = arith.mulf %35, %37 : vector<8x256xf32>
    %c0_19 = arith.constant 0 : index
    %c0_20 = arith.constant 0 : index
    %39 = vector.load %arg6[%c0_19, %c0_20] : memref<1x256xf32, #tpu.memory_space<vmem>>, vector<1x256xf32>
    %40 = vector.broadcast %39 : vector<1x256xf32> to vector<8x256xf32>
    %41 = arith.addf %38, %40 : vector<8x256xf32>
    %cst_21 = arith.constant 0.000000e+00 : f32
    %42 = vector.broadcast %cst_21 : f32 to vector<8x256xf32>
    %43 = arith.cmpf ogt, %41, %42 : vector<8x256xf32>
    %cst_22 = arith.constant 2.000000e-01 : f32
    %44 = vector.broadcast %cst_22 : f32 to vector<8x256xf32>
    %45 = arith.mulf %44, %41 : vector<8x256xf32>
    %46 = arith.select %43, %41, %45 : vector<8x256xi1>, vector<8x256xf32>
    %47 = arith.truncf %46 : vector<8x256xf32> to vector<8x256xbf16>
    %c0_23 = arith.constant 0 : index
    %c0_24 = arith.constant 0 : index
    %48 = vector.load %arg7[%c0_23, %c0_24] : memref<256x512xbf16, #tpu.memory_space<vmem>>, vector<256x512xbf16>
    %cst_25 = arith.constant dense<0.000000e+00> : vector<8x512xf32>
    %49 = tpu.matmul %47, %48, %cst_25 {dimension_numbers = #tpu.dot_dimension_numbers<[1], [0], [0], [1], [0, 0, 1, 1], [], []>} : vector<8x256xbf16>, vector<256x512xbf16>, vector<8x512xf32> -> vector<8x512xf32>
    %c0_26 = arith.constant 0 : index
    %c0_27 = arith.constant 0 : index
    %50 = vector.load %arg8[%c0_26, %c0_27] : memref<1x512xf32, #tpu.memory_space<vmem>>, vector<1x512xf32>
    %51 = vector.broadcast %50 : vector<1x512xf32> to vector<8x512xf32>
    %52 = arith.addf %49, %51 : vector<8x512xf32>
    %cst_28 = arith.constant dense<0.000000e+00> : vector<512xf32>
    %53 = vector.multi_reduction <add>, %52, %cst_28 [0] : vector<8x512xf32> to vector<512xf32>
    %54 = vector.shape_cast %53 : vector<512xf32> to vector<1x512xf32>
    %cst_29 = arith.constant 8.000000e+00 : f32
    %55 = vector.broadcast %cst_29 : f32 to vector<1x512xf32>
    %56 = arith.divf %54, %55 : vector<1x512xf32>
    %57 = vector.broadcast %56 : vector<1x512xf32> to vector<8x512xf32>
    %58 = arith.subf %52, %57 : vector<8x512xf32>
    %59 = arith.mulf %58, %58 : vector<8x512xf32>
    %cst_30 = arith.constant dense<0.000000e+00> : vector<512xf32>
    %60 = vector.multi_reduction <add>, %59, %cst_30 [0] : vector<8x512xf32> to vector<512xf32>
    %61 = vector.shape_cast %60 : vector<512xf32> to vector<1x512xf32>
    %cst_31 = arith.constant 8.000000e+00 : f32
    %62 = vector.broadcast %cst_31 : f32 to vector<1x512xf32>
    %63 = arith.divf %61, %62 : vector<1x512xf32>
    %64 = vector.broadcast %56 : vector<1x512xf32> to vector<8x512xf32>
    %65 = arith.subf %52, %64 : vector<8x512xf32>
    %cst_32 = arith.constant 8.000000e-01 : f32
    %66 = vector.broadcast %cst_32 : f32 to vector<1x512xf32>
    %67 = arith.addf %63, %66 : vector<1x512xf32>
    %68 = math.rsqrt %67 : vector<1x512xf32>
    %69 = vector.broadcast %68 : vector<1x512xf32> to vector<8x512xf32>
    %70 = arith.mulf %65, %69 : vector<8x512xf32>
    %c0_33 = arith.constant 0 : index
    %c0_34 = arith.constant 0 : index
    %71 = vector.load %arg9[%c0_33, %c0_34] : memref<1x512xf32, #tpu.memory_space<vmem>>, vector<1x512xf32>
    %72 = vector.broadcast %71 : vector<1x512xf32> to vector<8x512xf32>
    %73 = arith.mulf %70, %72 : vector<8x512xf32>
    %c0_35 = arith.constant 0 : index
    %c0_36 = arith.constant 0 : index
    %74 = vector.load %arg10[%c0_35, %c0_36] : memref<1x512xf32, #tpu.memory_space<vmem>>, vector<1x512xf32>
    %75 = vector.broadcast %74 : vector<1x512xf32> to vector<8x512xf32>
    %76 = arith.addf %73, %75 : vector<8x512xf32>
    %cst_37 = arith.constant 0.000000e+00 : f32
    %77 = vector.broadcast %cst_37 : f32 to vector<8x512xf32>
    %78 = arith.cmpf ogt, %76, %77 : vector<8x512xf32>
    %cst_38 = arith.constant 2.000000e-01 : f32
    %79 = vector.broadcast %cst_38 : f32 to vector<8x512xf32>
    %80 = arith.mulf %79, %76 : vector<8x512xf32>
    %81 = arith.select %78, %76, %80 : vector<8x512xi1>, vector<8x512xf32>
    %82 = arith.truncf %81 : vector<8x512xf32> to vector<8x512xbf16>
    %c0_39 = arith.constant 0 : index
    %c0_40 = arith.constant 0 : index
    %83 = vector.load %arg11[%c0_39, %c0_40] : memref<512x1024xbf16, #tpu.memory_space<vmem>>, vector<512x1024xbf16>
    %cst_41 = arith.constant dense<0.000000e+00> : vector<8x1024xf32>
    %84 = tpu.matmul %82, %83, %cst_41 {dimension_numbers = #tpu.dot_dimension_numbers<[1], [0], [0], [1], [0, 0, 1, 1], [], []>} : vector<8x512xbf16>, vector<512x1024xbf16>, vector<8x1024xf32> -> vector<8x1024xf32>
    %c0_42 = arith.constant 0 : index
    %c0_43 = arith.constant 0 : index
    %85 = vector.load %arg12[%c0_42, %c0_43] : memref<1x1024xf32, #tpu.memory_space<vmem>>, vector<1x1024xf32>
    %86 = vector.broadcast %85 : vector<1x1024xf32> to vector<8x1024xf32>
    %87 = arith.addf %84, %86 : vector<8x1024xf32>
    %cst_44 = arith.constant dense<0.000000e+00> : vector<1024xf32>
    %88 = vector.multi_reduction <add>, %87, %cst_44 [0] : vector<8x1024xf32> to vector<1024xf32>
    %89 = vector.shape_cast %88 : vector<1024xf32> to vector<1x1024xf32>
    %cst_45 = arith.constant 8.000000e+00 : f32
    %90 = vector.broadcast %cst_45 : f32 to vector<1x1024xf32>
    %91 = arith.divf %89, %90 : vector<1x1024xf32>
    %92 = vector.broadcast %91 : vector<1x1024xf32> to vector<8x1024xf32>
    %93 = arith.subf %87, %92 : vector<8x1024xf32>
    %94 = arith.mulf %93, %93 : vector<8x1024xf32>
    %cst_46 = arith.constant dense<0.000000e+00> : vector<1024xf32>
    %95 = vector.multi_reduction <add>, %94, %cst_46 [0] : vector<8x1024xf32> to vector<1024xf32>
    %96 = vector.shape_cast %95 : vector<1024xf32> to vector<1x1024xf32>
    %cst_47 = arith.constant 8.000000e+00 : f32
    %97 = vector.broadcast %cst_47 : f32 to vector<1x1024xf32>
    %98 = arith.divf %96, %97 : vector<1x1024xf32>
    %99 = vector.broadcast %91 : vector<1x1024xf32> to vector<8x1024xf32>
    %100 = arith.subf %87, %99 : vector<8x1024xf32>
    %cst_48 = arith.constant 8.000000e-01 : f32
    %101 = vector.broadcast %cst_48 : f32 to vector<1x1024xf32>
    %102 = arith.addf %98, %101 : vector<1x1024xf32>
    %103 = math.rsqrt %102 : vector<1x1024xf32>
    %104 = vector.broadcast %103 : vector<1x1024xf32> to vector<8x1024xf32>
    %105 = arith.mulf %100, %104 : vector<8x1024xf32>
    %c0_49 = arith.constant 0 : index
    %c0_50 = arith.constant 0 : index
    %106 = vector.load %arg13[%c0_49, %c0_50] : memref<1x1024xf32, #tpu.memory_space<vmem>>, vector<1x1024xf32>
    %107 = vector.broadcast %106 : vector<1x1024xf32> to vector<8x1024xf32>
    %108 = arith.mulf %105, %107 : vector<8x1024xf32>
    %c0_51 = arith.constant 0 : index
    %c0_52 = arith.constant 0 : index
    %109 = vector.load %arg14[%c0_51, %c0_52] : memref<1x1024xf32, #tpu.memory_space<vmem>>, vector<1x1024xf32>
    %110 = vector.broadcast %109 : vector<1x1024xf32> to vector<8x1024xf32>
    %111 = arith.addf %108, %110 : vector<8x1024xf32>
    %cst_53 = arith.constant 0.000000e+00 : f32
    %112 = vector.broadcast %cst_53 : f32 to vector<8x1024xf32>
    %113 = arith.cmpf ogt, %111, %112 : vector<8x1024xf32>
    %cst_54 = arith.constant 2.000000e-01 : f32
    %114 = vector.broadcast %cst_54 : f32 to vector<8x1024xf32>
    %115 = arith.mulf %114, %111 : vector<8x1024xf32>
    %116 = arith.select %113, %111, %115 : vector<8x1024xi1>, vector<8x1024xf32>
    %117 = arith.truncf %116 : vector<8x1024xf32> to vector<8x1024xbf16>
    %c0_55 = arith.constant 0 : index
    %c0_56 = arith.constant 0 : index
    %118 = vector.load %arg15[%c0_55, %c0_56] : memref<1024x2048xbf16, #tpu.memory_space<vmem>>, vector<1024x2048xbf16>
    %cst_57 = arith.constant dense<0.000000e+00> : vector<8x2048xf32>
    %119 = tpu.matmul %117, %118, %cst_57 {dimension_numbers = #tpu.dot_dimension_numbers<[1], [0], [0], [1], [0, 0, 1, 1], [], []>} : vector<8x1024xbf16>, vector<1024x2048xbf16>, vector<8x2048xf32> -> vector<8x2048xf32>
    %c0_58 = arith.constant 0 : index
    %c0_59 = arith.constant 0 : index
    %120 = vector.load %arg16[%c0_58, %c0_59] : memref<1x2048xf32, #tpu.memory_space<vmem>>, vector<1x2048xf32>
    %121 = vector.broadcast %120 : vector<1x2048xf32> to vector<8x2048xf32>
    %122 = arith.addf %119, %121 : vector<8x2048xf32>
    %123 = math.tanh %122 : vector<8x2048xf32>
    %c0_60 = arith.constant 0 : index
    %c0_61 = arith.constant 0 : index
    %124 = vector.load %arg17[%c0_60, %c0_61] : memref<8x2048xf32, #tpu.memory_space<vmem>>, vector<8x2048xf32>
    tpu.vector_store %arg17[%c0_60, %c0_61], %123 {strides = array<i32>} : memref<8x2048xf32, #tpu.memory_space<vmem>>, vector<8x2048xf32>,
    return
  }
}

</mosaic_0001>

<bundles_post_ra>
// kernel: generator_forward.1
= control target key start
LH: loop header
LB: loop body
LE: loop exit
PB: predicated region body
PF: predicated region fallthrough
CT: control target
= control target key end

     0   :  { %s14146_s0 = inlined_call_operand.vmem [shape: f32[8,512], index: 0, kind: input, shape index: {}]   ;;  %s14147_s1 = inlined_call_operand.hbm [shape: bf16[512,128], index: 1, kind: input, shape index: {}]   ;;  %s14148_s2 = inlined_call_operand.hbm [shape: f32[1,128], index: 2, kind: input, shape index: {}]   ;;  %s14149_s3 = inlined_call_operand.hbm [shape: bf16[128,256], index: 3, kind: input, shape index: {}]   ;;  %s14150_s4 = inlined_call_operand.hbm [shape: f32[1,256], index: 4, kind: input, shape index: {}]   ;;  %s14151_s5 = inlined_call_operand.hbm [shape: f32[1,256], index: 5, kind: input, shape index: {}]   ;;  %s14152_s6 = inlined_call_operand.hbm [shape: f32[1,256], index: 6, kind: input, shape index: {}]   ;;  %s14153_s7 = inlined_call_operand.hbm [shape: bf16[256,512], index: 7, kind: input, shape index: {}]   ;;  %s14154_s8 = inlined_call_operand.hbm [shape: f32[1,512], index: 8, kind: input, shape index: {}]   ;;  %s14155_s9 = inlined_call_operand.hbm [shape: f32[1,512], index: 9, kind: input, shape index: {}]   ;;  %s14156_s10 = inlined_call_operand.hbm [shape: f32[1,512], index: 10, kind: input, shape index: {}]   ;;  %s14157_s11 = inlined_call_operand.hbm [shape: bf16[512,1024], index: 11, kind: input, shape index: {}]   ;;  %s14158_s12 = inlined_call_operand.hbm [shape: f32[1,1024], index: 12, kind: input, shape index: {}]   ;;  %s14159_s13 = inlined_call_operand.hbm [shape: f32[1,1024], index: 13, kind: input, shape index: {}]   ;;  %s14160_s14 = inlined_call_operand.hbm [shape: f32[1,1024], index: 14, kind: input, shape index: {}]   ;;  %s14161_s15 = inlined_call_operand.hbm [shape: bf16[1024,2048], index: 15, kind: input, shape index: {}]   ;;  %s14162_s16 = inlined_call_operand.hbm [shape: f32[1,2048], index: 16, kind: input, shape index: {}]   ;;  %s14163_s17 = inlined_call_operand.hbm [shape: f32[8,2048], index: 17, kind: output, shape index: {}]  }
   0x1   :  { %14166 = sst [smem:[#allocation39_spill]] %s14146_s0 }
   0x2   :  { %14167 = sst [smem:[#allocation40_spill]] %s14147_s1 }
   0x3   :  { %22 = vsyncpa [#allocation3], 0 }
   0x4   :  { %23 = vsyncpa [#allocation6], 0 }
   0x5   :  { %24 = vsyncpa [#allocation9], 0 }
   0x6   :  { %25 = vsyncpa [#allocation12], 0 }
   0x7   :  { %26 = vsyncpa [#allocation15], 0 }
   0x8   :  { %27 = vsyncpa [#allocation18], 0 }
   0x9   :  { %28 = vsyncpa [#allocation21], 0 }
   0xa   :  { %29 = vsyncpa [#allocation24], 0 }
   0xb   :  { %30 = vsyncpa [#allocation27], 0 }
   0xc   :  { %31 = vsyncpa [#allocation4], 0  ;;  %s13458_s24 = smov [#allocation5]   ;;  %s13459_s26 = smov [#allocation8]  }
   0xd   :  { %s52_s25 = sshll.u32 %s13458_s24, 4  ;;  %s74_s27 = sshll.u32 %s13459_s26, 4  ;;  %s53_s25 = int_to_ptr.vmem [resolvable:$true] %s52_s25  ;;  %s75_s27 = int_to_ptr.vmem [resolvable:$true] %s74_s27 }
   0xe   :  { %s13064_s0 = scalar_lea.hbm %s14148_s2, 16 }
   0xf   :  { %p13065_p0 = scmp.ne.s32.totalorder %s14148_s2, %s13064_s0  ;;  %p13068_p1 = scmp.lt.u32.totalorder %s13064_s0, %s14148_s2 }
  0x11   :  { %p13070_p2 = pnand %p13068_p1, %p13065_p0 }
  0x13   :  { %13073 = shalt.err (!%p13070_p2)
}
  0x14   :  { %s13074_s20 = scalar_lea.vmem %s53_s25, 16  ;;  %s13078_s21 = scalar_lea.vmem %s53_s25, 32 }
  0x15   :  { %p13075_p3 = scmp.ne.s32.totalorder %s53_s25, %s13074_s20  ;;  %p13079_p4 = scmp.lt.s32.totalorder %s53_s25, %s53_s25 }
  0x16   :  { %p13080_p5 = scmp.lt.s32.totalorder %s13078_s21, %s13074_s20 }
  0x18   :  { %p13081_p6 = por %p13080_p5, %p13079_p4 }
  0x1a   :  { %p13082_p7 = pnand %p13081_p6, %p13075_p3 }
  0x1c   :  { %13085 = shalt.err (!%p13082_p7)
}
  0x1d   :  { %55 = dma.hbm_to_vmem [thread:$0]  %s14148_s2, 16, %s53_s25, [#allocation6]  }
  0x1e   :  { %s13086_s28 = scalar_lea.hbm %s14150_s4, 32 }
  0x1f   :  { %p13087_p8 = scmp.ne.s32.totalorder %s14150_s4, %s13086_s28  ;;  %p13090_p9 = scmp.lt.u32.totalorder %s13086_s28, %s14150_s4 }
  0x21   :  { %p13092_p10 = pnand %p13090_p9, %p13087_p8 }
  0x23   :  { %13095 = shalt.err (!%p13092_p10)
}
  0x24   :  { %s13096_s19 = scalar_lea.vmem %s75_s27, 32  ;;  %p13101_p12 = scmp.lt.s32.totalorder %s75_s27, %s75_s27 }
  0x25   :  { %p13097_p11 = scmp.ne.s32.totalorder %s75_s27, %s13096_s19  ;;  %p13102_p13 = scmp.lt.s32.totalorder %s13096_s19, %s13096_s19 }
  0x27   :  { %p13103_p0 = por %p13102_p13, %p13101_p12 }
  0x29   :  { %p13104_p1 = pnand %p13103_p0, %p13097_p11 }
  0x2b   :  { %13107 = shalt.err (!%p13104_p1)
}
  0x2c   :  { %77 = dma.hbm_to_vmem [thread:$0]  %s14150_s4, 32, %s75_s27, [#allocation9]  }
  0x2d   :  { %s13460_s1 = smov [#allocation11]   ;;  %s13461_s21 = smov [#allocation14]  }
  0x2e   :  { %s94_s20 = sshll.u32 %s13460_s1, 4  ;;  %s116_s22 = sshll.u32 %s13461_s21, 4  ;;  %s95_s20 = int_to_ptr.vmem [resolvable:$true] %s94_s20  ;;  %s117_s22 = int_to_ptr.vmem [resolvable:$true] %s116_s22 }
  0x2f   :  { %s13108_s26 = scalar_lea.hbm %s14152_s6, 32 }
  0x30   :  { %p13109_p2 = scmp.ne.s32.totalorder %s14152_s6, %s13108_s26  ;;  %p13112_p3 = scmp.lt.u32.totalorder %s13108_s26, %s14152_s6 }
  0x32   :  { %p13114_p4 = pnand %p13112_p3, %p13109_p2 }
  0x34   :  { %13117 = shalt.err (!%p13114_p4)
}
  0x35   :  { %s13118_s4 = scalar_lea.vmem %s95_s20, 32  ;;  %p13123_p6 = scmp.lt.s32.totalorder %s95_s20, %s95_s20 }
  0x36   :  { %p13119_p5 = scmp.ne.s32.totalorder %s95_s20, %s13118_s4  ;;  %p13124_p7 = scmp.lt.s32.totalorder %s13118_s4, %s13118_s4 }
  0x38   :  { %p13125_p8 = por %p13124_p7, %p13123_p6 }
  0x3a   :  { %p13126_p9 = pnand %p13125_p8, %p13119_p5 }
  0x3c   :  { %13129 = shalt.err (!%p13126_p9)
}
  0x3d   :  { %97 = dma.hbm_to_vmem [thread:$0]  %s14152_s6, 32, %s95_s20, [#allocation12]  }
  0x3e   :  { %s13130_s25 = scalar_lea.hbm %s14154_s8, 64 }
  0x3f   :  { %p13131_p10 = scmp.ne.s32.totalorder %s14154_s8, %s13130_s25  ;;  %p13134_p11 = scmp.lt.u32.totalorder %s13130_s25, %s14154_s8 }
  0x41   :  { %p13136_p12 = pnand %p13134_p11, %p13131_p10 }
  0x43   :  { %13139 = shalt.err (!%p13136_p12)
}
  0x44   :  { %s13140_s26 = scalar_lea.vmem %s117_s22, 64  ;;  %p13145_p0 = scmp.lt.s32.totalorder %s117_s22, %s117_s22 }
  0x45   :  { %p13141_p13 = scmp.ne.s32.totalorder %s117_s22, %s13140_s26  ;;  %p13146_p1 = scmp.lt.s32.totalorder %s13140_s26, %s13140_s26 }
  0x47   :  { %p13147_p2 = por %p13146_p1, %p13145_p0 }
  0x49   :  { %p13148_p3 = pnand %p13147_p2, %p13141_p13 }
  0x4b   :  { %13151 = shalt.err (!%p13148_p3)
}
  0x4c   :  { %119 = dma.hbm_to_vmem [thread:$0]  %s14154_s8, 64, %s117_s22, [#allocation15]  }
  0x4d   :  { %s13462_s28 = smov [#allocation17]   ;;  %s13463_s0 = smov [#allocation20]  }
  0x4e   :  { %s136_s29 = sshll.u32 %s13462_s28, 4  ;;  %s158_s30 = sshll.u32 %s13463_s0, 4  ;;  %s137_s29 = int_to_ptr.vmem [resolvable:$true] %s136_s29  ;;  %s159_s30 = int_to_ptr.vmem [resolvable:$true] %s158_s30 }
  0x4f   :  { %s13152_s18 = scalar_lea.hbm %s14156_s10, 64 }
  0x50   :  { %p13153_p4 = scmp.ne.s32.totalorder %s14156_s10, %s13152_s18  ;;  %p13156_p5 = scmp.lt.u32.totalorder %s13152_s18, %s14156_s10 }
  0x52   :  { %p13158_p6 = pnand %p13156_p5, %p13153_p4 }
  0x54   :  { %13161 = shalt.err (!%p13158_p6)
}
  0x55   :  { %s13162_s8 = scalar_lea.vmem %s137_s29, 64  ;;  %p13167_p8 = scmp.lt.s32.totalorder %s137_s29, %s137_s29 }
  0x56   :  { %p13163_p7 = scmp.ne.s32.totalorder %s137_s29, %s13162_s8  ;;  %p13168_p9 = scmp.lt.s32.totalorder %s13162_s8, %s13162_s8 }
  0x58   :  { %p13169_p10 = por %p13168_p9, %p13167_p8 }
  0x5a   :  { %p13170_p11 = pnand %p13169_p10, %p13163_p7 }
  0x5c   :  { %13173 = shalt.err (!%p13170_p11)
}
  0x5d   :  { %139 = dma.hbm_to_vmem [thread:$0]  %s14156_s10, 64, %s137_s29, [#allocation18]  }
  0x5e   :  { %s13174_s26 = scalar_lea.hbm %s14158_s12, 128 }
  0x5f   :  { %p13175_p12 = scmp.ne.s32.totalorder %s14158_s12, %s13174_s26  ;;  %p13178_p13 = scmp.lt.u32.totalorder %s13174_s26, %s14158_s12 }
  0x61   :  { %p13180_p0 = pnand %p13178_p13, %p13175_p12 }
  0x63   :  { %13183 = shalt.err (!%p13180_p0)
}
  0x64   :  { %s13184_s4 = scalar_lea.vmem %s159_s30, 128  ;;  %p13189_p2 = scmp.lt.s32.totalorder %s159_s30, %s159_s30 }
  0x65   :  { %p13185_p1 = scmp.ne.s32.totalorder %s159_s30, %s13184_s4  ;;  %p13190_p3 = scmp.lt.s32.totalorder %s13184_s4, %s13184_s4 }
  0x67   :  { %p13191_p4 = por %p13190_p3, %p13189_p2 }
  0x69   :  { %p13192_p5 = pnand %p13191_p4, %p13185_p1 }
  0x6b   :  { %13195 = shalt.err (!%p13192_p5)
}
  0x6c   :  { %161 = dma.hbm_to_vmem [thread:$0]  %s14158_s12, 128, %s159_s30, [#allocation21]  }
  0x6d   :  { %s13464_s27 = smov [#allocation23]   ;;  %s13465_s19 = smov [#allocation2]  }
  0x6e   :  { %s178_s18 = sshll.u32 %s13464_s27, 4  ;;  %s39_s2 = sshll.u32 %s13465_s19, 4  ;;  %s179_s18 = int_to_ptr.vmem [resolvable:$true] %s178_s18  ;;  %s13647_s2 = int_to_ptr.vmem [resolvable:$true] %s39_s2 }
  0x6f   :  { %s13196_s8 = scalar_lea.hbm %s14160_s14, 128 }
  0x70   :  { %p13197_p6 = scmp.ne.s32.totalorder %s14160_s14, %s13196_s8  ;;  %p13200_p7 = scmp.lt.u32.totalorder %s13196_s8, %s14160_s14 }
  0x72   :  { %p13202_p8 = pnand %p13200_p7, %p13197_p6 }
  0x74   :  { %13205 = shalt.err (!%p13202_p8)
}
  0x75   :  { %s13206_s12 = scalar_lea.vmem %s179_s18, 128  ;;  %p13211_p10 = scmp.lt.s32.totalorder %s179_s18, %s179_s18 }
  0x76   :  { %p13207_p9 = scmp.ne.s32.totalorder %s179_s18, %s13206_s12  ;;  %p13212_p11 = scmp.lt.s32.totalorder %s13206_s12, %s13206_s12 }
  0x78   :  { %p13213_p12 = por %p13212_p11, %p13211_p10 }
  0x7a   :  { %p13214_p13 = pnand %p13213_p12, %p13207_p9 }
  0x7c   :  { %13217 = shalt.err (!%p13214_p13)
}
  0x7d   :  { %181 = dma.hbm_to_vmem [thread:$0]  %s14160_s14, 128, %s179_s18, [#allocation24]  }
  0x7e   :  { %s14168_s28 = sld [smem:[#allocation40_spill]] }
  0x84   :  { %s13218_s0 = scalar_lea.hbm %s14168_s28, 4096 }
  0x85   :  { %p13219_p0 = scmp.ne.s32.totalorder %s14168_s28, %s13218_s0  ;;  %p13222_p1 = scmp.lt.u32.totalorder %s13218_s0, %s14168_s28 }
  0x87   :  { %p13224_p2 = pnand %p13222_p1, %p13219_p0 }
  0x89   :  { %13227 = shalt.err (!%p13224_p2)
}
  0x8a   :  { %s13228_s19 = scalar_lea.vmem %s13647_s2, 4096  ;;  %p13233_p4 = scmp.lt.s32.totalorder %s13647_s2, %s13647_s2 }
  0x8b   :  { %p13229_p3 = scmp.ne.s32.totalorder %s13647_s2, %s13228_s19  ;;  %p13234_p5 = scmp.lt.s32.totalorder %s13228_s19, %s13228_s19 }
  0x8d   :  { %p13235_p6 = por %p13234_p5, %p13233_p4 }
  0x8f   :  { %p13236_p7 = pnand %p13235_p6, %p13229_p3 }
  0x91   :  { %13239 = shalt.err (!%p13236_p7)
}
  0x92   :  { %s13466_s14 = smov 64   ;;  %s13467_s18 = smov 4  }
  0x93   :  { %45 = dma.hbm_to_vmem [thread:$0]  %s14168_s28, 4096, %s13647_s2, [#allocation3], %s13466_s14, %s13466_s14, %s13467_s18  }
  0x94   :  { %s13468_s8 = smov [#allocation7]   ;;  %s13240_s24 = scalar_lea.hbm %s14149_s3, 2048 }
  0x95   :  { %s61_s22 = sshll.u32 %s13468_s8, 4  ;;  %p13241_p8 = scmp.ne.s32.totalorder %s14149_s3, %s13240_s24  ;;  %s62_s22 = int_to_ptr.vmem [resolvable:$true] %s61_s22 }
  0x96   :  { %p13244_p9 = scmp.lt.u32.totalorder %s13240_s24, %s14149_s3 }
  0x98   :  { %p13246_p10 = pnand %p13244_p9, %p13241_p8 }
  0x9a   :  { %13249 = shalt.err (!%p13246_p10)
}
  0x9b   :  { %s13250_s20 = scalar_lea.vmem %s62_s22, 2048  ;;  %p13255_p12 = scmp.lt.s32.totalorder %s62_s22, %s62_s22 }
  0x9c   :  { %p13251_p11 = scmp.ne.s32.totalorder %s62_s22, %s13250_s20  ;;  %p13256_p13 = scmp.lt.s32.totalorder %s13250_s20, %s13250_s20 }
  0x9e   :  { %p13257_p0 = por %p13256_p13, %p13255_p12 }
  0xa0   :  { %p13258_p1 = pnand %p13257_p0, %p13251_p11 }
  0xa2   :  { %13261 = shalt.err (!%p13258_p1)
}
  0xa3   :  { %s13469_s2 = smov 128   ;;  %s13470_s28 = smov 8  }
  0xa4   :  { %67 = dma.hbm_to_vmem [thread:$0]  %s14149_s3, 2048, %s62_s22, [#allocation6], %s13469_s2, %s13469_s2, %s13470_s28  }
  0xa5   :  { %s13471_s10 = smov [#allocation10]   ;;  %s13472_s27 = smov [#allocation13]  }
  0xa6   :  { %s84_s29 = sshll.u32 %s13471_s10, 4  ;;  %s103_s19 = sshll.u32 %s13472_s27, 4  ;;  %s85_s29 = int_to_ptr.vmem [resolvable:$true] %s84_s29  ;;  %s104_s19 = int_to_ptr.vmem [resolvable:$true] %s103_s19 }
  0xa7   :  { %s13262_s1 = scalar_lea.hbm %s14151_s5, 32 }
  0xa8   :  { %p13263_p2 = scmp.ne.s32.totalorder %s14151_s5, %s13262_s1  ;;  %p13266_p3 = scmp.lt.u32.totalorder %s13262_s1, %s14151_s5 }
  0xaa   :  { %p13268_p4 = pnand %p13266_p3, %p13263_p2 }
  0xac   :  { %13271 = shalt.err (!%p13268_p4)
}
  0xad   :  { %s13272_s3 = scalar_lea.vmem %s85_s29, 32  ;;  %p13277_p6 = scmp.lt.s32.totalorder %s85_s29, %s85_s29 }
  0xae   :  { %p13273_p5 = scmp.ne.s32.totalorder %s85_s29, %s13272_s3  ;;  %p13278_p7 = scmp.lt.s32.totalorder %s13272_s3, %s13272_s3 }
  0xb0   :  { %p13279_p8 = por %p13278_p7, %p13277_p6 }
  0xb2   :  { %p13280_p9 = pnand %p13279_p8, %p13273_p5 }
  0xb4   :  { %13283 = shalt.err (!%p13280_p9)
}
  0xb5   :  { %87 = dma.hbm_to_vmem [thread:$0]  %s14151_s5, 32, %s85_s29, [#allocation9]  }
  0xb6   :  { %s13284_s6 = scalar_lea.hbm %s14153_s7, 8192 }
  0xb7   :  { %p13285_p10 = scmp.ne.s32.totalorder %s14153_s7, %s13284_s6  ;;  %p13288_p11 = scmp.lt.u32.totalorder %s13284_s6, %s14153_s7 }
  0xb9   :  { %p13290_p12 = pnand %p13288_p11, %p13285_p10 }
  0xbb   :  { %13293 = shalt.err (!%p13290_p12)
}
  0xbc   :  { %s13294_s4 = scalar_lea.vmem %s104_s19, 8192  ;;  %p13299_p0 = scmp.lt.s32.totalorder %s104_s19, %s104_s19 }
  0xbd   :  { %p13295_p13 = scmp.ne.s32.totalorder %s104_s19, %s13294_s4  ;;  %p13300_p1 = scmp.lt.s32.totalorder %s13294_s4, %s13294_s4 }
  0xbf   :  { %p13301_p2 = por %p13300_p1, %p13299_p0 }
  0xc1   :  { %p13302_p3 = pnand %p13301_p2, %p13295_p13 }
  0xc3   :  { %13305 = shalt.err (!%p13302_p3)
}
  0xc4   :  { %s13473_s5 = smov 256   ;;  %s13474_s10 = smov 16  }
  0xc5   :  { %109 = dma.hbm_to_vmem [thread:$0]  %s14153_s7, 8192, %s104_s19, [#allocation12], %s13473_s5, %s13473_s5, %s13474_s10  }
  0xc6   :  { %s13475_s18 = smov [#allocation16]   ;;  %s13476_s1 = smov [#allocation19]  }
  0xc7   :  { %s126_s25 = sshll.u32 %s13475_s18, 4  ;;  %s145_s8 = sshll.u32 %s13476_s1, 4  ;;  %s127_s25 = int_to_ptr.vmem [resolvable:$true] %s126_s25  ;;  %s146_s8 = int_to_ptr.vmem [resolvable:$true] %s145_s8 }
  0xc8   :  { %s13306_s24 = scalar_lea.hbm %s14155_s9, 64 }
  0xc9   :  { %p13307_p4 = scmp.ne.s32.totalorder %s14155_s9, %s13306_s24  ;;  %p13310_p5 = scmp.lt.u32.totalorder %s13306_s24, %s14155_s9 }
  0xcb   :  { %p13312_p6 = pnand %p13310_p5, %p13307_p4 }
  0xcd   :  { %13315 = shalt.err (!%p13312_p6)
}
  0xce   :  { %s13316_s7 = scalar_lea.vmem %s127_s25, 64  ;;  %p13321_p8 = scmp.lt.s32.totalorder %s127_s25, %s127_s25 }
  0xcf   :  { %p13317_p7 = scmp.ne.s32.totalorder %s127_s25, %s13316_s7  ;;  %p13322_p9 = scmp.lt.s32.totalorder %s13316_s7, %s13316_s7 }
  0xd1   :  { %p13323_p10 = por %p13322_p9, %p13321_p8 }
  0xd3   :  { %p13324_p11 = pnand %p13323_p10, %p13317_p7 }
  0xd5   :  { %13327 = shalt.err (!%p13324_p11)
}
  0xd6   :  { %129 = dma.hbm_to_vmem [thread:$0]  %s14155_s9, 64, %s127_s25, [#allocation15]  }
  0xd7   :  { %s13328_s2 = scalar_lea.hbm %s14157_s11, 32768 }
  0xd8   :  { %p13329_p12 = scmp.ne.s32.totalorder %s14157_s11, %s13328_s2  ;;  %p13332_p13 = scmp.lt.u32.totalorder %s13328_s2, %s14157_s11 }
  0xda   :  { %p13334_p0 = pnand %p13332_p13, %p13329_p12 }
  0xdc   :  { %13337 = shalt.err (!%p13334_p0)
}
  0xdd   :  { %s13338_s10 = scalar_lea.vmem %s146_s8, 32768  ;;  %p13343_p2 = scmp.lt.s32.totalorder %s146_s8, %s146_s8 }
  0xde   :  { %p13339_p1 = scmp.ne.s32.totalorder %s146_s8, %s13338_s10  ;;  %p13344_p3 = scmp.lt.s32.totalorder %s13338_s10, %s13338_s10 }
  0xe0   :  { %p13345_p4 = por %p13344_p3, %p13343_p2 }
  0xe2   :  { %p13346_p5 = pnand %p13345_p4, %p13339_p1 }
  0xe4   :  { %13349 = shalt.err (!%p13346_p5)
}
  0xe5   :  { %s13477_s9 = smov 512   ;;  %s13478_s29 = smov 32  }
  0xe6   :  { %151 = dma.hbm_to_vmem [thread:$0]  %s14157_s11, 32768, %s146_s8, [#allocation18], %s13477_s9, %s13477_s9, %s13478_s29  }
  0xe7   :  { %s13479_s25 = smov [#allocation22]   ;;  %s13480_s21 = smov [#allocation25]  }
  0xe8   :  { %s168_s1 = sshll.u32 %s13479_s25, 4  ;;  %s187_s23 = sshll.u32 %s13480_s21, 4  ;;  %s169_s1 = int_to_ptr.vmem [resolvable:$true] %s168_s1  ;;  %s188_s23 = int_to_ptr.vmem [resolvable:$true] %s187_s23 }
  0xe9   :  { %s13350_s22 = scalar_lea.hbm %s14159_s13, 128 }
  0xea   :  { %p13351_p6 = scmp.ne.s32.totalorder %s14159_s13, %s13350_s22  ;;  %p13354_p7 = scmp.lt.u32.totalorder %s13350_s22, %s14159_s13 }
  0xec   :  { %p13356_p8 = pnand %p13354_p7, %p13351_p6 }
  0xee   :  { %13359 = shalt.err (!%p13356_p8)
}
  0xef   :  { %s13360_s11 = scalar_lea.vmem %s169_s1, 128  ;;  %p13365_p10 = scmp.lt.s32.totalorder %s169_s1, %s169_s1 }
  0xf0   :  { %p13361_p9 = scmp.ne.s32.totalorder %s169_s1, %s13360_s11  ;;  %p13366_p11 = scmp.lt.s32.totalorder %s13360_s11, %s13360_s11 }
  0xf2   :  { %p13367_p12 = por %p13366_p11, %p13365_p10 }
  0xf4   :  { %p13368_p13 = pnand %p13367_p12, %p13361_p9 }
  0xf6   :  { %13371 = shalt.err (!%p13368_p13)
}
  0xf7   :  { %171 = dma.hbm_to_vmem [thread:$0]  %s14159_s13, 128, %s169_s1, [#allocation21]  }
  0xf8   :  { %s13372_s2 = scalar_lea.hbm %s14161_s15, 131072 }
  0xf9   :  { %p13373_p0 = scmp.ne.s32.totalorder %s14161_s15, %s13372_s2  ;;  %p13376_p1 = scmp.lt.u32.totalorder %s13372_s2, %s14161_s15 }
  0xfb   :  { %p13378_p2 = pnand %p13376_p1, %p13373_p0 }
  0xfd   :  { %13381 = shalt.err (!%p13378_p2)
}
  0xfe   :  { %s13382_s10 = scalar_lea.vmem %s188_s23, 131072  ;;  %p13387_p4 = scmp.lt.s32.totalorder %s188_s23, %s188_s23 }
  0xff   :  { %p13383_p3 = scmp.ne.s32.totalorder %s188_s23, %s13382_s10  ;;  %p13388_p5 = scmp.lt.s32.totalorder %s13382_s10, %s13382_s10 }
 0x101   :  { %p13389_p6 = por %p13388_p5, %p13387_p4 }
 0x103   :  { %p13390_p7 = pnand %p13389_p6, %p13383_p3 }
 0x105   :  { %13393 = shalt.err (!%p13390_p7)
}
 0x106   :  { %s13481_s13 = smov 1024   ;;  %s13482_s27 = smov [#allocation26]  }
 0x107   :  { %193 = dma.hbm_to_vmem [thread:$0]  %s14161_s15, 131072, %s188_s23, [#allocation24], %s13481_s13, %s13481_s13, %s13466_s14  }
 0x108   :  { %s200_s18 = sshll.u32 %s13482_s27, 4  ;;  %s13394_s21 = scalar_lea.hbm %s14162_s16, 256  ;;  %s201_s18 = int_to_ptr.vmem [resolvable:$true] %s200_s18 }
 0x109   :  { %p13395_p8 = scmp.ne.s32.totalorder %s14162_s16, %s13394_s21  ;;  %p13398_p9 = scmp.lt.u32.totalorder %s13394_s21, %s14162_s16 }
 0x10b   :  { %p13400_p10 = pnand %p13398_p9, %p13395_p8 }
 0x10d   :  { %13403 = shalt.err (!%p13400_p10)
}
 0x10e   :  { %s13404_s30 = scalar_lea.vmem %s201_s18, 256  ;;  %p13409_p12 = scmp.lt.s32.totalorder %s201_s18, %s201_s18 }
 0x10f   :  { %p13405_p11 = scmp.ne.s32.totalorder %s201_s18, %s13404_s30  ;;  %p13410_p13 = scmp.lt.s32.totalorder %s13404_s30, %s13404_s30 }
 0x111   :  { %p13411_p0 = por %p13410_p13, %p13409_p12 }
 0x113   :  { %p13412_p1 = pnand %p13411_p0, %p13405_p11 }
 0x115   :  { %13415 = shalt.err (!%p13412_p1)
}
 0x116   :  { %203 = dma.hbm_to_vmem [thread:$0]  %s14162_s16, 256, %s201_s18, [#allocation27]  }
 0x117   :  { %13438 = dma.done.wait [#allocation3], 4096  }
 0x118   :  { %13439 = vsyncadd [#allocation3], 4294963200 }
 0x119   :  { %13440 = dma.done.wait [#allocation6], 2064  }
 0x11a   :  { %13441 = vsyncadd [#allocation6], 4294965232 }
 0x11b   :  { %13442 = dma.done.wait [#allocation9], 64  }
 0x11c   :  { %13443 = vsyncadd [#allocation9], 4294967232 }
 0x11d   :  { %13444 = dma.done.wait [#allocation12], 8224  }
 0x11e   :  { %13445 = vsyncadd [#allocation12], 4294959072 }
 0x11f   :  { %13446 = dma.done.wait [#allocation15], 128  }
 0x120   :  { %13447 = vsyncadd [#allocation15], 4294967168 }
 0x121   :  { %13448 = dma.done.wait [#allocation18], 32832  }
 0x122   :  { %13449 = vsyncadd [#allocation18], 4294934464 }
 0x123   :  { %13450 = dma.done.wait [#allocation21], 256  }
 0x124   :  { %13451 = vsyncadd [#allocation21], 4294967040 }
 0x125   :  { %13452 = dma.done.wait [#allocation24], 131200  }
 0x126   :  { %13453 = vsyncadd [#allocation24], 4294836096 }
 0x127   :  { %13454 = dma.done.wait [#allocation27], 256  }
 0x128   :  { %13455 = vsyncadd [#allocation27], 4294967040  ;;  %v12849_v0 = vld [vmem:[#allocation2 + $0x40] sm:$0xff]   ;;  %v12853_v4 = vld [vmem:[#allocation2 + $0x48] sm:$0xff]   ;;  %s14169_s7 = sld [smem:[#allocation39_spill]]  ;;  %v13483_v56 = vmov 0  }
 0x129   :  { %v12850_v1 = vld [vmem:[#allocation2 + $0xc0] sm:$0xff]   ;;  %12642 = vmatprep.subr.bf16.mxu0 %v12849_v0  ;;  %v12854_v5 = vld [vmem:[#allocation2 + $0xc8] sm:$0xff]   ;;  %v12857_v8 = vld [vmem:[#allocation2 + $0x50] sm:$0xff]   ;;  %s13484_s2 = smov [#allocation28]  }
 0x12a   :  { %v12851_v2 = vld [vmem:[#allocation2] sm:$0xff]   ;;  %12664 = vmatprep.subr.bf16.mxu1 %v12850_v1  ;;  %v12855_v6 = vld [vmem:[#allocation2 + $0x8] sm:$0xff]   ;;  %v12858_v9 = vld [vmem:[#allocation2 + $0xd0] sm:$0xff]   ;;  %s11232_s28 = sshll.u32 %s13484_s2, 4  ;;  %s11233_s28 = int_to_ptr.vmem [resolvable:$true] %s11232_s28 }
 0x12b   :  { %v12852_v3 = vld [vmem:[#allocation2 + $0x80] sm:$0xff]   ;;  %12643 = vmatpush3.bf16.msra.mxu0 %v12851_v2  ;;  %v12856_v7 = vld [vmem:[#allocation2 + $0x88] sm:$0xff]   ;;  %v12859_v10 = vld [vmem:[#allocation2 + $0x10] sm:$0xff]   ;;  %s13416_s0 = scalar_lea.vmem %s11233_s28, 2048  ;;  %p13421_p3 = scmp.lt.s32.totalorder %s11233_s28, %s11233_s28 }
 0x12c   :  { %12665 = vmatpush3.bf16.msra.mxu1 %v12852_v3  ;;  %12644 = vmatprep.subr.bf16.mxu0 %v12853_v4  ;;  %v12860_v11 = vld [vmem:[#allocation2 + $0x90] sm:$0xff]   ;;  %v12861_v12 = vld [vmem:[#allocation2 + $0x58] sm:$0xff]   ;;  %v12865_v16 = vld [vmem:[#allocation2 + $0x60] sm:$0xff]   ;;  %p13417_p2 = scmp.ne.s32.totalorder %s11233_s28, %s13416_s0  ;;  %p13422_p4 = scmp.lt.s32.totalorder %s13416_s0, %s13416_s0 }
 0x12d   :  { %12666 = vmatprep.subr.bf16.mxu1 %v12854_v5  ;;  %v12862_v13 = vld [vmem:[#allocation2 + $0xd8] sm:$0xff]   ;;  %v12866_v17 = vld [vmem:[#allocation2 + $0xe0] sm:$0xff]   ;;  %v12869_v20 = vld [vmem:[#allocation2 + $0x68] sm:$0xff]  }
 0x12e   :  { %v12863_v14 = vld [vmem:[#allocation2 + $0x18] sm:$0xff]   ;;  %v12867_v18 = vld [vmem:[#allocation2 + $0x20] sm:$0xff]   ;;  %v12870_v21 = vld [vmem:[#allocation2 + $0xe8] sm:$0xff]   ;;  %p13423_p5 = por %p13422_p4, %p13421_p3 }
 0x12f   :  { %12645 = vmatpush3.bf16.msra.mxu0 %v12855_v6  ;;  %v12864_v15 = vld [vmem:[#allocation2 + $0x98] sm:$0xff]   ;;  %v12868_v19 = vld [vmem:[#allocation2 + $0xa0] sm:$0xff]   ;;  %v12871_v22 = vld [vmem:[#allocation2 + $0x28] sm:$0xff]  }
 0x130   :  { %12667 = vmatpush3.bf16.msra.mxu1 %v12856_v7  ;;  %12646 = vmatprep.subr.bf16.mxu0 %v12857_v8  ;;  %v12872_v23 = vld [vmem:[#allocation2 + $0xa8] sm:$0xff]   ;;  %v12873_v24 = vld [vmem:[#allocation2 + $0x70] sm:$0xff]   ;;  %v12877_v28 = vld [vmem:[#allocation2 + $0x78] sm:$0xff]   ;;  %p13424_p6 = pnand %p13423_p5, %p13417_p2 }
 0x131   :  { %12668 = vmatprep.subr.bf16.mxu1 %v12858_v9  ;;  %v12874_v25 = vld [vmem:[#allocation2 + $0xf0] sm:$0xff]   ;;  %v12878_v29 = vld [vmem:[#allocation2 + $0xf8] sm:$0xff]   ;;  %v254_v32 = vld [vmem:[%s14169_s7 + $0x8] sm:$0xff] }
 0x132   :  { %v12875_v26 = vld [vmem:[#allocation2 + $0x30] sm:$0xff]   ;;  %v12879_v30 = vld [vmem:[#allocation2 + $0x38] sm:$0xff]   ;;  %v253_v34 = vld [vmem:[%s14169_s7] sm:$0xff]  ;;  %v258_v35 = vpack.c.bf16 %v254_v32, %v254_v32 }
 0x133   :  { %12647 = vmatpush3.bf16.msra.mxu0 %v12859_v10  ;;  %v12876_v27 = vld [vmem:[#allocation2 + $0xb0] sm:$0xff]   ;;  %v12880_v31 = vld [vmem:[#allocation2 + $0xb8] sm:$0xff]   ;;  %v257_v37 = vpack.c.bf16 %v253_v34, %v253_v34  ;;  %v12881_v40 = vld [vmem:[#allocation7] ss:$8 sps:$4 sm:$0xff]  }
 0x134   :  { %12669 = vmatpush3.bf16.msra.mxu1 %v12860_v11  ;;  %12648 = vmatprep.subr.bf16.mxu0 %v12861_v12  ;;  %v256_v33 = vld [vmem:[%s14169_s7 + $0x18] sm:$0xff]  ;;  %v255_v38 = vld [vmem:[%s14169_s7 + $0x10] sm:$0xff]  ;;  %v12887_v45 = vld [vmem:[#allocation7 + $0x20] ss:$8 sps:$4 sm:$0xff]  }
 0x135   :  { %12670 = vmatprep.subr.bf16.mxu1 %v12862_v13  ;;  %v260_v36 = vpack.c.bf16 %v256_v33, %v256_v33  ;;  %v259_v39 = vpack.c.bf16 %v255_v38, %v255_v38  ;;  %v12883_v41 = vld [vmem:[#allocation7 + $0x4] ss:$8 sps:$4 sm:$0xff]   ;;  %556 = vmatprep.mubr.bf16.mxu0 %v258_v35  ;;  %v12886_v42 = vld [vmem:[#allocation7 + $0x14] ss:$8 sps:$4 sm:$0xff]   ;;  %v12884_v43 = vld [vmem:[#allocation7 + $0x10] ss:$8 sps:$4 sm:$0xff]  }
 0x136   :  { %v12889_v44 = vld [vmem:[#allocation7 + $0x24] ss:$8 sps:$4 sm:$0xff]   ;;  %v12892_v46 = vld [vmem:[#allocation7 + $0x34] ss:$8 sps:$4 sm:$0xff]   ;;  %v12890_v47 = vld [vmem:[#allocation7 + $0x30] ss:$8 sps:$4 sm:$0xff]  }
 0x137   :  { %12649 = vmatpush3.bf16.msra.mxu0 %v12863_v14  ;;  %596 = vmatprep.mubr.bf16.mxu1 %v260_v36  ;;  %v12895_v48 = vld [vmem:[#allocation7 + $0x44] ss:$8 sps:$4 sm:$0xff]   ;;  %v12893_v49 = vld [vmem:[#allocation7 + $0x40] ss:$8 sps:$4 sm:$0xff]   ;;  %v12898_v50 = vld [vmem:[#allocation7 + $0x54] ss:$8 sps:$4 sm:$0xff]  }
 0x138   :  { %12671 = vmatpush3.bf16.msra.mxu1 %v12864_v15  ;;  %12650 = vmatprep.subr.bf16.mxu0 %v12865_v16  ;;  %v12896_v51 = vld [vmem:[#allocation7 + $0x50] ss:$8 sps:$4 sm:$0xff]   ;;  %v12901_v52 = vld [vmem:[#allocation7 + $0x64] ss:$8 sps:$4 sm:$0xff]   ;;  %v12899_v53 = vld [vmem:[#allocation7 + $0x60] ss:$8 sps:$4 sm:$0xff]  }
 0x139   :  { %12672 = vmatprep.subr.bf16.mxu1 %v12866_v17  ;;  %v12904_v54 = vld [vmem:[#allocation7 + $0x74] ss:$8 sps:$4 sm:$0xff]   ;;  %v12902_v55 = vld [vmem:[#allocation7 + $0x70] ss:$8 sps:$4 sm:$0xff]  }
 0x13a   :  { %v12905_v57 = vld [vmem:[#allocation13] ss:$16 sps:$4 sm:$0xff]   ;;  %v12907_v58 = vld [vmem:[#allocation13 + $0x4] ss:$16 sps:$4 sm:$0xff]   ;;  %v12910_v59 = vld [vmem:[#allocation13 + $0xc] ss:$16 sps:$4 sm:$0xff]  }
 0x13b   :  { %12651 = vmatpush3.bf16.msra.mxu0 %v12867_v18  ;;  %v11249_v62 = vld [vmem:[#allocation5] ss:$0 sm:$0xff]  ;;  %v12913_v13 = vld [vmem:[#allocation13 + $0x24] ss:$16 sps:$4 sm:$0xff]   ;;  %v12916_v14 = vld [vmem:[#allocation13 + $0x2c] ss:$16 sps:$4 sm:$0xff]  }
 0x13c   :  { %12673 = vmatpush3.bf16.msra.mxu1 %v12868_v19  ;;  %12652 = vmatprep.subr.bf16.mxu0 %v12869_v20  ;;  %v12908_v11 = vld [vmem:[#allocation13 + $0x8] ss:$16 sps:$4 sm:$0xff]   ;;  %v12911_v15 = vld [vmem:[#allocation13 + $0x20] ss:$16 sps:$4 sm:$0xff]   ;;  %v12919_v17 = vld [vmem:[#allocation13 + $0x44] ss:$16 sps:$4 sm:$0xff]  }
 0x13d   :  { %12674 = vmatprep.subr.bf16.mxu1 %v12870_v21  ;;  %v12914_v16 = vld [vmem:[#allocation13 + $0x28] ss:$16 sps:$4 sm:$0xff]   ;;  %v12922_v18 = vld [vmem:[#allocation13 + $0x4c] ss:$16 sps:$4 sm:$0xff]   ;;  %v12917_v19 = vld [vmem:[#allocation13 + $0x40] ss:$16 sps:$4 sm:$0xff]  }
 0x13e   :  { %v12920_v20 = vld [vmem:[#allocation13 + $0x48] ss:$16 sps:$4 sm:$0xff]   ;;  %v12925_v21 = vld [vmem:[#allocation13 + $0x64] ss:$16 sps:$4 sm:$0xff]   ;;  %v12946_v34 = vld [vmem:[#allocation13 + $0xcc] ss:$16 sps:$4 sm:$0xff]  }
 0x13f   :  { %12653 = vmatpush3.bf16.msra.mxu0 %v12871_v22  ;;  %v12928_v22 = vld [vmem:[#allocation13 + $0x6c] ss:$16 sps:$4 sm:$0xff]   ;;  %v12938_v32 = vld [vmem:[#allocation13 + $0xa8] ss:$16 sps:$4 sm:$0xff]   ;;  %v12943_v33 = vld [vmem:[#allocation13 + $0xc4] ss:$16 sps:$4 sm:$0xff]  }
 0x140   :  { %12675 = vmatpush3.bf16.msra.mxu1 %v12872_v23  ;;  %12654 = vmatprep.subr.bf16.mxu0 %v12873_v24  ;;  %v12923_v23 = vld [vmem:[#allocation13 + $0x60] ss:$16 sps:$4 sm:$0xff]   ;;  %v12926_v24 = vld [vmem:[#allocation13 + $0x68] ss:$16 sps:$4 sm:$0xff]   ;;  %v12952_v38 = vld [vmem:[#allocation13 + $0xec] ss:$16 sps:$4 sm:$0xff]  }
 0x141   :  { %12676 = vmatprep.subr.bf16.mxu1 %v12874_v25  ;;  %v12931_v25 = vld [vmem:[#allocation13 + $0x84] ss:$16 sps:$4 sm:$0xff]   ;;  %v12941_v35 = vld [vmem:[#allocation13 + $0xc0] ss:$16 sps:$4 sm:$0xff]   ;;  %v12944_v36 = vld [vmem:[#allocation13 + $0xc8] ss:$16 sps:$4 sm:$0xff]  }
 0x143   :  { %12655 = vmatpush3.bf16.msra.mxu0 %v12875_v26  ;;  %v12934_v26 = vld [vmem:[#allocation13 + $0x8c] ss:$16 sps:$4 sm:$0xff]  }
 0x144   :  { %12677 = vmatpush3.bf16.msra.mxu1 %v12876_v27  ;;  %12656 = vmatprep.subr.bf16.mxu0 %v12877_v28  ;;  %v12929_v27 = vld [vmem:[#allocation13 + $0x80] ss:$16 sps:$4 sm:$0xff]   ;;  %v12932_v28 = vld [vmem:[#allocation13 + $0x88] ss:$16 sps:$4 sm:$0xff]  }
 0x145   :  { %12678 = vmatprep.subr.bf16.mxu1 %v12878_v29  ;;  %v12937_v29 = vld [vmem:[#allocation13 + $0xa4] ss:$16 sps:$4 sm:$0xff]  }
 0x147   :  { %12657 = vmatpush3.bf16.msra.mxu0 %v12879_v30  ;;  %v12940_v30 = vld [vmem:[#allocation13 + $0xac] ss:$16 sps:$4 sm:$0xff]  }
 0x148   :  { %12679 = vmatpush3.bf16.msra.mxu1 %v12880_v31  ;;  %716 = vmatprep.subr.bf16.mxu0 %v12883_v41  ;;  %v12935_v31 = vld [vmem:[#allocation13 + $0xa0] ss:$16 sps:$4 sm:$0xff]   ;;  %v12955_v41 = vld [vmem:[#allocation13 + $0x104] ss:$16 sps:$4 sm:$0xff]  }
 0x149   :  { %1238 = vmatprep.subr.bf16.mxu1 %v12907_v58  ;;  %v12982_v58 = vld [vmem:[#allocation13 + $0x18c] ss:$16 sps:$4 sm:$0xff]  }
 0x14a   :  { %557 = vmatmul.mubr.bf16.vlgmr.msra.gmra.mrb[0].mxu0 %v257_v37  ;;  %v12949_v37 = vld [vmem:[#allocation13 + $0xe4] ss:$16 sps:$4 sm:$0xff]  }
 0x14b   :  { %597 = vmatmul.mubr.bf16.vlgmr.msra.gmra.mrb[0].mxu1 %v259_v39  ;;  %717 = vmatpush1.bf16.msra.mxu0 %v12881_v40  ;;  %v12947_v39 = vld [vmem:[#allocation13 + $0xe0] ss:$16 sps:$4 sm:$0xff]   ;;  %v12950_v40 = vld [vmem:[#allocation13 + $0xe8] ss:$16 sps:$4 sm:$0xff]  }
 0x14c   :  { %718 = vmatprep.subr.bf16.mxu0 %v12886_v42  ;;  %748 = vmatprep.mubr.bf16.mxu0 %v13483_v56  ;;  %v12958_v42 = vld [vmem:[#allocation13 + $0x10c] ss:$16 sps:$4 sm:$0xff]   ;;  %v12974_v56 = vld [vmem:[#allocation13 + $0x168] ss:$16 sps:$4 sm:$0xff]  }
 0x14d   :  { %1239 = vmatpush1.bf16.msra.mxu1 %v12905_v57  ;;  %v12979_v57 = vld [vmem:[#allocation13 + $0x184] ss:$16 sps:$4 sm:$0xff]  }
 0x14e   :  { %1240 = vmatprep.subr.bf16.mxu1 %v12913_v13 }
 0x14f   :  { %719 = vmatpush1.bf16.msra.mxu0 %v12884_v43  ;;  %v12953_v43 = vld [vmem:[#allocation13 + $0x100] ss:$16 sps:$4 sm:$0xff]  }
 0x150   :  { %720 = vmatprep.subr.bf16.mxu0 %v12889_v44  ;;  %v12956_v44 = vld [vmem:[#allocation13 + $0x108] ss:$16 sps:$4 sm:$0xff]  }
 0x151   :  { %1241 = vmatpush1.bf16.msra.mxu1 %v12911_v15 }
 0x152   :  { %1242 = vmatprep.subr.bf16.mxu1 %v12919_v17  ;;  %v626_v17 = vlaneseq }
 0x153   :  { %721 = vmatpush1.bf16.msra.mxu0 %v12887_v45  ;;  %v12961_v45 = vld [vmem:[#allocation13 + $0x124] ss:$16 sps:$4 sm:$0xff]  }
 0x154   :  { %722 = vmatprep.subr.bf16.mxu0 %v12892_v46  ;;  %v12964_v46 = vld [vmem:[#allocation13 + $0x12c] ss:$16 sps:$4 sm:$0xff]  }
 0x155   :  { %1243 = vmatpush1.bf16.msra.mxu1 %v12917_v19 }
 0x156   :  { %1244 = vmatprep.subr.bf16.mxu1 %v12925_v21 }
 0x157   :  { %723 = vmatpush1.bf16.msra.mxu0 %v12890_v47  ;;  %v12959_v47 = vld [vmem:[#allocation13 + $0x120] ss:$16 sps:$4 sm:$0xff]  }
 0x158   :  { %724 = vmatprep.subr.bf16.mxu0 %v12895_v48  ;;  %v12962_v48 = vld [vmem:[#allocation13 + $0x128] ss:$16 sps:$4 sm:$0xff]  }
 0x159   :  { %1245 = vmatpush1.bf16.msra.mxu1 %v12923_v23 }
 0x15a   :  { %1246 = vmatprep.subr.bf16.mxu1 %v12931_v25 }
 0x15b   :  { %725 = vmatpush1.bf16.msra.mxu0 %v12893_v49  ;;  %v12967_v49 = vld [vmem:[#allocation13 + $0x144] ss:$16 sps:$4 sm:$0xff]  }
 0x15c   :  { %726 = vmatprep.subr.bf16.mxu0 %v12898_v50  ;;  %v12970_v50 = vld [vmem:[#allocation13 + $0x14c] ss:$16 sps:$4 sm:$0xff]  }
 0x15d   :  { %1247 = vmatpush1.bf16.msra.mxu1 %v12929_v27 }
 0x15e   :  { %1248 = vmatprep.subr.bf16.mxu1 %v12937_v29 }
 0x15f   :  { %727 = vmatpush1.bf16.msra.mxu0 %v12896_v51  ;;  %v12965_v51 = vld [vmem:[#allocation13 + $0x140] ss:$16 sps:$4 sm:$0xff]  }
 0x160   :  { %728 = vmatprep.subr.bf16.mxu0 %v12901_v52  ;;  %v12968_v52 = vld [vmem:[#allocation13 + $0x148] ss:$16 sps:$4 sm:$0xff]  }
 0x161   :  { %1249 = vmatpush1.bf16.msra.mxu1 %v12935_v31 }
 0x162   :  { %1250 = vmatprep.subr.bf16.mxu1 %v12943_v33 }
 0x163   :  { %729 = vmatpush1.bf16.msra.mxu0 %v12899_v53  ;;  %v12973_v53 = vld [vmem:[#allocation13 + $0x164] ss:$16 sps:$4 sm:$0xff]  }
 0x164   :  { %730 = vmatprep.subr.bf16.mxu0 %v12904_v54  ;;  %v12976_v54 = vld [vmem:[#allocation13 + $0x16c] ss:$16 sps:$4 sm:$0xff]  }
 0x165   :  { %1251 = vmatpush1.bf16.msra.mxu1 %v12941_v35 }
 0x166   :  { %1252 = vmatprep.subr.bf16.mxu1 %v12949_v37 }
 0x167   :  { %731 = vmatpush1.bf16.msra.mxu0 %v12902_v55  ;;  %v12971_v55 = vld [vmem:[#allocation13 + $0x160] ss:$16 sps:$4 sm:$0xff]  }
 0x168   :  { %1279 = vmatprep.subr.bf16.mxu0 %v12910_v59  ;;  %v12977_v59 = vld [vmem:[#allocation13 + $0x180] ss:$16 sps:$4 sm:$0xff]  }
 0x169   :  { %1253 = vmatpush1.bf16.msra.mxu1 %v12947_v39 }
 0x16a   :  { %1254 = vmatprep.subr.bf16.mxu1 %v12955_v41 }
 0x16d   :  { %1255 = vmatpush1.bf16.msra.mxu1 %v12953_v43 }
 0x16e   :  { %1256 = vmatprep.subr.bf16.mxu1 %v12961_v45 }
 0x171   :  { %1257 = vmatpush1.bf16.msra.mxu1 %v12959_v47 }
 0x172   :  { %1258 = vmatprep.subr.bf16.mxu1 %v12967_v49 }
 0x175   :  { %1259 = vmatpush1.bf16.msra.mxu1 %v12965_v51 }
 0x176   :  { %1260 = vmatprep.subr.bf16.mxu1 %v12973_v53 }
 0x179   :  { %1261 = vmatpush1.bf16.msra.mxu1 %v12971_v55 }
 0x17a   :  { %1262 = vmatprep.subr.bf16.mxu1 %v12979_v57 }
 0x17d   :  { %1263 = vmatpush1.bf16.msra.mxu1 %v12977_v59 }
 0x21d   :  { %v12658_v60 = vpop.f32.mrb[0].mxu0 }
 0x21e   :  { %v12680_v61 = vpop.f32.mrb[0].mxu1  ;;  %v12659_v63 = vpop.f32.mrb[1].mxu0 }
 0x21f   :  { %v12681_v0 = vpop.f32.mrb[1].mxu1  ;;  %v12660_v1 = vadd.f32 %v12659_v63, %v12658_v60  ;;  %v12661_v3 = vpop.f32.mrb[2].mxu0  ;;  %v12980_v60 = vld [vmem:[#allocation13 + $0x188] ss:$16 sps:$4 sm:$0xff]   ;;  %v12983_v63 = vld [vmem:[#allocation13 + $0x1a0] ss:$16 sps:$4 sm:$0xff]  }
 0x220   :  { %v12682_v2 = vadd.f32 %v12681_v0, %v12680_v61  ;;  %v12683_v4 = vpop.f32.mrb[2].mxu1  ;;  %v12662_v5 = vpop.f32.mrb[3].mxu0  ;;  %v12985_v61 = vld [vmem:[#allocation13 + $0x1a4] ss:$16 sps:$4 sm:$0xff]   ;;  %v12986_v0 = vld [vmem:[#allocation13 + $0x1a8] ss:$16 sps:$4 sm:$0xff]  }
 0x221   :  { %v12684_v6 = vpop.f32.mrb[3].mxu1  ;;  %v559_v7 = vadd.f32 %v12660_v1, %v11249_v62  ;;  %v12988_v62 = vld [vmem:[#allocation13 + $0x1ac] ss:$16 sps:$4 sm:$0xff]   ;;  %1264 = vmatprep.subr.bf16.mxu1 %v12985_v61  ;;  %v12991_v1 = vld [vmem:[#allocation13 + $0x1c4] ss:$16 sps:$4 sm:$0xff]  }
 0x222   :  { %1265 = vmatpush1.bf16.msra.mxu1 %v12983_v63  ;;  %v12989_v3 = vld [vmem:[#allocation13 + $0x1c0] ss:$16 sps:$4 sm:$0xff]   ;;  %v12992_v4 = vld [vmem:[#allocation13 + $0x1c8] ss:$16 sps:$4 sm:$0xff]   ;;  %v12997_v5 = vld [vmem:[#allocation13 + $0x1e4] ss:$16 sps:$4 sm:$0xff]  }
 0x223   :  { %v599_v8 = vadd.f32 %v12682_v2, %v559_v7  ;;  %v12994_v2 = vld [vmem:[#allocation13 + $0x1cc] ss:$16 sps:$4 sm:$0xff]   ;;  %1266 = vmatprep.subr.bf16.mxu1 %v12991_v1  ;;  %v12995_v7 = vld [vmem:[#allocation13 + $0x1e0] ss:$16 sps:$4 sm:$0xff]  }
 0x224   :  { %v13000_v6 = vld [vmem:[#allocation13 + $0x1ec] ss:$16 sps:$4 sm:$0xff]  }
 0x225   :  { %vm604_vm0 = vcmp.gt.f32.partialorder %v599_v8, 0.0  ;;  %v605_v9 = vmul.f32 0.2, %v599_v8  ;;  %v810_v1 = vld [vmem:[#allocation11] sm:$0x3] }
 0x226   :  { %1267 = vmatpush1.bf16.msra.mxu1 %v12989_v3 }
 0x227   :  { %v606_v10 = vsel %vm604_vm0, %v599_v8, %v605_v9  ;;  %v12998_v8 = vld [vmem:[#allocation13 + $0x1e8] ss:$16 sps:$4 sm:$0xff]   ;;  %1268 = vmatprep.subr.bf16.mxu1 %v12997_v5  ;;  %v13789_v9 = vld [vmem:[#allocation19] sm:$0xff] }
 0x228   :  { %v607_v12 = vpack.c.bf16 %v606_v10, %v606_v10  ;;  %v13791_v10 = vld [vmem:[#allocation19 + $0x20] sm:$0xff] }
 0x229   :  { %v11363_v13 = vcombine.high %v13789_v9, %v13791_v10 }
 0x22a   :  { %749 = vmatmul.mubr.bf16.vlgmr.msra.gmra.mrb[4].mxu0 %v607_v12  ;;  %1269 = vmatpush1.bf16.msra.mxu1 %v12995_v7  ;;  %v11362_v12 = vcombine.low %v13789_v9, %v13791_v10  ;;  %v1481_v9 = vld [vmem:[#allocation19 + $0x88] sm:$0xff] }
 0x22b   :  { %1280 = vmatpush1.bf16.msra.mxu0 %v12908_v11  ;;  %v13793_v11 = vld [vmem:[#allocation19 + $0x8] sm:$0xff]  ;;  %3042 = vmatprep.subr.bf16.mxu1 %v11363_v13 }
 0x22c   :  { %1281 = vmatprep.subr.bf16.mxu0 %v12916_v14  ;;  %v13799_v14 = vld [vmem:[#allocation19 + $0x28] sm:$0xff] }
 0x22d   :  { %v11364_v15 = vcombine.low %v13793_v11, %v13799_v14 }
 0x22f   :  { %1282 = vmatpush1.bf16.msra.mxu0 %v12914_v16  ;;  %v11365_v16 = vcombine.high %v13793_v11, %v13799_v14 }
 0x230   :  { %1283 = vmatprep.subr.bf16.mxu0 %v12922_v18  ;;  %v13805_v18 = vshrl.u32 %v626_v17, 7 }
 0x232   :  { %v13808_v19 = vsub.s32 0, %v13805_v18  ;;  %v13811_v21 = vsub.s32 1, %v13805_v18 }
 0x233   :  { %1284 = vmatpush1.bf16.msra.mxu0 %v12920_v20  ;;  %v624_v20 = vld [vmem:[#allocation8] sm:$0x3] }
 0x234   :  { %1285 = vmatprep.subr.bf16.mxu0 %v12928_v22  ;;  %v629_v22 = vrot.slane %v624_v20, %v13808_v19  ;;  %v633_v23 = vrot.slane %v624_v20, %v13811_v21  ;;  %v815_v7 = vrot.slane %v810_v1, %v13808_v19  ;;  %v819_v13 = vrot.slane %v810_v1, %v13811_v21  ;;  %v1513_v1 = vld [vmem:[#allocation19 + $0x188] sm:$0xff] }
 0x237   :  { %1286 = vmatpush1.bf16.msra.mxu0 %v12926_v24 }
 0x238   :  { %1287 = vmatprep.subr.bf16.mxu0 %v12934_v26 }
 0x23b   :  { %1288 = vmatpush1.bf16.msra.mxu0 %v12932_v28 }
 0x23c   :  { %1289 = vmatprep.subr.bf16.mxu0 %v12940_v30 }
 0x23f   :  { %1290 = vmatpush1.bf16.msra.mxu0 %v12938_v32 }
 0x240   :  { %1291 = vmatprep.subr.bf16.mxu0 %v12946_v34 }
 0x243   :  { %1292 = vmatpush1.bf16.msra.mxu0 %v12944_v36 }
 0x244   :  { %1293 = vmatprep.subr.bf16.mxu0 %v12952_v38 }
 0x247   :  { %1294 = vmatpush1.bf16.msra.mxu0 %v12950_v40 }
 0x248   :  { %1295 = vmatprep.subr.bf16.mxu0 %v12958_v42 }
 0x24b   :  { %1296 = vmatpush1.bf16.msra.mxu0 %v12956_v44 }
 0x24c   :  { %1297 = vmatprep.subr.bf16.mxu0 %v12964_v46 }
 0x24f   :  { %1298 = vmatpush1.bf16.msra.mxu0 %v12962_v48 }
 0x250   :  { %1299 = vmatprep.subr.bf16.mxu0 %v12970_v50 }
 0x253   :  { %1300 = vmatpush1.bf16.msra.mxu0 %v12968_v52 }
 0x254   :  { %1301 = vmatprep.subr.bf16.mxu0 %v12976_v54 }
 0x257   :  { %1302 = vmatpush1.bf16.msra.mxu0 %v12974_v56 }
 0x258   :  { %1303 = vmatprep.subr.bf16.mxu0 %v12982_v58 }
 0x25b   :  { %1304 = vmatpush1.bf16.msra.mxu0 %v12980_v60 }
 0x25c   :  { %1305 = vmatprep.subr.bf16.mxu0 %v12988_v62 }
 0x25f   :  { %1306 = vmatpush1.bf16.msra.mxu0 %v12986_v0  ;;  %v796_v0 = vld [vmem:[#allocation10] sm:$0x3] }
 0x260   :  { %1307 = vmatprep.subr.bf16.mxu0 %v12994_v2  ;;  %v801_v2 = vrot.slane %v796_v0, %v13808_v19 }
 0x263   :  { %1308 = vmatpush1.bf16.msra.mxu0 %v12992_v4  ;;  %v805_v4 = vrot.slane %v796_v0, %v13811_v21  ;;  %v1516_v0 = vld [vmem:[#allocation19 + $0x1a0] sm:$0xff] }
 0x264   :  { %1309 = vmatprep.subr.bf16.mxu0 %v13000_v6 }
 0x267   :  { %1310 = vmatpush1.bf16.msra.mxu0 %v12998_v8 }
 0x268   :  { %3124 = vmatprep.subr.bf16.mxu0 %v11365_v16 }
 0x2fd   :  { %v750_v24 = vpop.f32.mrb[4].mxu0 }
 0x2fe   :  { %v751_v25 = vadd.f32 %v750_v24, %v629_v22  ;;  %v752_v26 = vpop.f32.mrb[5].mxu0 }
 0x2ff   :  { %v753_v27 = vadd.f32 %v752_v26, %v633_v23  ;;  %v754_v28 = vpop.f32.mrb[6].mxu0 }
 0x300   :  { %v757_v29 = vrot.slane %v751_v25, 4  ;;  %v755_v30 = vpop.f32.mrb[7].mxu0 }
 0x301   :  { %v763_v31 = vrot.slane %v753_v27, 4  ;;  %v1476_v30 = vld [vmem:[#allocation19 + $0x60] sm:$0xff] }
 0x302   :  { %v758_v32 = vadd.f32 %v757_v29, %v751_v25  ;;  %v1472_v29 = vld [vmem:[#allocation19 + $0x40] sm:$0xff] }
 0x303   :  { %v764_v33 = vadd.f32 %v763_v31, %v753_v27  ;;  %v1473_v31 = vld [vmem:[#allocation19 + $0x48] sm:$0xff] }
 0x304   :  { %v759_v34 = vrot.slane %v758_v32, 2 }
 0x305   :  { %v765_v35 = vrot.slane %v764_v33, 2 }
 0x306   :  { %v760_v36 = vadd.f32 %v759_v34, %v758_v32  ;;  %v11371_v32 = vcombine.high %v1472_v29, %v1476_v30  ;;  %v11370_v34 = vcombine.low %v1472_v29, %v1476_v30 }
 0x307   :  { %v766_v37 = vadd.f32 %v765_v35, %v764_v33  ;;  %v1477_v33 = vld [vmem:[#allocation19 + $0x68] sm:$0xff] }
 0x308   :  { %v761_v38 = vrot.slane %v760_v36, 1  ;;  %v11372_v35 = vcombine.low %v1473_v31, %v1477_v33 }
 0x309   :  { %v767_v39 = vrot.slane %v766_v37, 1 }
 0x30a   :  { %v762_v40 = vadd.f32 %v761_v38, %v760_v36  ;;  %v11373_v36 = vcombine.high %v1473_v31, %v1477_v33  ;;  %v1484_v38 = vld [vmem:[#allocation19 + $0xa0] sm:$0xff] }
 0x30b   :  { %v768_v41 = vadd.f32 %v767_v39, %v766_v37  ;;  %v1480_v37 = vld [vmem:[#allocation19 + $0x80] sm:$0xff] }
 0x30c   :  { %v770_v42 = vmul.f32 0.125, %v762_v40  ;;  %v11379_v10 = vcombine.high %v1480_v37, %v1484_v38  ;;  %v11378_v39 = vcombine.low %v1480_v37, %v1484_v38  ;;  %v1492_v40 = vld [vmem:[#allocation19 + $0xe0] sm:$0xff] }
 0x30d   :  { %v771_v43 = vmul.f32 0.125, %v768_v41  ;;  %v1489_v41 = vld [vmem:[#allocation19 + $0xc8] sm:$0xff]  ;;  %v1540_v33 = vld [vmem:[#allocation19 + $0x260] sm:$0xff] }
 0x30e   :  { %v772_v44 = vsub.f32 %v751_v25, %v770_v42 }
 0x30f   :  { %v773_v45 = vsub.f32 %v753_v27, %v771_v43  ;;  %v1493_v43 = vld [vmem:[#allocation19 + $0xe8] sm:$0xff] }
 0x310   :  { %v774_v46 = vmul.f32 %v772_v44, %v772_v44 }
 0x311   :  { %v775_v47 = vmul.f32 %v773_v45, %v773_v45 }
 0x312   :  { %v776_v48 = vrot.slane %v774_v46, 4 }
 0x313   :  { %v782_v49 = vrot.slane %v775_v47, 4 }
 0x314   :  { %v777_v50 = vadd.f32 %v776_v48, %v774_v46  ;;  %v11389_v46 = vcombine.high %v1489_v41, %v1493_v43  ;;  %v1500_v48 = vld [vmem:[#allocation19 + $0x120] sm:$0xff] }
 0x315   :  { %v783_v51 = vadd.f32 %v782_v49, %v775_v47  ;;  %v1496_v47 = vld [vmem:[#allocation19 + $0x100] sm:$0xff]  ;;  %v1497_v49 = vld [vmem:[#allocation19 + $0x108] sm:$0xff] }
 0x316   :  { %v778_v52 = vrot.slane %v777_v50, 2 }
 0x317   :  { %v784_v53 = vrot.slane %v783_v51, 2 }
 0x318   :  { %v779_v54 = vadd.f32 %v778_v52, %v777_v50  ;;  %v11395_v50 = vcombine.high %v1496_v47, %v1500_v48  ;;  %v11394_v52 = vcombine.low %v1496_v47, %v1500_v48 }
 0x319   :  { %v785_v55 = vadd.f32 %v784_v53, %v783_v51  ;;  %v1501_v51 = vld [vmem:[#allocation19 + $0x128] sm:$0xff] }
 0x31a   :  { %v780_v56 = vrot.slane %v779_v54, 1  ;;  %v11396_v53 = vcombine.low %v1497_v49, %v1501_v51 }
 0x31b   :  { %v786_v57 = vrot.slane %v785_v55, 1 }
 0x31c   :  { %v781_v58 = vadd.f32 %v780_v56, %v779_v54  ;;  %v11397_v54 = vcombine.high %v1497_v49, %v1501_v51  ;;  %v1508_v56 = vld [vmem:[#allocation19 + $0x160] sm:$0xff] }
 0x31d   :  { %v787_v59 = vadd.f32 %v786_v57, %v785_v55  ;;  %v1504_v55 = vld [vmem:[#allocation19 + $0x140] sm:$0xff]  ;;  %v1505_v57 = vld [vmem:[#allocation19 + $0x148] sm:$0xff] }
 0x31e   :  { %v788_v60 = vmul.f32 0.125, %v781_v58  ;;  %v11403_v58 = vcombine.high %v1504_v55, %v1508_v56  ;;  %v1564_v51 = vld [vmem:[#allocation19 + $0x320] sm:$0xff] }
 0x31f   :  { %v789_v61 = vmul.f32 0.125, %v787_v59  ;;  %v1509_v59 = vld [vmem:[#allocation19 + $0x168] sm:$0xff] }
 0x320   :  { %v790_v62 = vadd.f32 0.8, %v788_v60  ;;  %v11402_v60 = vcombine.low %v1504_v55, %v1508_v56 }
 0x321   :  { %v791_v63 = vadd.f32 0.8, %v789_v61  ;;  %v11404_v61 = vcombine.low %v1505_v57, %v1509_v59 }
 0x322   :  { %13001 = vrsqrt.f32 %v790_v62  ;;  %v11405_v62 = vcombine.high %v1505_v57, %v1509_v59  ;;  %v1572_v59 = vld [vmem:[#allocation19 + $0x360] sm:$0xff] }
 0x323   :  { %13003 = vrsqrt.f32 %v791_v63  ;;  %v1512_v63 = vld [vmem:[#allocation19 + $0x180] sm:$0xff] }
 0x32c   :  { %v13002_v3 = vpop.eup %13001 }
 0x32d   :  { %v13004_v5 = vpop.eup %13003  ;;  %v794_v6 = vmul.f32 %v13002_v3, %v772_v44  ;;  %v1517_v3 = vld [vmem:[#allocation19 + $0x1a8] sm:$0xff] }
 0x32e   :  { %v795_v8 = vmul.f32 %v13004_v5, %v773_v45  ;;  %v11388_v45 = vcombine.low %v1489_v41, %v1493_v43  ;;  %v11412_v5 = vcombine.low %v1513_v1, %v1517_v3  ;;  %v1556_v43 = vld [vmem:[#allocation19 + $0x2e0] sm:$0xff] }
 0x32f   :  { %v808_v16 = vmul.f32 %v801_v2, %v794_v6  ;;  %v11411_v2 = vcombine.high %v1512_v63, %v1516_v0  ;;  %v11413_v6 = vcombine.high %v1513_v1, %v1517_v3  ;;  %v1580_v3 = vld [vmem:[#allocation19 + $0x3a0] sm:$0xff] }
 0x330   :  { %v809_v17 = vmul.f32 %v805_v4, %v795_v8  ;;  %v11410_v4 = vcombine.low %v1512_v63, %v1516_v0  ;;  %v1524_v8 = vld [vmem:[#allocation19 + $0x1e0] sm:$0xff] }
 0x331   :  { %v822_v20 = vadd.f32 %v815_v7, %v808_v16  ;;  %v1520_v7 = vld [vmem:[#allocation19 + $0x1c0] sm:$0xff] }
 0x332   :  { %v823_v22 = vadd.f32 %v819_v13, %v809_v17  ;;  %v1521_v13 = vld [vmem:[#allocation19 + $0x1c8] sm:$0xff]  ;;  %v11419_v16 = vcombine.high %v1520_v7, %v1524_v8 }
 0x333   :  { %vm824_vm1 = vcmp.gt.f32.partialorder %v822_v20, 0.0  ;;  %v826_v23 = vmul.f32 0.2, %v822_v20  ;;  %v1525_v17 = vld [vmem:[#allocation19 + $0x1e8] sm:$0xff] }
 0x334   :  { %vm825_vm2 = vcmp.gt.f32.partialorder %v823_v22, 0.0  ;;  %v827_v24 = vmul.f32 0.2, %v823_v22 }
 0x335   :  { %v828_v25 = vsel %vm824_vm1, %v822_v20, %v826_v23  ;;  %v11418_v20 = vcombine.low %v1520_v7, %v1524_v8  ;;  %v11421_v23 = vcombine.high %v1521_v13, %v1525_v17 }
 0x336   :  { %v829_v26 = vsel %vm825_vm2, %v823_v22, %v827_v24  ;;  %v830_v28 = vpack.c.bf16 %v828_v25, %v828_v25  ;;  %v11420_v22 = vcombine.low %v1521_v13, %v1525_v17  ;;  %v1528_v24 = vld [vmem:[#allocation19 + $0x200] sm:$0xff] }
 0x337   :  { %v831_v27 = vpack.c.bf16 %v829_v26, %v829_v26  ;;  %v1532_v25 = vld [vmem:[#allocation19 + $0x220] sm:$0xff]  ;;  %v1529_v26 = vld [vmem:[#allocation19 + $0x208] sm:$0xff] }
 0x338   :  { %v11426_v29 = vcombine.low %v1528_v24, %v1532_v25  ;;  %v1588_v17 = vld [vmem:[#allocation19 + $0x3e0] sm:$0xff] }
 0x339   :  { %1270 = vmatprep.mubr.bf16.mxu1 %v831_v27  ;;  %1311 = vmatprep.mubr.bf16.mxu0 %v831_v27  ;;  %v11427_v27 = vcombine.high %v1528_v24, %v1532_v25  ;;  %v1589_v24 = vld [vmem:[#allocation19 + $0x3e8] sm:$0xff] }
 0x33a   :  { %1271 = vmatmul.mubr.bf16.vlgmr.msra.gmra.mrb[4].mxu1 %v830_v28  ;;  %1312 = vmatmul.mubr.bf16.vlgmr.msra.gmra.mrb[8].mxu0 %v830_v28  ;;  %v1533_v28 = vld [vmem:[#allocation19 + $0x228] sm:$0xff] }
 0x33b   :  { %3043 = vmatpush1.bf16.msra.mxu1 %v11362_v12  ;;  %3125 = vmatpush1.bf16.msra.mxu0 %v11364_v15  ;;  %v1485_v12 = vld [vmem:[#allocation19 + $0xa8] sm:$0xff]  ;;  %v1488_v15 = vld [vmem:[#allocation19 + $0xc0] sm:$0xff]  ;;  %v11428_v30 = vcombine.low %v1529_v26, %v1533_v28  ;;  %v11429_v31 = vcombine.high %v1529_v26, %v1533_v28 }
 0x33c   :  { %3044 = vmatprep.subr.bf16.mxu1 %v11371_v32  ;;  %3126 = vmatprep.subr.bf16.mxu0 %v11373_v36  ;;  %v11380_v11 = vcombine.low %v1481_v9, %v1485_v12  ;;  %v11381_v14 = vcombine.high %v1481_v9, %v1485_v12  ;;  %v11387_v42 = vcombine.high %v1488_v15, %v1492_v40  ;;  %v1536_v32 = vld [vmem:[#allocation19 + $0x240] sm:$0xff]  ;;  %v1541_v36 = vld [vmem:[#allocation19 + $0x268] sm:$0xff] }
 0x33d   :  { %v11386_v44 = vcombine.low %v1488_v15, %v1492_v40  ;;  %v11434_v37 = vcombine.low %v1536_v32, %v1540_v33  ;;  %v1548_v12 = vld [vmem:[#allocation19 + $0x2a0] sm:$0xff] }
 0x33e   :  { %v13827_v28 = vld [vmem:[#allocation19 + $0x420] sm:$0xff] }
 0x33f   :  { %3045 = vmatpush1.bf16.msra.mxu1 %v11370_v34  ;;  %3127 = vmatpush1.bf16.msra.mxu0 %v11372_v35  ;;  %v1537_v34 = vld [vmem:[#allocation19 + $0x248] sm:$0xff]  ;;  %v11435_v35 = vcombine.high %v1536_v32, %v1540_v33 }
 0x340   :  { %3046 = vmatprep.subr.bf16.mxu1 %v11379_v10  ;;  %3128 = vmatprep.subr.bf16.mxu0 %v11381_v14  ;;  %v11436_v38 = vcombine.low %v1537_v34, %v1541_v36  ;;  %v11437_v9 = vcombine.high %v1537_v34, %v1541_v36  ;;  %v1544_v10 = vld [vmem:[#allocation19 + $0x280] sm:$0xff]  ;;  %v1549_v14 = vld [vmem:[#allocation19 + $0x2a8] sm:$0xff]  ;;  %v896_v36 = vld [vmem:[#allocation14] sm:$0xf] }
 0x341   :  { %v11442_v15 = vcombine.low %v1544_v10, %v1548_v12 }
 0x343   :  { %3047 = vmatpush1.bf16.msra.mxu1 %v11378_v39  ;;  %3129 = vmatpush1.bf16.msra.mxu0 %v11380_v11  ;;  %v1545_v39 = vld [vmem:[#allocation19 + $0x288] sm:$0xff]  ;;  %v11443_v11 = vcombine.high %v1544_v10, %v1548_v12  ;;  %v905_v10 = vrot.slane %v896_v36, %v13811_v21 }
 0x344   :  { %3048 = vmatprep.subr.bf16.mxu1 %v11387_v42  ;;  %3130 = vmatprep.subr.bf16.mxu0 %v11389_v46  ;;  %v11444_v40 = vcombine.low %v1545_v39, %v1549_v14  ;;  %v11445_v41 = vcombine.high %v1545_v39, %v1549_v14  ;;  %v1552_v42 = vld [vmem:[#allocation19 + $0x2c0] sm:$0xff]  ;;  %v1557_v46 = vld [vmem:[#allocation19 + $0x2e8] sm:$0xff] }
 0x345   :  { %v11450_v47 = vcombine.low %v1552_v42, %v1556_v43 }
 0x347   :  { %3049 = vmatpush1.bf16.msra.mxu1 %v11386_v44  ;;  %3131 = vmatpush1.bf16.msra.mxu0 %v11388_v45  ;;  %v1553_v44 = vld [vmem:[#allocation19 + $0x2c8] sm:$0xff]  ;;  %v11451_v45 = vcombine.high %v1552_v42, %v1556_v43 }
 0x348   :  { %3050 = vmatprep.subr.bf16.mxu1 %v11395_v50  ;;  %3132 = vmatprep.subr.bf16.mxu0 %v11397_v54  ;;  %v11452_v48 = vcombine.low %v1553_v44, %v1557_v46  ;;  %v11453_v49 = vcombine.high %v1553_v44, %v1557_v46  ;;  %v1560_v50 = vld [vmem:[#allocation19 + $0x300] sm:$0xff]  ;;  %v1565_v54 = vld [vmem:[#allocation19 + $0x328] sm:$0xff] }
 0x349   :  { %v11458_v55 = vcombine.low %v1560_v50, %v1564_v51 }
 0x34b   :  { %3051 = vmatpush1.bf16.msra.mxu1 %v11394_v52  ;;  %3133 = vmatpush1.bf16.msra.mxu0 %v11396_v53  ;;  %v1561_v52 = vld [vmem:[#allocation19 + $0x308] sm:$0xff]  ;;  %v11459_v53 = vcombine.high %v1560_v50, %v1564_v51 }
 0x34c   :  { %3052 = vmatprep.subr.bf16.mxu1 %v11403_v58  ;;  %3134 = vmatprep.subr.bf16.mxu0 %v11405_v62  ;;  %v11460_v56 = vcombine.low %v1561_v52, %v1565_v54  ;;  %v11461_v57 = vcombine.high %v1561_v52, %v1565_v54  ;;  %v1568_v58 = vld [vmem:[#allocation19 + $0x340] sm:$0xff]  ;;  %v1573_v62 = vld [vmem:[#allocation19 + $0x368] sm:$0xff] }
 0x34d   :  { %v11466_v63 = vcombine.low %v1568_v58, %v1572_v59 }
 0x34f   :  { %3053 = vmatpush1.bf16.msra.mxu1 %v11402_v60  ;;  %3135 = vmatpush1.bf16.msra.mxu0 %v11404_v61  ;;  %v11467_v60 = vcombine.high %v1568_v58, %v1572_v59  ;;  %v1569_v61 = vld [vmem:[#allocation19 + $0x348] sm:$0xff] }
 0x350   :  { %3054 = vmatprep.subr.bf16.mxu1 %v11411_v2  ;;  %3136 = vmatprep.subr.bf16.mxu0 %v11413_v6  ;;  %v11468_v0 = vcombine.low %v1569_v61, %v1573_v62  ;;  %v11469_v1 = vcombine.high %v1569_v61, %v1573_v62  ;;  %v1576_v2 = vld [vmem:[#allocation19 + $0x380] sm:$0xff]  ;;  %v1581_v6 = vld [vmem:[#allocation19 + $0x3a8] sm:$0xff] }
 0x351   :  { %v11474_v7 = vcombine.low %v1576_v2, %v1580_v3 }
 0x353   :  { %3055 = vmatpush1.bf16.msra.mxu1 %v11410_v4  ;;  %3137 = vmatpush1.bf16.msra.mxu0 %v11412_v5  ;;  %v1577_v4 = vld [vmem:[#allocation19 + $0x388] sm:$0xff]  ;;  %v11475_v5 = vcombine.high %v1576_v2, %v1580_v3 }
 0x354   :  { %3056 = vmatprep.subr.bf16.mxu1 %v11419_v16  ;;  %3138 = vmatprep.subr.bf16.mxu0 %v11421_v23  ;;  %v11476_v8 = vcombine.low %v1577_v4, %v1581_v6  ;;  %v11477_v13 = vcombine.high %v1577_v4, %v1581_v6  ;;  %v1584_v16 = vld [vmem:[#allocation19 + $0x3c0] sm:$0xff] }
 0x355   :  { %v11483_v23 = vcombine.high %v1584_v16, %v1588_v17 }
 0x357   :  { %3057 = vmatpush1.bf16.msra.mxu1 %v11418_v20  ;;  %3139 = vmatpush1.bf16.msra.mxu0 %v11420_v22  ;;  %v1585_v20 = vld [vmem:[#allocation19 + $0x3c8] sm:$0xff]  ;;  %v11482_v22 = vcombine.low %v1584_v16, %v1588_v17 }
 0x358   :  { %3058 = vmatprep.subr.bf16.mxu1 %v11427_v27  ;;  %3140 = vmatprep.subr.bf16.mxu0 %v11429_v31  ;;  %v11484_v25 = vcombine.low %v1585_v20, %v1589_v24  ;;  %v11485_v26 = vcombine.high %v1585_v20, %v1589_v24  ;;  %v13825_v27 = vld [vmem:[#allocation19 + $0x400] sm:$0xff]  ;;  %v13833_v31 = vld [vmem:[#allocation19 + $0x428] sm:$0xff] }
 0x359   :  { %v11490_v32 = vcombine.low %v13825_v27, %v13827_v28 }
 0x35b   :  { %3059 = vmatpush1.bf16.msra.mxu1 %v11426_v29  ;;  %3141 = vmatpush1.bf16.msra.mxu0 %v11428_v30  ;;  %v13829_v29 = vld [vmem:[#allocation19 + $0x408] sm:$0xff]  ;;  %v11491_v30 = vcombine.high %v13825_v27, %v13827_v28 }
 0x35c   :  { %3060 = vmatprep.subr.bf16.mxu1 %v11435_v35  ;;  %3142 = vmatprep.subr.bf16.mxu0 %v11437_v9  ;;  %v11492_v33 = vcombine.low %v13829_v29, %v13833_v31  ;;  %v11493_v34 = vcombine.high %v13829_v29, %v13833_v31  ;;  %v13842_v35 = vsub.s32 2, %v13805_v18 }
 0x35e   :  { %v909_v9 = vrot.slane %v896_v36, %v13842_v35 }
 0x35f   :  { %3061 = vmatpush1.bf16.msra.mxu1 %v11434_v37  ;;  %3143 = vmatpush1.bf16.msra.mxu0 %v11436_v38  ;;  %v13845_v37 = vsub.s32 3, %v13805_v18  ;;  %v901_v38 = vrot.slane %v896_v36, %v13808_v19 }
 0x360   :  { %3062 = vmatprep.subr.bf16.mxu1 %v11443_v11  ;;  %3144 = vmatprep.subr.bf16.mxu0 %v11445_v41 }
 0x361   :  { %v913_v12 = vrot.slane %v896_v36, %v13845_v37 }
 0x363   :  { %3063 = vmatpush1.bf16.msra.mxu1 %v11442_v15  ;;  %3145 = vmatpush1.bf16.msra.mxu0 %v11444_v40 }
 0x364   :  { %3064 = vmatprep.subr.bf16.mxu1 %v11451_v45  ;;  %3146 = vmatprep.subr.bf16.mxu0 %v11453_v49 }
 0x367   :  { %3065 = vmatpush1.bf16.msra.mxu1 %v11450_v47  ;;  %3147 = vmatpush1.bf16.msra.mxu0 %v11452_v48 }
 0x368   :  { %3066 = vmatprep.subr.bf16.mxu1 %v11459_v53  ;;  %3148 = vmatprep.subr.bf16.mxu0 %v11461_v57 }
 0x36b   :  { %3067 = vmatpush1.bf16.msra.mxu1 %v11458_v55  ;;  %3149 = vmatpush1.bf16.msra.mxu0 %v11460_v56 }
 0x36c   :  { %3068 = vmatprep.subr.bf16.mxu1 %v11467_v60  ;;  %3150 = vmatprep.subr.bf16.mxu0 %v11469_v1 }
 0x36f   :  { %3069 = vmatpush1.bf16.msra.mxu1 %v11466_v63  ;;  %3151 = vmatpush1.bf16.msra.mxu0 %v11468_v0 }
 0x370   :  { %3070 = vmatprep.subr.bf16.mxu1 %v11475_v5  ;;  %3152 = vmatprep.subr.bf16.mxu0 %v11477_v13 }
 0x373   :  { %3071 = vmatpush1.bf16.msra.mxu1 %v11474_v7  ;;  %3153 = vmatpush1.bf16.msra.mxu0 %v11476_v8 }
 0x374   :  { %3072 = vmatprep.subr.bf16.mxu1 %v11483_v23  ;;  %3154 = vmatprep.subr.bf16.mxu0 %v11485_v26 }
 0x377   :  { %3073 = vmatpush1.bf16.msra.mxu1 %v11482_v22  ;;  %3155 = vmatpush1.bf16.msra.mxu0 %v11484_v25 }
 0x378   :  { %3083 = vmatprep.subr.bf16.mxu1 %v11491_v30  ;;  %3165 = vmatprep.subr.bf16.mxu0 %v11493_v34 }
 0x40d   :  { %v1272_v39 = vpop.f32.mrb[4].mxu1  ;;  %v1313_v11 = vpop.f32.mrb[8].mxu0 }
 0x40e   :  { %v1273_v14 = vadd.f32 %v1272_v39, %v901_v38  ;;  %v1314_v15 = vadd.f32 %v1313_v11, %v909_v9  ;;  %v1274_v40 = vpop.f32.mrb[5].mxu1  ;;  %v1315_v41 = vpop.f32.mrb[9].mxu0 }
 0x40f   :  { %v1275_v42 = vadd.f32 %v1274_v40, %v905_v10  ;;  %v1316_v43 = vadd.f32 %v1315_v41, %v913_v12  ;;  %v1276_v44 = vpop.f32.mrb[6].mxu1  ;;  %v1317_v45 = vpop.f32.mrb[10].mxu0 }
 0x410   :  { %v1320_v46 = vrot.slane %v1273_v14, 4  ;;  %v1332_v47 = vrot.slane %v1314_v15, 4  ;;  %v1277_v48 = vpop.f32.mrb[7].mxu1  ;;  %v1318_v49 = vpop.f32.mrb[11].mxu0 }
 0x411   :  { %v1326_v50 = vrot.slane %v1275_v42, 4  ;;  %v1338_v51 = vrot.slane %v1316_v43, 4 }
 0x412   :  { %v1321_v52 = vadd.f32 %v1320_v46, %v1273_v14  ;;  %v1333_v53 = vadd.f32 %v1332_v47, %v1314_v15 }
 0x413   :  { %v1327_v54 = vadd.f32 %v1326_v50, %v1275_v42  ;;  %v1339_v55 = vadd.f32 %v1338_v51, %v1316_v43 }
 0x414   :  { %v1322_v56 = vrot.slane %v1321_v52, 2  ;;  %v1334_v57 = vrot.slane %v1333_v53, 2 }
 0x415   :  { %v1328_v58 = vrot.slane %v1327_v54, 2  ;;  %v1340_v59 = vrot.slane %v1339_v55, 2 }
 0x416   :  { %v1323_v60 = vadd.f32 %v1322_v56, %v1321_v52  ;;  %v1335_v61 = vadd.f32 %v1334_v57, %v1333_v53 }
 0x417   :  { %v1329_v62 = vadd.f32 %v1328_v58, %v1327_v54  ;;  %v1341_v63 = vadd.f32 %v1340_v59, %v1339_v55 }
 0x418   :  { %v1324_v0 = vrot.slane %v1323_v60, 1  ;;  %v1336_v1 = vrot.slane %v1335_v61, 1 }
 0x419   :  { %v1330_v2 = vrot.slane %v1329_v62, 1  ;;  %v1342_v3 = vrot.slane %v1341_v63, 1 }
 0x41a   :  { %v1325_v4 = vadd.f32 %v1324_v0, %v1323_v60  ;;  %v1337_v5 = vadd.f32 %v1336_v1, %v1335_v61  ;;  %v1422_v0 = vld [vmem:[#allocation17] sm:$0xf] }
 0x41b   :  { %v1331_v6 = vadd.f32 %v1330_v2, %v1329_v62  ;;  %v1343_v7 = vadd.f32 %v1342_v3, %v1341_v63  ;;  %v1396_v63 = vld [vmem:[#allocation16] sm:$0xf] }
 0x41c   :  { %v1344_v8 = vmul.f32 0.125, %v1325_v4  ;;  %v1346_v13 = vmul.f32 0.125, %v1337_v5  ;;  %v1401_v1 = vrot.slane %v1396_v63, %v13808_v19  ;;  %v1409_v3 = vrot.slane %v1396_v63, %v13842_v35 }
 0x41d   :  { %v1345_v16 = vmul.f32 0.125, %v1331_v6  ;;  %v1347_v17 = vmul.f32 0.125, %v1343_v7  ;;  %v1427_v6 = vrot.slane %v1422_v0, %v13808_v19  ;;  %v1405_v7 = vrot.slane %v1396_v63, %v13811_v21 }
 0x41e   :  { %v1348_v20 = vsub.f32 %v1273_v14, %v1344_v8  ;;  %v1350_v22 = vsub.f32 %v1314_v15, %v1346_v13 }
 0x41f   :  { %v1349_v23 = vsub.f32 %v1275_v42, %v1345_v16  ;;  %v1351_v24 = vsub.f32 %v1316_v43, %v1347_v17  ;;  %v1435_v16 = vrot.slane %v1422_v0, %v13842_v35  ;;  %v1413_v17 = vrot.slane %v1396_v63, %v13845_v37  ;;  %v1625_v63 = vld [vmem:[#allocation19 + $0x508] sm:$0xff] }
 0x420   :  { %v1352_v25 = vmul.f32 %v1348_v20, %v1348_v20  ;;  %v1354_v26 = vmul.f32 %v1350_v22, %v1350_v22 }
 0x421   :  { %v1353_v30 = vmul.f32 %v1349_v23, %v1349_v23  ;;  %v1355_v34 = vmul.f32 %v1351_v24, %v1351_v24 }
 0x422   :  { %v1356_v36 = vrot.slane %v1352_v25, 4  ;;  %v1368_v38 = vrot.slane %v1354_v26, 4 }
 0x423   :  { %v1362_v9 = vrot.slane %v1353_v30, 4  ;;  %v1374_v10 = vrot.slane %v1355_v34, 4 }
 0x424   :  { %v1357_v12 = vadd.f32 %v1356_v36, %v1352_v25  ;;  %v1369_v39 = vadd.f32 %v1368_v38, %v1354_v26 }
 0x425   :  { %v1363_v11 = vadd.f32 %v1362_v9, %v1353_v30  ;;  %v1375_v40 = vadd.f32 %v1374_v10, %v1355_v34  ;;  %v1431_v34 = vrot.slane %v1422_v0, %v13811_v21  ;;  %v1439_v9 = vrot.slane %v1422_v0, %v13845_v37  ;;  %v1629_v0 = vld [vmem:[#allocation19 + $0x528] sm:$0xff] }
 0x426   :  { %v1358_v41 = vrot.slane %v1357_v12, 2  ;;  %v1370_v44 = vrot.slane %v1369_v39, 2 }
 0x427   :  { %v1364_v45 = vrot.slane %v1363_v11, 2  ;;  %v1376_v46 = vrot.slane %v1375_v40, 2 }
 0x428   :  { %v1359_v14 = vadd.f32 %v1358_v41, %v1357_v12  ;;  %v1371_v15 = vadd.f32 %v1370_v44, %v1369_v39 }
 0x429   :  { %v1365_v42 = vadd.f32 %v1364_v45, %v1363_v11  ;;  %v1377_v43 = vadd.f32 %v1376_v46, %v1375_v40  ;;  %v1600_v45 = vld [vmem:[#allocation19 + $0x440] sm:$0xff] }
 0x42a   :  { %v1360_v47 = vrot.slane %v1359_v14, 1  ;;  %v1372_v48 = vrot.slane %v1371_v15, 1 }
 0x42b   :  { %v1366_v49 = vrot.slane %v1365_v42, 1  ;;  %v1378_v50 = vrot.slane %v1377_v43, 1 }
 0x42c   :  { %v1361_v51 = vadd.f32 %v1360_v47, %v1359_v14  ;;  %v1373_v52 = vadd.f32 %v1372_v48, %v1371_v15  ;;  %v1604_v14 = vld [vmem:[#allocation19 + $0x460] sm:$0xff]  ;;  %v1605_v15 = vld [vmem:[#allocation19 + $0x468] sm:$0xff] }
 0x42d   :  { %v1367_v53 = vadd.f32 %v1366_v49, %v1365_v42  ;;  %v1379_v54 = vadd.f32 %v1378_v50, %v1377_v43  ;;  %v1608_v48 = vld [vmem:[#allocation19 + $0x480] sm:$0xff]  ;;  %v11499_v49 = vcombine.high %v1600_v45, %v1604_v14 }
 0x42e   :  { %v1380_v55 = vmul.f32 0.125, %v1361_v51  ;;  %v1382_v56 = vmul.f32 0.125, %v1373_v52  ;;  %v1612_v51 = vld [vmem:[#allocation19 + $0x4a0] sm:$0xff]  ;;  %v1609_v52 = vld [vmem:[#allocation19 + $0x488] sm:$0xff] }
 0x42f   :  { %v1381_v57 = vmul.f32 0.125, %v1367_v53  ;;  %v1383_v58 = vmul.f32 0.125, %v1379_v54  ;;  %v1613_v53 = vld [vmem:[#allocation19 + $0x4a8] sm:$0xff]  ;;  %v11506_v27 = vcombine.low %v1608_v48, %v1612_v51 }
 0x430   :  { %v1384_v59 = vadd.f32 0.8, %v1380_v55  ;;  %v1386_v60 = vadd.f32 0.8, %v1382_v56  ;;  %v11498_v55 = vcombine.low %v1600_v45, %v1604_v14  ;;  %v11508_v28 = vcombine.low %v1609_v52, %v1613_v53  ;;  %v1660_v14 = vld [vmem:[#allocation19 + $0x620] sm:$0xff] }
 0x431   :  { %v1385_v61 = vadd.f32 0.8, %v1381_v57  ;;  %v1387_v62 = vadd.f32 0.8, %v1383_v58  ;;  %v11507_v57 = vcombine.high %v1608_v48, %v1612_v51  ;;  %v11509_v58 = vcombine.high %v1609_v52, %v1613_v53  ;;  %v1664_v51 = vld [vmem:[#allocation19 + $0x640] sm:$0xff]  ;;  %v1665_v53 = vld [vmem:[#allocation19 + $0x648] sm:$0xff] }
 0x432   :  { %13005 = vrsqrt.f32 %v1384_v59  ;;  %v1616_v59 = vld [vmem:[#allocation19 + $0x4c0] sm:$0xff] }
 0x433   :  { %13007 = vrsqrt.f32 %v1386_v60  ;;  %v1620_v60 = vld [vmem:[#allocation19 + $0x4e0] sm:$0xff] }
 0x434   :  { %13009 = vrsqrt.f32 %v1385_v61  ;;  %v1617_v61 = vld [vmem:[#allocation19 + $0x4c8] sm:$0xff]  ;;  %v11515_v29 = vcombine.high %v1616_v59, %v1620_v60  ;;  %v1668_v52 = vld [vmem:[#allocation19 + $0x660] sm:$0xff] }
 0x435   :  { %13011 = vrsqrt.f32 %v1387_v62  ;;  %v1621_v62 = vld [vmem:[#allocation19 + $0x4e8] sm:$0xff] }
 0x436   :  { %v11517_v31 = vcombine.high %v1617_v61, %v1621_v62 }
 0x43c   :  { %v13006_v2 = vpop.eup %13005 }
 0x43d   :  { %v13008_v4 = vpop.eup %13007  ;;  %v1392_v5 = vmul.f32 %v13006_v2, %v1348_v20  ;;  %v11516_v2 = vcombine.low %v1617_v61, %v1621_v62  ;;  %v1676_v61 = vld [vmem:[#allocation19 + $0x6a0] sm:$0xff]  ;;  %v1673_v62 = vld [vmem:[#allocation19 + $0x688] sm:$0xff] }
 0x43e   :  { %v13010_v8 = vpop.eup %13009  ;;  %v1394_v13 = vmul.f32 %v13008_v4, %v1350_v22  ;;  %v11525_v4 = vcombine.high %v1625_v63, %v1629_v0 }
 0x43f   :  { %v13012_v25 = vpop.eup %13011  ;;  %v1418_v26 = vmul.f32 %v1401_v1, %v1392_v5  ;;  %v1393_v30 = vmul.f32 %v13010_v8, %v1349_v23  ;;  %v11514_v1 = vcombine.low %v1616_v59, %v1620_v60  ;;  %v1632_v5 = vld [vmem:[#allocation19 + $0x540] sm:$0xff]  ;;  %v1637_v8 = vld [vmem:[#allocation19 + $0x568] sm:$0xff] }
 0x440   :  { %v1420_v36 = vmul.f32 %v1409_v3, %v1394_v13  ;;  %v1395_v38 = vmul.f32 %v13012_v25, %v1351_v24  ;;  %v1601_v24 = vld [vmem:[#allocation19 + $0x448] sm:$0xff]  ;;  %v1672_v60 = vld [vmem:[#allocation19 + $0x680] sm:$0xff] }
 0x441   :  { %v1444_v20 = vadd.f32 %v1427_v6, %v1418_v26  ;;  %v1419_v10 = vmul.f32 %v1405_v7, %v1393_v30  ;;  %v11501_v50 = vcombine.high %v1601_v24, %v1605_v15  ;;  %v11500_v56 = vcombine.low %v1601_v24, %v1605_v15  ;;  %v1636_v6 = vld [vmem:[#allocation19 + $0x560] sm:$0xff]  ;;  %v1633_v7 = vld [vmem:[#allocation19 + $0x548] sm:$0xff] }
 0x442   :  { %v13859_v12 = vadd.f32 %v1435_v16, %v1420_v36  ;;  %v1421_v39 = vmul.f32 %v1413_v17, %v1395_v38  ;;  %v11524_v16 = vcombine.low %v1625_v63, %v1629_v0  ;;  %v11531_v17 = vcombine.high %v1632_v5, %v1636_v6  ;;  %v1640_v26 = vld [vmem:[#allocation19 + $0x580] sm:$0xff]  ;;  %v1645_v36 = vld [vmem:[#allocation19 + $0x5a8] sm:$0xff] }
 0x443   :  { %v1445_v11 = vadd.f32 %v1431_v34, %v1419_v10  ;;  %vm1448_vm3 = vcmp.gt.f32.partialorder %v1444_v20, 0.0  ;;  %v1452_v22 = vmul.f32 0.2, %v1444_v20  ;;  %v11533_v25 = vcombine.high %v1633_v7, %v1637_v8  ;;  %v1644_v30 = vld [vmem:[#allocation19 + $0x5a0] sm:$0xff]  ;;  %v1641_v34 = vld [vmem:[#allocation19 + $0x588] sm:$0xff] }
 0x444   :  { %v1447_v40 = vadd.f32 %v1439_v9, %v1421_v39  ;;  %v11530_v38 = vcombine.low %v1632_v5, %v1636_v6  ;;  %v11532_v9 = vcombine.low %v1633_v7, %v1637_v8  ;;  %v11541_v10 = vcombine.high %v1641_v34, %v1645_v36  ;;  %v1648_v39 = vld [vmem:[#allocation19 + $0x5c0] sm:$0xff]  ;;  %v1657_v24 = vld [vmem:[#allocation19 + $0x608] sm:$0xff] }
 0x445   :  { %vm1449_vm4 = vcmp.gt.f32.partialorder %v1445_v11, 0.0  ;;  %v1453_v41 = vmul.f32 0.2, %v1445_v11  ;;  %v1456_v44 = vsel %vm1448_vm3, %v1444_v20, %v1452_v22  ;;  %v11539_v20 = vcombine.high %v1640_v26, %v1644_v30  ;;  %v1649_v22 = vld [vmem:[#allocation19 + $0x5c8] sm:$0xff]  ;;  %v1684_v63 = vld [vmem:[#allocation19 + $0x6e0] sm:$0xff] }
 0x446   :  { %vm1451_vm5 = vcmp.gt.f32.partialorder %v1447_v40, 0.0  ;;  %v1455_v23 = vmul.f32 0.2, %v1447_v40  ;;  %v13863_v47 = vpack.c.bf16 %v1456_v44, %v1456_v44  ;;  %v11540_v44 = vcombine.low %v1641_v34, %v1645_v36  ;;  %v1661_v15 = vld [vmem:[#allocation19 + $0x628] sm:$0xff]  ;;  %v1688_v6 = vld [vmem:[#allocation19 + $0x700] sm:$0xff] }
 0x447   :  { %v1457_v46 = vsel %vm1449_vm4, %v1445_v11, %v1453_v41  ;;  %v1652_v11 = vld [vmem:[#allocation19 + $0x5e0] sm:$0xff]  ;;  %v11538_v41 = vcombine.low %v1640_v26, %v1644_v30  ;;  %v1681_v0 = vld [vmem:[#allocation19 + $0x6c8] sm:$0xff]  ;;  %vm1450_vm6 = vcmp.gt.f32.partialorder %v13859_v12, 0.0 }
 0x448   :  { %v13861_v42 = vpack.c.bf16 %v1457_v46, %v1457_v46  ;;  %v1459_v43 = vsel %vm1451_vm5, %v1447_v40, %v1455_v23  ;;  %v1653_v40 = vld [vmem:[#allocation19 + $0x5e8] sm:$0xff]  ;;  %v11547_v23 = vcombine.high %v1648_v39, %v1652_v11  ;;  %v1656_v46 = vld [vmem:[#allocation19 + $0x600] sm:$0xff] }
 0x449   :  { %v13869_v54 = vpack.c.bf16 %v1459_v43, %v1459_v43  ;;  %v11549_v45 = vcombine.high %v1649_v22, %v1653_v40  ;;  %v11546_v43 = vcombine.low %v1648_v39, %v1652_v11  ;;  %v11548_v48 = vcombine.low %v1649_v22, %v1653_v40  ;;  %v1692_v7 = vld [vmem:[#allocation19 + $0x720] sm:$0xff]  ;;  %v1689_v8 = vld [vmem:[#allocation19 + $0x708] sm:$0xff] }
 0x44a   :  { %3074 = vmatprep.mubr.bf16.mxu1 %v13861_v42  ;;  %3156 = vmatprep.mubr.bf16.mxu0 %v13861_v42  ;;  %v1696_v30 = vld [vmem:[#allocation19 + $0x740] sm:$0xff]  ;;  %v1697_v36 = vld [vmem:[#allocation19 + $0x748] sm:$0xff] }
 0x44b   :  { %3075 = vmatmul.mubr.bf16.vlgmr.msra.gmra.mrb[8].mxu1 %v13863_v47  ;;  %3157 = vmatmul.mubr.bf16.vlgmr.msra.gmra.mrb[12].mxu0 %v13863_v47  ;;  %v1700_v34 = vld [vmem:[#allocation19 + $0x760] sm:$0xff]  ;;  %v1705_v40 = vld [vmem:[#allocation19 + $0x788] sm:$0xff] }
 0x44c   :  { %3084 = vmatpush1.bf16.msra.mxu1 %v11490_v32  ;;  %3166 = vmatpush1.bf16.msra.mxu0 %v11492_v33  ;;  %v1624_v32 = vld [vmem:[#allocation19 + $0x500] sm:$0xff] }
 0x44d   :  { %3115 = vmatprep.mubr.bf16.mxu1 %v13869_v54  ;;  %3197 = vmatprep.mubr.bf16.mxu0 %v13869_v54  ;;  %v1628_v33 = vld [vmem:[#allocation19 + $0x520] sm:$0xff] }
 0x44e   :  { %3085 = vmatprep.subr.bf16.mxu1 %v11499_v49  ;;  %3167 = vmatprep.subr.bf16.mxu0 %v11501_v50  ;;  %v11523_v3 = vcombine.high %v1624_v32, %v1628_v33  ;;  %v11522_v13 = vcombine.low %v1624_v32, %v1628_v33  ;;  %v11555_v49 = vcombine.high %v1656_v46, %v1660_v14  ;;  %v1680_v33 = vld [vmem:[#allocation19 + $0x6c0] sm:$0xff] }
 0x44f   :  { %v11557_v50 = vcombine.high %v1657_v24, %v1661_v15  ;;  %v1704_v11 = vld [vmem:[#allocation19 + $0x780] sm:$0xff] }
 0x450   :  { %3086 = vmatpush1.bf16.msra.mxu1 %v11498_v55  ;;  %3168 = vmatpush1.bf16.msra.mxu0 %v11500_v56  ;;  %v1669_v55 = vld [vmem:[#allocation19 + $0x668] sm:$0xff]  ;;  %v11554_v56 = vcombine.low %v1656_v46, %v1660_v14  ;;  %v1708_v22 = vld [vmem:[#allocation19 + $0x7a0] sm:$0xff] }
 0x451   :  { %3087 = vmatprep.subr.bf16.mxu1 %v11507_v57  ;;  %3169 = vmatprep.subr.bf16.mxu0 %v11509_v58  ;;  %v11556_v57 = vcombine.low %v1657_v24, %v1661_v15  ;;  %v11563_v58 = vcombine.high %v1664_v51, %v1668_v52  ;;  %v11565_v59 = vcombine.high %v1665_v53, %v1669_v55  ;;  %v1712_v14 = vld [vmem:[#allocation19 + $0x7c0] sm:$0xff]  ;;  %v1713_v15 = vld [vmem:[#allocation19 + $0x7c8] sm:$0xff] }
 0x452   :  { %v1716_v24 = vld [vmem:[#allocation19 + $0x7e0] sm:$0xff] }
 0x454   :  { %3088 = vmatpush1.bf16.msra.mxu1 %v11506_v27  ;;  %3170 = vmatpush1.bf16.msra.mxu0 %v11508_v28  ;;  %v1677_v27 = vld [vmem:[#allocation19 + $0x6a8] sm:$0xff]  ;;  %v11562_v28 = vcombine.low %v1664_v51, %v1668_v52  ;;  %v1466_v52 = vld [vmem:[#allocation19 + $0x10] sm:$0xff] }
 0x455   :  { %3089 = vmatprep.subr.bf16.mxu1 %v11515_v29  ;;  %3171 = vmatprep.subr.bf16.mxu0 %v11517_v31  ;;  %v11564_v29 = vcombine.low %v1665_v53, %v1669_v55  ;;  %v11571_v31 = vcombine.high %v1672_v60, %v1676_v61  ;;  %v11573_v32 = vcombine.high %v1673_v62, %v1677_v27  ;;  %v1454_v53 = vmul.f32 0.2, %v13859_v12  ;;  %v1470_v55 = vld [vmem:[#allocation19 + $0x30] sm:$0xff] }
 0x458   :  { %3090 = vmatpush1.bf16.msra.mxu1 %v11514_v1  ;;  %3172 = vmatpush1.bf16.msra.mxu0 %v11516_v2  ;;  %v1685_v1 = vld [vmem:[#allocation19 + $0x6e8] sm:$0xff]  ;;  %v11570_v2 = vcombine.low %v1672_v60, %v1676_v61  ;;  %v11367_v60 = vcombine.high %v1466_v52, %v1470_v55 }
 0x459   :  { %3091 = vmatprep.subr.bf16.mxu1 %v11523_v3  ;;  %3173 = vmatprep.subr.bf16.mxu0 %v11525_v4  ;;  %v11572_v3 = vcombine.low %v1673_v62, %v1677_v27  ;;  %v11579_v4 = vcombine.high %v1680_v33, %v1684_v63  ;;  %v11581_v5 = vcombine.high %v1681_v0, %v1685_v1  ;;  %v1474_v27 = vld [vmem:[#allocation19 + $0x50] sm:$0xff] }
 0x45a   :  { %v1458_v62 = vsel %vm1450_vm6, %v13859_v12, %v1454_v53  ;;  %v1483_v12 = vld [vmem:[#allocation19 + $0x98] sm:$0xff] }
 0x45c   :  { %3092 = vmatpush1.bf16.msra.mxu1 %v11522_v13  ;;  %3174 = vmatpush1.bf16.msra.mxu0 %v11524_v16  ;;  %v1693_v13 = vld [vmem:[#allocation19 + $0x728] sm:$0xff]  ;;  %v11578_v16 = vcombine.low %v1680_v33, %v1684_v63  ;;  %v13882_v33 = vpack.c.bf16 %v1458_v62, %v1458_v62 }
 0x45d   :  { %3093 = vmatprep.subr.bf16.mxu1 %v11531_v17  ;;  %3175 = vmatprep.subr.bf16.mxu0 %v11533_v25  ;;  %v11580_v17 = vcombine.low %v1681_v0, %v1685_v1  ;;  %v11587_v25 = vcombine.high %v1688_v6, %v1692_v7  ;;  %v11589_v26 = vcombine.high %v1689_v8, %v1693_v13 }
 0x460   :  { %3094 = vmatpush1.bf16.msra.mxu1 %v11530_v38  ;;  %3176 = vmatpush1.bf16.msra.mxu0 %v11532_v9  ;;  %v1701_v38 = vld [vmem:[#allocation19 + $0x768] sm:$0xff]  ;;  %v11586_v9 = vcombine.low %v1688_v6, %v1692_v7 }
 0x461   :  { %3095 = vmatprep.subr.bf16.mxu1 %v11539_v20  ;;  %3177 = vmatprep.subr.bf16.mxu0 %v11541_v10  ;;  %v11588_v20 = vcombine.low %v1689_v8, %v1693_v13  ;;  %v11595_v10 = vcombine.high %v1696_v30, %v1700_v34  ;;  %v11597_v39 = vcombine.high %v1697_v36, %v1701_v38  ;;  %v1490_v13 = vld [vmem:[#allocation19 + $0xd0] sm:$0xff] }
 0x464   :  { %3096 = vmatpush1.bf16.msra.mxu1 %v11538_v41  ;;  %3178 = vmatpush1.bf16.msra.mxu0 %v11540_v44  ;;  %v1709_v41 = vld [vmem:[#allocation19 + $0x7a8] sm:$0xff]  ;;  %v11594_v44 = vcombine.low %v1696_v30, %v1700_v34 }
 0x465   :  { %3097 = vmatprep.subr.bf16.mxu1 %v11547_v23  ;;  %3179 = vmatprep.subr.bf16.mxu0 %v11549_v45  ;;  %v11596_v23 = vcombine.low %v1697_v36, %v1701_v38  ;;  %v11603_v45 = vcombine.high %v1704_v11, %v1708_v22  ;;  %v11605_v46 = vcombine.high %v1705_v40, %v1709_v41  ;;  %v1498_v38 = vld [vmem:[#allocation19 + $0x110] sm:$0xff] }
 0x468   :  { %3098 = vmatpush1.bf16.msra.mxu1 %v11546_v43  ;;  %3180 = vmatpush1.bf16.msra.mxu0 %v11548_v48  ;;  %v1717_v43 = vld [vmem:[#allocation19 + $0x7e8] sm:$0xff]  ;;  %v11602_v48 = vcombine.low %v1704_v11, %v1708_v22 }
 0x469   :  { %3099 = vmatprep.subr.bf16.mxu1 %v11555_v49  ;;  %3181 = vmatprep.subr.bf16.mxu0 %v11557_v50  ;;  %v11604_v49 = vcombine.low %v1705_v40, %v1709_v41  ;;  %v11611_v50 = vcombine.high %v1712_v14, %v1716_v24  ;;  %v11613_v51 = vcombine.high %v1713_v15, %v1717_v43  ;;  %v1506_v40 = vld [vmem:[#allocation19 + $0x150] sm:$0xff] }
 0x46a   :  { %v1510_v41 = vld [vmem:[#allocation19 + $0x170] sm:$0xff] }
 0x46c   :  { %3100 = vmatpush1.bf16.msra.mxu1 %v11554_v56  ;;  %3182 = vmatpush1.bf16.msra.mxu0 %v11556_v57  ;;  %v1467_v56 = vld [vmem:[#allocation19 + $0x18] sm:$0xff] }
 0x46d   :  { %3101 = vmatprep.subr.bf16.mxu1 %v11563_v58  ;;  %3183 = vmatprep.subr.bf16.mxu0 %v11565_v59  ;;  %v1471_v57 = vld [vmem:[#allocation19 + $0x38] sm:$0xff]  ;;  %v11610_v58 = vcombine.low %v1712_v14, %v1716_v24  ;;  %v11612_v59 = vcombine.low %v1713_v15, %v1717_v43  ;;  %v11407_v14 = vcombine.high %v1506_v40, %v1510_v41  ;;  %v1514_v15 = vld [vmem:[#allocation19 + $0x190] sm:$0xff] }
 0x46e   :  { %v11369_v61 = vcombine.high %v1467_v56, %v1471_v57  ;;  %v11368_v63 = vcombine.low %v1467_v56, %v1471_v57  ;;  %v1518_v43 = vld [vmem:[#allocation19 + $0x1b0] sm:$0xff]  ;;  %v1523_v57 = vld [vmem:[#allocation19 + $0x1d8] sm:$0xff] }
 0x46f   :  { %v1526_v56 = vld [vmem:[#allocation19 + $0x1f0] sm:$0xff] }
 0x470   :  { %3102 = vmatpush1.bf16.msra.mxu1 %v11562_v28  ;;  %3184 = vmatpush1.bf16.msra.mxu0 %v11564_v29  ;;  %v1478_v28 = vld [vmem:[#allocation19 + $0x70] sm:$0xff]  ;;  %v1475_v29 = vld [vmem:[#allocation19 + $0x58] sm:$0xff] }
 0x471   :  { %3103 = vmatprep.subr.bf16.mxu1 %v11571_v31  ;;  %3185 = vmatprep.subr.bf16.mxu0 %v11573_v32  ;;  %v1479_v31 = vld [vmem:[#allocation19 + $0x78] sm:$0xff]  ;;  %v11366_v32 = vcombine.low %v1466_v52, %v1470_v55  ;;  %v11375_v0 = vcombine.high %v1474_v27, %v1478_v28  ;;  %v11415_v52 = vcombine.high %v1514_v15, %v1518_v43  ;;  %v1522_v55 = vld [vmem:[#allocation19 + $0x1d0] sm:$0xff] }
 0x472   :  { %v11377_v1 = vcombine.high %v1475_v29, %v1479_v31  ;;  %v11376_v6 = vcombine.low %v1475_v29, %v1479_v31  ;;  %v1531_v29 = vld [vmem:[#allocation19 + $0x218] sm:$0xff] }
 0x473   :  { %v1535_v31 = vld [vmem:[#allocation19 + $0x238] sm:$0xff] }
 0x474   :  { %3104 = vmatpush1.bf16.msra.mxu1 %v11570_v2  ;;  %3186 = vmatpush1.bf16.msra.mxu0 %v11572_v3  ;;  %v1482_v2 = vld [vmem:[#allocation19 + $0x90] sm:$0xff] }
 0x475   :  { %3105 = vmatprep.subr.bf16.mxu1 %v11579_v4  ;;  %3187 = vmatprep.subr.bf16.mxu0 %v11581_v5  ;;  %v1486_v3 = vld [vmem:[#allocation19 + $0xb0] sm:$0xff]  ;;  %v1487_v4 = vld [vmem:[#allocation19 + $0xb8] sm:$0xff]  ;;  %v11374_v5 = vcombine.low %v1474_v27, %v1478_v28 }
 0x476   :  { %v11383_v7 = vcombine.high %v1482_v2, %v1486_v3  ;;  %v11385_v8 = vcombine.high %v1483_v12, %v1487_v4  ;;  %v11384_v30 = vcombine.low %v1483_v12, %v1487_v4  ;;  %v1530_v27 = vld [vmem:[#allocation19 + $0x210] sm:$0xff]  ;;  %v1539_v12 = vld [vmem:[#allocation19 + $0x258] sm:$0xff] }
 0x477   :  { %v1534_v28 = vld [vmem:[#allocation19 + $0x230] sm:$0xff]  ;;  %v1543_v4 = vld [vmem:[#allocation19 + $0x278] sm:$0xff] }
 0x478   :  { %3106 = vmatpush1.bf16.msra.mxu1 %v11578_v16  ;;  %3188 = vmatpush1.bf16.msra.mxu0 %v11580_v17  ;;  %v1494_v16 = vld [vmem:[#allocation19 + $0xf0] sm:$0xff]  ;;  %v1491_v17 = vld [vmem:[#allocation19 + $0xd8] sm:$0xff] }
 0x479   :  { %3107 = vmatprep.subr.bf16.mxu1 %v11587_v25  ;;  %3189 = vmatprep.subr.bf16.mxu0 %v11589_v26  ;;  %v1495_v25 = vld [vmem:[#allocation19 + $0xf8] sm:$0xff]  ;;  %v11382_v26 = vcombine.low %v1482_v2, %v1486_v3  ;;  %v11391_v34 = vcombine.high %v1490_v13, %v1494_v16  ;;  %v1538_v2 = vld [vmem:[#allocation19 + $0x250] sm:$0xff] }
 0x47a   :  { %v11393_v36 = vcombine.high %v1491_v17, %v1495_v25  ;;  %v1542_v3 = vld [vmem:[#allocation19 + $0x270] sm:$0xff] }
 0x47c   :  { %3108 = vmatpush1.bf16.msra.mxu1 %v11586_v9  ;;  %3190 = vmatpush1.bf16.msra.mxu0 %v11588_v20  ;;  %v1502_v9 = vld [vmem:[#allocation19 + $0x130] sm:$0xff]  ;;  %v1503_v20 = vld [vmem:[#allocation19 + $0x138] sm:$0xff] }
 0x47d   :  { %3109 = vmatprep.subr.bf16.mxu1 %v11595_v10  ;;  %3191 = vmatprep.subr.bf16.mxu0 %v11597_v39  ;;  %v11390_v10 = vcombine.low %v1490_v13, %v1494_v16  ;;  %v11392_v39 = vcombine.low %v1491_v17, %v1495_v25  ;;  %v11399_v11 = vcombine.high %v1498_v38, %v1502_v9  ;;  %v1546_v13 = vld [vmem:[#allocation19 + $0x290] sm:$0xff]  ;;  %v1547_v17 = vld [vmem:[#allocation19 + $0x298] sm:$0xff] }
 0x47e   :  { %v1550_v16 = vld [vmem:[#allocation19 + $0x2b0] sm:$0xff]  ;;  %v1551_v25 = vld [vmem:[#allocation19 + $0x2b8] sm:$0xff] }
 0x480   :  { %3110 = vmatpush1.bf16.msra.mxu1 %v11594_v44  ;;  %3192 = vmatpush1.bf16.msra.mxu0 %v11596_v23  ;;  %v1507_v44 = vld [vmem:[#allocation19 + $0x158] sm:$0xff] }
 0x481   :  { %3111 = vmatprep.subr.bf16.mxu1 %v11603_v45  ;;  %3193 = vmatprep.subr.bf16.mxu0 %v11605_v46  ;;  %v1511_v23 = vld [vmem:[#allocation19 + $0x178] sm:$0xff]  ;;  %v11398_v45 = vcombine.low %v1498_v38, %v1502_v9  ;;  %v1554_v38 = vld [vmem:[#allocation19 + $0x2d0] sm:$0xff] }
 0x482   :  { %v11409_v24 = vcombine.high %v1507_v44, %v1511_v23  ;;  %v1558_v9 = vld [vmem:[#allocation19 + $0x2f0] sm:$0xff] }
 0x484   :  { %3112 = vmatpush1.bf16.msra.mxu1 %v11602_v48  ;;  %3194 = vmatpush1.bf16.msra.mxu0 %v11604_v49  ;;  %v1515_v48 = vld [vmem:[#allocation19 + $0x198] sm:$0xff] }
 0x485   :  { %3113 = vmatprep.subr.bf16.mxu1 %v11611_v50  ;;  %3195 = vmatprep.subr.bf16.mxu0 %v11613_v51  ;;  %v1519_v49 = vld [vmem:[#allocation19 + $0x1b8] sm:$0xff]  ;;  %v11406_v50 = vcombine.low %v1506_v40, %v1510_v41  ;;  %v11408_v51 = vcombine.low %v1507_v44, %v1511_v23  ;;  %v1562_v40 = vld [vmem:[#allocation19 + $0x310] sm:$0xff] }
 0x486   :  { %v11417_v53 = vcombine.high %v1515_v48, %v1519_v49  ;;  %v1566_v41 = vld [vmem:[#allocation19 + $0x330] sm:$0xff]  ;;  %v1563_v44 = vld [vmem:[#allocation19 + $0x318] sm:$0xff] }
 0x487   :  { %v1567_v23 = vld [vmem:[#allocation19 + $0x338] sm:$0xff] }
 0x488   :  { %3114 = vmatpush1.bf16.msra.mxu1 %v11610_v58  ;;  %3196 = vmatpush1.bf16.msra.mxu0 %v11612_v59  ;;  %v1527_v58 = vld [vmem:[#allocation19 + $0x1f8] sm:$0xff]  ;;  %v11414_v59 = vcombine.low %v1514_v15, %v1518_v43  ;;  %v1570_v15 = vld [vmem:[#allocation19 + $0x350] sm:$0xff] }
 0x489   :  { %3206 = vmatprep.subr.bf16.mxu1 %v11367_v60  ;;  %3288 = vmatprep.subr.bf16.mxu0 %v11369_v61  ;;  %v11416_v60 = vcombine.low %v1515_v48, %v1519_v49  ;;  %v11423_v61 = vcombine.high %v1522_v55, %v1526_v56  ;;  %v11425_v62 = vcombine.high %v1523_v57, %v1527_v58  ;;  %v1574_v43 = vld [vmem:[#allocation19 + $0x370] sm:$0xff]  ;;  %v1571_v48 = vld [vmem:[#allocation19 + $0x358] sm:$0xff] }
 0x48a   :  { %v1575_v49 = vld [vmem:[#allocation19 + $0x378] sm:$0xff] }
 0x48b   :  { %3116 = vmatmul.mubr.bf16.vlgmr.msra.gmra.mrb[8].mxu1 %v13882_v33  ;;  %3198 = vmatmul.mubr.bf16.vlgmr.msra.gmra.mrb[12].mxu0 %v13882_v33 }
 0x48c   :  { %3207 = vmatpush1.bf16.msra.mxu1 %v11366_v32  ;;  %3238 = vmatprep.mubr.bf16.mxu1 %v13861_v42  ;;  %v11422_v32 = vcombine.low %v1522_v55, %v1526_v56  ;;  %v1578_v55 = vld [vmem:[#allocation19 + $0x390] sm:$0xff] }
 0x48d   :  { %3289 = vmatpush1.bf16.msra.mxu0 %v11368_v63  ;;  %3320 = vmatprep.mubr.bf16.mxu0 %v13861_v42  ;;  %v1499_v42 = vld [vmem:[#allocation19 + $0x118] sm:$0xff]  ;;  %v11424_v63 = vcombine.low %v1523_v57, %v1527_v58  ;;  %v1582_v56 = vld [vmem:[#allocation19 + $0x3b0] sm:$0xff] }
 0x48e   :  { %3208 = vmatprep.subr.bf16.mxu1 %v11375_v0  ;;  %3290 = vmatprep.subr.bf16.mxu0 %v11377_v1  ;;  %v11401_v22 = vcombine.high %v1499_v42, %v1503_v20  ;;  %v11400_v46 = vcombine.low %v1499_v42, %v1503_v20  ;;  %v11431_v0 = vcombine.high %v1530_v27, %v1534_v28  ;;  %v1555_v42 = vld [vmem:[#allocation19 + $0x2d8] sm:$0xff] }
 0x48f   :  { %v11433_v1 = vcombine.high %v1531_v29, %v1535_v31  ;;  %v1559_v20 = vld [vmem:[#allocation19 + $0x2f8] sm:$0xff] }
 0x490   :  { %3209 = vmatpush1.bf16.msra.mxu1 %v11374_v5  ;;  %v11430_v5 = vcombine.low %v1530_v27, %v1534_v28  ;;  %v1579_v57 = vld [vmem:[#allocation19 + $0x398] sm:$0xff]  ;;  %v1586_v27 = vld [vmem:[#allocation19 + $0x3d0] sm:$0xff] }
 0x491   :  { %3291 = vmatpush1.bf16.msra.mxu0 %v11376_v6  ;;  %3210 = vmatprep.subr.bf16.mxu1 %v11383_v7  ;;  %v11432_v6 = vcombine.low %v1531_v29, %v1535_v31  ;;  %v11439_v7 = vcombine.high %v1538_v2, %v1542_v3  ;;  %v1583_v58 = vld [vmem:[#allocation19 + $0x3b8] sm:$0xff]  ;;  %v1590_v28 = vld [vmem:[#allocation19 + $0x3f0] sm:$0xff] }
 0x492   :  { %3292 = vmatprep.subr.bf16.mxu0 %v11385_v8  ;;  %v11441_v8 = vcombine.high %v1539_v12, %v1543_v4  ;;  %v1587_v29 = vld [vmem:[#allocation19 + $0x3d8] sm:$0xff] }
 0x493   :  { %v1591_v31 = vld [vmem:[#allocation19 + $0x3f8] sm:$0xff] }
 0x494   :  { %3211 = vmatpush1.bf16.msra.mxu1 %v11382_v26  ;;  %v11438_v26 = vcombine.low %v1538_v2, %v1542_v3  ;;  %v1594_v2 = vld [vmem:[#allocation19 + $0x410] sm:$0xff] }
 0x495   :  { %3293 = vmatpush1.bf16.msra.mxu0 %v11384_v30  ;;  %3212 = vmatprep.subr.bf16.mxu1 %v11391_v34  ;;  %v11440_v30 = vcombine.low %v1539_v12, %v1543_v4  ;;  %v11447_v34 = vcombine.high %v1546_v13, %v1550_v16  ;;  %v1598_v3 = vld [vmem:[#allocation19 + $0x430] sm:$0xff]  ;;  %v1595_v12 = vld [vmem:[#allocation19 + $0x418] sm:$0xff] }
 0x496   :  { %3294 = vmatprep.subr.bf16.mxu0 %v11393_v36  ;;  %v11449_v36 = vcombine.high %v1547_v17, %v1551_v25  ;;  %v1599_v4 = vld [vmem:[#allocation19 + $0x438] sm:$0xff] }
 0x498   :  { %3213 = vmatpush1.bf16.msra.mxu1 %v11390_v10  ;;  %v11446_v10 = vcombine.low %v1546_v13, %v1550_v16  ;;  %v1602_v13 = vld [vmem:[#allocation19 + $0x450] sm:$0xff] }
 0x499   :  { %3295 = vmatpush1.bf16.msra.mxu0 %v11392_v39  ;;  %3214 = vmatprep.subr.bf16.mxu1 %v11399_v11  ;;  %v11448_v39 = vcombine.low %v1547_v17, %v1551_v25  ;;  %v11455_v11 = vcombine.high %v1554_v38, %v1558_v9  ;;  %v1606_v16 = vld [vmem:[#allocation19 + $0x470] sm:$0xff]  ;;  %v11494_v17 = vcombine.low %v1594_v2, %v1598_v3  ;;  %v1603_v25 = vld [vmem:[#allocation19 + $0x458] sm:$0xff] }
 0x49a   :  { %3296 = vmatprep.subr.bf16.mxu0 %v11401_v22  ;;  %v11457_v22 = vcombine.high %v1555_v42, %v1559_v20 }
 0x49c   :  { %3215 = vmatpush1.bf16.msra.mxu1 %v11398_v45  ;;  %v11454_v45 = vcombine.low %v1554_v38, %v1558_v9  ;;  %v1614_v38 = vld [vmem:[#allocation19 + $0x4b0] sm:$0xff] }
 0x49d   :  { %3297 = vmatpush1.bf16.msra.mxu0 %v11400_v46  ;;  %3216 = vmatprep.subr.bf16.mxu1 %v11407_v14  ;;  %v11456_v46 = vcombine.low %v1555_v42, %v1559_v20  ;;  %v11463_v14 = vcombine.high %v1562_v40, %v1566_v41  ;;  %v1611_v42 = vld [vmem:[#allocation19 + $0x498] sm:$0xff] }
 0x49e   :  { %3298 = vmatprep.subr.bf16.mxu0 %v11409_v24  ;;  %v11465_v24 = vcombine.high %v1563_v44, %v1567_v23  ;;  %v1615_v20 = vld [vmem:[#allocation19 + $0x4b8] sm:$0xff] }
 0x4a0   :  { %3217 = vmatpush1.bf16.msra.mxu1 %v11406_v50  ;;  %v11462_v50 = vcombine.low %v1562_v40, %v1566_v41  ;;  %v1618_v40 = vld [vmem:[#allocation19 + $0x4d0] sm:$0xff] }
 0x4a1   :  { %3299 = vmatpush1.bf16.msra.mxu0 %v11408_v51  ;;  %3218 = vmatprep.subr.bf16.mxu1 %v11415_v52  ;;  %v11464_v51 = vcombine.low %v1563_v44, %v1567_v23  ;;  %v11471_v52 = vcombine.high %v1570_v15, %v1574_v43  ;;  %v1622_v41 = vld [vmem:[#allocation19 + $0x4f0] sm:$0xff]  ;;  %v1619_v44 = vld [vmem:[#allocation19 + $0x4d8] sm:$0xff] }
 0x4a2   :  { %3300 = vmatprep.subr.bf16.mxu0 %v11417_v53  ;;  %v11473_v53 = vcombine.high %v1571_v48, %v1575_v49  ;;  %v1623_v23 = vld [vmem:[#allocation19 + $0x4f8] sm:$0xff] }
 0x4a4   :  { %3219 = vmatpush1.bf16.msra.mxu1 %v11414_v59  ;;  %v11470_v59 = vcombine.low %v1570_v15, %v1574_v43  ;;  %v1630_v15 = vld [vmem:[#allocation19 + $0x530] sm:$0xff]  ;;  %v1627_v43 = vld [vmem:[#allocation19 + $0x518] sm:$0xff] }
 0x4a5   :  { %3301 = vmatpush1.bf16.msra.mxu0 %v11416_v60  ;;  %3220 = vmatprep.subr.bf16.mxu1 %v11423_v61  ;;  %v11472_v60 = vcombine.low %v1571_v48, %v1575_v49  ;;  %v11479_v61 = vcombine.high %v1578_v55, %v1582_v56  ;;  %v1631_v48 = vld [vmem:[#allocation19 + $0x538] sm:$0xff]  ;;  %v11520_v49 = vcombine.low %v1619_v44, %v1623_v23 }
 0x4a6   :  { %3302 = vmatprep.subr.bf16.mxu0 %v11425_v62  ;;  %v11481_v62 = vcombine.high %v1579_v57, %v1583_v58 }
 0x4a8   :  { %3221 = vmatpush1.bf16.msra.mxu1 %v11422_v32  ;;  %v11478_v32 = vcombine.low %v1578_v55, %v1582_v56  ;;  %v1635_v55 = vld [vmem:[#allocation19 + $0x558] sm:$0xff] }
 0x4a9   :  { %3303 = vmatpush1.bf16.msra.mxu0 %v11424_v63  ;;  %3222 = vmatprep.subr.bf16.mxu1 %v11431_v0  ;;  %v11480_v63 = vcombine.low %v1579_v57, %v1583_v58  ;;  %v11487_v0 = vcombine.high %v1586_v27, %v1590_v28  ;;  %v1639_v56 = vld [vmem:[#allocation19 + $0x578] sm:$0xff]  ;;  %v11528_v58 = vcombine.low %v1627_v43, %v1631_v48 }
 0x4aa   :  { %3304 = vmatprep.subr.bf16.mxu0 %v11433_v1  ;;  %v11489_v1 = vcombine.high %v1587_v29, %v1591_v31 }
 0x4ac   :  { %3223 = vmatpush1.bf16.msra.mxu1 %v11430_v5  ;;  %v11486_v5 = vcombine.low %v1586_v27, %v1590_v28  ;;  %v1643_v27 = vld [vmem:[#allocation19 + $0x598] sm:$0xff] }
 0x4ad   :  { %3305 = vmatpush1.bf16.msra.mxu0 %v11432_v6  ;;  %3224 = vmatprep.subr.bf16.mxu1 %v11439_v7  ;;  %v11488_v6 = vcombine.low %v1587_v29, %v1591_v31  ;;  %v11495_v7 = vcombine.high %v1594_v2, %v1598_v3  ;;  %v1647_v28 = vld [vmem:[#allocation19 + $0x5b8] sm:$0xff]  ;;  %v11536_v31 = vcombine.low %v1635_v55, %v1639_v56 }
 0x4ae   :  { %3306 = vmatprep.subr.bf16.mxu0 %v11441_v8  ;;  %v11497_v8 = vcombine.high %v1595_v12, %v1599_v4  ;;  %v1651_v2 = vld [vmem:[#allocation19 + $0x5d8] sm:$0xff] }
 0x4af   :  { %v1655_v3 = vld [vmem:[#allocation19 + $0x5f8] sm:$0xff] }
 0x4b0   :  { %3225 = vmatpush1.bf16.msra.mxu1 %v11438_v26  ;;  %v1607_v26 = vld [vmem:[#allocation19 + $0x478] sm:$0xff] }
 0x4b1   :  { %3307 = vmatpush1.bf16.msra.mxu0 %v11440_v30  ;;  %3226 = vmatprep.subr.bf16.mxu1 %v11447_v34  ;;  %v11496_v30 = vcombine.low %v1595_v12, %v1599_v4  ;;  %v11503_v34 = vcombine.high %v1602_v13, %v1606_v16  ;;  %v11505_v9 = vcombine.high %v1603_v25, %v1607_v26 }
 0x4b2   :  { %3308 = vmatprep.subr.bf16.mxu0 %v11449_v36  ;;  %v1610_v36 = vld [vmem:[#allocation19 + $0x490] sm:$0xff]  ;;  %v11544_v4 = vcombine.low %v1643_v27, %v1647_v28 }
 0x4b4   :  { %3227 = vmatpush1.bf16.msra.mxu1 %v11446_v10  ;;  %v11502_v10 = vcombine.low %v1602_v13, %v1606_v16  ;;  %v1659_v13 = vld [vmem:[#allocation19 + $0x618] sm:$0xff] }
 0x4b5   :  { %3309 = vmatpush1.bf16.msra.mxu0 %v11448_v39  ;;  %3228 = vmatprep.subr.bf16.mxu1 %v11455_v11  ;;  %v11504_v39 = vcombine.low %v1603_v25, %v1607_v26  ;;  %v11511_v11 = vcombine.high %v1610_v36, %v1614_v38  ;;  %v1663_v16 = vld [vmem:[#allocation19 + $0x638] sm:$0xff]  ;;  %v11552_v25 = vcombine.low %v1651_v2, %v1655_v3 }
 0x4b6   :  { %3310 = vmatprep.subr.bf16.mxu0 %v11457_v22  ;;  %v11513_v22 = vcombine.high %v1611_v42, %v1615_v20 }
 0x4b8   :  { %3229 = vmatpush1.bf16.msra.mxu1 %v11454_v45  ;;  %v11510_v45 = vcombine.low %v1610_v36, %v1614_v38  ;;  %v1670_v36 = vld [vmem:[#allocation19 + $0x670] sm:$0xff]  ;;  %v1667_v38 = vld [vmem:[#allocation19 + $0x658] sm:$0xff] }
 0x4b9   :  { %3311 = vmatpush1.bf16.msra.mxu0 %v11456_v46  ;;  %3230 = vmatprep.subr.bf16.mxu1 %v11463_v14  ;;  %v11519_v46 = vcombine.high %v1618_v40, %v1622_v41  ;;  %v11521_v14 = vcombine.high %v1619_v44, %v1623_v23 }
 0x4ba   :  { %3312 = vmatprep.subr.bf16.mxu0 %v11465_v24  ;;  %v1626_v24 = vld [vmem:[#allocation19 + $0x510] sm:$0xff] }
 0x4bb   :  { %v11526_v57 = vcombine.low %v1626_v24, %v1630_v15 }
 0x4bc   :  { %3231 = vmatpush1.bf16.msra.mxu1 %v11462_v50  ;;  %v11527_v50 = vcombine.high %v1626_v24, %v1630_v15  ;;  %v1683_v24 = vld [vmem:[#allocation19 + $0x6d8] sm:$0xff] }
 0x4bd   :  { %3313 = vmatpush1.bf16.msra.mxu0 %v11464_v51  ;;  %3232 = vmatprep.subr.bf16.mxu1 %v11471_v52  ;;  %v11529_v51 = vcombine.high %v1627_v43, %v1631_v48  ;;  %v1634_v52 = vld [vmem:[#allocation19 + $0x550] sm:$0xff]  ;;  %v1687_v15 = vld [vmem:[#allocation19 + $0x6f8] sm:$0xff] }
 0x4be   :  { %3314 = vmatprep.subr.bf16.mxu0 %v11473_v53  ;;  %v1638_v53 = vld [vmem:[#allocation19 + $0x570] sm:$0xff] }
 0x4bf   :  { %v11534_v29 = vcombine.low %v1634_v52, %v1638_v53 }
 0x4c0   :  { %3233 = vmatpush1.bf16.msra.mxu1 %v11470_v59  ;;  %v11535_v59 = vcombine.high %v1634_v52, %v1638_v53  ;;  %v1691_v52 = vld [vmem:[#allocation19 + $0x718] sm:$0xff] }
 0x4c1   :  { %3315 = vmatpush1.bf16.msra.mxu0 %v11472_v60  ;;  %3234 = vmatprep.subr.bf16.mxu1 %v11479_v61  ;;  %v11537_v60 = vcombine.high %v1635_v55, %v1639_v56  ;;  %v1642_v61 = vld [vmem:[#allocation19 + $0x590] sm:$0xff]  ;;  %v1695_v53 = vld [vmem:[#allocation19 + $0x738] sm:$0xff]  ;;  %v11584_v56 = vcombine.low %v1683_v24, %v1687_v15 }
 0x4c2   :  { %3316 = vmatprep.subr.bf16.mxu0 %v11481_v62  ;;  %v1646_v62 = vld [vmem:[#allocation19 + $0x5b0] sm:$0xff] }
 0x4c3   :  { %v11542_v12 = vcombine.low %v1642_v61, %v1646_v62 }
 0x4c4   :  { %3235 = vmatpush1.bf16.msra.mxu1 %v11478_v32  ;;  %v11543_v32 = vcombine.high %v1642_v61, %v1646_v62  ;;  %v1699_v61 = vld [vmem:[#allocation19 + $0x758] sm:$0xff] }
 0x4c5   :  { %3317 = vmatpush1.bf16.msra.mxu0 %v11480_v63  ;;  %3236 = vmatprep.subr.bf16.mxu1 %v11487_v0  ;;  %v11545_v63 = vcombine.high %v1643_v27, %v1647_v28  ;;  %v1650_v0 = vld [vmem:[#allocation19 + $0x5d0] sm:$0xff]  ;;  %v1703_v62 = vld [vmem:[#allocation19 + $0x778] sm:$0xff]  ;;  %v11592_v28 = vcombine.low %v1691_v52, %v1695_v53 }
 0x4c6   :  { %3318 = vmatprep.subr.bf16.mxu0 %v11489_v1  ;;  %v1654_v1 = vld [vmem:[#allocation19 + $0x5f0] sm:$0xff] }
 0x4c8   :  { %3237 = vmatpush1.bf16.msra.mxu1 %v11486_v5  ;;  %v11551_v5 = vcombine.high %v1650_v0, %v1654_v1 }
 0x4c9   :  { %3319 = vmatpush1.bf16.msra.mxu0 %v11488_v6  ;;  %3247 = vmatprep.subr.bf16.mxu1 %v11495_v7  ;;  %v11553_v6 = vcombine.high %v1651_v2, %v1655_v3  ;;  %v1658_v7 = vld [vmem:[#allocation19 + $0x610] sm:$0xff]  ;;  %v11600_v3 = vcombine.low %v1699_v61, %v1703_v62 }
 0x4ca   :  { %3329 = vmatprep.subr.bf16.mxu0 %v11497_v8  ;;  %v1662_v8 = vld [vmem:[#allocation19 + $0x630] sm:$0xff] }
 0x4cb   :  { %3239 = vmatmul.mubr.bf16.vlgmr.msra.gmra.mrb[12].mxu1 %v13863_v47  ;;  %v11559_v26 = vcombine.high %v1658_v7, %v1662_v8 }
 0x4cc   :  { %3321 = vmatmul.mubr.bf16.vlgmr.msra.gmra.mrb[16].mxu0 %v13863_v47  ;;  %3248 = vmatpush1.bf16.msra.mxu1 %v11494_v17  ;;  %v11512_v47 = vcombine.low %v1611_v42, %v1615_v20  ;;  %v11550_v17 = vcombine.low %v1650_v0, %v1654_v1  ;;  %v11558_v42 = vcombine.low %v1658_v7, %v1662_v8  ;;  %v1707_v0 = vld [vmem:[#allocation19 + $0x798] sm:$0xff] }
 0x4cd   :  { %3279 = vmatprep.mubr.bf16.mxu1 %v13869_v54  ;;  %3330 = vmatpush1.bf16.msra.mxu0 %v11496_v30  ;;  %v11561_v30 = vcombine.high %v1659_v13, %v1663_v16  ;;  %v11560_v20 = vcombine.low %v1659_v13, %v1663_v16  ;;  %v1711_v1 = vld [vmem:[#allocation19 + $0x7b8] sm:$0xff] }
 0x4ce   :  { %3361 = vmatprep.mubr.bf16.mxu0 %v13869_v54  ;;  %3249 = vmatprep.subr.bf16.mxu1 %v11503_v34  ;;  %v11518_v54 = vcombine.low %v1618_v40, %v1622_v41  ;;  %v1666_v34 = vld [vmem:[#allocation19 + $0x650] sm:$0xff]  ;;  %v1675_v40 = vld [vmem:[#allocation19 + $0x698] sm:$0xff]  ;;  %v11608_v16 = vcombine.low %v1707_v0, %v1711_v1 }
 0x4cf   :  { %3331 = vmatprep.subr.bf16.mxu0 %v11505_v9  ;;  %v1671_v9 = vld [vmem:[#allocation19 + $0x678] sm:$0xff]  ;;  %v11566_v44 = vcombine.low %v1666_v34, %v1670_v36 }
 0x4d0   :  { %3250 = vmatpush1.bf16.msra.mxu1 %v11502_v10  ;;  %v11567_v10 = vcombine.high %v1666_v34, %v1670_v36  ;;  %v1679_v41 = vld [vmem:[#allocation19 + $0x6b8] sm:$0xff]  ;;  %v11568_v23 = vcombine.low %v1667_v38, %v1671_v9  ;;  %v3655_v34 = vld [vmem:[#allocation25 + $0x8] sm:$0xff] }
 0x4d1   :  { %3332 = vmatpush1.bf16.msra.mxu0 %v11504_v39  ;;  %3251 = vmatprep.subr.bf16.mxu1 %v11511_v11  ;;  %v11569_v39 = vcombine.high %v1667_v38, %v1671_v9  ;;  %v1674_v11 = vld [vmem:[#allocation19 + $0x690] sm:$0xff]  ;;  %v11576_v48 = vcombine.low %v1675_v40, %v1679_v41  ;;  %v1715_v7 = vld [vmem:[#allocation19 + $0x7d8] sm:$0xff]  ;;  %v3663_v36 = vld [vmem:[#allocation25 + $0x48] sm:$0xff] }
 0x4d2   :  { %3333 = vmatprep.subr.bf16.mxu0 %v11513_v22  ;;  %v1678_v22 = vld [vmem:[#allocation19 + $0x6b0] sm:$0xff]  ;;  %v1719_v8 = vld [vmem:[#allocation19 + $0x7f8] sm:$0xff] }
 0x4d3   :  { %v11574_v43 = vcombine.low %v1674_v11, %v1678_v22  ;;  %v11616_v9 = vcombine.low %v1715_v7, %v1719_v8 }
 0x4d4   :  { %3252 = vmatpush1.bf16.msra.mxu1 %v11510_v45  ;;  %v11575_v45 = vcombine.high %v1674_v11, %v1678_v22  ;;  %v3671_v11 = vld [vmem:[#allocation25 + $0x88] sm:$0xff] }
 0x4d5   :  { %3334 = vmatpush1.bf16.msra.mxu0 %v11512_v47  ;;  %3253 = vmatprep.subr.bf16.mxu1 %v11519_v46  ;;  %v11577_v47 = vcombine.high %v1675_v40, %v1679_v41  ;;  %v1682_v46 = vld [vmem:[#allocation19 + $0x6d0] sm:$0xff]  ;;  %v3679_v22 = vld [vmem:[#allocation25 + $0xc8] sm:$0xff]  ;;  %v11620_v41 = vcombine.low %v3655_v34, %v3663_v36 }
 0x4d6   :  { %3335 = vmatprep.subr.bf16.mxu0 %v11521_v14  ;;  %v1686_v14 = vld [vmem:[#allocation19 + $0x6f0] sm:$0xff] }
 0x4d7   :  { %v11582_v55 = vcombine.low %v1682_v46, %v1686_v14 }
 0x4d8   :  { %3254 = vmatpush1.bf16.msra.mxu1 %v11518_v54  ;;  %v11583_v54 = vcombine.high %v1682_v46, %v1686_v14  ;;  %v3687_v46 = vld [vmem:[#allocation25 + $0x108] sm:$0xff] }
 0x4d9   :  { %3336 = vmatpush1.bf16.msra.mxu0 %v11520_v49  ;;  %3255 = vmatprep.subr.bf16.mxu1 %v11527_v50  ;;  %v11585_v49 = vcombine.high %v1683_v24, %v1687_v15  ;;  %v1690_v50 = vld [vmem:[#allocation19 + $0x710] sm:$0xff]  ;;  %v3695_v14 = vld [vmem:[#allocation25 + $0x148] sm:$0xff]  ;;  %v11636_v15 = vcombine.low %v3671_v11, %v3679_v22 }
 0x4da   :  { %3337 = vmatprep.subr.bf16.mxu0 %v11529_v51  ;;  %v1694_v51 = vld [vmem:[#allocation19 + $0x730] sm:$0xff] }
 0x4db   :  { %v11590_v27 = vcombine.low %v1690_v50, %v1694_v51 }
 0x4dc   :  { %3256 = vmatpush1.bf16.msra.mxu1 %v11526_v57  ;;  %v11591_v57 = vcombine.high %v1690_v50, %v1694_v51  ;;  %v3703_v50 = vld [vmem:[#allocation25 + $0x188] sm:$0xff] }
 0x4dd   :  { %3338 = vmatpush1.bf16.msra.mxu0 %v11528_v58  ;;  %3257 = vmatprep.subr.bf16.mxu1 %v11535_v59  ;;  %v11593_v58 = vcombine.high %v1691_v52, %v1695_v53  ;;  %v1698_v59 = vld [vmem:[#allocation19 + $0x750] sm:$0xff]  ;;  %v3711_v51 = vld [vmem:[#allocation25 + $0x1c8] sm:$0xff]  ;;  %v11652_v53 = vcombine.low %v3687_v46, %v3695_v14 }
 0x4de   :  { %3339 = vmatprep.subr.bf16.mxu0 %v11537_v60  ;;  %v1702_v60 = vld [vmem:[#allocation19 + $0x770] sm:$0xff] }
 0x4df   :  { %v11598_v2 = vcombine.low %v1698_v59, %v1702_v60 }
 0x4e0   :  { %3258 = vmatpush1.bf16.msra.mxu1 %v11534_v29  ;;  %v11599_v29 = vcombine.high %v1698_v59, %v1702_v60  ;;  %v3727_v59 = vld [vmem:[#allocation25 + $0x248] sm:$0xff] }
 0x4e1   :  { %3340 = vmatpush1.bf16.msra.mxu0 %v11536_v31  ;;  %3259 = vmatprep.subr.bf16.mxu1 %v11543_v32  ;;  %v11601_v31 = vcombine.high %v1699_v61, %v1703_v62  ;;  %v1706_v32 = vld [vmem:[#allocation19 + $0x790] sm:$0xff]  ;;  %v11668_v61 = vcombine.low %v3703_v50, %v3711_v51 }
 0x4e2   :  { %3341 = vmatprep.subr.bf16.mxu0 %v11545_v63  ;;  %v1710_v63 = vld [vmem:[#allocation19 + $0x7b0] sm:$0xff] }
 0x4e3   :  { %v11606_v13 = vcombine.low %v1706_v32, %v1710_v63 }
 0x4e4   :  { %3260 = vmatpush1.bf16.msra.mxu1 %v11542_v12  ;;  %v11607_v12 = vcombine.high %v1706_v32, %v1710_v63  ;;  %v3743_v32 = vld [vmem:[#allocation25 + $0x2c8] sm:$0xff] }
 0x4e5   :  { %3342 = vmatpush1.bf16.msra.mxu0 %v11544_v4  ;;  %3261 = vmatprep.subr.bf16.mxu1 %v11551_v5  ;;  %v11609_v4 = vcombine.high %v1707_v0, %v1711_v1  ;;  %v1714_v5 = vld [vmem:[#allocation19 + $0x7d0] sm:$0xff] }
 0x4e6   :  { %3343 = vmatprep.subr.bf16.mxu0 %v11553_v6  ;;  %v1718_v6 = vld [vmem:[#allocation19 + $0x7f0] sm:$0xff] }
 0x4e7   :  { %v11614_v38 = vcombine.low %v1714_v5, %v1718_v6 }
 0x4e8   :  { %3262 = vmatpush1.bf16.msra.mxu1 %v11550_v17  ;;  %v11615_v17 = vcombine.high %v1714_v5, %v1718_v6  ;;  %v3750_v5 = vld [vmem:[#allocation25 + $0x300] sm:$0xff] }
 0x4e9   :  { %3344 = vmatpush1.bf16.msra.mxu0 %v11552_v25  ;;  %3263 = vmatprep.subr.bf16.mxu1 %v11559_v26  ;;  %v11617_v25 = vcombine.high %v1715_v7, %v1719_v8  ;;  %v3654_v26 = vld [vmem:[#allocation25] sm:$0xff]  ;;  %v13900_v7 = vld [vmem:[#allocation25 + $0x848] sm:$0xff] }
 0x4ea   :  { %3345 = vmatprep.subr.bf16.mxu0 %v11561_v30  ;;  %v3662_v30 = vld [vmem:[#allocation25 + $0x40] sm:$0xff]  ;;  %v3751_v8 = vld [vmem:[#allocation25 + $0x308] sm:$0xff] }
 0x4eb   :  { %v11618_v40 = vcombine.low %v3654_v26, %v3662_v30  ;;  %v3758_v6 = vld [vmem:[#allocation25 + $0x340] sm:$0xff] }
 0x4ec   :  { %3264 = vmatpush1.bf16.msra.mxu1 %v11558_v42  ;;  %v11619_v42 = vcombine.high %v3654_v26, %v3662_v30  ;;  %v11715_v30 = vcombine.high %v3750_v5, %v3758_v6 }
 0x4ed   :  { %3346 = vmatpush1.bf16.msra.mxu0 %v11560_v20  ;;  %3265 = vmatprep.subr.bf16.mxu1 %v11567_v10  ;;  %v11621_v20 = vcombine.high %v3655_v34, %v3663_v36  ;;  %v3670_v10 = vld [vmem:[#allocation25 + $0x80] sm:$0xff] }
 0x4ee   :  { %3347 = vmatprep.subr.bf16.mxu0 %v11569_v39  ;;  %v3678_v39 = vld [vmem:[#allocation25 + $0xc0] sm:$0xff] }
 0x4ef   :  { %v11634_v24 = vcombine.low %v3670_v10, %v3678_v39  ;;  %v3766_v36 = vld [vmem:[#allocation25 + $0x380] sm:$0xff] }
 0x4f0   :  { %3266 = vmatpush1.bf16.msra.mxu1 %v11566_v44  ;;  %v11635_v44 = vcombine.high %v3670_v10, %v3678_v39 }
 0x4f1   :  { %3348 = vmatpush1.bf16.msra.mxu0 %v11568_v23  ;;  %3267 = vmatprep.subr.bf16.mxu1 %v11575_v45  ;;  %v11637_v23 = vcombine.high %v3671_v11, %v3679_v22  ;;  %v3686_v45 = vld [vmem:[#allocation25 + $0x100] sm:$0xff] }
 0x4f2   :  { %3349 = vmatprep.subr.bf16.mxu0 %v11577_v47  ;;  %v3694_v47 = vld [vmem:[#allocation25 + $0x140] sm:$0xff] }
 0x4f3   :  { %v11650_v52 = vcombine.low %v3686_v45, %v3694_v47  ;;  %v3782_v22 = vld [vmem:[#allocation25 + $0x400] sm:$0xff] }
 0x4f4   :  { %3268 = vmatpush1.bf16.msra.mxu1 %v11574_v43  ;;  %v11651_v43 = vcombine.high %v3686_v45, %v3694_v47 }
 0x4f5   :  { %3350 = vmatpush1.bf16.msra.mxu0 %v11576_v48  ;;  %3269 = vmatprep.subr.bf16.mxu1 %v11583_v54  ;;  %v11653_v48 = vcombine.high %v3687_v46, %v3695_v14  ;;  %v3702_v54 = vld [vmem:[#allocation25 + $0x180] sm:$0xff] }
 0x4f6   :  { %3351 = vmatprep.subr.bf16.mxu0 %v11585_v49  ;;  %v3710_v49 = vld [vmem:[#allocation25 + $0x1c0] sm:$0xff] }
 0x4f7   :  { %v11666_v60 = vcombine.low %v3702_v54, %v3710_v49  ;;  %v3798_v14 = vld [vmem:[#allocation25 + $0x480] sm:$0xff] }
 0x4f8   :  { %3270 = vmatpush1.bf16.msra.mxu1 %v11582_v55  ;;  %v11667_v55 = vcombine.high %v3702_v54, %v3710_v49 }
 0x4f9   :  { %3352 = vmatpush1.bf16.msra.mxu0 %v11584_v56  ;;  %3271 = vmatprep.subr.bf16.mxu1 %v11591_v57  ;;  %v3718_v56 = vld [vmem:[#allocation25 + $0x200] sm:$0xff] }
 0x4fa   :  { %3353 = vmatprep.subr.bf16.mxu0 %v11593_v58  ;;  %v3726_v57 = vld [vmem:[#allocation25 + $0x240] sm:$0xff]  ;;  %v3719_v58 = vld [vmem:[#allocation25 + $0x208] sm:$0xff] }
 0x4fb   :  { %v11683_v62 = vcombine.high %v3718_v56, %v3726_v57  ;;  %v11682_v63 = vcombine.low %v3718_v56, %v3726_v57  ;;  %v11684_v0 = vcombine.low %v3719_v58, %v3727_v59 }
 0x4fc   :  { %3272 = vmatpush1.bf16.msra.mxu1 %v11590_v27  ;;  %v11685_v27 = vcombine.high %v3719_v58, %v3727_v59  ;;  %v3830_v59 = vld [vmem:[#allocation25 + $0x580] sm:$0xff] }
 0x4fd   :  { %3354 = vmatpush1.bf16.msra.mxu0 %v11592_v28  ;;  %3273 = vmatprep.subr.bf16.mxu1 %v11599_v29  ;;  %v3734_v28 = vld [vmem:[#allocation25 + $0x280] sm:$0xff] }
 0x4fe   :  { %3355 = vmatprep.subr.bf16.mxu0 %v11601_v31  ;;  %v3742_v29 = vld [vmem:[#allocation25 + $0x2c0] sm:$0xff]  ;;  %v3735_v31 = vld [vmem:[#allocation25 + $0x288] sm:$0xff] }
 0x4ff   :  { %v11699_v1 = vcombine.high %v3734_v28, %v3742_v29  ;;  %v11700_v26 = vcombine.low %v3735_v31, %v3743_v32 }
 0x500   :  { %3274 = vmatpush1.bf16.msra.mxu1 %v11598_v2  ;;  %v13894_v2 = vld [vmem:[#allocation25 + $0x800] sm:$0xff] }
 0x501   :  { %3356 = vmatpush1.bf16.msra.mxu0 %v11600_v3  ;;  %3275 = vmatprep.subr.bf16.mxu1 %v11607_v12  ;;  %v13896_v3 = vld [vmem:[#allocation25 + $0x840] sm:$0xff]  ;;  %v13898_v12 = vld [vmem:[#allocation25 + $0x808] sm:$0xff] }
 0x502   :  { %3357 = vmatprep.subr.bf16.mxu0 %v11609_v4  ;;  %v11701_v4 = vcombine.high %v3735_v31, %v3743_v32  ;;  %v3846_v32 = vld [vmem:[#allocation25 + $0x600] sm:$0xff] }
 0x504   :  { %3276 = vmatpush1.bf16.msra.mxu1 %v11606_v13  ;;  %v3759_v13 = vld [vmem:[#allocation25 + $0x348] sm:$0xff] }
 0x505   :  { %3358 = vmatpush1.bf16.msra.mxu0 %v11608_v16  ;;  %3277 = vmatprep.subr.bf16.mxu1 %v11615_v17  ;;  %v11874_v16 = vcombine.low %v13894_v2, %v13896_v3  ;;  %v11876_v17 = vcombine.low %v13898_v12, %v13900_v7  ;;  %v11717_v34 = vcombine.high %v3751_v8, %v3759_v13 }
 0x506   :  { %3359 = vmatprep.subr.bf16.mxu0 %v11617_v25  ;;  %v11698_v25 = vcombine.low %v3734_v28, %v3742_v29  ;;  %v11716_v10 = vcombine.low %v3751_v8, %v3759_v13  ;;  %v3862_v13 = vld [vmem:[#allocation25 + $0x680] sm:$0xff] }
 0x508   :  { %3278 = vmatpush1.bf16.msra.mxu1 %v11614_v38  ;;  %v3774_v38 = vld [vmem:[#allocation25 + $0x3c0] sm:$0xff] }
 0x509   :  { %3360 = vmatpush1.bf16.msra.mxu0 %v11616_v9  ;;  %9882 = vmatprep.subr.bf16.mxu1 %v11619_v42  ;;  %v3767_v9 = vld [vmem:[#allocation25 + $0x388] sm:$0xff]  ;;  %v11731_v39 = vcombine.high %v3766_v36, %v3774_v38 }
 0x50a   :  { %10046 = vmatprep.subr.bf16.mxu0 %v11621_v20  ;;  %v3775_v42 = vld [vmem:[#allocation25 + $0x3c8] sm:$0xff]  ;;  %v11714_v20 = vcombine.low %v3750_v5, %v3758_v6 }
 0x50b   :  { %3280 = vmatmul.mubr.bf16.vlgmr.msra.gmra.mrb[12].mxu1 %v13882_v33  ;;  %v11733_v11 = vcombine.high %v3767_v9, %v3775_v42  ;;  %v11732_v45 = vcombine.low %v3767_v9, %v3775_v42  ;;  %v3878_v42 = vld [vmem:[#allocation25 + $0x700] sm:$0xff] }
 0x50c   :  { %3362 = vmatmul.mubr.bf16.vlgmr.msra.gmra.mrb[16].mxu0 %v13882_v33  ;;  %9883 = vmatpush1.bf16.msra.mxu1 %v11618_v40  ;;  %v11669_v33 = vcombine.high %v3703_v50, %v3711_v51  ;;  %v3790_v40 = vld [vmem:[#allocation25 + $0x440] sm:$0xff] }
 0x50d   :  { %10047 = vmatpush1.bf16.msra.mxu0 %v11620_v41  ;;  %9884 = vmatprep.subr.bf16.mxu1 %v11635_v44  ;;  %v3783_v41 = vld [vmem:[#allocation25 + $0x408] sm:$0xff]  ;;  %v11747_v47 = vcombine.high %v3782_v22, %v3790_v40  ;;  %v3814_v51 = vld [vmem:[#allocation25 + $0x500] sm:$0xff] }
 0x50e   :  { %10048 = vmatprep.subr.bf16.mxu0 %v11637_v23  ;;  %v3791_v44 = vld [vmem:[#allocation25 + $0x448] sm:$0xff]  ;;  %v11730_v23 = vcombine.low %v3766_v36, %v3774_v38 }
 0x50f   :  { %v11749_v46 = vcombine.high %v3783_v41, %v3791_v44  ;;  %v11748_v54 = vcombine.low %v3783_v41, %v3791_v44  ;;  %v3894_v44 = vld [vmem:[#allocation25 + $0x780] sm:$0xff] }
 0x510   :  { %9885 = vmatpush1.bf16.msra.mxu1 %v11634_v24  ;;  %v3806_v24 = vld [vmem:[#allocation25 + $0x4c0] sm:$0xff] }
 0x511   :  { %10049 = vmatpush1.bf16.msra.mxu0 %v11636_v15  ;;  %9886 = vmatprep.subr.bf16.mxu1 %v11651_v43  ;;  %v3799_v15 = vld [vmem:[#allocation25 + $0x488] sm:$0xff]  ;;  %v11763_v49 = vcombine.high %v3798_v14, %v3806_v24 }
 0x512   :  { %10050 = vmatprep.subr.bf16.mxu0 %v11653_v48  ;;  %v3807_v43 = vld [vmem:[#allocation25 + $0x4c8] sm:$0xff]  ;;  %v11746_v48 = vcombine.low %v3782_v22, %v3790_v40 }
 0x513   :  { %v11765_v50 = vcombine.high %v3799_v15, %v3807_v43  ;;  %v11764_v56 = vcombine.low %v3799_v15, %v3807_v43 }
 0x514   :  { %9887 = vmatpush1.bf16.msra.mxu1 %v11650_v52  ;;  %v3822_v52 = vld [vmem:[#allocation25 + $0x540] sm:$0xff] }
 0x515   :  { %10051 = vmatpush1.bf16.msra.mxu0 %v11652_v53  ;;  %9888 = vmatprep.subr.bf16.mxu1 %v11667_v55  ;;  %v3815_v53 = vld [vmem:[#allocation25 + $0x508] sm:$0xff]  ;;  %v11779_v57 = vcombine.high %v3814_v51, %v3822_v52 }
 0x516   :  { %10052 = vmatprep.subr.bf16.mxu0 %v11669_v33  ;;  %v3823_v55 = vld [vmem:[#allocation25 + $0x548] sm:$0xff]  ;;  %v11762_v33 = vcombine.low %v3798_v14, %v3806_v24 }
 0x517   :  { %v11781_v58 = vcombine.high %v3815_v53, %v3823_v55  ;;  %v11780_v28 = vcombine.low %v3815_v53, %v3823_v55 }
 0x518   :  { %9889 = vmatpush1.bf16.msra.mxu1 %v11666_v60  ;;  %v3838_v60 = vld [vmem:[#allocation25 + $0x5c0] sm:$0xff] }
 0x519   :  { %10053 = vmatpush1.bf16.msra.mxu0 %v11668_v61  ;;  %9890 = vmatprep.subr.bf16.mxu1 %v11683_v62  ;;  %v3831_v61 = vld [vmem:[#allocation25 + $0x588] sm:$0xff]  ;;  %v11795_v29 = vcombine.high %v3830_v59, %v3838_v60 }
 0x51a   :  { %10054 = vmatprep.subr.bf16.mxu0 %v11685_v27  ;;  %v3839_v62 = vld [vmem:[#allocation25 + $0x5c8] sm:$0xff]  ;;  %v11778_v27 = vcombine.low %v3814_v51, %v3822_v52 }
 0x51b   :  { %v11797_v31 = vcombine.high %v3831_v61, %v3839_v62  ;;  %v11796_v5 = vcombine.low %v3831_v61, %v3839_v62 }
 0x51c   :  { %9891 = vmatpush1.bf16.msra.mxu1 %v11682_v63  ;;  %v3854_v63 = vld [vmem:[#allocation25 + $0x640] sm:$0xff] }
 0x51d   :  { %10055 = vmatpush1.bf16.msra.mxu0 %v11684_v0  ;;  %9892 = vmatprep.subr.bf16.mxu1 %v11699_v1  ;;  %v3847_v0 = vld [vmem:[#allocation25 + $0x608] sm:$0xff]  ;;  %v11811_v6 = vcombine.high %v3846_v32, %v3854_v63 }
 0x51e   :  { %10056 = vmatprep.subr.bf16.mxu0 %v11701_v4  ;;  %v3855_v1 = vld [vmem:[#allocation25 + $0x648] sm:$0xff]  ;;  %v11794_v4 = vcombine.low %v3830_v59, %v3838_v60 }
 0x51f   :  { %v11813_v8 = vcombine.high %v3847_v0, %v3855_v1  ;;  %v11812_v36 = vcombine.low %v3847_v0, %v3855_v1 }
 0x520   :  { %9893 = vmatpush1.bf16.msra.mxu1 %v11698_v25  ;;  %v3870_v25 = vld [vmem:[#allocation25 + $0x6c0] sm:$0xff] }
 0x521   :  { %10057 = vmatpush1.bf16.msra.mxu0 %v11700_v26  ;;  %9894 = vmatprep.subr.bf16.mxu1 %v11715_v30  ;;  %v3863_v26 = vld [vmem:[#allocation25 + $0x688] sm:$0xff]  ;;  %v11827_v38 = vcombine.high %v3862_v13, %v3870_v25 }
 0x522   :  { %10058 = vmatprep.subr.bf16.mxu0 %v11717_v34  ;;  %v3871_v30 = vld [vmem:[#allocation25 + $0x6c8] sm:$0xff]  ;;  %v11810_v34 = vcombine.low %v3846_v32, %v3854_v63 }
 0x523   :  { %v11829_v9 = vcombine.high %v3863_v26, %v3871_v30  ;;  %v11828_v22 = vcombine.low %v3863_v26, %v3871_v30 }
 0x524   :  { %9895 = vmatpush1.bf16.msra.mxu1 %v11714_v20  ;;  %v3886_v20 = vld [vmem:[#allocation25 + $0x740] sm:$0xff] }
 0x525   :  { %10059 = vmatpush1.bf16.msra.mxu0 %v11716_v10  ;;  %9896 = vmatprep.subr.bf16.mxu1 %v11731_v39  ;;  %v3879_v10 = vld [vmem:[#allocation25 + $0x708] sm:$0xff]  ;;  %v11843_v40 = vcombine.high %v3878_v42, %v3886_v20 }
 0x526   :  { %10060 = vmatprep.subr.bf16.mxu0 %v11733_v11  ;;  %v3887_v39 = vld [vmem:[#allocation25 + $0x748] sm:$0xff]  ;;  %v11826_v11 = vcombine.low %v3862_v13, %v3870_v25 }
 0x527   :  { %v11845_v41 = vcombine.high %v3879_v10, %v3887_v39  ;;  %v11844_v14 = vcombine.low %v3879_v10, %v3887_v39 }
 0x528   :  { %9897 = vmatpush1.bf16.msra.mxu1 %v11730_v23  ;;  %v3902_v23 = vld [vmem:[#allocation25 + $0x7c0] sm:$0xff] }
 0x529   :  { %10061 = vmatpush1.bf16.msra.mxu0 %v11732_v45  ;;  %9898 = vmatprep.subr.bf16.mxu1 %v11747_v47  ;;  %v3895_v45 = vld [vmem:[#allocation25 + $0x788] sm:$0xff]  ;;  %v11859_v24 = vcombine.high %v3894_v44, %v3902_v23  ;;  %v11858_v43 = vcombine.low %v3894_v44, %v3902_v23 }
 0x52a   :  { %10062 = vmatprep.subr.bf16.mxu0 %v11749_v46  ;;  %v3903_v47 = vld [vmem:[#allocation25 + $0x7c8] sm:$0xff]  ;;  %v11842_v46 = vcombine.low %v3878_v42, %v3886_v20 }
 0x52b   :  { %v11861_v15 = vcombine.high %v3895_v45, %v3903_v47 }
 0x52c   :  { %9899 = vmatpush1.bf16.msra.mxu1 %v11746_v48  ;;  %v11860_v48 = vcombine.low %v3895_v45, %v3903_v47 }
 0x52d   :  { %10063 = vmatpush1.bf16.msra.mxu0 %v11748_v54  ;;  %9900 = vmatprep.subr.bf16.mxu1 %v11763_v49  ;;  %v11875_v54 = vcombine.high %v13894_v2, %v13896_v3  ;;  %v11877_v49 = vcombine.high %v13898_v12, %v13900_v7  ;;  %v3967_v2 = vld [vmem:[#allocation25 + $0x9c8] sm:$0xff] }
 0x52e   :  { %10064 = vmatprep.subr.bf16.mxu0 %v11765_v50  ;;  %v13910_v50 = vld [vmem:[#allocation20] sm:$0xff] }
 0x52f   :  { %v1725_v51 = vrot.slane %v13910_v50, %v13808_v19  ;;  %v1729_v52 = vrot.slane %v13910_v50, %v13811_v21  ;;  %v1737_v53 = vrot.slane %v13910_v50, %v13845_v37  ;;  %v1733_v20 = vrot.slane %v13910_v50, %v13842_v35 }
 0x530   :  { %9901 = vmatpush1.bf16.msra.mxu1 %v11762_v33 }
 0x531   :  { %10065 = vmatpush1.bf16.msra.mxu0 %v11764_v56  ;;  %9902 = vmatprep.subr.bf16.mxu1 %v11779_v57 }
 0x532   :  { %10066 = vmatprep.subr.bf16.mxu0 %v11781_v58 }
 0x534   :  { %9903 = vmatpush1.bf16.msra.mxu1 %v11778_v27 }
 0x535   :  { %10067 = vmatpush1.bf16.msra.mxu0 %v11780_v28  ;;  %9904 = vmatprep.subr.bf16.mxu1 %v11795_v29 }
 0x536   :  { %10068 = vmatprep.subr.bf16.mxu0 %v11797_v31 }
 0x538   :  { %9905 = vmatpush1.bf16.msra.mxu1 %v11794_v4 }
 0x539   :  { %10069 = vmatpush1.bf16.msra.mxu0 %v11796_v5  ;;  %9906 = vmatprep.subr.bf16.mxu1 %v11811_v6 }
 0x53a   :  { %10070 = vmatprep.subr.bf16.mxu0 %v11813_v8 }
 0x53c   :  { %9907 = vmatpush1.bf16.msra.mxu1 %v11810_v34 }
 0x53d   :  { %10071 = vmatpush1.bf16.msra.mxu0 %v11812_v36  ;;  %9908 = vmatprep.subr.bf16.mxu1 %v11827_v38 }
 0x53e   :  { %10072 = vmatprep.subr.bf16.mxu0 %v11829_v9 }
 0x540   :  { %9909 = vmatpush1.bf16.msra.mxu1 %v11826_v11 }
 0x541   :  { %10073 = vmatpush1.bf16.msra.mxu0 %v11828_v22  ;;  %9910 = vmatprep.subr.bf16.mxu1 %v11843_v40 }
 0x542   :  { %10074 = vmatprep.subr.bf16.mxu0 %v11845_v41 }
 0x544   :  { %9911 = vmatpush1.bf16.msra.mxu1 %v11842_v46 }
 0x545   :  { %10075 = vmatpush1.bf16.msra.mxu0 %v11844_v14  ;;  %9912 = vmatprep.subr.bf16.mxu1 %v11859_v24 }
 0x546   :  { %10076 = vmatprep.subr.bf16.mxu0 %v11861_v15 }
 0x548   :  { %9913 = vmatpush1.bf16.msra.mxu1 %v11858_v43 }
 0x549   :  { %10077 = vmatpush1.bf16.msra.mxu0 %v11860_v48  ;;  %9923 = vmatprep.subr.bf16.mxu1 %v11875_v54 }
 0x54a   :  { %10087 = vmatprep.subr.bf16.mxu0 %v11877_v49 }
 0x55e   :  { %v3117_v55 = vpop.f32.mrb[8].mxu1  ;;  %v3199_v33 = vpop.f32.mrb[12].mxu0 }
 0x55f   :  { %v12686_v56 = vadd.f32 %v3117_v55, %v1725_v51  ;;  %v3119_v57 = vpop.f32.mrb[9].mxu1  ;;  %v3201_v58 = vpop.f32.mrb[13].mxu0  ;;  %v12688_v44 = vadd.f32 %v3199_v33, %v1733_v20 }
 0x560   :  { %v12687_v59 = vadd.f32 %v3119_v57, %v1729_v52  ;;  %v12689_v60 = vadd.f32 %v3201_v58, %v1737_v53  ;;  %v3121_v61 = vpop.f32.mrb[10].mxu1  ;;  %v3203_v62 = vpop.f32.mrb[14].mxu0 }
 0x561   :  { %v3370_v27 = vrot.slane %v12686_v56, 4  ;;  %v3122_v28 = vpop.f32.mrb[11].mxu1  ;;  %v3204_v29 = vpop.f32.mrb[15].mxu0  ;;  %v3382_v15 = vrot.slane %v12688_v44, 4 }
 0x562   :  { %v3376_v31 = vrot.slane %v12687_v59, 4  ;;  %v3388_v32 = vrot.slane %v12689_v60, 4 }
 0x563   :  { %v3371_v63 = vadd.f32 %v12686_v56, %v3370_v27  ;;  %v3383_v53 = vadd.f32 %v12688_v44, %v3382_v15 }
 0x564   :  { %v3377_v0 = vadd.f32 %v12687_v59, %v3376_v31  ;;  %v3389_v1 = vadd.f32 %v12689_v60, %v3388_v32 }
 0x565   :  { %v3372_v4 = vrot.slane %v3371_v63, 2 }
 0x566   :  { %v3378_v5 = vrot.slane %v3377_v0, 2  ;;  %v3390_v6 = vrot.slane %v3389_v1, 2 }
 0x567   :  { %v3373_v8 = vadd.f32 %v3372_v4, %v3371_v63  ;;  %v13920_v4 = vld [vmem:[#allocation22] sm:$0xff] }
 0x568   :  { %v3379_v13 = vadd.f32 %v3378_v5, %v3377_v0  ;;  %v3391_v25 = vadd.f32 %v3390_v6, %v3389_v1  ;;  %v13922_v6 = vld [vmem:[#allocation23] sm:$0xff] }
 0x569   :  { %v3374_v26 = vrot.slane %v3373_v8, 1 }
 0x56a   :  { %v3380_v30 = vrot.slane %v3379_v13, 1  ;;  %v3392_v34 = vrot.slane %v3391_v25, 1 }
 0x56b   :  { %v3375_v36 = vadd.f32 %v3374_v26, %v3373_v8  ;;  %v3527_v8 = vrot.slane %v13920_v4, %v13808_v19  ;;  %v3577_v26 = vrot.slane %v13922_v6, %v13808_v19 }
 0x56c   :  { %v3381_v38 = vadd.f32 %v3380_v30, %v3379_v13  ;;  %v3393_v9 = vadd.f32 %v3392_v34, %v3391_v25  ;;  %v3531_v34 = vrot.slane %v13920_v4, %v13811_v21 }
 0x56d   :  { %v3418_v42 = vmul.f32 0.125, %v3375_v36 }
 0x56e   :  { %v3419_v10 = vmul.f32 0.125, %v3381_v38  ;;  %v3421_v39 = vmul.f32 0.125, %v3393_v9  ;;  %v3539_v38 = vrot.slane %v13920_v4, %v13845_v37 }
 0x56f   :  { %v3426_v11 = vsub.f32 %v12686_v56, %v3418_v42 }
 0x570   :  { %v3427_v22 = vsub.f32 %v12687_v59, %v3419_v10  ;;  %v3429_v40 = vsub.f32 %v12689_v60, %v3421_v39  ;;  %v3384_v60 = vrot.slane %v3383_v53, 2  ;;  %v3581_v10 = vrot.slane %v13922_v6, %v13811_v21 }
 0x571   :  { %v3434_v41 = vmul.f32 %v3426_v11, %v3426_v11 }
 0x572   :  { %v3435_v23 = vmul.f32 %v3427_v22, %v3427_v22  ;;  %v3437_v45 = vmul.f32 %v3429_v40, %v3429_v40  ;;  %v3385_v32 = vadd.f32 %v3384_v60, %v3383_v53  ;;  %v3943_v60 = vld [vmem:[#allocation25 + $0x908] sm:$0xff] }
 0x573   :  { %v3442_v47 = vrot.slane %v3434_v41, 4 }
 0x574   :  { %v3448_v46 = vrot.slane %v3435_v23, 4  ;;  %v3460_v14 = vrot.slane %v3437_v45, 4  ;;  %v3386_v1 = vrot.slane %v3385_v32, 1 }
 0x575   :  { %v3443_v24 = vadd.f32 %v3442_v47, %v3434_v41 }
 0x576   :  { %v3449_v43 = vadd.f32 %v3448_v46, %v3435_v23  ;;  %v3461_v48 = vadd.f32 %v3460_v14, %v3437_v45  ;;  %v3387_v5 = vadd.f32 %v3386_v1, %v3385_v32  ;;  %v3959_v1 = vld [vmem:[#allocation25 + $0x988] sm:$0xff] }
 0x577   :  { %v3444_v54 = vrot.slane %v3443_v24, 2 }
 0x578   :  { %v3450_v49 = vrot.slane %v3449_v43, 2  ;;  %v3462_v51 = vrot.slane %v3461_v48, 2  ;;  %v3420_v30 = vmul.f32 0.125, %v3387_v5  ;;  %v3974_v5 = vld [vmem:[#allocation25 + $0xa00] sm:$0xff] }
 0x579   :  { %v3445_v52 = vadd.f32 %v3444_v54, %v3443_v24 }
 0x57a   :  { %v3451_v55 = vadd.f32 %v3450_v49, %v3449_v43  ;;  %v3463_v56 = vadd.f32 %v3462_v51, %v3461_v48  ;;  %v13936_v23 = vsub.f32 %v12688_v44, %v3420_v30  ;;  %v3926_v48 = vld [vmem:[#allocation25 + $0x880] sm:$0xff]  ;;  %v3927_v51 = vld [vmem:[#allocation25 + $0x888] sm:$0xff]  ;;  %v11924_v30 = vcombine.low %v3959_v1, %v3967_v2 }
 0x57b   :  { %v3446_v57 = vrot.slane %v3445_v52, 1  ;;  %v3934_v49 = vld [vmem:[#allocation25 + $0x8c0] sm:$0xff]  ;;  %v3935_v44 = vld [vmem:[#allocation25 + $0x8c8] sm:$0xff] }
 0x57c   :  { %v3452_v58 = vrot.slane %v3451_v55, 1  ;;  %v3464_v59 = vrot.slane %v3463_v56, 1  ;;  %v3436_v15 = vmul.f32 %v13936_v23, %v13936_v23 }
 0x57d   :  { %v3447_v33 = vadd.f32 %v3446_v57, %v3445_v52  ;;  %v3942_v57 = vld [vmem:[#allocation25 + $0x900] sm:$0xff] }
 0x57e   :  { %v3453_v61 = vadd.f32 %v3452_v58, %v3451_v55  ;;  %v3465_v62 = vadd.f32 %v3464_v59, %v3463_v56  ;;  %v3454_v56 = vrot.slane %v3436_v15, 4  ;;  %v11891_v58 = vcombine.high %v3926_v48, %v3934_v49 }
 0x57f   :  { %v3490_v27 = vmul.f32 0.125, %v3447_v33  ;;  %v11893_v59 = vcombine.high %v3927_v51, %v3935_v44  ;;  %v3950_v33 = vld [vmem:[#allocation25 + $0x940] sm:$0xff] }
 0x580   :  { %v3491_v28 = vmul.f32 0.125, %v3453_v61  ;;  %v3493_v29 = vmul.f32 0.125, %v3465_v62  ;;  %v3951_v61 = vld [vmem:[#allocation25 + $0x948] sm:$0xff]  ;;  %v11906_v3 = vcombine.low %v3942_v57, %v3950_v33 }
 0x581   :  { %v3498_v31 = vadd.f32 0.8, %v3490_v27  ;;  %v11890_v27 = vcombine.low %v3926_v48, %v3934_v49  ;;  %v11909_v32 = vcombine.high %v3943_v60, %v3951_v61  ;;  %v11908_v12 = vcombine.low %v3943_v60, %v3951_v61  ;;  %v4022_v49 = vld [vmem:[#allocation25 + $0xb80] sm:$0xff] }
 0x582   :  { %v3499_v63 = vadd.f32 0.8, %v3491_v28  ;;  %v3501_v0 = vadd.f32 0.8, %v3493_v29  ;;  %v11892_v28 = vcombine.low %v3927_v51, %v3935_v44  ;;  %v3455_v29 = vadd.f32 %v3454_v56, %v3436_v15  ;;  %v4015_v15 = vld [vmem:[#allocation25 + $0xb48] sm:$0xff]  ;;  %v4030_v51 = vld [vmem:[#allocation25 + $0xbc0] sm:$0xff] }
 0x583   :  { %13013 = vrsqrt.f32 %v3498_v31  ;;  %v11907_v31 = vcombine.high %v3942_v57, %v3950_v33  ;;  %v4023_v44 = vld [vmem:[#allocation25 + $0xb88] sm:$0xff]  ;;  %v4038_v60 = vld [vmem:[#allocation25 + $0xc00] sm:$0xff] }
 0x584   :  { %13015 = vrsqrt.f32 %v3499_v63  ;;  %v3958_v63 = vld [vmem:[#allocation25 + $0x980] sm:$0xff]  ;;  %v3456_v7 = vrot.slane %v3455_v29, 2 }
 0x585   :  { %13017 = vrsqrt.f32 %v3501_v0  ;;  %v3966_v0 = vld [vmem:[#allocation25 + $0x9c0] sm:$0xff] }
 0x586   :  { %v4046_v61 = vld [vmem:[#allocation25 + $0xc40] sm:$0xff] }
 0x58d   :  { %v13014_v13 = vpop.eup %13013 }
 0x58e   :  { %v3514_v25 = vmul.f32 %v13014_v13, %v3426_v11  ;;  %v13016_v36 = vpop.eup %13015  ;;  %v3589_v11 = vrot.slane %v13922_v6, %v13845_v37  ;;  %v3975_v13 = vld [vmem:[#allocation25 + $0xa08] sm:$0xff] }
 0x58f   :  { %v13018_v9 = vpop.eup %13017  ;;  %v3515_v20 = vmul.f32 %v13016_v36, %v3427_v22 }
 0x590   :  { %v3564_v42 = vmul.f32 %v3527_v8, %v3514_v25  ;;  %v3517_v39 = vmul.f32 %v13018_v9, %v3429_v40  ;;  %v3982_v8 = vld [vmem:[#allocation25 + $0xa40] sm:$0xff]  ;;  %v3983_v25 = vld [vmem:[#allocation25 + $0xa48] sm:$0xff] }
 0x591   :  { %v3565_v45 = vmul.f32 %v3531_v34, %v3515_v20  ;;  %v3457_v34 = vadd.f32 %v3456_v7, %v3455_v29  ;;  %v11939_v36 = vcombine.high %v3974_v5, %v3982_v8  ;;  %v3990_v9 = vld [vmem:[#allocation25 + $0xa80] sm:$0xff]  ;;  %v3991_v20 = vld [vmem:[#allocation25 + $0xa88] sm:$0xff]  ;;  %v11986_v29 = vcombine.low %v4022_v49, %v4030_v51 }
 0x592   :  { %v3614_v41 = vadd.f32 %v3577_v26, %v3564_v42  ;;  %v3567_v47 = vmul.f32 %v3539_v38, %v3517_v39  ;;  %v11922_v26 = vcombine.low %v3958_v63, %v3966_v0  ;;  %v11941_v38 = vcombine.high %v3975_v13, %v3983_v25  ;;  %v3998_v42 = vld [vmem:[#allocation25 + $0xac0] sm:$0xff] }
 0x593   :  { %v3615_v14 = vadd.f32 %v3581_v10, %v3565_v45  ;;  %v3999_v10 = vld [vmem:[#allocation25 + $0xac8] sm:$0xff]  ;;  %v11938_v39 = vcombine.low %v3974_v5, %v3982_v8  ;;  %v11955_v45 = vcombine.high %v3990_v9, %v3998_v42  ;;  %v12002_v7 = vcombine.low %v4038_v60, %v4046_v61  ;;  %v4070_v8 = vld [vmem:[#allocation25 + $0xd00] sm:$0xff] }
 0x594   :  { %vm3622_vm7 = vcmp.gt.f32.partialorder %v3614_v41, 0.0  ;;  %v3630_v46 = vmul.f32 0.2, %v3614_v41  ;;  %v3617_v24 = vadd.f32 %v3589_v11, %v3567_v47  ;;  %v11940_v11 = vcombine.low %v3975_v13, %v3983_v25  ;;  %v4078_v13 = vld [vmem:[#allocation25 + $0xd40] sm:$0xff]  ;;  %v4071_v25 = vld [vmem:[#allocation25 + $0xd08] sm:$0xff] }
 0x595   :  { %vm3623_vm8 = vcmp.gt.f32.partialorder %v3615_v14, 0.0  ;;  %v3631_v22 = vmul.f32 0.2, %v3615_v14  ;;  %v11957_v47 = vcombine.high %v3991_v20, %v3999_v10 }
 0x596   :  { %v3638_v43 = vsel %vm3622_vm7, %v3614_v41, %v3630_v46  ;;  %vm3625_vm9 = vcmp.gt.f32.partialorder %v3617_v24, 0.0  ;;  %v3633_v40 = vmul.f32 0.2, %v3617_v24  ;;  %v3458_v41 = vrot.slane %v3457_v34, 1  ;;  %v4006_v46 = vld [vmem:[#allocation25 + $0xb00] sm:$0xff] }
 0x597   :  { %v3639_v54 = vsel %vm3623_vm8, %v3615_v14, %v3631_v22  ;;  %v13942_v55 = vpack.c.bf16 %v3638_v43, %v3638_v43  ;;  %v4014_v14 = vld [vmem:[#allocation25 + $0xb40] sm:$0xff]  ;;  %v11954_v22 = vcombine.low %v3990_v9, %v3998_v42  ;;  %v11956_v43 = vcombine.low %v3991_v20, %v3999_v10  ;;  %v4087_v20 = vld [vmem:[#allocation25 + $0xd88] sm:$0xff] }
 0x598   :  { %v13940_v52 = vpack.c.bf16 %v3639_v54, %v3639_v54  ;;  %v3641_v53 = vsel %vm3625_vm9, %v3617_v24, %v3633_v40  ;;  %v4007_v24 = vld [vmem:[#allocation25 + $0xb08] sm:$0xff]  ;;  %v3459_v40 = vadd.f32 %v3458_v41, %v3457_v34  ;;  %v11971_v48 = vcombine.high %v4006_v46, %v4014_v14  ;;  %v4086_v9 = vld [vmem:[#allocation25 + $0xd80] sm:$0xff] }
 0x599   :  { %v13946_v62 = vpack.c.bf16 %v3641_v53, %v3641_v53  ;;  %v11973_v54 = vcombine.high %v4007_v24, %v4015_v15  ;;  %v4031_v53 = vld [vmem:[#allocation25 + $0xbc8] sm:$0xff]  ;;  %v11970_v56 = vcombine.low %v4006_v46, %v4014_v14  ;;  %v11972_v57 = vcombine.low %v4007_v24, %v4015_v15  ;;  %v4094_v42 = vld [vmem:[#allocation25 + $0xdc0] sm:$0xff] }
 0x59a   :  { %9914 = vmatprep.mubr.bf16.mxu1 %v13940_v52  ;;  %10078 = vmatprep.mubr.bf16.mxu0 %v13940_v52  ;;  %v11989_v33 = vcombine.high %v4023_v44, %v4031_v53  ;;  %v4095_v10 = vld [vmem:[#allocation25 + $0xdc8] sm:$0xff]  ;;  %v12051_v41 = vcombine.high %v4086_v9, %v4094_v42  ;;  %v4110_v46 = vld [vmem:[#allocation25 + $0xe40] sm:$0xff] }
 0x59b   :  { %9915 = vmatmul.mubr.bf16.vlgmr.msra.gmra.mrb[16].mxu1 %v13942_v55  ;;  %10079 = vmatmul.mubr.bf16.vlgmr.msra.gmra.mrb[20].mxu0 %v13942_v55  ;;  %v4103_v14 = vld [vmem:[#allocation25 + $0xe08] sm:$0xff] }
 0x59c   :  { %9924 = vmatpush1.bf16.msra.mxu1 %v11874_v16  ;;  %10088 = vmatpush1.bf16.msra.mxu0 %v11876_v17  ;;  %v11923_v16 = vcombine.high %v3958_v63, %v3966_v0  ;;  %v11925_v17 = vcombine.high %v3959_v1, %v3967_v2  ;;  %v12003_v63 = vcombine.high %v4038_v60, %v4046_v61  ;;  %v4054_v1 = vld [vmem:[#allocation25 + $0xc80] sm:$0xff]  ;;  %v4111_v24 = vld [vmem:[#allocation25 + $0xe48] sm:$0xff] }
 0x59d   :  { %9955 = vmatprep.mubr.bf16.mxu1 %v13946_v62  ;;  %10119 = vmatprep.mubr.bf16.mxu0 %v13946_v62  ;;  %v4062_v2 = vld [vmem:[#allocation25 + $0xcc0] sm:$0xff] }
 0x59e   :  { %9925 = vmatprep.subr.bf16.mxu1 %v11891_v58  ;;  %10089 = vmatprep.subr.bf16.mxu0 %v11893_v59  ;;  %v3492_v58 = vmul.f32 0.125, %v3459_v40  ;;  %v11987_v59 = vcombine.high %v4022_v49, %v4030_v51  ;;  %v3535_v51 = vrot.slane %v13920_v4, %v13842_v35  ;;  %v4134_v60 = vld [vmem:[#allocation25 + $0xf00] sm:$0xff] }
 0x5a0   :  { %9926 = vmatpush1.bf16.msra.mxu1 %v11890_v27  ;;  %10090 = vmatpush1.bf16.msra.mxu0 %v11892_v28  ;;  %v4039_v27 = vld [vmem:[#allocation25 + $0xc08] sm:$0xff] }
 0x5a1   :  { %9927 = vmatprep.subr.bf16.mxu1 %v11907_v31  ;;  %10091 = vmatprep.subr.bf16.mxu0 %v11909_v32  ;;  %v4047_v28 = vld [vmem:[#allocation25 + $0xc48] sm:$0xff]  ;;  %v11988_v31 = vcombine.low %v4023_v44, %v4031_v53  ;;  %v3500_v32 = vadd.f32 0.8, %v3492_v58  ;;  %v4126_v44 = vld [vmem:[#allocation25 + $0xec0] sm:$0xff]  ;;  %v12068_v58 = vcombine.low %v4103_v14, %v4111_v24 }
 0x5a2   :  { %v12005_v0 = vcombine.high %v4039_v27, %v4047_v28  ;;  %v4119_v53 = vld [vmem:[#allocation25 + $0xe88] sm:$0xff] }
 0x5a3   :  { %13019 = vrsqrt.f32 %v3500_v32 }
 0x5a4   :  { %9928 = vmatpush1.bf16.msra.mxu1 %v11906_v3  ;;  %10092 = vmatpush1.bf16.msra.mxu0 %v11908_v12  ;;  %v4055_v3 = vld [vmem:[#allocation25 + $0xc88] sm:$0xff] }
 0x5a5   :  { %9929 = vmatprep.subr.bf16.mxu1 %v11923_v16  ;;  %10093 = vmatprep.subr.bf16.mxu0 %v11925_v17  ;;  %v4063_v12 = vld [vmem:[#allocation25 + $0xcc8] sm:$0xff]  ;;  %v12004_v16 = vcombine.low %v4039_v27, %v4047_v28  ;;  %v12019_v17 = vcombine.high %v4054_v1, %v4062_v2  ;;  %v3585_v27 = vrot.slane %v13922_v6, %v13842_v35 }
 0x5a6   :  { %v12021_v5 = vcombine.high %v4055_v3, %v4063_v12  ;;  %v12020_v34 = vcombine.low %v4055_v3, %v4063_v12  ;;  %v4135_v28 = vld [vmem:[#allocation25 + $0xf08] sm:$0xff]  ;;  %v4158_v3 = vld [vmem:[#allocation25 + $0xfc0] sm:$0xff] }
 0x5a7   :  { %v4151_v12 = vld [vmem:[#allocation25 + $0xf88] sm:$0xff] }
 0x5a8   :  { %9930 = vmatpush1.bf16.msra.mxu1 %v11922_v26  ;;  %10094 = vmatpush1.bf16.msra.mxu0 %v11924_v30  ;;  %v4079_v26 = vld [vmem:[#allocation25 + $0xd48] sm:$0xff]  ;;  %v12018_v30 = vcombine.low %v4054_v1, %v4062_v2  ;;  %v4150_v1 = vld [vmem:[#allocation25 + $0xf80] sm:$0xff] }
 0x5a9   :  { %9931 = vmatprep.subr.bf16.mxu1 %v11939_v36  ;;  %10095 = vmatprep.subr.bf16.mxu0 %v11941_v38  ;;  %v12035_v36 = vcombine.high %v4070_v8, %v4078_v13  ;;  %v12037_v38 = vcombine.high %v4071_v25, %v4079_v26 }
 0x5ac   :  { %9932 = vmatpush1.bf16.msra.mxu1 %v11938_v39  ;;  %10096 = vmatpush1.bf16.msra.mxu0 %v11940_v11  ;;  %v12034_v39 = vcombine.low %v4070_v8, %v4078_v13  ;;  %v12036_v11 = vcombine.low %v4071_v25, %v4079_v26  ;;  %v4166_v13 = vld [vmem:[#allocation25 + $0x1000] sm:$0xff] }
 0x5ad   :  { %9933 = vmatprep.subr.bf16.mxu1 %v11955_v45  ;;  %10097 = vmatprep.subr.bf16.mxu0 %v11957_v47  ;;  %v12053_v45 = vcombine.high %v4087_v20, %v4095_v10  ;;  %v4102_v47 = vld [vmem:[#allocation25 + $0xe00] sm:$0xff]  ;;  %v13020_v15 = vpop.eup %13019 }
 0x5ae   :  { %v12067_v40 = vcombine.high %v4102_v47, %v4110_v46  ;;  %v3516_v49 = vmul.f32 %v13020_v15, %v13936_v23  ;;  %v4142_v23 = vld [vmem:[#allocation25 + $0xf40] sm:$0xff] }
 0x5af   :  { %v4174_v26 = vld [vmem:[#allocation25 + $0x1040] sm:$0xff] }
 0x5b0   :  { %9934 = vmatpush1.bf16.msra.mxu1 %v11954_v22  ;;  %10098 = vmatpush1.bf16.msra.mxu0 %v11956_v43  ;;  %v12050_v22 = vcombine.low %v4086_v9, %v4094_v42  ;;  %v12052_v43 = vcombine.low %v4087_v20, %v4095_v10  ;;  %v3566_v61 = vmul.f32 %v3535_v51, %v3516_v49  ;;  %v4182_v20 = vld [vmem:[#allocation25 + $0x1080] sm:$0xff]  ;;  %v4199_v49 = vld [vmem:[#allocation25 + $0x1108] sm:$0xff] }
 0x5b1   :  { %9935 = vmatprep.subr.bf16.mxu1 %v11971_v48  ;;  %10099 = vmatprep.subr.bf16.mxu0 %v11973_v54  ;;  %v12069_v48 = vcombine.high %v4103_v14, %v4111_v24  ;;  %v4118_v54 = vld [vmem:[#allocation25 + $0xe80] sm:$0xff]  ;;  %v12131_v9 = vcombine.high %v4166_v13, %v4174_v26  ;;  %v13970_v24 = vsub.s32 7, %v13805_v18  ;;  %v4207_v51 = vld [vmem:[#allocation25 + $0x1148] sm:$0xff] }
 0x5b2   :  { %v3616_v2 = vadd.f32 %v3585_v27, %v3566_v61 }
 0x5b4   :  { %9936 = vmatpush1.bf16.msra.mxu1 %v11970_v56  ;;  %10100 = vmatpush1.bf16.msra.mxu0 %v11972_v57  ;;  %v4127_v56 = vld [vmem:[#allocation25 + $0xec8] sm:$0xff]  ;;  %v12066_v57 = vcombine.low %v4102_v47, %v4110_v46  ;;  %v3632_v25 = vmul.f32 0.2, %v3616_v2  ;;  %vm3624_vm10 = vcmp.gt.f32.partialorder %v3616_v2, 0.0  ;;  %v13967_v47 = vsub.s32 5, %v13805_v18 }
 0x5b5   :  { %9937 = vmatprep.subr.bf16.mxu1 %v11987_v59  ;;  %10101 = vmatprep.subr.bf16.mxu0 %v11989_v33  ;;  %v12083_v59 = vcombine.high %v4118_v54, %v4126_v44  ;;  %v12085_v33 = vcombine.high %v4119_v53, %v4127_v56  ;;  %v12084_v32 = vcombine.low %v4119_v53, %v4127_v56 }
 0x5b6   :  { %v3640_v10 = vsel %vm3624_vm10, %v3616_v2, %v3632_v25  ;;  %v12130_v46 = vcombine.low %v4166_v13, %v4174_v26  ;;  %v4230_v25 = vld [vmem:[#allocation25 + $0x1200] sm:$0xff] }
 0x5b7   :  { %v13972_v15 = vpack.c.bf16 %v3640_v10, %v3640_v10 }
 0x5b8   :  { %9938 = vmatpush1.bf16.msra.mxu1 %v11986_v29  ;;  %10102 = vmatpush1.bf16.msra.mxu0 %v11988_v31  ;;  %v4143_v29 = vld [vmem:[#allocation25 + $0xf48] sm:$0xff]  ;;  %v12082_v31 = vcombine.low %v4118_v54, %v4126_v44  ;;  %v4206_v54 = vld [vmem:[#allocation25 + $0x1140] sm:$0xff]  ;;  %v1745_v44 = vrot.slane %v13910_v50, %v13967_v47 }
 0x5b9   :  { %9939 = vmatprep.subr.bf16.mxu1 %v12003_v63  ;;  %10103 = vmatprep.subr.bf16.mxu0 %v12005_v0  ;;  %v12099_v63 = vcombine.high %v4134_v60, %v4142_v23  ;;  %v12101_v0 = vcombine.high %v4135_v28, %v4143_v29 }
 0x5bc   :  { %9940 = vmatpush1.bf16.msra.mxu1 %v12002_v7  ;;  %10104 = vmatpush1.bf16.msra.mxu0 %v12004_v16  ;;  %v4159_v7 = vld [vmem:[#allocation25 + $0xfc8] sm:$0xff]  ;;  %v12098_v16 = vcombine.low %v4134_v60, %v4142_v23  ;;  %v4214_v60 = vld [vmem:[#allocation25 + $0x1180] sm:$0xff] }
 0x5bd   :  { %9941 = vmatprep.subr.bf16.mxu1 %v12019_v17  ;;  %10105 = vmatprep.subr.bf16.mxu0 %v12021_v5  ;;  %v12100_v17 = vcombine.low %v4135_v28, %v4143_v29  ;;  %v12115_v5 = vcombine.high %v4150_v1, %v4158_v3  ;;  %v12117_v8 = vcombine.high %v4151_v12, %v4159_v7  ;;  %v4222_v28 = vld [vmem:[#allocation25 + $0x11c0] sm:$0xff]  ;;  %v4215_v29 = vld [vmem:[#allocation25 + $0x1188] sm:$0xff] }
 0x5be   :  { %v12178_v10 = vcombine.low %v4214_v60, %v4222_v28 }
 0x5c0   :  { %9942 = vmatpush1.bf16.msra.mxu1 %v12018_v30  ;;  %10106 = vmatpush1.bf16.msra.mxu0 %v12020_v34  ;;  %v4167_v30 = vld [vmem:[#allocation25 + $0x1008] sm:$0xff] }
 0x5c1   :  { %9943 = vmatprep.subr.bf16.mxu1 %v12035_v36  ;;  %10107 = vmatprep.subr.bf16.mxu0 %v12037_v38  ;;  %v4175_v34 = vld [vmem:[#allocation25 + $0x1048] sm:$0xff]  ;;  %v12114_v36 = vcombine.low %v4150_v1, %v4158_v3  ;;  %v12116_v38 = vcombine.low %v4151_v12, %v4159_v7 }
 0x5c2   :  { %v12133_v42 = vcombine.high %v4167_v30, %v4175_v34  ;;  %v12132_v14 = vcombine.low %v4167_v30, %v4175_v34  ;;  %v4238_v34 = vld [vmem:[#allocation25 + $0x1240] sm:$0xff] }
 0x5c4   :  { %9944 = vmatpush1.bf16.msra.mxu1 %v12034_v39  ;;  %10108 = vmatpush1.bf16.msra.mxu0 %v12036_v11  ;;  %v13964_v39 = vsub.s32 4, %v13805_v18  ;;  %v4190_v11 = vld [vmem:[#allocation25 + $0x10c0] sm:$0xff] }
 0x5c5   :  { %9945 = vmatprep.subr.bf16.mxu1 %v12051_v41  ;;  %10109 = vmatprep.subr.bf16.mxu0 %v12053_v45  ;;  %v4183_v41 = vld [vmem:[#allocation25 + $0x1088] sm:$0xff]  ;;  %v12146_v53 = vcombine.low %v4182_v20, %v4190_v11 }
 0x5c6   :  { %v4191_v45 = vld [vmem:[#allocation25 + $0x10c8] sm:$0xff] }
 0x5c7   :  { %v12148_v56 = vcombine.low %v4183_v41, %v4191_v45 }
 0x5c8   :  { %9946 = vmatpush1.bf16.msra.mxu1 %v12050_v22  ;;  %10110 = vmatpush1.bf16.msra.mxu0 %v12052_v43  ;;  %v12147_v22 = vcombine.high %v4182_v20, %v4190_v11  ;;  %v12149_v43 = vcombine.high %v4183_v41, %v4191_v45  ;;  %v12195_v45 = vcombine.high %v4230_v25, %v4238_v34 }
 0x5c9   :  { %9947 = vmatprep.subr.bf16.mxu1 %v12067_v40  ;;  %10111 = vmatprep.subr.bf16.mxu0 %v12069_v48  ;;  %v4198_v40 = vld [vmem:[#allocation25 + $0x1100] sm:$0xff]  ;;  %v1741_v48 = vrot.slane %v13910_v50, %v13964_v39 }
 0x5ca   :  { %v12162_v7 = vcombine.low %v4198_v40, %v4206_v54 }
 0x5cc   :  { %9948 = vmatpush1.bf16.msra.mxu1 %v12066_v57  ;;  %10112 = vmatpush1.bf16.msra.mxu0 %v12068_v58  ;;  %v1753_v57 = vrot.slane %v13910_v50, %v13970_v24 }
 0x5cd   :  { %9949 = vmatprep.subr.bf16.mxu1 %v12083_v59  ;;  %10113 = vmatprep.subr.bf16.mxu0 %v12085_v33  ;;  %v12163_v59 = vcombine.high %v4198_v40, %v4206_v54  ;;  %v12165_v33 = vcombine.high %v4199_v49, %v4207_v51  ;;  %v4254_v40 = vld [vmem:[#allocation25 + $0x12c0] sm:$0xff]  ;;  %v4255_v54 = vld [vmem:[#allocation25 + $0x12c8] sm:$0xff] }
 0x5d0   :  { %9950 = vmatpush1.bf16.msra.mxu1 %v12082_v31  ;;  %10114 = vmatpush1.bf16.msra.mxu0 %v12084_v32  ;;  %v4223_v31 = vld [vmem:[#allocation25 + $0x11c8] sm:$0xff] }
 0x5d1   :  { %9951 = vmatprep.subr.bf16.mxu1 %v12099_v63  ;;  %10115 = vmatprep.subr.bf16.mxu0 %v12101_v0  ;;  %v12181_v13 = vcombine.high %v4215_v29, %v4223_v31  ;;  %v12180_v11 = vcombine.low %v4215_v29, %v4223_v31  ;;  %v4270_v29 = vld [vmem:[#allocation25 + $0x1340] sm:$0xff]  ;;  %v4263_v31 = vld [vmem:[#allocation25 + $0x1308] sm:$0xff] }
 0x5d4   :  { %9952 = vmatpush1.bf16.msra.mxu1 %v12098_v16  ;;  %10116 = vmatpush1.bf16.msra.mxu0 %v12100_v17  ;;  %v12164_v16 = vcombine.low %v4199_v49, %v4207_v51 }
 0x5d5   :  { %9953 = vmatprep.subr.bf16.mxu1 %v12115_v5  ;;  %10117 = vmatprep.subr.bf16.mxu0 %v12117_v8  ;;  %v12179_v8 = vcombine.high %v4214_v60, %v4222_v28  ;;  %v4262_v60 = vld [vmem:[#allocation25 + $0x1300] sm:$0xff] }
 0x5d8   :  { %9954 = vmatpush1.bf16.msra.mxu1 %v12114_v36  ;;  %10118 = vmatpush1.bf16.msra.mxu0 %v12116_v38  ;;  %v4231_v36 = vld [vmem:[#allocation25 + $0x1208] sm:$0xff] }
 0x5d9   :  { %9964 = vmatprep.subr.bf16.mxu1 %v12131_v9  ;;  %10128 = vmatprep.subr.bf16.mxu0 %v12133_v42  ;;  %v4239_v38 = vld [vmem:[#allocation25 + $0x1248] sm:$0xff] }
 0x5db   :  { %9956 = vmatmul.mubr.bf16.vlgmr.msra.gmra.mrb[16].mxu1 %v13972_v15  ;;  %10120 = vmatmul.mubr.bf16.vlgmr.msra.gmra.mrb[20].mxu0 %v13972_v15 }
 0x5dc   :  { %9965 = vmatpush1.bf16.msra.mxu1 %v12130_v46  ;;  %10129 = vmatpush1.bf16.msra.mxu0 %v12132_v14  ;;  %v12197_v46 = vcombine.high %v4231_v36, %v4239_v38  ;;  %v4246_v14 = vld [vmem:[#allocation25 + $0x1280] sm:$0xff] }
 0x5dd   :  { %9966 = vmatprep.subr.bf16.mxu1 %v12147_v22  ;;  %10130 = vmatprep.subr.bf16.mxu0 %v12149_v43 }
 0x5de   :  { %v3281_v58 = vpop.f32.mrb[12].mxu1 }
 0x5df   :  { %v13982_v61 = vadd.f32 %v3281_v58, %v1741_v48  ;;  %v13984_v27 = vpop.f32.mrb[16].mxu0  ;;  %v3283_v23 = vpop.f32.mrb[13].mxu1  ;;  %v4247_v48 = vld [vmem:[#allocation25 + $0x1288] sm:$0xff] }
 0x5e0   :  { %v13986_v32 = vadd.f32 %v3283_v23, %v1745_v44  ;;  %v3365_v63 = vpop.f32.mrb[17].mxu0  ;;  %v3285_v0 = vpop.f32.mrb[14].mxu1  ;;  %9967 = vmatpush1.bf16.msra.mxu1 %v12146_v53  ;;  %10131 = vmatpush1.bf16.msra.mxu0 %v12148_v56  ;;  %v12194_v53 = vcombine.low %v4230_v25, %v4238_v34  ;;  %v12196_v56 = vcombine.low %v4231_v36, %v4239_v38  ;;  %v4287_v34 = vld [vmem:[#allocation25 + $0x13c8] sm:$0xff] }
 0x5e1   :  { %v3394_v1 = vrot.slane %v13982_v61, 4  ;;  %v13989_v2 = vadd.f32 %v3365_v63, %v1753_v57  ;;  %v3367_v3 = vpop.f32.mrb[18].mxu0  ;;  %v3286_v12 = vpop.f32.mrb[15].mxu1  ;;  %9968 = vmatprep.subr.bf16.mxu1 %v12163_v59  ;;  %10132 = vmatprep.subr.bf16.mxu0 %v12165_v33  ;;  %v13997_v57 = vsub.s32 6, %v13805_v18  ;;  %v12211_v59 = vcombine.high %v4246_v14, %v4254_v40  ;;  %v4271_v63 = vld [vmem:[#allocation25 + $0x1348] sm:$0xff] }
 0x5e2   :  { %v3400_v17 = vrot.slane %v13986_v32, 4  ;;  %v3368_v5 = vpop.f32.mrb[19].mxu0  ;;  %v12213_v33 = vcombine.high %v4247_v48, %v4255_v54  ;;  %v12210_v12 = vcombine.low %v4246_v14, %v4254_v40  ;;  %v12226_v38 = vcombine.low %v4262_v60, %v4270_v29  ;;  %v4303_v14 = vld [vmem:[#allocation25 + $0x1448] sm:$0xff] }
 0x5e3   :  { %v3395_v26 = vadd.f32 %v13982_v61, %v3394_v1  ;;  %v3412_v30 = vrot.slane %v13989_v2, 4  ;;  %v1749_v18 = vrot.slane %v13910_v50, %v13997_v57  ;;  %v12229_v5 = vcombine.high %v4263_v31, %v4271_v63 }
 0x5e4   :  { %v3401_v9 = vadd.f32 %v13986_v32, %v3400_v17  ;;  %9969 = vmatpush1.bf16.msra.mxu1 %v12162_v7  ;;  %10133 = vmatpush1.bf16.msra.mxu0 %v12164_v16  ;;  %v12212_v7 = vcombine.low %v4247_v48, %v4255_v54  ;;  %v12227_v17 = vcombine.high %v4262_v60, %v4270_v29  ;;  %v4319_v60 = vld [vmem:[#allocation25 + $0x14c8] sm:$0xff] }
 0x5e5   :  { %v3396_v42 = vrot.slane %v3395_v26, 2  ;;  %v3413_v20 = vadd.f32 %v13989_v2, %v3412_v30  ;;  %9970 = vmatprep.subr.bf16.mxu1 %v12179_v8  ;;  %10134 = vmatprep.subr.bf16.mxu0 %v12181_v13  ;;  %v4278_v8 = vld [vmem:[#allocation25 + $0x1380] sm:$0xff]  ;;  %v4279_v30 = vld [vmem:[#allocation25 + $0x1388] sm:$0xff] }
 0x5e6   :  { %v3402_v41 = vrot.slane %v3401_v9, 2  ;;  %v4286_v13 = vld [vmem:[#allocation25 + $0x13c0] sm:$0xff]  ;;  %v12244_v48 = vcombine.low %v4279_v30, %v4287_v34 }
 0x5e7   :  { %v3397_v22 = vadd.f32 %v3396_v42, %v3395_v26  ;;  %v3414_v43 = vrot.slane %v3413_v20, 2 }
 0x5e8   :  { %v3403_v49 = vadd.f32 %v3402_v41, %v3401_v9  ;;  %9971 = vmatpush1.bf16.msra.mxu1 %v12178_v10  ;;  %10135 = vmatpush1.bf16.msra.mxu0 %v12180_v11  ;;  %v12228_v9 = vcombine.low %v4263_v31, %v4271_v63  ;;  %v4294_v11 = vld [vmem:[#allocation25 + $0x1400] sm:$0xff] }
 0x5e9   :  { %v3398_v51 = vrot.slane %v3397_v22, 1  ;;  %v3415_v44 = vadd.f32 %v3414_v43, %v3413_v20  ;;  %9972 = vmatprep.subr.bf16.mxu1 %v12195_v45  ;;  %10136 = vmatprep.subr.bf16.mxu0 %v12197_v46  ;;  %v12243_v20 = vcombine.high %v4278_v8, %v4286_v13  ;;  %v4302_v46 = vld [vmem:[#allocation25 + $0x1440] sm:$0xff] }
 0x5ea   :  { %v3404_v58 = vrot.slane %v3403_v49, 1 }
 0x5eb   :  { %v3399_v23 = vadd.f32 %v3398_v51, %v3397_v22  ;;  %v3416_v28 = vrot.slane %v3415_v44, 1  ;;  %v12259_v51 = vcombine.high %v4294_v11, %v4302_v46 }
 0x5ec   :  { %v3405_v0 = vadd.f32 %v3404_v58, %v3403_v49  ;;  %9973 = vmatpush1.bf16.msra.mxu1 %v12194_v53  ;;  %10137 = vmatpush1.bf16.msra.mxu0 %v12196_v56  ;;  %v4310_v53 = vld [vmem:[#allocation25 + $0x1480] sm:$0xff] }
 0x5ed   :  { %v3422_v1 = vmul.f32 0.125, %v3399_v23  ;;  %v3417_v3 = vadd.f32 %v3416_v28, %v3415_v44  ;;  %9974 = vmatprep.subr.bf16.mxu1 %v12211_v59  ;;  %10138 = vmatprep.subr.bf16.mxu0 %v12213_v33  ;;  %v4318_v56 = vld [vmem:[#allocation25 + $0x14c0] sm:$0xff]  ;;  %v4311_v33 = vld [vmem:[#allocation25 + $0x1488] sm:$0xff]  ;;  %v12258_v28 = vcombine.low %v4294_v11, %v4302_v46 }
 0x5ee   :  { %v3423_v16 = vmul.f32 0.125, %v3405_v0  ;;  %v12275_v0 = vcombine.high %v4310_v53, %v4318_v56  ;;  %v4343_v46 = vld [vmem:[#allocation25 + $0x1588] sm:$0xff] }
 0x5ef   :  { %v14002_v25 = vsub.f32 %v13982_v61, %v3422_v1  ;;  %v3425_v26 = vmul.f32 0.125, %v3417_v3  ;;  %v14013_v61 = vadd.f32 %v13984_v27, %v1749_v18  ;;  %v12242_v27 = vcombine.low %v4278_v8, %v4286_v13  ;;  %v4335_v8 = vld [vmem:[#allocation25 + $0x1548] sm:$0xff] }
 0x5f0   :  { %v14005_v36 = vsub.f32 %v13986_v32, %v3423_v16  ;;  %9975 = vmatpush1.bf16.msra.mxu1 %v12210_v12  ;;  %10139 = vmatpush1.bf16.msra.mxu0 %v12212_v7  ;;  %v12245_v32 = vcombine.high %v4279_v30, %v4287_v34  ;;  %v12277_v12 = vcombine.high %v4311_v33, %v4319_v60  ;;  %v4326_v7 = vld [vmem:[#allocation25 + $0x1500] sm:$0xff] }
 0x5f1   :  { %v3438_v50 = vmul.f32 %v14002_v25, %v14002_v25  ;;  %v14010_v42 = vsub.f32 %v13989_v2, %v3425_v26  ;;  %9976 = vmatprep.subr.bf16.mxu1 %v12227_v17  ;;  %10140 = vmatprep.subr.bf16.mxu0 %v12229_v5  ;;  %v4295_v2 = vld [vmem:[#allocation25 + $0x1408] sm:$0xff]  ;;  %v3406_v54 = vrot.slane %v14013_v61, 4  ;;  %v4334_v17 = vld [vmem:[#allocation25 + $0x1540] sm:$0xff]  ;;  %v12274_v34 = vcombine.low %v4310_v53, %v4318_v56 }
 0x5f2   :  { %v3439_v10 = vmul.f32 %v14005_v36, %v14005_v36  ;;  %v12261_v44 = vcombine.high %v4295_v2, %v4303_v14  ;;  %v12260_v63 = vcombine.low %v4295_v2, %v4303_v14  ;;  %v4327_v5 = vld [vmem:[#allocation25 + $0x1508] sm:$0xff]  ;;  %v4366_v56 = vld [vmem:[#allocation25 + $0x1640] sm:$0xff] }
 0x5f3   :  { %v3466_v41 = vrot.slane %v3438_v50, 4  ;;  %v3441_v45 = vmul.f32 %v14010_v42, %v14010_v42  ;;  %v3407_v1 = vadd.f32 %v14013_v61, %v3406_v54  ;;  %v4351_v2 = vld [vmem:[#allocation25 + $0x15c8] sm:$0xff] }
 0x5f4   :  { %v3472_v22 = vrot.slane %v3439_v10, 4  ;;  %9977 = vmatpush1.bf16.msra.mxu1 %v12226_v38  ;;  %10141 = vmatpush1.bf16.msra.mxu0 %v12228_v9  ;;  %v12276_v38 = vcombine.low %v4311_v33, %v4319_v60  ;;  %v12308_v60 = vcombine.low %v4343_v46, %v4351_v2 }
 0x5f5   :  { %v3467_v43 = vadd.f32 %v3466_v41, %v3438_v50  ;;  %v3484_v40 = vrot.slane %v3441_v45, 4  ;;  %9978 = vmatprep.subr.bf16.mxu1 %v12243_v20  ;;  %10142 = vmatprep.subr.bf16.mxu0 %v12245_v32  ;;  %v3408_v9 = vrot.slane %v3407_v1, 2  ;;  %v12291_v20 = vcombine.high %v4326_v7, %v4334_v17  ;;  %v4342_v32 = vld [vmem:[#allocation25 + $0x1580] sm:$0xff] }
 0x5f6   :  { %v3473_v49 = vadd.f32 %v3472_v22, %v3439_v10  ;;  %v12293_v10 = vcombine.high %v4327_v5, %v4335_v8 }
 0x5f7   :  { %v3468_v58 = vrot.slane %v3467_v43, 2  ;;  %v3485_v59 = vadd.f32 %v3484_v40, %v3441_v45  ;;  %v4350_v45 = vld [vmem:[#allocation25 + $0x15c0] sm:$0xff]  ;;  %v12290_v40 = vcombine.low %v4326_v7, %v4334_v17 }
 0x5f8   :  { %v3474_v23 = vrot.slane %v3473_v49, 2  ;;  %9979 = vmatpush1.bf16.msra.mxu1 %v12242_v27  ;;  %10143 = vmatpush1.bf16.msra.mxu0 %v12244_v48  ;;  %v12292_v27 = vcombine.low %v4327_v5, %v4335_v8  ;;  %v3409_v48 = vadd.f32 %v3408_v9, %v3407_v1  ;;  %v12306_v33 = vcombine.low %v4342_v32, %v4350_v45  ;;  %v4383_v1 = vld [vmem:[#allocation25 + $0x16c8] sm:$0xff]  ;;  %v4390_v17 = vld [vmem:[#allocation25 + $0x1700] sm:$0xff] }
 0x5f9   :  { %v3469_v29 = vadd.f32 %v3468_v58, %v3467_v43  ;;  %v3486_v31 = vrot.slane %v3485_v59, 2  ;;  %9980 = vmatprep.subr.bf16.mxu1 %v12259_v51  ;;  %10144 = vmatprep.subr.bf16.mxu0 %v12261_v44  ;;  %v12309_v51 = vcombine.high %v4343_v46, %v4351_v2  ;;  %v4358_v44 = vld [vmem:[#allocation25 + $0x1600] sm:$0xff]  ;;  %v4359_v58 = vld [vmem:[#allocation25 + $0x1608] sm:$0xff]  ;;  %v3547_v9 = vrot.slane %v13920_v4, %v13967_v47 }
 0x5fa   :  { %v3475_v3 = vadd.f32 %v3474_v23, %v3473_v49  ;;  %v12307_v49 = vcombine.high %v4342_v32, %v4350_v45  ;;  %v3410_v23 = vrot.slane %v3409_v48, 1  ;;  %v4398_v5 = vld [vmem:[#allocation25 + $0x1740] sm:$0xff]  ;;  %v4391_v8 = vld [vmem:[#allocation25 + $0x1708] sm:$0xff] }
 0x5fb   :  { %v3470_v18 = vrot.slane %v3469_v29, 1  ;;  %v3487_v16 = vadd.f32 %v3486_v31, %v3485_v59  ;;  %v4367_v59 = vld [vmem:[#allocation25 + $0x1648] sm:$0xff]  ;;  %v4374_v31 = vld [vmem:[#allocation25 + $0x1680] sm:$0xff] }
 0x5fc   :  { %v3476_v13 = vrot.slane %v3475_v3, 1  ;;  %9981 = vmatpush1.bf16.msra.mxu1 %v12258_v28  ;;  %10145 = vmatpush1.bf16.msra.mxu0 %v12260_v63  ;;  %v12323_v28 = vcombine.high %v4358_v44, %v4366_v56  ;;  %v4382_v63 = vld [vmem:[#allocation25 + $0x16c0] sm:$0xff]  ;;  %v3411_v7 = vadd.f32 %v3410_v23, %v3409_v48  ;;  %v4407_v46 = vld [vmem:[#allocation25 + $0x1788] sm:$0xff] }
 0x5fd   :  { %v3471_v26 = vadd.f32 %v3470_v18, %v3469_v29  ;;  %v3488_v30 = vrot.slane %v3487_v16, 1  ;;  %9982 = vmatprep.subr.bf16.mxu1 %v12275_v0  ;;  %10146 = vmatprep.subr.bf16.mxu0 %v12277_v12  ;;  %v12325_v29 = vcombine.high %v4359_v58, %v4367_v59  ;;  %v4375_v0 = vld [vmem:[#allocation25 + $0x1688] sm:$0xff]  ;;  %v12324_v12 = vcombine.low %v4359_v58, %v4367_v59  ;;  %v4414_v45 = vld [vmem:[#allocation25 + $0x17c0] sm:$0xff] }
 0x5fe   :  { %v3477_v50 = vadd.f32 %v3476_v13, %v3475_v3  ;;  %v12322_v3 = vcombine.low %v4358_v44, %v4366_v56  ;;  %v12339_v18 = vcombine.high %v4374_v31, %v4382_v63  ;;  %v4399_v13 = vld [vmem:[#allocation25 + $0x1748] sm:$0xff]  ;;  %v3424_v32 = vmul.f32 0.125, %v3411_v7  ;;  %v4430_v59 = vld [vmem:[#allocation25 + $0x1840] sm:$0xff] }
 0x5ff   :  { %v3494_v11 = vmul.f32 0.125, %v3471_v26  ;;  %v3489_v41 = vadd.f32 %v3488_v30, %v3487_v16  ;;  %v12341_v16 = vcombine.high %v4375_v0, %v4383_v1  ;;  %v3543_v26 = vrot.slane %v13920_v4, %v13964_v39  ;;  %v4415_v2 = vld [vmem:[#allocation25 + $0x17c8] sm:$0xff]  ;;  %v4438_v7 = vld [vmem:[#allocation25 + $0x1880] sm:$0xff] }
 0x600   :  { %v3495_v14 = vmul.f32 0.125, %v3477_v50  ;;  %9983 = vmatpush1.bf16.msra.mxu1 %v12274_v34  ;;  %10147 = vmatpush1.bf16.msra.mxu0 %v12276_v38  ;;  %v12338_v30 = vcombine.low %v4374_v31, %v4382_v63  ;;  %v3593_v38 = vrot.slane %v13922_v6, %v13964_v39  ;;  %v12340_v50 = vcombine.low %v4375_v0, %v4383_v1 }
 0x601   :  { %v3502_v22 = vadd.f32 0.8, %v3494_v11  ;;  %v3497_v43 = vmul.f32 0.125, %v3489_v41  ;;  %9984 = vmatprep.subr.bf16.mxu1 %v12291_v20  ;;  %10148 = vmatprep.subr.bf16.mxu0 %v12293_v10  ;;  %v4406_v20 = vld [vmem:[#allocation25 + $0x1780] sm:$0xff]  ;;  %v12355_v11 = vcombine.high %v4390_v17, %v4398_v5  ;;  %v12357_v41 = vcombine.high %v4391_v8, %v4399_v13 }
 0x602   :  { %v3503_v54 = vadd.f32 0.8, %v3495_v14  ;;  %v12371_v44 = vcombine.high %v4406_v20, %v4414_v45  ;;  %v14037_v58 = vsub.f32 %v14013_v61, %v3424_v32  ;;  %v12372_v31 = vcombine.low %v4407_v46, %v4415_v2  ;;  %v4455_v32 = vld [vmem:[#allocation25 + $0x1908] sm:$0xff] }
 0x603   :  { %13021 = vrsqrt.f32 %v3502_v22  ;;  %v3505_v53 = vadd.f32 0.8, %v3497_v43  ;;  %v3597_v22 = vrot.slane %v13922_v6, %v13967_v47  ;;  %v3555_v43 = vrot.slane %v13920_v4, %v13970_v24 }
 0x604   :  { %13023 = vrsqrt.f32 %v3503_v54  ;;  %9985 = vmatpush1.bf16.msra.mxu1 %v12290_v40  ;;  %10149 = vmatpush1.bf16.msra.mxu0 %v12292_v27  ;;  %v3605_v40 = vrot.slane %v13922_v6, %v13970_v24  ;;  %v12354_v54 = vcombine.low %v4390_v17, %v4398_v5  ;;  %v4422_v6 = vld [vmem:[#allocation25 + $0x1800] sm:$0xff]  ;;  %v3440_v61 = vmul.f32 %v14037_v58, %v14037_v58  ;;  %v4439_v5 = vld [vmem:[#allocation25 + $0x1888] sm:$0xff] }
 0x605   :  { %13025 = vrsqrt.f32 %v3505_v53  ;;  %9986 = vmatprep.subr.bf16.mxu1 %v12307_v49  ;;  %10150 = vmatprep.subr.bf16.mxu0 %v12309_v51  ;;  %v12356_v49 = vcombine.low %v4391_v8, %v4399_v13  ;;  %v12373_v53 = vcombine.high %v4407_v46, %v4415_v2  ;;  %v12387_v63 = vcombine.high %v4422_v6, %v4430_v59  ;;  %v4446_v17 = vld [vmem:[#allocation25 + $0x18c0] sm:$0xff]  ;;  %v4447_v8 = vld [vmem:[#allocation25 + $0x18c8] sm:$0xff] }
 0x606   :  { %v12404_v46 = vcombine.low %v4439_v5, %v4447_v8 }
 0x608   :  { %9987 = vmatpush1.bf16.msra.mxu1 %v12306_v33  ;;  %10151 = vmatpush1.bf16.msra.mxu0 %v12308_v60  ;;  %v4423_v60 = vld [vmem:[#allocation25 + $0x1808] sm:$0xff] }
 0x609   :  { %9988 = vmatprep.subr.bf16.mxu1 %v12323_v28  ;;  %10152 = vmatprep.subr.bf16.mxu0 %v12325_v29 }
 0x60c   :  { %9989 = vmatpush1.bf16.msra.mxu1 %v12322_v3  ;;  %10153 = vmatpush1.bf16.msra.mxu0 %v12324_v12 }
 0x60d   :  { %v13022_v34 = vpop.eup %13021  ;;  %9990 = vmatprep.subr.bf16.mxu1 %v12339_v18  ;;  %10154 = vmatprep.subr.bf16.mxu0 %v12341_v16  ;;  %v12386_v16 = vcombine.low %v4422_v6, %v4430_v59  ;;  %v4495_v6 = vld [vmem:[#allocation25 + $0x1a48] sm:$0xff] }
 0x60e   :  { %v3518_v10 = vmul.f32 %v13022_v34, %v14002_v25  ;;  %v13024_v14 = vpop.eup %13023 }
 0x60f   :  { %v13026_v27 = vpop.eup %13025  ;;  %v3519_v48 = vmul.f32 %v13024_v14, %v14005_v36  ;;  %v4431_v36 = vld [vmem:[#allocation25 + $0x1848] sm:$0xff] }
 0x610   :  { %v3568_v25 = vmul.f32 %v3543_v26, %v3518_v10  ;;  %v3521_v51 = vmul.f32 %v13026_v27, %v14010_v42  ;;  %9991 = vmatpush1.bf16.msra.mxu1 %v12338_v30  ;;  %10155 = vmatpush1.bf16.msra.mxu0 %v12340_v50  ;;  %v12370_v42 = vcombine.low %v4406_v20, %v4414_v45  ;;  %v4462_v10 = vld [vmem:[#allocation25 + $0x1940] sm:$0xff]  ;;  %v4471_v27 = vld [vmem:[#allocation25 + $0x1988] sm:$0xff] }
 0x611   :  { %v3569_v4 = vmul.f32 %v3547_v9, %v3519_v48  ;;  %9992 = vmatprep.subr.bf16.mxu1 %v12355_v11  ;;  %10156 = vmatprep.subr.bf16.mxu0 %v12357_v41  ;;  %v12389_v1 = vcombine.high %v4423_v60, %v4431_v36  ;;  %v12388_v30 = vcombine.low %v4423_v60, %v4431_v36  ;;  %v4454_v9 = vld [vmem:[#allocation25 + $0x1900] sm:$0xff]  ;;  %v4463_v11 = vld [vmem:[#allocation25 + $0x1948] sm:$0xff] }
 0x612   :  { %v3618_v56 = vadd.f32 %v3593_v38, %v3568_v25  ;;  %v3571_v33 = vmul.f32 %v3555_v43, %v3521_v51  ;;  %v3478_v38 = vrot.slane %v3440_v61, 4  ;;  %v12403_v50 = vcombine.high %v4438_v7, %v4446_v17  ;;  %v4470_v43 = vld [vmem:[#allocation25 + $0x1980] sm:$0xff]  ;;  %v4479_v25 = vld [vmem:[#allocation25 + $0x19c8] sm:$0xff] }
 0x613   :  { %v3619_v28 = vadd.f32 %v3597_v22, %v3569_v4  ;;  %v12405_v20 = vcombine.high %v4439_v5, %v4447_v8  ;;  %v12402_v45 = vcombine.low %v4438_v7, %v4446_v17  ;;  %v12419_v14 = vcombine.high %v4454_v9, %v4462_v10  ;;  %v4487_v4 = vld [vmem:[#allocation25 + $0x1a08] sm:$0xff]  ;;  %v4526_v7 = vld [vmem:[#allocation25 + $0x1b40] sm:$0xff] }
 0x614   :  { %vm3626_vm11 = vcmp.gt.f32.partialorder %v3618_v56, 0.0  ;;  %v3634_v23 = vmul.f32 0.2, %v3618_v56  ;;  %v3621_v29 = vadd.f32 %v3605_v40, %v3571_v33  ;;  %9993 = vmatpush1.bf16.msra.mxu1 %v12354_v54  ;;  %10157 = vmatpush1.bf16.msra.mxu0 %v12356_v49  ;;  %v3479_v2 = vadd.f32 %v3478_v38, %v3440_v61  ;;  %v4478_v40 = vld [vmem:[#allocation25 + $0x19c0] sm:$0xff] }
 0x615   :  { %vm3627_vm12 = vcmp.gt.f32.partialorder %v3619_v28, 0.0  ;;  %v3635_v0 = vmul.f32 0.2, %v3619_v28  ;;  %9994 = vmatprep.subr.bf16.mxu1 %v12371_v44  ;;  %10158 = vmatprep.subr.bf16.mxu0 %v12373_v53  ;;  %v12421_v22 = vcombine.high %v4455_v32, %v4463_v11  ;;  %v12418_v48 = vcombine.low %v4454_v9, %v4462_v10  ;;  %v4486_v53 = vld [vmem:[#allocation25 + $0x1a00] sm:$0xff] }
 0x616   :  { %v3642_v3 = vsel %vm3626_vm11, %v3618_v56, %v3634_v23  ;;  %vm3629_vm13 = vcmp.gt.f32.partialorder %v3621_v29, 0.0  ;;  %v3637_v12 = vmul.f32 0.2, %v3621_v29  ;;  %v12420_v54 = vcombine.low %v4455_v32, %v4463_v11  ;;  %v4494_v56 = vld [vmem:[#allocation25 + $0x1a40] sm:$0xff] }
 0x617   :  { %v3643_v18 = vsel %vm3627_vm12, %v3619_v28, %v3635_v0  ;;  %v14043_v34 = vpack.c.bf16 %v3642_v3, %v3642_v3  ;;  %v3480_v49 = vrot.slane %v3479_v2, 2  ;;  %v12435_v51 = vcombine.high %v4470_v43, %v4478_v40  ;;  %v4502_v28 = vld [vmem:[#allocation25 + $0x1a80] sm:$0xff] }
 0x618   :  { %v14041_v13 = vpack.c.bf16 %v3643_v18, %v3643_v18  ;;  %v3645_v26 = vsel %vm3629_vm13, %v3621_v29, %v3637_v12  ;;  %9995 = vmatpush1.bf16.msra.mxu1 %v12370_v42  ;;  %10159 = vmatpush1.bf16.msra.mxu0 %v12372_v31  ;;  %v12437_v44 = vcombine.high %v4471_v27, %v4479_v25  ;;  %v4510_v42 = vld [vmem:[#allocation25 + $0x1ac0] sm:$0xff]  ;;  %v4503_v29 = vld [vmem:[#allocation25 + $0x1a88] sm:$0xff] }
 0x619   :  { %10005 = vmatprep.subr.bf16.mxu1 %v12387_v63  ;;  %10169 = vmatprep.subr.bf16.mxu0 %v12389_v1  ;;  %v14047_v41 = vpack.c.bf16 %v3645_v26, %v3645_v26  ;;  %v12434_v59 = vcombine.low %v4470_v43, %v4478_v40  ;;  %v12436_v33 = vcombine.low %v4471_v27, %v4479_v25  ;;  %v4511_v31 = vld [vmem:[#allocation25 + $0x1ac8] sm:$0xff]  ;;  %v4518_v12 = vld [vmem:[#allocation25 + $0x1b00] sm:$0xff] }
 0x61a   :  { %9996 = vmatprep.mubr.bf16.mxu1 %v14041_v13  ;;  %10160 = vmatprep.mubr.bf16.mxu0 %v14041_v13  ;;  %v3481_v60 = vadd.f32 %v3480_v49, %v3479_v2  ;;  %v12451_v36 = vcombine.high %v4486_v53, %v4494_v56  ;;  %v12453_v23 = vcombine.high %v4487_v4, %v4495_v6  ;;  %v4519_v18 = vld [vmem:[#allocation25 + $0x1b08] sm:$0xff]  ;;  %v4534_v38 = vld [vmem:[#allocation25 + $0x1b80] sm:$0xff] }
 0x61b   :  { %9997 = vmatmul.mubr.bf16.vlgmr.msra.gmra.mrb[16].mxu1 %v14043_v34  ;;  %10161 = vmatmul.mubr.bf16.vlgmr.msra.gmra.mrb[20].mxu0 %v14043_v34  ;;  %v12450_v63 = vcombine.low %v4486_v53, %v4494_v56  ;;  %v12452_v61 = vcombine.low %v4487_v4, %v4495_v6  ;;  %v12467_v1 = vcombine.high %v4502_v28, %v4510_v42  ;;  %v4542_v9 = vld [vmem:[#allocation25 + $0x1bc0] sm:$0xff]  ;;  %v4559_v43 = vld [vmem:[#allocation25 + $0x1c48] sm:$0xff] }
 0x61c   :  { %10006 = vmatpush1.bf16.msra.mxu1 %v12386_v16  ;;  %10170 = vmatpush1.bf16.msra.mxu0 %v12388_v30  ;;  %v3482_v0 = vrot.slane %v3481_v60, 1  ;;  %v12469_v3 = vcombine.high %v4503_v29, %v4511_v31  ;;  %v4527_v16 = vld [vmem:[#allocation25 + $0x1b48] sm:$0xff]  ;;  %v12466_v17 = vcombine.low %v4502_v28, %v4510_v42  ;;  %v12468_v5 = vcombine.low %v4503_v29, %v4511_v31  ;;  %v4550_v2 = vld [vmem:[#allocation25 + $0x1c00] sm:$0xff] }
 0x61d   :  { %10037 = vmatprep.mubr.bf16.mxu1 %v14047_v41  ;;  %10201 = vmatprep.mubr.bf16.mxu0 %v14047_v41  ;;  %v12483_v26 = vcombine.high %v4518_v12, %v4526_v7  ;;  %v12485_v30 = vcombine.high %v4519_v18, %v4527_v16  ;;  %v12482_v10 = vcombine.low %v4518_v12, %v4526_v7  ;;  %v4566_v49 = vld [vmem:[#allocation25 + $0x1c80] sm:$0xff]  ;;  %v4575_v53 = vld [vmem:[#allocation25 + $0x1cc8] sm:$0xff] }
 0x61e   :  { %10007 = vmatprep.subr.bf16.mxu1 %v12403_v50  ;;  %10171 = vmatprep.subr.bf16.mxu0 %v12405_v20  ;;  %v3483_v8 = vadd.f32 %v3482_v0, %v3481_v60  ;;  %v4535_v50 = vld [vmem:[#allocation25 + $0x1b88] sm:$0xff]  ;;  %v12484_v32 = vcombine.low %v4519_v18, %v4527_v16  ;;  %v12498_v40 = vcombine.low %v4534_v38, %v4542_v9  ;;  %v4590_v60 = vld [vmem:[#allocation25 + $0x1d40] sm:$0xff] }
 0x61f   :  { %v4543_v20 = vld [vmem:[#allocation25 + $0x1bc8] sm:$0xff]  ;;  %v4614_v16 = vld [vmem:[#allocation25 + $0x1e00] sm:$0xff] }
 0x620   :  { %10008 = vmatpush1.bf16.msra.mxu1 %v12402_v45  ;;  %10172 = vmatpush1.bf16.msra.mxu0 %v12404_v46  ;;  %v3496_v11 = vmul.f32 0.125, %v3483_v8  ;;  %v12499_v45 = vcombine.high %v4534_v38, %v4542_v9  ;;  %v12501_v46 = vcombine.high %v4535_v50, %v4543_v20  ;;  %v12500_v27 = vcombine.low %v4535_v50, %v4543_v20  ;;  %v4599_v0 = vld [vmem:[#allocation25 + $0x1d88] sm:$0xff]  ;;  %v4630_v20 = vld [vmem:[#allocation25 + $0x1e80] sm:$0xff] }
 0x621   :  { %10009 = vmatprep.subr.bf16.mxu1 %v12419_v14  ;;  %10173 = vmatprep.subr.bf16.mxu0 %v12421_v22  ;;  %v4558_v14 = vld [vmem:[#allocation25 + $0x1c40] sm:$0xff]  ;;  %v4551_v22 = vld [vmem:[#allocation25 + $0x1c08] sm:$0xff] }
 0x622   :  { %v3504_v25 = vadd.f32 0.8, %v3496_v11  ;;  %v12514_v56 = vcombine.low %v4550_v2, %v4558_v14  ;;  %v12516_v4 = vcombine.low %v4551_v22, %v4559_v43  ;;  %v4623_v8 = vld [vmem:[#allocation25 + $0x1e48] sm:$0xff] }
 0x624   :  { %10010 = vmatpush1.bf16.msra.mxu1 %v12418_v48  ;;  %10174 = vmatpush1.bf16.msra.mxu0 %v12420_v54  ;;  %v12515_v48 = vcombine.high %v4550_v2, %v4558_v14  ;;  %v12517_v54 = vcombine.high %v4551_v22, %v4559_v43  ;;  %13027 = vrsqrt.f32 %v3504_v25  ;;  %v4639_v2 = vld [vmem:[#allocation25 + $0x1ec8] sm:$0xff] }
 0x625   :  { %10011 = vmatprep.subr.bf16.mxu1 %v12435_v51  ;;  %10175 = vmatprep.subr.bf16.mxu0 %v12437_v44  ;;  %v4574_v51 = vld [vmem:[#allocation25 + $0x1cc0] sm:$0xff]  ;;  %v4567_v44 = vld [vmem:[#allocation25 + $0x1c88] sm:$0xff] }
 0x626   :  { %v12531_v6 = vcombine.high %v4566_v49, %v4574_v51  ;;  %v12530_v28 = vcombine.low %v4566_v49, %v4574_v51  ;;  %v12532_v42 = vcombine.low %v4567_v44, %v4575_v53  ;;  %v4647_v49 = vld [vmem:[#allocation25 + $0x1f08] sm:$0xff] }
 0x627   :  { %v4655_v51 = vld [vmem:[#allocation25 + $0x1f48] sm:$0xff] }
 0x628   :  { %10012 = vmatpush1.bf16.msra.mxu1 %v12434_v59  ;;  %10176 = vmatpush1.bf16.msra.mxu0 %v12436_v33  ;;  %v12533_v59 = vcombine.high %v4567_v44, %v4575_v53  ;;  %v4582_v33 = vld [vmem:[#allocation25 + $0x1d00] sm:$0xff] }
 0x629   :  { %10013 = vmatprep.subr.bf16.mxu1 %v12451_v36  ;;  %10177 = vmatprep.subr.bf16.mxu0 %v12453_v23  ;;  %v4583_v36 = vld [vmem:[#allocation25 + $0x1d08] sm:$0xff]  ;;  %v12547_v29 = vcombine.high %v4582_v33, %v4590_v60 }
 0x62a   :  { %v4591_v23 = vld [vmem:[#allocation25 + $0x1d48] sm:$0xff] }
 0x62b   :  { %v12549_v31 = vcombine.high %v4583_v36, %v4591_v23  ;;  %v12548_v12 = vcombine.low %v4583_v36, %v4591_v23  ;;  %v4671_v36 = vld [vmem:[#allocation25 + $0x1fc8] sm:$0xff] }
 0x62c   :  { %10014 = vmatpush1.bf16.msra.mxu1 %v12450_v63  ;;  %10178 = vmatpush1.bf16.msra.mxu0 %v12452_v61  ;;  %v4598_v63 = vld [vmem:[#allocation25 + $0x1d80] sm:$0xff] }
 0x62d   :  { %10015 = vmatprep.subr.bf16.mxu1 %v12467_v1  ;;  %10179 = vmatprep.subr.bf16.mxu0 %v12469_v3  ;;  %v4606_v61 = vld [vmem:[#allocation25 + $0x1dc0] sm:$0xff]  ;;  %v4607_v1 = vld [vmem:[#allocation25 + $0x1dc8] sm:$0xff]  ;;  %v12546_v3 = vcombine.low %v4582_v33, %v4590_v60 }
 0x62e   :  { %v12563_v7 = vcombine.high %v4598_v63, %v4606_v61  ;;  %v12565_v18 = vcombine.high %v4599_v0, %v4607_v1  ;;  %v12564_v38 = vcombine.low %v4599_v0, %v4607_v1  ;;  %v4670_v33 = vld [vmem:[#allocation25 + $0x1fc0] sm:$0xff]  ;;  %v4663_v60 = vld [vmem:[#allocation25 + $0x1f88] sm:$0xff]  ;;  %v3657_v0 = vld [vmem:[#allocation25 + $0x18] sm:$0xff] }
 0x62f   :  { %v3665_v1 = vld [vmem:[#allocation25 + $0x58] sm:$0xff] }
 0x630   :  { %10016 = vmatpush1.bf16.msra.mxu1 %v12466_v17  ;;  %10180 = vmatpush1.bf16.msra.mxu0 %v12468_v5  ;;  %v4622_v17 = vld [vmem:[#allocation25 + $0x1e40] sm:$0xff]  ;;  %v4615_v5 = vld [vmem:[#allocation25 + $0x1e08] sm:$0xff] }
 0x631   :  { %10017 = vmatprep.subr.bf16.mxu1 %v12483_v26  ;;  %10181 = vmatprep.subr.bf16.mxu0 %v12485_v30  ;;  %v13028_v26 = vpop.eup %13027  ;;  %v12562_v30 = vcombine.low %v4598_v63, %v4606_v61  ;;  %v12579_v9 = vcombine.high %v4614_v16, %v4622_v17  ;;  %v12581_v50 = vcombine.high %v4615_v5, %v4623_v8  ;;  %v3664_v61 = vld [vmem:[#allocation25 + $0x50] sm:$0xff] }
 0x632   :  { %v12578_v14 = vcombine.low %v4614_v16, %v4622_v17  ;;  %v12580_v22 = vcombine.low %v4615_v5, %v4623_v8  ;;  %v3672_v17 = vld [vmem:[#allocation25 + $0x90] sm:$0xff]  ;;  %v3673_v8 = vld [vmem:[#allocation25 + $0x98] sm:$0xff] }
 0x633   :  { %v3680_v5 = vld [vmem:[#allocation25 + $0xd0] sm:$0xff] }
 0x634   :  { %10018 = vmatpush1.bf16.msra.mxu1 %v12482_v10  ;;  %10182 = vmatpush1.bf16.msra.mxu0 %v12484_v32  ;;  %v3520_v10 = vmul.f32 %v13028_v26, %v14037_v58  ;;  %v13061_v32 = vld [vmem:[#allocation22] sm:$0xff]  ;;  %v4654_v58 = vld [vmem:[#allocation25 + $0x1f40] sm:$0xff]  ;;  %v3681_v26 = vld [vmem:[#allocation25 + $0xd8] sm:$0xff] }
 0x635   :  { %10019 = vmatprep.subr.bf16.mxu1 %v12499_v45  ;;  %10183 = vmatprep.subr.bf16.mxu0 %v12501_v46  ;;  %v3551_v11 = vrot.slane %v13061_v32, %v13997_v57  ;;  %v4638_v45 = vld [vmem:[#allocation25 + $0x1ec0] sm:$0xff]  ;;  %v4631_v46 = vld [vmem:[#allocation25 + $0x1e88] sm:$0xff]  ;;  %v3696_v32 = vld [vmem:[#allocation25 + $0x150] sm:$0xff] }
 0x636   :  { %v12595_v43 = vcombine.high %v4630_v20, %v4638_v45  ;;  %v12594_v44 = vcombine.low %v4630_v20, %v4638_v45  ;;  %v12596_v53 = vcombine.low %v4631_v46, %v4639_v2  ;;  %v11641_v20 = vcombine.high %v3673_v8, %v3681_v26  ;;  %v3697_v45 = vld [vmem:[#allocation25 + $0x158] sm:$0xff] }
 0x637   :  { %v3570_v25 = vmul.f32 %v3551_v11, %v3520_v10  ;;  %v3688_v10 = vld [vmem:[#allocation25 + $0x110] sm:$0xff]  ;;  %v3689_v11 = vld [vmem:[#allocation25 + $0x118] sm:$0xff] }
 0x638   :  { %10020 = vmatpush1.bf16.msra.mxu1 %v12498_v40  ;;  %10184 = vmatpush1.bf16.msra.mxu0 %v12500_v27  ;;  %v12597_v40 = vcombine.high %v4631_v46, %v4639_v2  ;;  %v4646_v27 = vld [vmem:[#allocation25 + $0x1f00] sm:$0xff]  ;;  %v11638_v46 = vcombine.low %v3672_v17, %v3680_v5  ;;  %v11640_v2 = vcombine.low %v3673_v8, %v3681_v26  ;;  %v3769_v8 = vld [vmem:[#allocation25 + $0x398] sm:$0xff] }
 0x639   :  { %10021 = vmatprep.subr.bf16.mxu1 %v12515_v48  ;;  %10185 = vmatprep.subr.bf16.mxu0 %v12517_v54  ;;  %v13062_v48 = vld [vmem:[#allocation23] sm:$0xff]  ;;  %v12610_v23 = vcombine.low %v4646_v27, %v4654_v58 }
 0x63a   :  { %v3601_v54 = vrot.slane %v13062_v48, %v13997_v57  ;;  %v11654_v48 = vcombine.low %v3688_v10, %v3696_v32  ;;  %v3777_v26 = vld [vmem:[#allocation25 + $0x3d8] sm:$0xff] }
 0x63c   :  { %10022 = vmatpush1.bf16.msra.mxu1 %v12514_v56  ;;  %10186 = vmatpush1.bf16.msra.mxu0 %v12516_v4  ;;  %v12611_v56 = vcombine.high %v4646_v27, %v4654_v58  ;;  %v12613_v4 = vcombine.high %v4647_v49, %v4655_v51  ;;  %v3705_v27 = vld [vmem:[#allocation25 + $0x198] sm:$0xff] }
 0x63d   :  { %10023 = vmatprep.subr.bf16.mxu1 %v12531_v6  ;;  %10187 = vmatprep.subr.bf16.mxu0 %v12533_v59  ;;  %v4662_v6 = vld [vmem:[#allocation25 + $0x1f80] sm:$0xff]  ;;  %v3620_v59 = vadd.f32 %v3601_v54, %v3570_v25  ;;  %v3713_v25 = vld [vmem:[#allocation25 + $0x1d8] sm:$0xff]  ;;  %v11656_v54 = vcombine.low %v3689_v11, %v3697_v45 }
 0x63f   :  { %v3636_v63 = vmul.f32 0.2, %v3620_v59  ;;  %vm3628_vm14 = vcmp.gt.f32.partialorder %v3620_v59, 0.0 }
 0x640   :  { %10024 = vmatpush1.bf16.msra.mxu1 %v12530_v28  ;;  %10188 = vmatpush1.bf16.msra.mxu0 %v12532_v42  ;;  %v12612_v28 = vcombine.low %v4647_v49, %v4655_v51  ;;  %v12627_v42 = vcombine.high %v4662_v6, %v4670_v33  ;;  %v11673_v49 = vcombine.high %v3705_v27, %v3713_v25  ;;  %v3720_v51 = vld [vmem:[#allocation25 + $0x210] sm:$0xff] }
 0x641   :  { %10025 = vmatprep.subr.bf16.mxu1 %v12547_v29  ;;  %10189 = vmatprep.subr.bf16.mxu0 %v12549_v31  ;;  %v12629_v29 = vcombine.high %v4663_v60, %v4671_v36  ;;  %v3656_v31 = vld [vmem:[#allocation25 + $0x10] sm:$0xff]  ;;  %v3644_v16 = vsel %vm3628_vm14, %v3620_v59, %v3636_v63 }
 0x644   :  { %10026 = vmatpush1.bf16.msra.mxu1 %v12546_v3  ;;  %10190 = vmatpush1.bf16.msra.mxu0 %v12548_v12  ;;  %v12626_v3 = vcombine.low %v4662_v6, %v4670_v33  ;;  %v12628_v12 = vcombine.low %v4663_v60, %v4671_v36  ;;  %v11672_v6 = vcombine.low %v3705_v27, %v3713_v25  ;;  %v3736_v60 = vld [vmem:[#allocation25 + $0x290] sm:$0xff]  ;;  %v3801_v27 = vld [vmem:[#allocation25 + $0x498] sm:$0xff] }
 0x645   :  { %10027 = vmatprep.subr.bf16.mxu1 %v12563_v7  ;;  %10191 = vmatprep.subr.bf16.mxu0 %v12565_v18  ;;  %v11623_v7 = vcombine.high %v3656_v31, %v3664_v61  ;;  %v11625_v18 = vcombine.high %v3657_v0, %v3665_v1  ;;  %v3744_v36 = vld [vmem:[#allocation25 + $0x2d0] sm:$0xff]  ;;  %v3809_v25 = vld [vmem:[#allocation25 + $0x4d8] sm:$0xff] }
 0x648   :  { %10028 = vmatpush1.bf16.msra.mxu1 %v12562_v30  ;;  %10192 = vmatpush1.bf16.msra.mxu0 %v12564_v38  ;;  %v11622_v30 = vcombine.low %v3656_v31, %v3664_v61  ;;  %v14056_v38 = vpack.c.bf16 %v3644_v16, %v3644_v16  ;;  %v11703_v31 = vcombine.high %v3736_v60, %v3744_v36  ;;  %v3752_v61 = vld [vmem:[#allocation25 + $0x310] sm:$0xff] }
 0x649   :  { %10029 = vmatprep.subr.bf16.mxu1 %v12579_v9  ;;  %10193 = vmatprep.subr.bf16.mxu0 %v12581_v50  ;;  %v11624_v9 = vcombine.low %v3657_v0, %v3665_v1  ;;  %v11639_v50 = vcombine.high %v3672_v17, %v3680_v5  ;;  %v3760_v0 = vld [vmem:[#allocation25 + $0x350] sm:$0xff]  ;;  %v3753_v1 = vld [vmem:[#allocation25 + $0x318] sm:$0xff] }
 0x64a   :  { %v3768_v17 = vld [vmem:[#allocation25 + $0x390] sm:$0xff] }
 0x64b   :  { %v3776_v5 = vld [vmem:[#allocation25 + $0x3d0] sm:$0xff] }
 0x64c   :  { %10030 = vmatpush1.bf16.msra.mxu1 %v12578_v14  ;;  %10194 = vmatpush1.bf16.msra.mxu0 %v12580_v22  ;;  %v11655_v14 = vcombine.high %v3688_v10, %v3696_v32  ;;  %v11657_v22 = vcombine.high %v3689_v11, %v3697_v45  ;;  %v3784_v10 = vld [vmem:[#allocation25 + $0x410] sm:$0xff]  ;;  %v3785_v11 = vld [vmem:[#allocation25 + $0x418] sm:$0xff] }
 0x64d   :  { %10031 = vmatprep.subr.bf16.mxu1 %v12595_v43  ;;  %10195 = vmatprep.subr.bf16.mxu0 %v12597_v40  ;;  %v3704_v43 = vld [vmem:[#allocation25 + $0x190] sm:$0xff]  ;;  %v3793_v45 = vld [vmem:[#allocation25 + $0x458] sm:$0xff] }
 0x64e   :  { %v3712_v40 = vld [vmem:[#allocation25 + $0x1d0] sm:$0xff] }
 0x64f   :  { %v11671_v58 = vcombine.high %v3704_v43, %v3712_v40  ;;  %v3792_v32 = vld [vmem:[#allocation25 + $0x450] sm:$0xff] }
 0x650   :  { %10032 = vmatpush1.bf16.msra.mxu1 %v12594_v44  ;;  %10196 = vmatpush1.bf16.msra.mxu0 %v12596_v53  ;;  %v3728_v44 = vld [vmem:[#allocation25 + $0x250] sm:$0xff]  ;;  %v3721_v53 = vld [vmem:[#allocation25 + $0x218] sm:$0xff] }
 0x651   :  { %10033 = vmatprep.subr.bf16.mxu1 %v12611_v56  ;;  %10197 = vmatprep.subr.bf16.mxu0 %v12613_v4  ;;  %v3729_v56 = vld [vmem:[#allocation25 + $0x258] sm:$0xff]  ;;  %v11670_v4 = vcombine.low %v3704_v43, %v3712_v40  ;;  %v11687_v59 = vcombine.high %v3720_v51, %v3728_v44  ;;  %v3800_v43 = vld [vmem:[#allocation25 + $0x490] sm:$0xff] }
 0x652   :  { %v11689_v33 = vcombine.high %v3721_v53, %v3729_v56  ;;  %v3808_v40 = vld [vmem:[#allocation25 + $0x4d0] sm:$0xff] }
 0x654   :  { %10034 = vmatpush1.bf16.msra.mxu1 %v12610_v23  ;;  %10198 = vmatpush1.bf16.msra.mxu0 %v12612_v28  ;;  %v3737_v23 = vld [vmem:[#allocation25 + $0x298] sm:$0xff] }
 0x655   :  { %10035 = vmatprep.subr.bf16.mxu1 %v12627_v42  ;;  %10199 = vmatprep.subr.bf16.mxu0 %v12629_v29  ;;  %v3745_v28 = vld [vmem:[#allocation25 + $0x2d8] sm:$0xff]  ;;  %v11686_v42 = vcombine.low %v3720_v51, %v3728_v44  ;;  %v11688_v29 = vcombine.low %v3721_v53, %v3729_v56  ;;  %v3816_v51 = vld [vmem:[#allocation25 + $0x510] sm:$0xff] }
 0x656   :  { %v11705_v63 = vcombine.high %v3737_v23, %v3745_v28  ;;  %v3824_v44 = vld [vmem:[#allocation25 + $0x550] sm:$0xff]  ;;  %v3817_v53 = vld [vmem:[#allocation25 + $0x518] sm:$0xff] }
 0x657   :  { %v3825_v56 = vld [vmem:[#allocation25 + $0x558] sm:$0xff] }
 0x658   :  { %10036 = vmatpush1.bf16.msra.mxu1 %v12626_v3  ;;  %10200 = vmatpush1.bf16.msra.mxu0 %v12628_v12  ;;  %v3761_v3 = vld [vmem:[#allocation25 + $0x358] sm:$0xff]  ;;  %v11702_v12 = vcombine.low %v3736_v60, %v3744_v36  ;;  %v3832_v60 = vld [vmem:[#allocation25 + $0x590] sm:$0xff] }
 0x659   :  { %10210 = vmatprep.subr.bf16.mxu1 %v11623_v7  ;;  %10374 = vmatprep.subr.bf16.mxu0 %v11625_v18  ;;  %v11704_v7 = vcombine.low %v3737_v23, %v3745_v28  ;;  %v11719_v18 = vcombine.high %v3752_v61, %v3760_v0  ;;  %v11721_v16 = vcombine.high %v3753_v1, %v3761_v3  ;;  %v3840_v36 = vld [vmem:[#allocation25 + $0x5d0] sm:$0xff]  ;;  %v3833_v23 = vld [vmem:[#allocation25 + $0x598] sm:$0xff] }
 0x65a   :  { %v3841_v28 = vld [vmem:[#allocation25 + $0x5d8] sm:$0xff] }
 0x65b   :  { %10038 = vmatmul.mubr.bf16.vlgmr.msra.gmra.mrb[16].mxu1 %v14056_v38  ;;  %10202 = vmatmul.mubr.bf16.vlgmr.msra.gmra.mrb[20].mxu0 %v14056_v38 }
 0x65c   :  { %10211 = vmatpush1.bf16.msra.mxu1 %v11622_v30  ;;  %10242 = vmatprep.mubr.bf16.mxu1 %v13940_v52  ;;  %v11718_v30 = vcombine.low %v3752_v61, %v3760_v0  ;;  %v3848_v61 = vld [vmem:[#allocation25 + $0x610] sm:$0xff] }
 0x65d   :  { %10375 = vmatpush1.bf16.msra.mxu0 %v11624_v9  ;;  %10406 = vmatprep.mubr.bf16.mxu0 %v13940_v52  ;;  %v11720_v9 = vcombine.low %v3753_v1, %v3761_v3  ;;  %v3856_v0 = vld [vmem:[#allocation25 + $0x650] sm:$0xff]  ;;  %v3849_v1 = vld [vmem:[#allocation25 + $0x618] sm:$0xff] }
 0x65e   :  { %10212 = vmatprep.subr.bf16.mxu1 %v11639_v50  ;;  %10376 = vmatprep.subr.bf16.mxu0 %v11641_v20  ;;  %v11735_v50 = vcombine.high %v3768_v17, %v3776_v5  ;;  %v11737_v20 = vcombine.high %v3769_v8, %v3777_v26  ;;  %v3857_v3 = vld [vmem:[#allocation25 + $0x658] sm:$0xff] }
 0x660   :  { %10213 = vmatpush1.bf16.msra.mxu1 %v11638_v46  ;;  %v11734_v46 = vcombine.low %v3768_v17, %v3776_v5  ;;  %v3864_v17 = vld [vmem:[#allocation25 + $0x690] sm:$0xff] }
 0x661   :  { %10377 = vmatpush1.bf16.msra.mxu0 %v11640_v2  ;;  %10214 = vmatprep.subr.bf16.mxu1 %v11655_v14  ;;  %v11736_v2 = vcombine.low %v3769_v8, %v3777_v26  ;;  %v11751_v14 = vcombine.high %v3784_v10, %v3792_v32  ;;  %v3872_v5 = vld [vmem:[#allocation25 + $0x6d0] sm:$0xff]  ;;  %v3865_v8 = vld [vmem:[#allocation25 + $0x698] sm:$0xff] }
 0x662   :  { %10378 = vmatprep.subr.bf16.mxu0 %v11657_v22  ;;  %v11753_v22 = vcombine.high %v3785_v11, %v3793_v45  ;;  %v3873_v26 = vld [vmem:[#allocation25 + $0x6d8] sm:$0xff] }
 0x664   :  { %10215 = vmatpush1.bf16.msra.mxu1 %v11654_v48  ;;  %v11750_v48 = vcombine.low %v3784_v10, %v3792_v32  ;;  %v3880_v10 = vld [vmem:[#allocation25 + $0x710] sm:$0xff] }
 0x665   :  { %10379 = vmatpush1.bf16.msra.mxu0 %v11656_v54  ;;  %10216 = vmatprep.subr.bf16.mxu1 %v11671_v58  ;;  %v11752_v54 = vcombine.low %v3785_v11, %v3793_v45  ;;  %v11767_v58 = vcombine.high %v3800_v43, %v3808_v40  ;;  %v3888_v32 = vld [vmem:[#allocation25 + $0x750] sm:$0xff]  ;;  %v3881_v11 = vld [vmem:[#allocation25 + $0x718] sm:$0xff] }
 0x666   :  { %10380 = vmatprep.subr.bf16.mxu0 %v11673_v49  ;;  %v11769_v49 = vcombine.high %v3801_v27, %v3809_v25  ;;  %v3889_v45 = vld [vmem:[#allocation25 + $0x758] sm:$0xff] }
 0x668   :  { %10217 = vmatpush1.bf16.msra.mxu1 %v11670_v4  ;;  %v11766_v4 = vcombine.low %v3800_v43, %v3808_v40  ;;  %v3896_v43 = vld [vmem:[#allocation25 + $0x790] sm:$0xff] }
 0x669   :  { %10381 = vmatpush1.bf16.msra.mxu0 %v11672_v6  ;;  %10218 = vmatprep.subr.bf16.mxu1 %v11687_v59  ;;  %v11768_v6 = vcombine.low %v3801_v27, %v3809_v25  ;;  %v11783_v59 = vcombine.high %v3816_v51, %v3824_v44  ;;  %v3904_v40 = vld [vmem:[#allocation25 + $0x7d0] sm:$0xff]  ;;  %v3897_v27 = vld [vmem:[#allocation25 + $0x798] sm:$0xff] }
 0x66a   :  { %10382 = vmatprep.subr.bf16.mxu0 %v11689_v33  ;;  %v11785_v33 = vcombine.high %v3817_v53, %v3825_v56  ;;  %v3905_v25 = vld [vmem:[#allocation25 + $0x7d8] sm:$0xff] }
 0x66c   :  { %10219 = vmatpush1.bf16.msra.mxu1 %v11686_v42  ;;  %v11782_v42 = vcombine.low %v3816_v51, %v3824_v44  ;;  %v3912_v51 = vld [vmem:[#allocation25 + $0x810] sm:$0xff] }
 0x66d   :  { %10383 = vmatpush1.bf16.msra.mxu0 %v11688_v29  ;;  %10220 = vmatprep.subr.bf16.mxu1 %v11703_v31  ;;  %v11784_v29 = vcombine.low %v3817_v53, %v3825_v56  ;;  %v11799_v31 = vcombine.high %v3832_v60, %v3840_v36  ;;  %v3920_v44 = vld [vmem:[#allocation25 + $0x850] sm:$0xff]  ;;  %v3913_v53 = vld [vmem:[#allocation25 + $0x818] sm:$0xff] }
 0x66e   :  { %10384 = vmatprep.subr.bf16.mxu0 %v11705_v63  ;;  %v11801_v63 = vcombine.high %v3833_v23, %v3841_v28  ;;  %v3921_v56 = vld [vmem:[#allocation25 + $0x858] sm:$0xff] }
 0x670   :  { %10221 = vmatpush1.bf16.msra.mxu1 %v11702_v12  ;;  %v11798_v12 = vcombine.low %v3832_v60, %v3840_v36  ;;  %v3928_v60 = vld [vmem:[#allocation25 + $0x890] sm:$0xff] }
 0x671   :  { %10385 = vmatpush1.bf16.msra.mxu0 %v11704_v7  ;;  %10222 = vmatprep.subr.bf16.mxu1 %v11719_v18  ;;  %v11800_v7 = vcombine.low %v3833_v23, %v3841_v28  ;;  %v11815_v18 = vcombine.high %v3848_v61, %v3856_v0  ;;  %v3936_v36 = vld [vmem:[#allocation25 + $0x8d0] sm:$0xff]  ;;  %v11878_v23 = vcombine.low %v3912_v51, %v3920_v44  ;;  %v3929_v28 = vld [vmem:[#allocation25 + $0x898] sm:$0xff] }
 0x672   :  { %10386 = vmatprep.subr.bf16.mxu0 %v11721_v16  ;;  %v11817_v16 = vcombine.high %v3849_v1, %v3857_v3 }
 0x674   :  { %10223 = vmatpush1.bf16.msra.mxu1 %v11718_v30  ;;  %v11814_v30 = vcombine.low %v3848_v61, %v3856_v0  ;;  %v3952_v61 = vld [vmem:[#allocation25 + $0x950] sm:$0xff] }
 0x675   :  { %10387 = vmatpush1.bf16.msra.mxu0 %v11720_v9  ;;  %10224 = vmatprep.subr.bf16.mxu1 %v11735_v50  ;;  %v11816_v9 = vcombine.low %v3849_v1, %v3857_v3  ;;  %v11831_v50 = vcombine.high %v3864_v17, %v3872_v5  ;;  %v3945_v1 = vld [vmem:[#allocation25 + $0x918] sm:$0xff] }
 0x676   :  { %10388 = vmatprep.subr.bf16.mxu0 %v11737_v20  ;;  %v11833_v20 = vcombine.high %v3865_v8, %v3873_v26  ;;  %v3953_v3 = vld [vmem:[#allocation25 + $0x958] sm:$0xff] }
 0x678   :  { %10225 = vmatpush1.bf16.msra.mxu1 %v11734_v46  ;;  %v11830_v46 = vcombine.low %v3864_v17, %v3872_v5  ;;  %v3960_v17 = vld [vmem:[#allocation25 + $0x990] sm:$0xff] }
 0x679   :  { %10389 = vmatpush1.bf16.msra.mxu0 %v11736_v2  ;;  %10226 = vmatprep.subr.bf16.mxu1 %v11751_v14  ;;  %v11832_v2 = vcombine.low %v3865_v8, %v3873_v26  ;;  %v11847_v14 = vcombine.high %v3880_v10, %v3888_v32  ;;  %v3968_v5 = vld [vmem:[#allocation25 + $0x9d0] sm:$0xff]  ;;  %v3961_v8 = vld [vmem:[#allocation25 + $0x998] sm:$0xff] }
 0x67a   :  { %10390 = vmatprep.subr.bf16.mxu0 %v11753_v22  ;;  %v11849_v22 = vcombine.high %v3881_v11, %v3889_v45  ;;  %v3969_v26 = vld [vmem:[#allocation25 + $0x9d8] sm:$0xff] }
 0x67c   :  { %10227 = vmatpush1.bf16.msra.mxu1 %v11750_v48  ;;  %v11846_v48 = vcombine.low %v3880_v10, %v3888_v32  ;;  %v3976_v10 = vld [vmem:[#allocation25 + $0xa10] sm:$0xff] }
 0x67d   :  { %10391 = vmatpush1.bf16.msra.mxu0 %v11752_v54  ;;  %10228 = vmatprep.subr.bf16.mxu1 %v11767_v58  ;;  %v11848_v54 = vcombine.low %v3881_v11, %v3889_v45  ;;  %v11863_v58 = vcombine.high %v3896_v43, %v3904_v40  ;;  %v3984_v32 = vld [vmem:[#allocation25 + $0xa50] sm:$0xff]  ;;  %v3977_v11 = vld [vmem:[#allocation25 + $0xa18] sm:$0xff] }
 0x67e   :  { %10392 = vmatprep.subr.bf16.mxu0 %v11769_v49  ;;  %v11865_v49 = vcombine.high %v3897_v27, %v3905_v25  ;;  %v3985_v45 = vld [vmem:[#allocation25 + $0xa58] sm:$0xff] }
 0x680   :  { %10229 = vmatpush1.bf16.msra.mxu1 %v11766_v4  ;;  %v11862_v4 = vcombine.low %v3896_v43, %v3904_v40  ;;  %v3992_v43 = vld [vmem:[#allocation25 + $0xa90] sm:$0xff] }
 0x681   :  { %10393 = vmatpush1.bf16.msra.mxu0 %v11768_v6  ;;  %10230 = vmatprep.subr.bf16.mxu1 %v11783_v59  ;;  %v11864_v6 = vcombine.low %v3897_v27, %v3905_v25  ;;  %v11879_v59 = vcombine.high %v3912_v51, %v3920_v44  ;;  %v4000_v40 = vld [vmem:[#allocation25 + $0xad0] sm:$0xff]  ;;  %v3993_v27 = vld [vmem:[#allocation25 + $0xa98] sm:$0xff] }
 0x682   :  { %10394 = vmatprep.subr.bf16.mxu0 %v11785_v33  ;;  %v11881_v33 = vcombine.high %v3913_v53, %v3921_v56  ;;  %v4001_v25 = vld [vmem:[#allocation25 + $0xad8] sm:$0xff]  ;;  %v4008_v51 = vld [vmem:[#allocation25 + $0xb10] sm:$0xff] }
 0x683   :  { %v4016_v44 = vld [vmem:[#allocation25 + $0xb50] sm:$0xff] }
 0x684   :  { %10231 = vmatpush1.bf16.msra.mxu1 %v11782_v42  ;;  %v3937_v42 = vld [vmem:[#allocation25 + $0x8d8] sm:$0xff] }
 0x685   :  { %10395 = vmatpush1.bf16.msra.mxu0 %v11784_v29  ;;  %10232 = vmatprep.subr.bf16.mxu1 %v11799_v31  ;;  %v11880_v29 = vcombine.low %v3913_v53, %v3921_v56  ;;  %v11895_v31 = vcombine.high %v3928_v60, %v3936_v36  ;;  %v11897_v0 = vcombine.high %v3929_v28, %v3937_v42  ;;  %v4009_v53 = vld [vmem:[#allocation25 + $0xb18] sm:$0xff] }
 0x686   :  { %10396 = vmatprep.subr.bf16.mxu0 %v11801_v63  ;;  %v3944_v63 = vld [vmem:[#allocation25 + $0x910] sm:$0xff]  ;;  %v4017_v56 = vld [vmem:[#allocation25 + $0xb58] sm:$0xff] }
 0x688   :  { %10233 = vmatpush1.bf16.msra.mxu1 %v11798_v12  ;;  %v11894_v12 = vcombine.low %v3928_v60, %v3936_v36  ;;  %v4024_v60 = vld [vmem:[#allocation25 + $0xb90] sm:$0xff] }
 0x689   :  { %10397 = vmatpush1.bf16.msra.mxu0 %v11800_v7  ;;  %10234 = vmatprep.subr.bf16.mxu1 %v11815_v18  ;;  %v11896_v7 = vcombine.low %v3929_v28, %v3937_v42  ;;  %v11911_v18 = vcombine.high %v3944_v63, %v3952_v61  ;;  %v4032_v36 = vld [vmem:[#allocation25 + $0xbd0] sm:$0xff]  ;;  %v4033_v28 = vld [vmem:[#allocation25 + $0xbd8] sm:$0xff]  ;;  %v11974_v42 = vcombine.low %v4008_v51, %v4016_v44 }
 0x68a   :  { %10398 = vmatprep.subr.bf16.mxu0 %v11817_v16  ;;  %v11913_v16 = vcombine.high %v3945_v1, %v3953_v3 }
 0x68c   :  { %10235 = vmatpush1.bf16.msra.mxu1 %v11814_v30  ;;  %v11910_v30 = vcombine.low %v3944_v63, %v3952_v61  ;;  %v4040_v61 = vld [vmem:[#allocation25 + $0xc10] sm:$0xff] }
 0x68d   :  { %10399 = vmatpush1.bf16.msra.mxu0 %v11816_v9  ;;  %10236 = vmatprep.subr.bf16.mxu1 %v11831_v50  ;;  %v11912_v9 = vcombine.low %v3945_v1, %v3953_v3  ;;  %v11927_v50 = vcombine.high %v3960_v17, %v3968_v5  ;;  %v4041_v1 = vld [vmem:[#allocation25 + $0xc18] sm:$0xff] }
 0x68e   :  { %10400 = vmatprep.subr.bf16.mxu0 %v11833_v20  ;;  %v11929_v20 = vcombine.high %v3961_v8, %v3969_v26  ;;  %v4049_v3 = vld [vmem:[#allocation25 + $0xc58] sm:$0xff] }
 0x690   :  { %10237 = vmatpush1.bf16.msra.mxu1 %v11830_v46  ;;  %v11926_v46 = vcombine.low %v3960_v17, %v3968_v5  ;;  %v4056_v17 = vld [vmem:[#allocation25 + $0xc90] sm:$0xff] }
 0x691   :  { %10401 = vmatpush1.bf16.msra.mxu0 %v11832_v2  ;;  %10238 = vmatprep.subr.bf16.mxu1 %v11847_v14  ;;  %v11928_v2 = vcombine.low %v3961_v8, %v3969_v26  ;;  %v11943_v14 = vcombine.high %v3976_v10, %v3984_v32  ;;  %v4064_v5 = vld [vmem:[#allocation25 + $0xcd0] sm:$0xff]  ;;  %v4057_v8 = vld [vmem:[#allocation25 + $0xc98] sm:$0xff] }
 0x692   :  { %10402 = vmatprep.subr.bf16.mxu0 %v11849_v22  ;;  %v11945_v22 = vcombine.high %v3977_v11, %v3985_v45  ;;  %v4065_v26 = vld [vmem:[#allocation25 + $0xcd8] sm:$0xff] }
 0x694   :  { %10239 = vmatpush1.bf16.msra.mxu1 %v11846_v48  ;;  %v11942_v48 = vcombine.low %v3976_v10, %v3984_v32  ;;  %v4072_v10 = vld [vmem:[#allocation25 + $0xd10] sm:$0xff] }
 0x695   :  { %10403 = vmatpush1.bf16.msra.mxu0 %v11848_v54  ;;  %10240 = vmatprep.subr.bf16.mxu1 %v11863_v58  ;;  %v11944_v54 = vcombine.low %v3977_v11, %v3985_v45  ;;  %v11959_v58 = vcombine.high %v3992_v43, %v4000_v40  ;;  %v4080_v32 = vld [vmem:[#allocation25 + $0xd50] sm:$0xff]  ;;  %v4073_v11 = vld [vmem:[#allocation25 + $0xd18] sm:$0xff] }
 0x696   :  { %10404 = vmatprep.subr.bf16.mxu0 %v11865_v49  ;;  %v11961_v49 = vcombine.high %v3993_v27, %v4001_v25  ;;  %v4081_v45 = vld [vmem:[#allocation25 + $0xd58] sm:$0xff] }
 0x698   :  { %10241 = vmatpush1.bf16.msra.mxu1 %v11862_v4  ;;  %v11958_v4 = vcombine.low %v3992_v43, %v4000_v40  ;;  %v4088_v43 = vld [vmem:[#allocation25 + $0xd90] sm:$0xff] }
 0x699   :  { %10405 = vmatpush1.bf16.msra.mxu0 %v11864_v6  ;;  %10251 = vmatprep.subr.bf16.mxu1 %v11879_v59  ;;  %v11960_v6 = vcombine.low %v3993_v27, %v4001_v25  ;;  %v11975_v59 = vcombine.high %v4008_v51, %v4016_v44  ;;  %v4096_v40 = vld [vmem:[#allocation25 + $0xdd0] sm:$0xff]  ;;  %v4089_v27 = vld [vmem:[#allocation25 + $0xd98] sm:$0xff] }
 0x69a   :  { %10415 = vmatprep.subr.bf16.mxu0 %v11881_v33  ;;  %v11977_v33 = vcombine.high %v4009_v53, %v4017_v56  ;;  %v4097_v25 = vld [vmem:[#allocation25 + $0xdd8] sm:$0xff]  ;;  %v4104_v51 = vld [vmem:[#allocation25 + $0xe10] sm:$0xff] }
 0x69b   :  { %10243 = vmatmul.mubr.bf16.vlgmr.msra.gmra.mrb[20].mxu1 %v13942_v55  ;;  %v4112_v44 = vld [vmem:[#allocation25 + $0xe50] sm:$0xff] }
 0x69c   :  { %10407 = vmatmul.mubr.bf16.vlgmr.msra.gmra.mrb[24].mxu0 %v13942_v55  ;;  %10252 = vmatpush1.bf16.msra.mxu1 %v11878_v23  ;;  %v4025_v23 = vld [vmem:[#allocation25 + $0xb98] sm:$0xff] }
 0x69d   :  { %10283 = vmatprep.mubr.bf16.mxu1 %v13946_v62  ;;  %10416 = vmatpush1.bf16.msra.mxu0 %v11880_v29  ;;  %v11976_v29 = vcombine.low %v4009_v53, %v4017_v56  ;;  %v11993_v63 = vcombine.high %v4025_v23, %v4033_v28  ;;  %v4105_v53 = vld [vmem:[#allocation25 + $0xe18] sm:$0xff] }
 0x69e   :  { %10447 = vmatprep.mubr.bf16.mxu0 %v13946_v62  ;;  %10253 = vmatprep.subr.bf16.mxu1 %v11895_v31  ;;  %v11991_v31 = vcombine.high %v4024_v60, %v4032_v36  ;;  %v4113_v56 = vld [vmem:[#allocation25 + $0xe58] sm:$0xff] }
 0x69f   :  { %10417 = vmatprep.subr.bf16.mxu0 %v11897_v0  ;;  %v4048_v0 = vld [vmem:[#allocation25 + $0xc50] sm:$0xff] }
 0x6a0   :  { %10254 = vmatpush1.bf16.msra.mxu1 %v11894_v12  ;;  %v11990_v12 = vcombine.low %v4024_v60, %v4032_v36  ;;  %v4120_v60 = vld [vmem:[#allocation25 + $0xe90] sm:$0xff] }
 0x6a1   :  { %10418 = vmatpush1.bf16.msra.mxu0 %v11896_v7  ;;  %10255 = vmatprep.subr.bf16.mxu1 %v11911_v18  ;;  %v11992_v7 = vcombine.low %v4025_v23, %v4033_v28  ;;  %v12007_v18 = vcombine.high %v4040_v61, %v4048_v0  ;;  %v4128_v36 = vld [vmem:[#allocation25 + $0xed0] sm:$0xff]  ;;  %v4121_v23 = vld [vmem:[#allocation25 + $0xe98] sm:$0xff] }
 0x6a2   :  { %10419 = vmatprep.subr.bf16.mxu0 %v11913_v16  ;;  %v12009_v16 = vcombine.high %v4041_v1, %v4049_v3  ;;  %v4129_v28 = vld [vmem:[#allocation25 + $0xed8] sm:$0xff] }
 0x6a4   :  { %10256 = vmatpush1.bf16.msra.mxu1 %v11910_v30  ;;  %v12006_v30 = vcombine.low %v4040_v61, %v4048_v0  ;;  %v4136_v61 = vld [vmem:[#allocation25 + $0xf10] sm:$0xff] }
 0x6a5   :  { %10420 = vmatpush1.bf16.msra.mxu0 %v11912_v9  ;;  %10257 = vmatprep.subr.bf16.mxu1 %v11927_v50  ;;  %v12008_v9 = vcombine.low %v4041_v1, %v4049_v3  ;;  %v12023_v50 = vcombine.high %v4056_v17, %v4064_v5  ;;  %v4144_v0 = vld [vmem:[#allocation25 + $0xf50] sm:$0xff]  ;;  %v4137_v1 = vld [vmem:[#allocation25 + $0xf18] sm:$0xff] }
 0x6a6   :  { %10421 = vmatprep.subr.bf16.mxu0 %v11929_v20  ;;  %v12025_v20 = vcombine.high %v4057_v8, %v4065_v26  ;;  %v4145_v3 = vld [vmem:[#allocation25 + $0xf58] sm:$0xff] }
 0x6a8   :  { %10258 = vmatpush1.bf16.msra.mxu1 %v11926_v46  ;;  %v12022_v46 = vcombine.low %v4056_v17, %v4064_v5  ;;  %v4152_v17 = vld [vmem:[#allocation25 + $0xf90] sm:$0xff] }
 0x6a9   :  { %10422 = vmatpush1.bf16.msra.mxu0 %v11928_v2  ;;  %10259 = vmatprep.subr.bf16.mxu1 %v11943_v14  ;;  %v12024_v2 = vcombine.low %v4057_v8, %v4065_v26  ;;  %v12039_v14 = vcombine.high %v4072_v10, %v4080_v32  ;;  %v4160_v5 = vld [vmem:[#allocation25 + $0xfd0] sm:$0xff]  ;;  %v4153_v8 = vld [vmem:[#allocation25 + $0xf98] sm:$0xff] }
 0x6aa   :  { %10423 = vmatprep.subr.bf16.mxu0 %v11945_v22  ;;  %v12041_v22 = vcombine.high %v4073_v11, %v4081_v45  ;;  %v4161_v26 = vld [vmem:[#allocation25 + $0xfd8] sm:$0xff] }
 0x6ac   :  { %10260 = vmatpush1.bf16.msra.mxu1 %v11942_v48  ;;  %v12038_v48 = vcombine.low %v4072_v10, %v4080_v32  ;;  %v4168_v10 = vld [vmem:[#allocation25 + $0x1010] sm:$0xff] }
 0x6ad   :  { %10424 = vmatpush1.bf16.msra.mxu0 %v11944_v54  ;;  %10261 = vmatprep.subr.bf16.mxu1 %v11959_v58  ;;  %v12040_v54 = vcombine.low %v4073_v11, %v4081_v45  ;;  %v12055_v58 = vcombine.high %v4088_v43, %v4096_v40  ;;  %v4176_v32 = vld [vmem:[#allocation25 + $0x1050] sm:$0xff]  ;;  %v4169_v11 = vld [vmem:[#allocation25 + $0x1018] sm:$0xff] }
 0x6ae   :  { %10425 = vmatprep.subr.bf16.mxu0 %v11961_v49  ;;  %v12057_v49 = vcombine.high %v4089_v27, %v4097_v25  ;;  %v4177_v45 = vld [vmem:[#allocation25 + $0x1058] sm:$0xff] }
 0x6b0   :  { %10262 = vmatpush1.bf16.msra.mxu1 %v11958_v4  ;;  %v12054_v4 = vcombine.low %v4088_v43, %v4096_v40  ;;  %v4184_v43 = vld [vmem:[#allocation25 + $0x1090] sm:$0xff] }
 0x6b1   :  { %10426 = vmatpush1.bf16.msra.mxu0 %v11960_v6  ;;  %10263 = vmatprep.subr.bf16.mxu1 %v11975_v59  ;;  %v12056_v6 = vcombine.low %v4089_v27, %v4097_v25  ;;  %v12071_v59 = vcombine.high %v4104_v51, %v4112_v44  ;;  %v4192_v40 = vld [vmem:[#allocation25 + $0x10d0] sm:$0xff]  ;;  %v12134_v27 = vcombine.low %v4168_v10, %v4176_v32  ;;  %v4185_v25 = vld [vmem:[#allocation25 + $0x1098] sm:$0xff] }
 0x6b2   :  { %10427 = vmatprep.subr.bf16.mxu0 %v11977_v33  ;;  %v12073_v33 = vcombine.high %v4105_v53, %v4113_v56 }
 0x6b4   :  { %10264 = vmatpush1.bf16.msra.mxu1 %v11974_v42  ;;  %v12070_v42 = vcombine.low %v4104_v51, %v4112_v44  ;;  %v4208_v51 = vld [vmem:[#allocation25 + $0x1150] sm:$0xff] }
 0x6b5   :  { %10428 = vmatpush1.bf16.msra.mxu0 %v11976_v29  ;;  %10265 = vmatprep.subr.bf16.mxu1 %v11991_v31  ;;  %v12072_v29 = vcombine.low %v4105_v53, %v4113_v56  ;;  %v12087_v31 = vcombine.high %v4120_v60, %v4128_v36  ;;  %v4201_v53 = vld [vmem:[#allocation25 + $0x1118] sm:$0xff] }
 0x6b6   :  { %10429 = vmatprep.subr.bf16.mxu0 %v11993_v63  ;;  %v12089_v63 = vcombine.high %v4121_v23, %v4129_v28  ;;  %v4209_v56 = vld [vmem:[#allocation25 + $0x1158] sm:$0xff] }
 0x6b8   :  { %10266 = vmatpush1.bf16.msra.mxu1 %v11990_v12  ;;  %v12086_v12 = vcombine.low %v4120_v60, %v4128_v36  ;;  %v4216_v60 = vld [vmem:[#allocation25 + $0x1190] sm:$0xff] }
 0x6b9   :  { %10430 = vmatpush1.bf16.msra.mxu0 %v11992_v7  ;;  %10267 = vmatprep.subr.bf16.mxu1 %v12007_v18  ;;  %v12088_v7 = vcombine.low %v4121_v23, %v4129_v28  ;;  %v12103_v18 = vcombine.high %v4136_v61, %v4144_v0  ;;  %v4224_v36 = vld [vmem:[#allocation25 + $0x11d0] sm:$0xff]  ;;  %v4217_v23 = vld [vmem:[#allocation25 + $0x1198] sm:$0xff] }
 0x6ba   :  { %10431 = vmatprep.subr.bf16.mxu0 %v12009_v16  ;;  %v12105_v16 = vcombine.high %v4137_v1, %v4145_v3  ;;  %v4225_v28 = vld [vmem:[#allocation25 + $0x11d8] sm:$0xff] }
 0x6bc   :  { %10268 = vmatpush1.bf16.msra.mxu1 %v12006_v30  ;;  %v12102_v30 = vcombine.low %v4136_v61, %v4144_v0  ;;  %v4232_v61 = vld [vmem:[#allocation25 + $0x1210] sm:$0xff] }
 0x6bd   :  { %10432 = vmatpush1.bf16.msra.mxu0 %v12008_v9  ;;  %10269 = vmatprep.subr.bf16.mxu1 %v12023_v50  ;;  %v12104_v9 = vcombine.low %v4137_v1, %v4145_v3  ;;  %v12119_v50 = vcombine.high %v4152_v17, %v4160_v5  ;;  %v4240_v0 = vld [vmem:[#allocation25 + $0x1250] sm:$0xff]  ;;  %v4233_v1 = vld [vmem:[#allocation25 + $0x1218] sm:$0xff] }
 0x6be   :  { %10433 = vmatprep.subr.bf16.mxu0 %v12025_v20  ;;  %v12121_v20 = vcombine.high %v4153_v8, %v4161_v26  ;;  %v4241_v3 = vld [vmem:[#allocation25 + $0x1258] sm:$0xff] }
 0x6c0   :  { %10270 = vmatpush1.bf16.msra.mxu1 %v12022_v46  ;;  %v12118_v46 = vcombine.low %v4152_v17, %v4160_v5  ;;  %v4248_v17 = vld [vmem:[#allocation25 + $0x1290] sm:$0xff] }
 0x6c1   :  { %10434 = vmatpush1.bf16.msra.mxu0 %v12024_v2  ;;  %10271 = vmatprep.subr.bf16.mxu1 %v12039_v14  ;;  %v12120_v2 = vcombine.low %v4153_v8, %v4161_v26  ;;  %v12135_v14 = vcombine.high %v4168_v10, %v4176_v32  ;;  %v4256_v5 = vld [vmem:[#allocation25 + $0x12d0] sm:$0xff]  ;;  %v4249_v8 = vld [vmem:[#allocation25 + $0x1298] sm:$0xff] }
 0x6c2   :  { %10435 = vmatprep.subr.bf16.mxu0 %v12041_v22  ;;  %v12137_v22 = vcombine.high %v4169_v11, %v4177_v45  ;;  %v4257_v26 = vld [vmem:[#allocation25 + $0x12d8] sm:$0xff]  ;;  %v4264_v10 = vld [vmem:[#allocation25 + $0x1310] sm:$0xff] }
 0x6c3   :  { %v4272_v32 = vld [vmem:[#allocation25 + $0x1350] sm:$0xff] }
 0x6c4   :  { %10272 = vmatpush1.bf16.msra.mxu1 %v12038_v48  ;;  %v4193_v48 = vld [vmem:[#allocation25 + $0x10d8] sm:$0xff] }
 0x6c5   :  { %10436 = vmatpush1.bf16.msra.mxu0 %v12040_v54  ;;  %10273 = vmatprep.subr.bf16.mxu1 %v12055_v58  ;;  %v12136_v54 = vcombine.low %v4169_v11, %v4177_v45  ;;  %v12151_v58 = vcombine.high %v4184_v43, %v4192_v40  ;;  %v12153_v44 = vcombine.high %v4185_v25, %v4193_v48  ;;  %v4265_v11 = vld [vmem:[#allocation25 + $0x1318] sm:$0xff] }
 0x6c6   :  { %10437 = vmatprep.subr.bf16.mxu0 %v12057_v49  ;;  %v4200_v49 = vld [vmem:[#allocation25 + $0x1110] sm:$0xff]  ;;  %v4273_v45 = vld [vmem:[#allocation25 + $0x1358] sm:$0xff] }
 0x6c8   :  { %10274 = vmatpush1.bf16.msra.mxu1 %v12054_v4  ;;  %v12150_v4 = vcombine.low %v4184_v43, %v4192_v40  ;;  %v4280_v43 = vld [vmem:[#allocation25 + $0x1390] sm:$0xff] }
 0x6c9   :  { %10438 = vmatpush1.bf16.msra.mxu0 %v12056_v6  ;;  %10275 = vmatprep.subr.bf16.mxu1 %v12071_v59  ;;  %v12152_v6 = vcombine.low %v4185_v25, %v4193_v48  ;;  %v12167_v59 = vcombine.high %v4200_v49, %v4208_v51  ;;  %v4288_v40 = vld [vmem:[#allocation25 + $0x13d0] sm:$0xff]  ;;  %v4289_v25 = vld [vmem:[#allocation25 + $0x13d8] sm:$0xff]  ;;  %v12230_v48 = vcombine.low %v4264_v10, %v4272_v32 }
 0x6ca   :  { %10439 = vmatprep.subr.bf16.mxu0 %v12073_v33  ;;  %v12169_v33 = vcombine.high %v4201_v53, %v4209_v56 }
 0x6cc   :  { %10276 = vmatpush1.bf16.msra.mxu1 %v12070_v42  ;;  %v12166_v42 = vcombine.low %v4200_v49, %v4208_v51  ;;  %v4296_v51 = vld [vmem:[#allocation25 + $0x1410] sm:$0xff] }
 0x6cd   :  { %10440 = vmatpush1.bf16.msra.mxu0 %v12072_v29  ;;  %10277 = vmatprep.subr.bf16.mxu1 %v12087_v31  ;;  %v12168_v29 = vcombine.low %v4201_v53, %v4209_v56  ;;  %v12183_v31 = vcombine.high %v4216_v60, %v4224_v36  ;;  %v4297_v53 = vld [vmem:[#allocation25 + $0x1418] sm:$0xff] }
 0x6ce   :  { %10441 = vmatprep.subr.bf16.mxu0 %v12089_v63  ;;  %v12185_v63 = vcombine.high %v4217_v23, %v4225_v28  ;;  %v4305_v56 = vld [vmem:[#allocation25 + $0x1458] sm:$0xff] }
 0x6d0   :  { %10278 = vmatpush1.bf16.msra.mxu1 %v12086_v12  ;;  %v12182_v12 = vcombine.low %v4216_v60, %v4224_v36  ;;  %v4312_v60 = vld [vmem:[#allocation25 + $0x1490] sm:$0xff] }
 0x6d1   :  { %10442 = vmatpush1.bf16.msra.mxu0 %v12088_v7  ;;  %10279 = vmatprep.subr.bf16.mxu1 %v12103_v18  ;;  %v12184_v7 = vcombine.low %v4217_v23, %v4225_v28  ;;  %v12199_v18 = vcombine.high %v4232_v61, %v4240_v0  ;;  %v4320_v36 = vld [vmem:[#allocation25 + $0x14d0] sm:$0xff]  ;;  %v4313_v23 = vld [vmem:[#allocation25 + $0x1498] sm:$0xff] }
 0x6d2   :  { %10443 = vmatprep.subr.bf16.mxu0 %v12105_v16  ;;  %v12201_v16 = vcombine.high %v4233_v1, %v4241_v3  ;;  %v4321_v28 = vld [vmem:[#allocation25 + $0x14d8] sm:$0xff] }
 0x6d4   :  { %10280 = vmatpush1.bf16.msra.mxu1 %v12102_v30  ;;  %v12198_v30 = vcombine.low %v4232_v61, %v4240_v0  ;;  %v4328_v61 = vld [vmem:[#allocation25 + $0x1510] sm:$0xff] }
 0x6d5   :  { %10444 = vmatpush1.bf16.msra.mxu0 %v12104_v9  ;;  %10281 = vmatprep.subr.bf16.mxu1 %v12119_v50  ;;  %v12200_v9 = vcombine.low %v4233_v1, %v4241_v3  ;;  %v12215_v50 = vcombine.high %v4248_v17, %v4256_v5  ;;  %v4336_v0 = vld [vmem:[#allocation25 + $0x1550] sm:$0xff]  ;;  %v4329_v1 = vld [vmem:[#allocation25 + $0x1518] sm:$0xff] }
 0x6d6   :  { %10445 = vmatprep.subr.bf16.mxu0 %v12121_v20  ;;  %v12217_v20 = vcombine.high %v4249_v8, %v4257_v26  ;;  %v4337_v3 = vld [vmem:[#allocation25 + $0x1558] sm:$0xff] }
 0x6d8   :  { %10282 = vmatpush1.bf16.msra.mxu1 %v12118_v46  ;;  %v12214_v46 = vcombine.low %v4248_v17, %v4256_v5  ;;  %v4344_v17 = vld [vmem:[#allocation25 + $0x1590] sm:$0xff] }
 0x6d9   :  { %10446 = vmatpush1.bf16.msra.mxu0 %v12120_v2  ;;  %10292 = vmatprep.subr.bf16.mxu1 %v12135_v14  ;;  %v12216_v2 = vcombine.low %v4249_v8, %v4257_v26  ;;  %v12231_v14 = vcombine.high %v4264_v10, %v4272_v32  ;;  %v4352_v5 = vld [vmem:[#allocation25 + $0x15d0] sm:$0xff]  ;;  %v4345_v8 = vld [vmem:[#allocation25 + $0x1598] sm:$0xff] }
 0x6da   :  { %10456 = vmatprep.subr.bf16.mxu0 %v12137_v22  ;;  %v12233_v22 = vcombine.high %v4265_v11, %v4273_v45  ;;  %v4353_v26 = vld [vmem:[#allocation25 + $0x15d8] sm:$0xff]  ;;  %v4360_v10 = vld [vmem:[#allocation25 + $0x1610] sm:$0xff] }
 0x6db   :  { %10284 = vmatmul.mubr.bf16.vlgmr.msra.gmra.mrb[20].mxu1 %v13972_v15  ;;  %v4368_v32 = vld [vmem:[#allocation25 + $0x1650] sm:$0xff] }
 0x6dc   :  { %10448 = vmatmul.mubr.bf16.vlgmr.msra.gmra.mrb[24].mxu0 %v13972_v15  ;;  %10293 = vmatpush1.bf16.msra.mxu1 %v12134_v27  ;;  %v4281_v27 = vld [vmem:[#allocation25 + $0x1398] sm:$0xff] }
 0x6dd   :  { %10324 = vmatprep.mubr.bf16.mxu1 %v14041_v13  ;;  %10457 = vmatpush1.bf16.msra.mxu0 %v12136_v54  ;;  %v12232_v54 = vcombine.low %v4265_v11, %v4273_v45  ;;  %v12249_v49 = vcombine.high %v4281_v27, %v4289_v25  ;;  %v4361_v11 = vld [vmem:[#allocation25 + $0x1618] sm:$0xff] }
 0x6de   :  { %10488 = vmatprep.mubr.bf16.mxu0 %v14041_v13  ;;  %10294 = vmatprep.subr.bf16.mxu1 %v12151_v58  ;;  %v12247_v58 = vcombine.high %v4280_v43, %v4288_v40  ;;  %v4369_v45 = vld [vmem:[#allocation25 + $0x1658] sm:$0xff] }
 0x6df   :  { %10458 = vmatprep.subr.bf16.mxu0 %v12153_v44  ;;  %v4304_v44 = vld [vmem:[#allocation25 + $0x1450] sm:$0xff] }
 0x6e0   :  { %10295 = vmatpush1.bf16.msra.mxu1 %v12150_v4  ;;  %v12246_v4 = vcombine.low %v4280_v43, %v4288_v40  ;;  %v4376_v43 = vld [vmem:[#allocation25 + $0x1690] sm:$0xff] }
 0x6e1   :  { %10459 = vmatpush1.bf16.msra.mxu0 %v12152_v6  ;;  %10296 = vmatprep.subr.bf16.mxu1 %v12167_v59  ;;  %v12248_v6 = vcombine.low %v4281_v27, %v4289_v25  ;;  %v12263_v59 = vcombine.high %v4296_v51, %v4304_v44  ;;  %v4384_v40 = vld [vmem:[#allocation25 + $0x16d0] sm:$0xff]  ;;  %v4377_v27 = vld [vmem:[#allocation25 + $0x1698] sm:$0xff] }
 0x6e2   :  { %10460 = vmatprep.subr.bf16.mxu0 %v12169_v33  ;;  %v12265_v33 = vcombine.high %v4297_v53, %v4305_v56  ;;  %v4385_v25 = vld [vmem:[#allocation25 + $0x16d8] sm:$0xff] }
 0x6e4   :  { %10297 = vmatpush1.bf16.msra.mxu1 %v12166_v42  ;;  %v12262_v42 = vcombine.low %v4296_v51, %v4304_v44  ;;  %v4392_v51 = vld [vmem:[#allocation25 + $0x1710] sm:$0xff] }
 0x6e5   :  { %10461 = vmatpush1.bf16.msra.mxu0 %v12168_v29  ;;  %10298 = vmatprep.subr.bf16.mxu1 %v12183_v31  ;;  %v12264_v29 = vcombine.low %v4297_v53, %v4305_v56  ;;  %v12279_v31 = vcombine.high %v4312_v60, %v4320_v36  ;;  %v4400_v44 = vld [vmem:[#allocation25 + $0x1750] sm:$0xff]  ;;  %v4393_v53 = vld [vmem:[#allocation25 + $0x1718] sm:$0xff] }
 0x6e6   :  { %10462 = vmatprep.subr.bf16.mxu0 %v12185_v63  ;;  %v12281_v63 = vcombine.high %v4313_v23, %v4321_v28  ;;  %v4401_v56 = vld [vmem:[#allocation25 + $0x1758] sm:$0xff] }
 0x6e8   :  { %10299 = vmatpush1.bf16.msra.mxu1 %v12182_v12  ;;  %v12278_v12 = vcombine.low %v4312_v60, %v4320_v36  ;;  %v4408_v60 = vld [vmem:[#allocation25 + $0x1790] sm:$0xff] }
 0x6e9   :  { %10463 = vmatpush1.bf16.msra.mxu0 %v12184_v7  ;;  %10300 = vmatprep.subr.bf16.mxu1 %v12199_v18  ;;  %v12280_v7 = vcombine.low %v4313_v23, %v4321_v28  ;;  %v12295_v18 = vcombine.high %v4328_v61, %v4336_v0  ;;  %v4416_v36 = vld [vmem:[#allocation25 + $0x17d0] sm:$0xff]  ;;  %v4409_v23 = vld [vmem:[#allocation25 + $0x1798] sm:$0xff] }
 0x6ea   :  { %10464 = vmatprep.subr.bf16.mxu0 %v12201_v16  ;;  %v12297_v16 = vcombine.high %v4329_v1, %v4337_v3  ;;  %v4417_v28 = vld [vmem:[#allocation25 + $0x17d8] sm:$0xff] }
 0x6ec   :  { %10301 = vmatpush1.bf16.msra.mxu1 %v12198_v30  ;;  %v12294_v30 = vcombine.low %v4328_v61, %v4336_v0  ;;  %v4424_v61 = vld [vmem:[#allocation25 + $0x1810] sm:$0xff] }
 0x6ed   :  { %10465 = vmatpush1.bf16.msra.mxu0 %v12200_v9  ;;  %10302 = vmatprep.subr.bf16.mxu1 %v12215_v50  ;;  %v12296_v9 = vcombine.low %v4329_v1, %v4337_v3  ;;  %v12311_v50 = vcombine.high %v4344_v17, %v4352_v5  ;;  %v4432_v0 = vld [vmem:[#allocation25 + $0x1850] sm:$0xff]  ;;  %v4425_v1 = vld [vmem:[#allocation25 + $0x1818] sm:$0xff] }
 0x6ee   :  { %10466 = vmatprep.subr.bf16.mxu0 %v12217_v20  ;;  %v12313_v20 = vcombine.high %v4345_v8, %v4353_v26  ;;  %v4433_v3 = vld [vmem:[#allocation25 + $0x1858] sm:$0xff] }
 0x6f0   :  { %10303 = vmatpush1.bf16.msra.mxu1 %v12214_v46  ;;  %v12310_v46 = vcombine.low %v4344_v17, %v4352_v5  ;;  %v4440_v17 = vld [vmem:[#allocation25 + $0x1890] sm:$0xff] }
 0x6f1   :  { %10467 = vmatpush1.bf16.msra.mxu0 %v12216_v2  ;;  %10304 = vmatprep.subr.bf16.mxu1 %v12231_v14  ;;  %v12312_v2 = vcombine.low %v4345_v8, %v4353_v26  ;;  %v12327_v14 = vcombine.high %v4360_v10, %v4368_v32  ;;  %v4448_v5 = vld [vmem:[#allocation25 + $0x18d0] sm:$0xff]  ;;  %v12390_v8 = vcombine.low %v4424_v61, %v4432_v0  ;;  %v4441_v26 = vld [vmem:[#allocation25 + $0x1898] sm:$0xff] }
 0x6f2   :  { %10468 = vmatprep.subr.bf16.mxu0 %v12233_v22  ;;  %v12329_v22 = vcombine.high %v4361_v11, %v4369_v45 }
 0x6f4   :  { %10305 = vmatpush1.bf16.msra.mxu1 %v12230_v48  ;;  %v12326_v48 = vcombine.low %v4360_v10, %v4368_v32  ;;  %v4464_v10 = vld [vmem:[#allocation25 + $0x1950] sm:$0xff] }
 0x6f5   :  { %10469 = vmatpush1.bf16.msra.mxu0 %v12232_v54  ;;  %10306 = vmatprep.subr.bf16.mxu1 %v12247_v58  ;;  %v12328_v54 = vcombine.low %v4361_v11, %v4369_v45  ;;  %v12343_v58 = vcombine.high %v4376_v43, %v4384_v40  ;;  %v4457_v11 = vld [vmem:[#allocation25 + $0x1918] sm:$0xff] }
 0x6f6   :  { %10470 = vmatprep.subr.bf16.mxu0 %v12249_v49  ;;  %v12345_v49 = vcombine.high %v4377_v27, %v4385_v25  ;;  %v4465_v45 = vld [vmem:[#allocation25 + $0x1958] sm:$0xff] }
 0x6f8   :  { %10307 = vmatpush1.bf16.msra.mxu1 %v12246_v4  ;;  %v12342_v4 = vcombine.low %v4376_v43, %v4384_v40  ;;  %v4472_v43 = vld [vmem:[#allocation25 + $0x1990] sm:$0xff] }
 0x6f9   :  { %10471 = vmatpush1.bf16.msra.mxu0 %v12248_v6  ;;  %10308 = vmatprep.subr.bf16.mxu1 %v12263_v59  ;;  %v12344_v6 = vcombine.low %v4377_v27, %v4385_v25  ;;  %v12359_v59 = vcombine.high %v4392_v51, %v4400_v44  ;;  %v4480_v40 = vld [vmem:[#allocation25 + $0x19d0] sm:$0xff]  ;;  %v4473_v27 = vld [vmem:[#allocation25 + $0x1998] sm:$0xff] }
 0x6fa   :  { %10472 = vmatprep.subr.bf16.mxu0 %v12265_v33  ;;  %v12361_v33 = vcombine.high %v4393_v53, %v4401_v56  ;;  %v4481_v25 = vld [vmem:[#allocation25 + $0x19d8] sm:$0xff] }
 0x6fc   :  { %10309 = vmatpush1.bf16.msra.mxu1 %v12262_v42  ;;  %v12358_v42 = vcombine.low %v4392_v51, %v4400_v44  ;;  %v4488_v51 = vld [vmem:[#allocation25 + $0x1a10] sm:$0xff] }
 0x6fd   :  { %10473 = vmatpush1.bf16.msra.mxu0 %v12264_v29  ;;  %10310 = vmatprep.subr.bf16.mxu1 %v12279_v31  ;;  %v12360_v29 = vcombine.low %v4393_v53, %v4401_v56  ;;  %v12375_v31 = vcombine.high %v4408_v60, %v4416_v36  ;;  %v4496_v44 = vld [vmem:[#allocation25 + $0x1a50] sm:$0xff]  ;;  %v4489_v53 = vld [vmem:[#allocation25 + $0x1a18] sm:$0xff] }
 0x6fe   :  { %10474 = vmatprep.subr.bf16.mxu0 %v12281_v63  ;;  %v12377_v63 = vcombine.high %v4409_v23, %v4417_v28  ;;  %v4497_v56 = vld [vmem:[#allocation25 + $0x1a58] sm:$0xff] }
 0x700   :  { %10311 = vmatpush1.bf16.msra.mxu1 %v12278_v12  ;;  %v12374_v12 = vcombine.low %v4408_v60, %v4416_v36  ;;  %v4504_v60 = vld [vmem:[#allocation25 + $0x1a90] sm:$0xff] }
 0x701   :  { %10475 = vmatpush1.bf16.msra.mxu0 %v12280_v7  ;;  %10312 = vmatprep.subr.bf16.mxu1 %v12295_v18  ;;  %v12376_v7 = vcombine.low %v4409_v23, %v4417_v28  ;;  %v12391_v18 = vcombine.high %v4424_v61, %v4432_v0  ;;  %v4512_v36 = vld [vmem:[#allocation25 + $0x1ad0] sm:$0xff]  ;;  %v4505_v23 = vld [vmem:[#allocation25 + $0x1a98] sm:$0xff] }
 0x702   :  { %10476 = vmatprep.subr.bf16.mxu0 %v12297_v16  ;;  %v12393_v16 = vcombine.high %v4425_v1, %v4433_v3  ;;  %v4513_v28 = vld [vmem:[#allocation25 + $0x1ad8] sm:$0xff]  ;;  %v4520_v0 = vld [vmem:[#allocation25 + $0x1b10] sm:$0xff] }
 0x703   :  { %v12473_v61 = vcombine.high %v4505_v23, %v4513_v28 }
 0x704   :  { %10313 = vmatpush1.bf16.msra.mxu1 %v12294_v30  ;;  %v4449_v30 = vld [vmem:[#allocation25 + $0x18d8] sm:$0xff] }
 0x705   :  { %10477 = vmatpush1.bf16.msra.mxu0 %v12296_v9  ;;  %10314 = vmatprep.subr.bf16.mxu1 %v12311_v50  ;;  %v12392_v9 = vcombine.low %v4425_v1, %v4433_v3  ;;  %v12407_v50 = vcombine.high %v4440_v17, %v4448_v5  ;;  %v12409_v32 = vcombine.high %v4441_v26, %v4449_v30  ;;  %v4528_v1 = vld [vmem:[#allocation25 + $0x1b50] sm:$0xff] }
 0x706   :  { %10478 = vmatprep.subr.bf16.mxu0 %v12313_v20  ;;  %v4456_v20 = vld [vmem:[#allocation25 + $0x1910] sm:$0xff] }
 0x708   :  { %10315 = vmatpush1.bf16.msra.mxu1 %v12310_v46  ;;  %v12406_v46 = vcombine.low %v4440_v17, %v4448_v5  ;;  %v12470_v5 = vcombine.low %v4504_v60, %v4512_v36 }
 0x709   :  { %10479 = vmatpush1.bf16.msra.mxu0 %v12312_v2  ;;  %10316 = vmatprep.subr.bf16.mxu1 %v12327_v14  ;;  %v12408_v2 = vcombine.low %v4441_v26, %v4449_v30  ;;  %v12423_v14 = vcombine.high %v4456_v20, %v4464_v10  ;;  %v12487_v26 = vcombine.high %v4520_v0, %v4528_v1 }
 0x70a   :  { %10480 = vmatprep.subr.bf16.mxu0 %v12329_v22  ;;  %v12425_v22 = vcombine.high %v4457_v11, %v4465_v45 }
 0x70c   :  { %10317 = vmatpush1.bf16.msra.mxu1 %v12326_v48  ;;  %v12422_v48 = vcombine.low %v4456_v20, %v4464_v10  ;;  %v4536_v20 = vld [vmem:[#allocation25 + $0x1b90] sm:$0xff] }
 0x70d   :  { %10481 = vmatpush1.bf16.msra.mxu0 %v12328_v54  ;;  %10318 = vmatprep.subr.bf16.mxu1 %v12343_v58  ;;  %v12424_v54 = vcombine.low %v4457_v11, %v4465_v45  ;;  %v12439_v58 = vcombine.high %v4472_v43, %v4480_v40  ;;  %v4544_v10 = vld [vmem:[#allocation25 + $0x1bd0] sm:$0xff] }
 0x70e   :  { %10482 = vmatprep.subr.bf16.mxu0 %v12345_v49  ;;  %v12441_v49 = vcombine.high %v4473_v27, %v4481_v25 }
 0x710   :  { %10319 = vmatpush1.bf16.msra.mxu1 %v12342_v4  ;;  %v12438_v4 = vcombine.low %v4472_v43, %v4480_v40 }
 0x711   :  { %10483 = vmatpush1.bf16.msra.mxu0 %v12344_v6  ;;  %10320 = vmatprep.subr.bf16.mxu1 %v12359_v59  ;;  %v12440_v6 = vcombine.low %v4473_v27, %v4481_v25  ;;  %v12455_v59 = vcombine.high %v4488_v51, %v4496_v44  ;;  %v12486_v25 = vcombine.low %v4520_v0, %v4528_v1  ;;  %v4584_v0 = vld [vmem:[#allocation25 + $0x1d10] sm:$0xff] }
 0x712   :  { %10484 = vmatprep.subr.bf16.mxu0 %v12361_v33  ;;  %v12457_v33 = vcombine.high %v4489_v53, %v4497_v56  ;;  %v4592_v1 = vld [vmem:[#allocation25 + $0x1d50] sm:$0xff] }
 0x714   :  { %10321 = vmatpush1.bf16.msra.mxu1 %v12358_v42  ;;  %v12454_v42 = vcombine.low %v4488_v51, %v4496_v44  ;;  %v4552_v44 = vld [vmem:[#allocation25 + $0x1c10] sm:$0xff] }
 0x715   :  { %10485 = vmatpush1.bf16.msra.mxu0 %v12360_v29  ;;  %10322 = vmatprep.subr.bf16.mxu1 %v12375_v31  ;;  %v4678_v29 = vld [vmem:[#allocation26] sm:$0xff]  ;;  %v12456_v31 = vcombine.low %v4489_v53, %v4497_v56  ;;  %v4560_v53 = vld [vmem:[#allocation25 + $0x1c50] sm:$0xff]  ;;  %v4553_v56 = vld [vmem:[#allocation25 + $0x1c18] sm:$0xff] }
 0x716   :  { %10486 = vmatprep.subr.bf16.mxu0 %v12377_v63  ;;  %v12471_v63 = vcombine.high %v4504_v60, %v4512_v36  ;;  %v4685_v3 = vrot.slane %v4678_v29, %v13808_v19  ;;  %v4697_v17 = vrot.slane %v4678_v29, %v13845_v37  ;;  %v4568_v36 = vld [vmem:[#allocation25 + $0x1c90] sm:$0xff] }
 0x718   :  { %10323 = vmatpush1.bf16.msra.mxu1 %v12374_v12  ;;  %v4693_v12 = vrot.slane %v4678_v29, %v13842_v35 }
 0x719   :  { %10487 = vmatpush1.bf16.msra.mxu0 %v12376_v7  ;;  %10333 = vmatprep.subr.bf16.mxu1 %v12391_v18  ;;  %v4521_v7 = vld [vmem:[#allocation25 + $0x1b18] sm:$0xff] }
 0x71a   :  { %10497 = vmatprep.subr.bf16.mxu0 %v12393_v16  ;;  %v4529_v18 = vld [vmem:[#allocation25 + $0x1b58] sm:$0xff]  ;;  %v4689_v16 = vrot.slane %v4678_v29, %v13811_v21  ;;  %v12518_v29 = vcombine.low %v4552_v44, %v4560_v53 }
 0x71b   :  { %10325 = vmatmul.mubr.bf16.vlgmr.msra.gmra.mrb[20].mxu1 %v14043_v34 }
 0x71c   :  { %10489 = vmatmul.mubr.bf16.vlgmr.msra.gmra.mrb[24].mxu0 %v14043_v34  ;;  %10334 = vmatpush1.bf16.msra.mxu1 %v12390_v8  ;;  %v12472_v8 = vcombine.low %v4505_v23, %v4513_v28  ;;  %v4576_v23 = vld [vmem:[#allocation25 + $0x1cd0] sm:$0xff]  ;;  %v4569_v28 = vld [vmem:[#allocation25 + $0x1c98] sm:$0xff] }
 0x71d   :  { %10365 = vmatprep.mubr.bf16.mxu1 %v14047_v41  ;;  %10498 = vmatpush1.bf16.msra.mxu0 %v12392_v9 }
 0x71e   :  { %10529 = vmatprep.mubr.bf16.mxu0 %v14047_v41  ;;  %10335 = vmatprep.subr.bf16.mxu1 %v12407_v50  ;;  %v12489_v50 = vcombine.high %v4521_v7, %v4529_v18 }
 0x71f   :  { %10499 = vmatprep.subr.bf16.mxu0 %v12409_v32 }
 0x720   :  { %10336 = vmatpush1.bf16.msra.mxu1 %v12406_v46 }
 0x721   :  { %10500 = vmatpush1.bf16.msra.mxu0 %v12408_v2  ;;  %10337 = vmatprep.subr.bf16.mxu1 %v12423_v14  ;;  %v4537_v2 = vld [vmem:[#allocation25 + $0x1b98] sm:$0xff] }
 0x722   :  { %10501 = vmatprep.subr.bf16.mxu0 %v12425_v22  ;;  %v4545_v14 = vld [vmem:[#allocation25 + $0x1bd8] sm:$0xff] }
 0x723   :  { %v12505_v51 = vcombine.high %v4537_v2, %v4545_v14 }
 0x724   :  { %10338 = vmatpush1.bf16.msra.mxu1 %v12422_v48 }
 0x725   :  { %10502 = vmatpush1.bf16.msra.mxu0 %v12424_v54  ;;  %10339 = vmatprep.subr.bf16.mxu1 %v12439_v58  ;;  %v12488_v58 = vcombine.low %v4521_v7, %v4529_v18  ;;  %v4593_v7 = vld [vmem:[#allocation25 + $0x1d58] sm:$0xff] }
 0x726   :  { %10503 = vmatprep.subr.bf16.mxu0 %v12441_v49  ;;  %v12503_v49 = vcombine.high %v4536_v20, %v4544_v10 }
 0x728   :  { %10340 = vmatpush1.bf16.msra.mxu1 %v12438_v4  ;;  %v4561_v4 = vld [vmem:[#allocation25 + $0x1c58] sm:$0xff] }
 0x729   :  { %10504 = vmatpush1.bf16.msra.mxu0 %v12440_v6  ;;  %10341 = vmatprep.subr.bf16.mxu1 %v12455_v59  ;;  %v12502_v6 = vcombine.low %v4536_v20, %v4544_v10  ;;  %v12504_v59 = vcombine.low %v4537_v2, %v4545_v14  ;;  %v12521_v60 = vcombine.high %v4553_v56, %v4561_v4  ;;  %v4601_v20 = vld [vmem:[#allocation25 + $0x1d98] sm:$0xff]  ;;  %v4616_v2 = vld [vmem:[#allocation25 + $0x1e10] sm:$0xff] }
 0x72a   :  { %10505 = vmatprep.subr.bf16.mxu0 %v12457_v33  ;;  %v12519_v33 = vcombine.high %v4552_v44, %v4560_v53  ;;  %v4609_v10 = vld [vmem:[#allocation25 + $0x1dd8] sm:$0xff]  ;;  %v4624_v14 = vld [vmem:[#allocation25 + $0x1e50] sm:$0xff] }
 0x72b   :  { %v12582_v44 = vcombine.low %v4616_v2, %v4624_v14 }
 0x72c   :  { %10342 = vmatpush1.bf16.msra.mxu1 %v12454_v42  ;;  %v4577_v42 = vld [vmem:[#allocation25 + $0x1cd8] sm:$0xff] }
 0x72d   :  { %10506 = vmatpush1.bf16.msra.mxu0 %v12456_v31  ;;  %10343 = vmatprep.subr.bf16.mxu1 %v12471_v63  ;;  %v12520_v31 = vcombine.low %v4553_v56, %v4561_v4  ;;  %v12535_v63 = vcombine.high %v4568_v36, %v4576_v23 }
 0x72e   :  { %v10039_v30 = vpop.f32.mrb[16].mxu1  ;;  %v10203_v9 = vpop.f32.mrb[20].mxu0  ;;  %10507 = vmatprep.subr.bf16.mxu0 %v12473_v61  ;;  %v12537_v61 = vcombine.high %v4569_v28, %v4577_v42 }
 0x72f   :  { %v12694_v32 = vadd.f32 %v10039_v30, %v4685_v3  ;;  %v12696_v11 = vadd.f32 %v10203_v9, %v4693_v12  ;;  %v10041_v45 = vpop.f32.mrb[17].mxu1  ;;  %v10205_v46 = vpop.f32.mrb[21].mxu0  ;;  %v4585_v12 = vld [vmem:[#allocation25 + $0x1d18] sm:$0xff]  ;;  %v4600_v9 = vld [vmem:[#allocation25 + $0x1d90] sm:$0xff] }
 0x730   :  { %v12695_v22 = vadd.f32 %v10041_v45, %v4689_v16  ;;  %v12697_v43 = vadd.f32 %v10205_v46, %v4697_v17  ;;  %v10043_v40 = vpop.f32.mrb[18].mxu1  ;;  %v10207_v27 = vpop.f32.mrb[22].mxu0  ;;  %10344 = vmatpush1.bf16.msra.mxu1 %v12470_v5  ;;  %v12534_v16 = vcombine.low %v4568_v36, %v4576_v23  ;;  %v12536_v5 = vcombine.low %v4569_v28, %v4577_v42 }
 0x731   :  { %13029 = vtanh.f32 %v12694_v32  ;;  %10508 = vmatpush1.bf16.msra.mxu0 %v12472_v8  ;;  %v10044_v48 = vpop.f32.mrb[19].mxu1  ;;  %v10208_v54 = vpop.f32.mrb[23].mxu0  ;;  %10345 = vmatprep.subr.bf16.mxu1 %v12487_v26  ;;  %v12551_v8 = vcombine.high %v4584_v0, %v4592_v1  ;;  %v12553_v30 = vcombine.high %v4585_v12, %v4593_v7  ;;  %v12550_v32 = vcombine.low %v4584_v0, %v4592_v1 }
 0x732   :  { %13031 = vtanh.f32 %v12696_v11  ;;  %10509 = vmatprep.subr.bf16.mxu0 %v12489_v50  ;;  %v4608_v50 = vld [vmem:[#allocation25 + $0x1dd0] sm:$0xff]  ;;  %v12552_v11 = vcombine.low %v4585_v12, %v4593_v7  ;;  %v12569_v46 = vcombine.high %v4601_v20, %v4609_v10  ;;  %v12568_v27 = vcombine.low %v4601_v20, %v4609_v10  ;;  %v3658_v7 = vld [vmem:[#allocation25 + $0x20] sm:$0xff]  ;;  %v3675_v10 = vld [vmem:[#allocation25 + $0xa8] sm:$0xff] }
 0x733   :  { %13033 = vtanh.f32 %v12695_v22  ;;  %v12567_v45 = vcombine.high %v4600_v9, %v4608_v50  ;;  %v4617_v22 = vld [vmem:[#allocation25 + $0x1e18] sm:$0xff]  ;;  %v12566_v40 = vcombine.low %v4600_v9, %v4608_v50  ;;  %v4632_v54 = vld [vmem:[#allocation25 + $0x1e90] sm:$0xff]  ;;  %v3674_v9 = vld [vmem:[#allocation25 + $0xa0] sm:$0xff] }
 0x734   :  { %13035 = vtanh.f32 %v12697_v43  ;;  %10346 = vmatpush1.bf16.msra.mxu1 %v12486_v25  ;;  %v4625_v43 = vld [vmem:[#allocation25 + $0x1e58] sm:$0xff]  ;;  %v12583_v25 = vcombine.high %v4616_v2, %v4624_v14  ;;  %v3682_v50 = vld [vmem:[#allocation25 + $0xe0] sm:$0xff] }
 0x735   :  { %10510 = vmatpush1.bf16.msra.mxu0 %v12488_v58  ;;  %10347 = vmatprep.subr.bf16.mxu1 %v12503_v49  ;;  %v12585_v48 = vcombine.high %v4617_v22, %v4625_v43  ;;  %v4640_v58 = vld [vmem:[#allocation25 + $0x1ed0] sm:$0xff]  ;;  %v4633_v49 = vld [vmem:[#allocation25 + $0x1e98] sm:$0xff]  ;;  %v12584_v53 = vcombine.low %v4617_v22, %v4625_v43  ;;  %v3698_v2 = vld [vmem:[#allocation25 + $0x160] sm:$0xff] }
 0x736   :  { %10511 = vmatprep.subr.bf16.mxu0 %v12505_v51  ;;  %v4641_v51 = vld [vmem:[#allocation25 + $0x1ed8] sm:$0xff]  ;;  %v12599_v56 = vcombine.high %v4632_v54, %v4640_v58  ;;  %v12598_v36 = vcombine.low %v4632_v54, %v4640_v58  ;;  %v3691_v22 = vld [vmem:[#allocation25 + $0x128] sm:$0xff]  ;;  %v3706_v54 = vld [vmem:[#allocation25 + $0x1a0] sm:$0xff] }
 0x737   :  { %v12601_v4 = vcombine.high %v4633_v49, %v4641_v51  ;;  %v12600_v23 = vcombine.low %v4633_v49, %v4641_v51  ;;  %v3699_v43 = vld [vmem:[#allocation25 + $0x168] sm:$0xff]  ;;  %v3714_v58 = vld [vmem:[#allocation25 + $0x1e0] sm:$0xff] }
 0x738   :  { %10348 = vmatpush1.bf16.msra.mxu1 %v12502_v6  ;;  %v4648_v6 = vld [vmem:[#allocation25 + $0x1f10] sm:$0xff]  ;;  %v3707_v49 = vld [vmem:[#allocation25 + $0x1a8] sm:$0xff] }
 0x739   :  { %10512 = vmatpush1.bf16.msra.mxu0 %v12504_v59  ;;  %10349 = vmatprep.subr.bf16.mxu1 %v12519_v33  ;;  %v4656_v59 = vld [vmem:[#allocation25 + $0x1f50] sm:$0xff]  ;;  %v4649_v33 = vld [vmem:[#allocation25 + $0x1f18] sm:$0xff]  ;;  %v3715_v51 = vld [vmem:[#allocation25 + $0x1e8] sm:$0xff] }
 0x73a   :  { %10513 = vmatprep.subr.bf16.mxu0 %v12521_v60  ;;  %v4657_v60 = vld [vmem:[#allocation25 + $0x1f58] sm:$0xff]  ;;  %v12615_v28 = vcombine.high %v4648_v6, %v4656_v59  ;;  %v12614_v0 = vcombine.low %v4648_v6, %v4656_v59  ;;  %v3722_v6 = vld [vmem:[#allocation25 + $0x220] sm:$0xff] }
 0x73b   :  { %v13030_v3 = vpop.eup %13029  ;;  %v12617_v42 = vcombine.high %v4649_v33, %v4657_v60  ;;  %v12616_v1 = vcombine.low %v4649_v33, %v4657_v60  ;;  %v3730_v59 = vld [vmem:[#allocation25 + $0x260] sm:$0xff]  ;;  %v3723_v33 = vld [vmem:[#allocation25 + $0x228] sm:$0xff] }
 0x73c   :  { %v13032_v18 = vpop.eup %13031  ;;  %11210 = vst [vmem:[#allocation28] sm:$0xff] %v13030_v3  ;;  %10350 = vmatpush1.bf16.msra.mxu1 %v12518_v29  ;;  %v4664_v29 = vld [vmem:[#allocation25 + $0x1f90] sm:$0xff]  ;;  %v3731_v60 = vld [vmem:[#allocation25 + $0x268] sm:$0xff] }
 0x73d   :  { %v13034_v17 = vpop.eup %13033  ;;  %11212 = vst [vmem:[#allocation28 + $0x10] sm:$0xff] %v13032_v18  ;;  %10514 = vmatpush1.bf16.msra.mxu0 %v12520_v31  ;;  %10351 = vmatprep.subr.bf16.mxu1 %v12535_v63  ;;  %v4672_v31 = vld [vmem:[#allocation25 + $0x1fd0] sm:$0xff]  ;;  %v4665_v63 = vld [vmem:[#allocation25 + $0x1f98] sm:$0xff]  ;;  %v3666_v18 = vld [vmem:[#allocation25 + $0x60] sm:$0xff] }
 0x73e   :  { %v13036_v26 = vpop.eup %13035  ;;  %11211 = vst [vmem:[#allocation28 + $0x8] sm:$0xff] %v13034_v17  ;;  %10515 = vmatprep.subr.bf16.mxu0 %v12537_v61  ;;  %v4673_v61 = vld [vmem:[#allocation25 + $0x1fd8] sm:$0xff]  ;;  %v12631_v3 = vcombine.high %v4664_v29, %v4672_v31  ;;  %v3667_v17 = vld [vmem:[#allocation25 + $0x68] sm:$0xff]  ;;  %v11626_v20 = vcombine.low %v3658_v7, %v3666_v18 }
 0x73f   :  { %11213 = vst [vmem:[#allocation28 + $0x18] sm:$0xff] %v13036_v26  ;;  %v12633_v12 = vcombine.high %v4665_v63, %v4673_v61  ;;  %v11627_v26 = vcombine.high %v3658_v7, %v3666_v18  ;;  %v3754_v7 = vld [vmem:[#allocation25 + $0x320] sm:$0xff] }
 0x740   :  { %10352 = vmatpush1.bf16.msra.mxu1 %v12534_v16  ;;  %v3659_v16 = vld [vmem:[#allocation25 + $0x28] sm:$0xff]  ;;  %v3762_v18 = vld [vmem:[#allocation25 + $0x360] sm:$0xff] }
 0x741   :  { %10516 = vmatpush1.bf16.msra.mxu0 %v12536_v5  ;;  %10353 = vmatprep.subr.bf16.mxu1 %v12551_v8  ;;  %v12630_v5 = vcombine.low %v4664_v29, %v4672_v31  ;;  %v12632_v8 = vcombine.low %v4665_v63, %v4673_v61  ;;  %v3738_v29 = vld [vmem:[#allocation25 + $0x2a0] sm:$0xff]  ;;  %v3739_v63 = vld [vmem:[#allocation25 + $0x2a8] sm:$0xff] }
 0x742   :  { %10517 = vmatprep.subr.bf16.mxu0 %v12553_v30  ;;  %v11629_v30 = vcombine.high %v3659_v16, %v3667_v17  ;;  %v3746_v31 = vld [vmem:[#allocation25 + $0x2e0] sm:$0xff]  ;;  %v3747_v61 = vld [vmem:[#allocation25 + $0x2e8] sm:$0xff] }
 0x744   :  { %10354 = vmatpush1.bf16.msra.mxu1 %v12550_v32  ;;  %v3683_v32 = vld [vmem:[#allocation25 + $0xe8] sm:$0xff] }
 0x745   :  { %10518 = vmatpush1.bf16.msra.mxu0 %v12552_v11  ;;  %10355 = vmatprep.subr.bf16.mxu1 %v12567_v45  ;;  %v11628_v11 = vcombine.low %v3659_v16, %v3667_v17  ;;  %v11643_v45 = vcombine.high %v3674_v9, %v3682_v50  ;;  %v11645_v14 = vcombine.high %v3675_v10, %v3683_v32  ;;  %v3755_v16 = vld [vmem:[#allocation25 + $0x328] sm:$0xff] }
 0x746   :  { %10519 = vmatprep.subr.bf16.mxu0 %v12569_v46  ;;  %v3690_v46 = vld [vmem:[#allocation25 + $0x120] sm:$0xff]  ;;  %v3763_v17 = vld [vmem:[#allocation25 + $0x368] sm:$0xff] }
 0x748   :  { %10356 = vmatpush1.bf16.msra.mxu1 %v12566_v40  ;;  %v11642_v40 = vcombine.low %v3674_v9, %v3682_v50  ;;  %v3770_v9 = vld [vmem:[#allocation25 + $0x3a0] sm:$0xff] }
 0x749   :  { %10520 = vmatpush1.bf16.msra.mxu0 %v12568_v27  ;;  %10357 = vmatprep.subr.bf16.mxu1 %v12583_v25  ;;  %v11644_v27 = vcombine.low %v3675_v10, %v3683_v32  ;;  %v11659_v25 = vcombine.high %v3690_v46, %v3698_v2  ;;  %v3778_v50 = vld [vmem:[#allocation25 + $0x3e0] sm:$0xff]  ;;  %v3779_v10 = vld [vmem:[#allocation25 + $0x3e8] sm:$0xff]  ;;  %v11722_v32 = vcombine.low %v3754_v7, %v3762_v18 }
 0x74a   :  { %10521 = vmatprep.subr.bf16.mxu0 %v12585_v48  ;;  %v11661_v48 = vcombine.high %v3691_v22, %v3699_v43 }
 0x74c   :  { %10358 = vmatpush1.bf16.msra.mxu1 %v12582_v44  ;;  %v11658_v44 = vcombine.low %v3690_v46, %v3698_v2  ;;  %v3786_v2 = vld [vmem:[#allocation25 + $0x420] sm:$0xff] }
 0x74d   :  { %10522 = vmatpush1.bf16.msra.mxu0 %v12584_v53  ;;  %10359 = vmatprep.subr.bf16.mxu1 %v12599_v56  ;;  %v11660_v53 = vcombine.low %v3691_v22, %v3699_v43  ;;  %v11675_v56 = vcombine.high %v3706_v54, %v3714_v58  ;;  %v3787_v22 = vld [vmem:[#allocation25 + $0x428] sm:$0xff] }
 0x74e   :  { %10523 = vmatprep.subr.bf16.mxu0 %v12601_v4  ;;  %v11677_v4 = vcombine.high %v3707_v49, %v3715_v51  ;;  %v3795_v43 = vld [vmem:[#allocation25 + $0x468] sm:$0xff] }
 0x750   :  { %10360 = vmatpush1.bf16.msra.mxu1 %v12598_v36  ;;  %v11674_v36 = vcombine.low %v3706_v54, %v3714_v58  ;;  %v3802_v54 = vld [vmem:[#allocation25 + $0x4a0] sm:$0xff] }
 0x751   :  { %10524 = vmatpush1.bf16.msra.mxu0 %v12600_v23  ;;  %10361 = vmatprep.subr.bf16.mxu1 %v12615_v28  ;;  %v11676_v23 = vcombine.low %v3707_v49, %v3715_v51  ;;  %v11691_v28 = vcombine.high %v3722_v6, %v3730_v59  ;;  %v3810_v58 = vld [vmem:[#allocation25 + $0x4e0] sm:$0xff]  ;;  %v3803_v49 = vld [vmem:[#allocation25 + $0x4a8] sm:$0xff] }
 0x752   :  { %10525 = vmatprep.subr.bf16.mxu0 %v12617_v42  ;;  %v11693_v42 = vcombine.high %v3723_v33, %v3731_v60  ;;  %v3811_v51 = vld [vmem:[#allocation25 + $0x4e8] sm:$0xff] }
 0x754   :  { %10362 = vmatpush1.bf16.msra.mxu1 %v12614_v0  ;;  %v11690_v0 = vcombine.low %v3722_v6, %v3730_v59  ;;  %v3818_v6 = vld [vmem:[#allocation25 + $0x520] sm:$0xff] }
 0x755   :  { %10526 = vmatpush1.bf16.msra.mxu0 %v12616_v1  ;;  %10363 = vmatprep.subr.bf16.mxu1 %v12631_v3  ;;  %v11692_v1 = vcombine.low %v3723_v33, %v3731_v60  ;;  %v11707_v3 = vcombine.high %v3738_v29, %v3746_v31  ;;  %v3826_v59 = vld [vmem:[#allocation25 + $0x560] sm:$0xff]  ;;  %v3819_v33 = vld [vmem:[#allocation25 + $0x528] sm:$0xff] }
 0x756   :  { %10527 = vmatprep.subr.bf16.mxu0 %v12633_v12  ;;  %v11709_v12 = vcombine.high %v3739_v63, %v3747_v61  ;;  %v3827_v60 = vld [vmem:[#allocation25 + $0x568] sm:$0xff] }
 0x758   :  { %10364 = vmatpush1.bf16.msra.mxu1 %v12630_v5  ;;  %v11706_v5 = vcombine.low %v3738_v29, %v3746_v31  ;;  %v3834_v29 = vld [vmem:[#allocation25 + $0x5a0] sm:$0xff] }
 0x759   :  { %10528 = vmatpush1.bf16.msra.mxu0 %v12632_v8  ;;  %10538 = vmatprep.subr.bf16.mxu1 %v11627_v26  ;;  %v11708_v8 = vcombine.low %v3739_v63, %v3747_v61  ;;  %v11723_v26 = vcombine.high %v3754_v7, %v3762_v18  ;;  %v3842_v31 = vld [vmem:[#allocation25 + $0x5e0] sm:$0xff]  ;;  %v3835_v63 = vld [vmem:[#allocation25 + $0x5a8] sm:$0xff] }
 0x75a   :  { %10702 = vmatprep.subr.bf16.mxu0 %v11629_v30  ;;  %v11725_v30 = vcombine.high %v3755_v16, %v3763_v17  ;;  %v3843_v61 = vld [vmem:[#allocation25 + $0x5e8] sm:$0xff]  ;;  %v3850_v7 = vld [vmem:[#allocation25 + $0x620] sm:$0xff] }
 0x75b   :  { %10366 = vmatmul.mubr.bf16.vlgmr.msra.gmra.mrb[20].mxu1 %v14056_v38  ;;  %v3858_v18 = vld [vmem:[#allocation25 + $0x660] sm:$0xff] }
 0x75c   :  { %10530 = vmatmul.mubr.bf16.vlgmr.msra.gmra.mrb[24].mxu0 %v14056_v38  ;;  %10539 = vmatpush1.bf16.msra.mxu1 %v11626_v20  ;;  %v3771_v20 = vld [vmem:[#allocation25 + $0x3a8] sm:$0xff] }
 0x75d   :  { %10570 = vmatprep.mubr.bf16.mxu1 %v13940_v52  ;;  %10703 = vmatpush1.bf16.msra.mxu0 %v11628_v11  ;;  %v11724_v11 = vcombine.low %v3755_v16, %v3763_v17  ;;  %v11741_v46 = vcombine.high %v3771_v20, %v3779_v10  ;;  %v3851_v16 = vld [vmem:[#allocation25 + $0x628] sm:$0xff] }
 0x75e   :  { %10734 = vmatprep.mubr.bf16.mxu0 %v13940_v52  ;;  %10540 = vmatprep.subr.bf16.mxu1 %v11643_v45  ;;  %v11739_v45 = vcombine.high %v3770_v9, %v3778_v50  ;;  %v3859_v17 = vld [vmem:[#allocation25 + $0x668] sm:$0xff] }
 0x75f   :  { %10704 = vmatprep.subr.bf16.mxu0 %v11645_v14  ;;  %v3794_v14 = vld [vmem:[#allocation25 + $0x460] sm:$0xff] }
 0x760   :  { %10541 = vmatpush1.bf16.msra.mxu1 %v11642_v40  ;;  %v11738_v40 = vcombine.low %v3770_v9, %v3778_v50  ;;  %v3866_v9 = vld [vmem:[#allocation25 + $0x6a0] sm:$0xff] }
 0x761   :  { %10705 = vmatpush1.bf16.msra.mxu0 %v11644_v27  ;;  %10542 = vmatprep.subr.bf16.mxu1 %v11659_v25  ;;  %v11740_v27 = vcombine.low %v3771_v20, %v3779_v10  ;;  %v11755_v25 = vcombine.high %v3786_v2, %v3794_v14  ;;  %v3874_v50 = vld [vmem:[#allocation25 + $0x6e0] sm:$0xff]  ;;  %v3867_v20 = vld [vmem:[#allocation25 + $0x6a8] sm:$0xff] }
 0x762   :  { %10706 = vmatprep.subr.bf16.mxu0 %v11661_v48  ;;  %v11757_v48 = vcombine.high %v3787_v22, %v3795_v43  ;;  %v3875_v10 = vld [vmem:[#allocation25 + $0x6e8] sm:$0xff] }
 0x764   :  { %10543 = vmatpush1.bf16.msra.mxu1 %v11658_v44  ;;  %v11754_v44 = vcombine.low %v3786_v2, %v3794_v14  ;;  %v3882_v2 = vld [vmem:[#allocation25 + $0x720] sm:$0xff] }
 0x765   :  { %10707 = vmatpush1.bf16.msra.mxu0 %v11660_v53  ;;  %10544 = vmatprep.subr.bf16.mxu1 %v11675_v56  ;;  %v11756_v53 = vcombine.low %v3787_v22, %v3795_v43  ;;  %v11771_v56 = vcombine.high %v3802_v54, %v3810_v58  ;;  %v3890_v14 = vld [vmem:[#allocation25 + $0x760] sm:$0xff]  ;;  %v3883_v22 = vld [vmem:[#allocation25 + $0x728] sm:$0xff] }
 0x766   :  { %10708 = vmatprep.subr.bf16.mxu0 %v11677_v4  ;;  %v11773_v4 = vcombine.high %v3803_v49, %v3811_v51  ;;  %v3891_v43 = vld [vmem:[#allocation25 + $0x768] sm:$0xff] }
 0x768   :  { %10545 = vmatpush1.bf16.msra.mxu1 %v11674_v36  ;;  %v11770_v36 = vcombine.low %v3802_v54, %v3810_v58  ;;  %v3898_v54 = vld [vmem:[#allocation25 + $0x7a0] sm:$0xff] }
 0x769   :  { %10709 = vmatpush1.bf16.msra.mxu0 %v11676_v23  ;;  %10546 = vmatprep.subr.bf16.mxu1 %v11691_v28  ;;  %v11772_v23 = vcombine.low %v3803_v49, %v3811_v51  ;;  %v11787_v28 = vcombine.high %v3818_v6, %v3826_v59  ;;  %v3906_v58 = vld [vmem:[#allocation25 + $0x7e0] sm:$0xff]  ;;  %v3899_v49 = vld [vmem:[#allocation25 + $0x7a8] sm:$0xff] }
 0x76a   :  { %10710 = vmatprep.subr.bf16.mxu0 %v11693_v42  ;;  %v11789_v42 = vcombine.high %v3819_v33, %v3827_v60  ;;  %v3907_v51 = vld [vmem:[#allocation25 + $0x7e8] sm:$0xff] }
 0x76c   :  { %10547 = vmatpush1.bf16.msra.mxu1 %v11690_v0  ;;  %v11786_v0 = vcombine.low %v3818_v6, %v3826_v59  ;;  %v3914_v6 = vld [vmem:[#allocation25 + $0x820] sm:$0xff] }
 0x76d   :  { %10711 = vmatpush1.bf16.msra.mxu0 %v11692_v1  ;;  %10548 = vmatprep.subr.bf16.mxu1 %v11707_v3  ;;  %v11788_v1 = vcombine.low %v3819_v33, %v3827_v60  ;;  %v11803_v3 = vcombine.high %v3834_v29, %v3842_v31  ;;  %v3922_v59 = vld [vmem:[#allocation25 + $0x860] sm:$0xff]  ;;  %v3915_v33 = vld [vmem:[#allocation25 + $0x828] sm:$0xff] }
 0x76e   :  { %10712 = vmatprep.subr.bf16.mxu0 %v11709_v12  ;;  %v11805_v12 = vcombine.high %v3835_v63, %v3843_v61  ;;  %v3923_v60 = vld [vmem:[#allocation25 + $0x868] sm:$0xff] }
 0x770   :  { %10549 = vmatpush1.bf16.msra.mxu1 %v11706_v5  ;;  %v11802_v5 = vcombine.low %v3834_v29, %v3842_v31  ;;  %v3930_v29 = vld [vmem:[#allocation25 + $0x8a0] sm:$0xff] }
 0x771   :  { %10713 = vmatpush1.bf16.msra.mxu0 %v11708_v8  ;;  %10550 = vmatprep.subr.bf16.mxu1 %v11723_v26  ;;  %v11804_v8 = vcombine.low %v3835_v63, %v3843_v61  ;;  %v11819_v26 = vcombine.high %v3850_v7, %v3858_v18  ;;  %v3938_v31 = vld [vmem:[#allocation25 + $0x8e0] sm:$0xff]  ;;  %v11882_v63 = vcombine.low %v3914_v6, %v3922_v59  ;;  %v3931_v61 = vld [vmem:[#allocation25 + $0x8a8] sm:$0xff] }
 0x772   :  { %10714 = vmatprep.subr.bf16.mxu0 %v11725_v30  ;;  %v11821_v30 = vcombine.high %v3851_v16, %v3859_v17 }
 0x774   :  { %10551 = vmatpush1.bf16.msra.mxu1 %v11722_v32  ;;  %v11818_v32 = vcombine.low %v3850_v7, %v3858_v18  ;;  %v3954_v7 = vld [vmem:[#allocation25 + $0x960] sm:$0xff] }
 0x775   :  { %10715 = vmatpush1.bf16.msra.mxu0 %v11724_v11  ;;  %10552 = vmatprep.subr.bf16.mxu1 %v11739_v45  ;;  %v11820_v11 = vcombine.low %v3851_v16, %v3859_v17  ;;  %v11835_v45 = vcombine.high %v3866_v9, %v3874_v50  ;;  %v3947_v16 = vld [vmem:[#allocation25 + $0x928] sm:$0xff] }
 0x776   :  { %10716 = vmatprep.subr.bf16.mxu0 %v11741_v46  ;;  %v11837_v46 = vcombine.high %v3867_v20, %v3875_v10  ;;  %v3955_v17 = vld [vmem:[#allocation25 + $0x968] sm:$0xff] }
 0x778   :  { %10553 = vmatpush1.bf16.msra.mxu1 %v11738_v40  ;;  %v11834_v40 = vcombine.low %v3866_v9, %v3874_v50  ;;  %v3962_v9 = vld [vmem:[#allocation25 + $0x9a0] sm:$0xff] }
 0x779   :  { %10717 = vmatpush1.bf16.msra.mxu0 %v11740_v27  ;;  %10554 = vmatprep.subr.bf16.mxu1 %v11755_v25  ;;  %v11836_v27 = vcombine.low %v3867_v20, %v3875_v10  ;;  %v11851_v25 = vcombine.high %v3882_v2, %v3890_v14  ;;  %v3970_v50 = vld [vmem:[#allocation25 + $0x9e0] sm:$0xff]  ;;  %v3963_v20 = vld [vmem:[#allocation25 + $0x9a8] sm:$0xff] }
 0x77a   :  { %10718 = vmatprep.subr.bf16.mxu0 %v11757_v48  ;;  %v11853_v48 = vcombine.high %v3883_v22, %v3891_v43  ;;  %v3971_v10 = vld [vmem:[#allocation25 + $0x9e8] sm:$0xff] }
 0x77c   :  { %10555 = vmatpush1.bf16.msra.mxu1 %v11754_v44  ;;  %v11850_v44 = vcombine.low %v3882_v2, %v3890_v14  ;;  %v3978_v2 = vld [vmem:[#allocation25 + $0xa20] sm:$0xff] }
 0x77d   :  { %10719 = vmatpush1.bf16.msra.mxu0 %v11756_v53  ;;  %10556 = vmatprep.subr.bf16.mxu1 %v11771_v56  ;;  %v11852_v53 = vcombine.low %v3883_v22, %v3891_v43  ;;  %v11867_v56 = vcombine.high %v3898_v54, %v3906_v58  ;;  %v3986_v14 = vld [vmem:[#allocation25 + $0xa60] sm:$0xff]  ;;  %v3979_v22 = vld [vmem:[#allocation25 + $0xa28] sm:$0xff] }
 0x77e   :  { %10720 = vmatprep.subr.bf16.mxu0 %v11773_v4  ;;  %v11869_v4 = vcombine.high %v3899_v49, %v3907_v51  ;;  %v3987_v43 = vld [vmem:[#allocation25 + $0xa68] sm:$0xff] }
 0x780   :  { %10557 = vmatpush1.bf16.msra.mxu1 %v11770_v36  ;;  %v11866_v36 = vcombine.low %v3898_v54, %v3906_v58  ;;  %v3994_v54 = vld [vmem:[#allocation25 + $0xaa0] sm:$0xff] }
 0x781   :  { %10721 = vmatpush1.bf16.msra.mxu0 %v11772_v23  ;;  %10558 = vmatprep.subr.bf16.mxu1 %v11787_v28  ;;  %v11868_v23 = vcombine.low %v3899_v49, %v3907_v51  ;;  %v11883_v28 = vcombine.high %v3914_v6, %v3922_v59  ;;  %v4002_v58 = vld [vmem:[#allocation25 + $0xae0] sm:$0xff]  ;;  %v3995_v49 = vld [vmem:[#allocation25 + $0xaa8] sm:$0xff] }
 0x782   :  { %10722 = vmatprep.subr.bf16.mxu0 %v11789_v42  ;;  %v11885_v42 = vcombine.high %v3915_v33, %v3923_v60  ;;  %v4003_v51 = vld [vmem:[#allocation25 + $0xae8] sm:$0xff]  ;;  %v4010_v6 = vld [vmem:[#allocation25 + $0xb20] sm:$0xff] }
 0x783   :  { %v4018_v59 = vld [vmem:[#allocation25 + $0xb60] sm:$0xff] }
 0x784   :  { %10559 = vmatpush1.bf16.msra.mxu1 %v11786_v0  ;;  %v3939_v0 = vld [vmem:[#allocation25 + $0x8e8] sm:$0xff] }
 0x785   :  { %10723 = vmatpush1.bf16.msra.mxu0 %v11788_v1  ;;  %10560 = vmatprep.subr.bf16.mxu1 %v11803_v3  ;;  %v11884_v1 = vcombine.low %v3915_v33, %v3923_v60  ;;  %v11899_v3 = vcombine.high %v3930_v29, %v3938_v31  ;;  %v11901_v18 = vcombine.high %v3931_v61, %v3939_v0  ;;  %v4011_v33 = vld [vmem:[#allocation25 + $0xb28] sm:$0xff] }
 0x786   :  { %10724 = vmatprep.subr.bf16.mxu0 %v11805_v12  ;;  %v3946_v12 = vld [vmem:[#allocation25 + $0x920] sm:$0xff]  ;;  %v4019_v60 = vld [vmem:[#allocation25 + $0xb68] sm:$0xff] }
 0x788   :  { %10561 = vmatpush1.bf16.msra.mxu1 %v11802_v5  ;;  %v11898_v5 = vcombine.low %v3930_v29, %v3938_v31  ;;  %v4026_v29 = vld [vmem:[#allocation25 + $0xba0] sm:$0xff] }
 0x789   :  { %10725 = vmatpush1.bf16.msra.mxu0 %v11804_v8  ;;  %10562 = vmatprep.subr.bf16.mxu1 %v11819_v26  ;;  %v11900_v8 = vcombine.low %v3931_v61, %v3939_v0  ;;  %v11915_v26 = vcombine.high %v3946_v12, %v3954_v7  ;;  %v4034_v31 = vld [vmem:[#allocation25 + $0xbe0] sm:$0xff]  ;;  %v4035_v61 = vld [vmem:[#allocation25 + $0xbe8] sm:$0xff]  ;;  %v11978_v0 = vcombine.low %v4010_v6, %v4018_v59 }
 0x78a   :  { %10726 = vmatprep.subr.bf16.mxu0 %v11821_v30  ;;  %v11917_v30 = vcombine.high %v3947_v16, %v3955_v17 }
 0x78c   :  { %10563 = vmatpush1.bf16.msra.mxu1 %v11818_v32  ;;  %v11914_v32 = vcombine.low %v3946_v12, %v3954_v7  ;;  %v4042_v7 = vld [vmem:[#allocation25 + $0xc20] sm:$0xff] }
 0x78d   :  { %10727 = vmatpush1.bf16.msra.mxu0 %v11820_v11  ;;  %10564 = vmatprep.subr.bf16.mxu1 %v11835_v45  ;;  %v11916_v11 = vcombine.low %v3947_v16, %v3955_v17  ;;  %v11931_v45 = vcombine.high %v3962_v9, %v3970_v50  ;;  %v4043_v16 = vld [vmem:[#allocation25 + $0xc28] sm:$0xff] }
 0x78e   :  { %10728 = vmatprep.subr.bf16.mxu0 %v11837_v46  ;;  %v11933_v46 = vcombine.high %v3963_v20, %v3971_v10  ;;  %v4051_v17 = vld [vmem:[#allocation25 + $0xc68] sm:$0xff] }
 0x790   :  { %10565 = vmatpush1.bf16.msra.mxu1 %v11834_v40  ;;  %v11930_v40 = vcombine.low %v3962_v9, %v3970_v50  ;;  %v4058_v9 = vld [vmem:[#allocation25 + $0xca0] sm:$0xff] }
 0x791   :  { %10729 = vmatpush1.bf16.msra.mxu0 %v11836_v27  ;;  %10566 = vmatprep.subr.bf16.mxu1 %v11851_v25  ;;  %v11932_v27 = vcombine.low %v3963_v20, %v3971_v10  ;;  %v11947_v25 = vcombine.high %v3978_v2, %v3986_v14  ;;  %v4066_v50 = vld [vmem:[#allocation25 + $0xce0] sm:$0xff]  ;;  %v4059_v20 = vld [vmem:[#allocation25 + $0xca8] sm:$0xff] }
 0x792   :  { %10730 = vmatprep.subr.bf16.mxu0 %v11853_v48  ;;  %v11949_v48 = vcombine.high %v3979_v22, %v3987_v43  ;;  %v4067_v10 = vld [vmem:[#allocation25 + $0xce8] sm:$0xff] }
 0x794   :  { %10567 = vmatpush1.bf16.msra.mxu1 %v11850_v44  ;;  %v11946_v44 = vcombine.low %v3978_v2, %v3986_v14  ;;  %v4074_v2 = vld [vmem:[#allocation25 + $0xd20] sm:$0xff] }
 0x795   :  { %10731 = vmatpush1.bf16.msra.mxu0 %v11852_v53  ;;  %10568 = vmatprep.subr.bf16.mxu1 %v11867_v56  ;;  %v11948_v53 = vcombine.low %v3979_v22, %v3987_v43  ;;  %v11963_v56 = vcombine.high %v3994_v54, %v4002_v58  ;;  %v4082_v14 = vld [vmem:[#allocation25 + $0xd60] sm:$0xff]  ;;  %v4075_v22 = vld [vmem:[#allocation25 + $0xd28] sm:$0xff] }
 0x796   :  { %10732 = vmatprep.subr.bf16.mxu0 %v11869_v4  ;;  %v11965_v4 = vcombine.high %v3995_v49, %v4003_v51  ;;  %v4083_v43 = vld [vmem:[#allocation25 + $0xd68] sm:$0xff] }
 0x798   :  { %10569 = vmatpush1.bf16.msra.mxu1 %v11866_v36  ;;  %v11962_v36 = vcombine.low %v3994_v54, %v4002_v58  ;;  %v4090_v54 = vld [vmem:[#allocation25 + $0xda0] sm:$0xff] }
 0x799   :  { %10733 = vmatpush1.bf16.msra.mxu0 %v11868_v23  ;;  %10579 = vmatprep.subr.bf16.mxu1 %v11883_v28  ;;  %v11964_v23 = vcombine.low %v3995_v49, %v4003_v51  ;;  %v11979_v28 = vcombine.high %v4010_v6, %v4018_v59  ;;  %v4098_v58 = vld [vmem:[#allocation25 + $0xde0] sm:$0xff]  ;;  %v4091_v49 = vld [vmem:[#allocation25 + $0xda8] sm:$0xff] }
 0x79a   :  { %10743 = vmatprep.subr.bf16.mxu0 %v11885_v42  ;;  %v11981_v42 = vcombine.high %v4011_v33, %v4019_v60  ;;  %v4099_v51 = vld [vmem:[#allocation25 + $0xde8] sm:$0xff]  ;;  %v4106_v6 = vld [vmem:[#allocation25 + $0xe20] sm:$0xff] }
 0x79b   :  { %10571 = vmatmul.mubr.bf16.vlgmr.msra.gmra.mrb[24].mxu1 %v13942_v55  ;;  %v4114_v59 = vld [vmem:[#allocation25 + $0xe60] sm:$0xff] }
 0x79c   :  { %10735 = vmatmul.mubr.bf16.vlgmr.msra.gmra.mrb[28].mxu0 %v13942_v55  ;;  %10580 = vmatpush1.bf16.msra.mxu1 %v11882_v63  ;;  %v4027_v63 = vld [vmem:[#allocation25 + $0xba8] sm:$0xff] }
 0x79d   :  { %10611 = vmatprep.mubr.bf16.mxu1 %v13946_v62  ;;  %10744 = vmatpush1.bf16.msra.mxu0 %v11884_v1  ;;  %v11980_v1 = vcombine.low %v4011_v33, %v4019_v60  ;;  %v11997_v12 = vcombine.high %v4027_v63, %v4035_v61  ;;  %v4107_v33 = vld [vmem:[#allocation25 + $0xe28] sm:$0xff] }
 0x79e   :  { %10775 = vmatprep.mubr.bf16.mxu0 %v13946_v62  ;;  %10581 = vmatprep.subr.bf16.mxu1 %v11899_v3  ;;  %v11995_v3 = vcombine.high %v4026_v29, %v4034_v31  ;;  %v4115_v60 = vld [vmem:[#allocation25 + $0xe68] sm:$0xff] }
 0x79f   :  { %10745 = vmatprep.subr.bf16.mxu0 %v11901_v18  ;;  %v4050_v18 = vld [vmem:[#allocation25 + $0xc60] sm:$0xff] }
 0x7a0   :  { %10582 = vmatpush1.bf16.msra.mxu1 %v11898_v5  ;;  %v11994_v5 = vcombine.low %v4026_v29, %v4034_v31  ;;  %v4122_v29 = vld [vmem:[#allocation25 + $0xea0] sm:$0xff] }
 0x7a1   :  { %10746 = vmatpush1.bf16.msra.mxu0 %v11900_v8  ;;  %10583 = vmatprep.subr.bf16.mxu1 %v11915_v26  ;;  %v11996_v8 = vcombine.low %v4027_v63, %v4035_v61  ;;  %v12011_v26 = vcombine.high %v4042_v7, %v4050_v18  ;;  %v4130_v31 = vld [vmem:[#allocation25 + $0xee0] sm:$0xff]  ;;  %v4123_v63 = vld [vmem:[#allocation25 + $0xea8] sm:$0xff] }
 0x7a2   :  { %10747 = vmatprep.subr.bf16.mxu0 %v11917_v30  ;;  %v12013_v30 = vcombine.high %v4043_v16, %v4051_v17  ;;  %v4131_v61 = vld [vmem:[#allocation25 + $0xee8] sm:$0xff] }
 0x7a4   :  { %10584 = vmatpush1.bf16.msra.mxu1 %v11914_v32  ;;  %v12010_v32 = vcombine.low %v4042_v7, %v4050_v18  ;;  %v4138_v7 = vld [vmem:[#allocation25 + $0xf20] sm:$0xff] }
 0x7a5   :  { %10748 = vmatpush1.bf16.msra.mxu0 %v11916_v11  ;;  %10585 = vmatprep.subr.bf16.mxu1 %v11931_v45  ;;  %v12012_v11 = vcombine.low %v4043_v16, %v4051_v17  ;;  %v12027_v45 = vcombine.high %v4058_v9, %v4066_v50  ;;  %v4146_v18 = vld [vmem:[#allocation25 + $0xf60] sm:$0xff]  ;;  %v4139_v16 = vld [vmem:[#allocation25 + $0xf28] sm:$0xff] }
 0x7a6   :  { %10749 = vmatprep.subr.bf16.mxu0 %v11933_v46  ;;  %v12029_v46 = vcombine.high %v4059_v20, %v4067_v10  ;;  %v4147_v17 = vld [vmem:[#allocation25 + $0xf68] sm:$0xff] }
 0x7a8   :  { %10586 = vmatpush1.bf16.msra.mxu1 %v11930_v40  ;;  %v12026_v40 = vcombine.low %v4058_v9, %v4066_v50  ;;  %v4154_v9 = vld [vmem:[#allocation25 + $0xfa0] sm:$0xff] }
 0x7a9   :  { %10750 = vmatpush1.bf16.msra.mxu0 %v11932_v27  ;;  %10587 = vmatprep.subr.bf16.mxu1 %v11947_v25  ;;  %v12028_v27 = vcombine.low %v4059_v20, %v4067_v10  ;;  %v12043_v25 = vcombine.high %v4074_v2, %v4082_v14  ;;  %v4162_v50 = vld [vmem:[#allocation25 + $0xfe0] sm:$0xff]  ;;  %v4155_v20 = vld [vmem:[#allocation25 + $0xfa8] sm:$0xff] }
 0x7aa   :  { %10751 = vmatprep.subr.bf16.mxu0 %v11949_v48  ;;  %v12045_v48 = vcombine.high %v4075_v22, %v4083_v43  ;;  %v4163_v10 = vld [vmem:[#allocation25 + $0xfe8] sm:$0xff] }
 0x7ac   :  { %10588 = vmatpush1.bf16.msra.mxu1 %v11946_v44  ;;  %v12042_v44 = vcombine.low %v4074_v2, %v4082_v14  ;;  %v4170_v2 = vld [vmem:[#allocation25 + $0x1020] sm:$0xff] }
 0x7ad   :  { %10752 = vmatpush1.bf16.msra.mxu0 %v11948_v53  ;;  %10589 = vmatprep.subr.bf16.mxu1 %v11963_v56  ;;  %v12044_v53 = vcombine.low %v4075_v22, %v4083_v43  ;;  %v12059_v56 = vcombine.high %v4090_v54, %v4098_v58  ;;  %v4178_v14 = vld [vmem:[#allocation25 + $0x1060] sm:$0xff]  ;;  %v4171_v22 = vld [vmem:[#allocation25 + $0x1028] sm:$0xff] }
 0x7ae   :  { %10753 = vmatprep.subr.bf16.mxu0 %v11965_v4  ;;  %v12061_v4 = vcombine.high %v4091_v49, %v4099_v51  ;;  %v4179_v43 = vld [vmem:[#allocation25 + $0x1068] sm:$0xff] }
 0x7b0   :  { %10590 = vmatpush1.bf16.msra.mxu1 %v11962_v36  ;;  %v12058_v36 = vcombine.low %v4090_v54, %v4098_v58  ;;  %v4186_v54 = vld [vmem:[#allocation25 + $0x10a0] sm:$0xff] }
 0x7b1   :  { %10754 = vmatpush1.bf16.msra.mxu0 %v11964_v23  ;;  %10591 = vmatprep.subr.bf16.mxu1 %v11979_v28  ;;  %v12060_v23 = vcombine.low %v4091_v49, %v4099_v51  ;;  %v12075_v28 = vcombine.high %v4106_v6, %v4114_v59  ;;  %v4194_v58 = vld [vmem:[#allocation25 + $0x10e0] sm:$0xff]  ;;  %v12138_v49 = vcombine.low %v4170_v2, %v4178_v14  ;;  %v4187_v51 = vld [vmem:[#allocation25 + $0x10a8] sm:$0xff] }
 0x7b2   :  { %10755 = vmatprep.subr.bf16.mxu0 %v11981_v42  ;;  %v12077_v42 = vcombine.high %v4107_v33, %v4115_v60 }
 0x7b4   :  { %10592 = vmatpush1.bf16.msra.mxu1 %v11978_v0  ;;  %v12074_v0 = vcombine.low %v4106_v6, %v4114_v59  ;;  %v4210_v6 = vld [vmem:[#allocation25 + $0x1160] sm:$0xff] }
 0x7b5   :  { %10756 = vmatpush1.bf16.msra.mxu0 %v11980_v1  ;;  %10593 = vmatprep.subr.bf16.mxu1 %v11995_v3  ;;  %v12076_v1 = vcombine.low %v4107_v33, %v4115_v60  ;;  %v12091_v3 = vcombine.high %v4122_v29, %v4130_v31  ;;  %v4203_v33 = vld [vmem:[#allocation25 + $0x1128] sm:$0xff] }
 0x7b6   :  { %10757 = vmatprep.subr.bf16.mxu0 %v11997_v12  ;;  %v12093_v12 = vcombine.high %v4123_v63, %v4131_v61  ;;  %v4211_v60 = vld [vmem:[#allocation25 + $0x1168] sm:$0xff] }
 0x7b8   :  { %10594 = vmatpush1.bf16.msra.mxu1 %v11994_v5  ;;  %v12090_v5 = vcombine.low %v4122_v29, %v4130_v31  ;;  %v4218_v29 = vld [vmem:[#allocation25 + $0x11a0] sm:$0xff] }
 0x7b9   :  { %10758 = vmatpush1.bf16.msra.mxu0 %v11996_v8  ;;  %10595 = vmatprep.subr.bf16.mxu1 %v12011_v26  ;;  %v12092_v8 = vcombine.low %v4123_v63, %v4131_v61  ;;  %v12107_v26 = vcombine.high %v4138_v7, %v4146_v18  ;;  %v4226_v31 = vld [vmem:[#allocation25 + $0x11e0] sm:$0xff]  ;;  %v4219_v63 = vld [vmem:[#allocation25 + $0x11a8] sm:$0xff] }
 0x7ba   :  { %10759 = vmatprep.subr.bf16.mxu0 %v12013_v30  ;;  %v12109_v30 = vcombine.high %v4139_v16, %v4147_v17  ;;  %v4227_v61 = vld [vmem:[#allocation25 + $0x11e8] sm:$0xff] }
 0x7bc   :  { %10596 = vmatpush1.bf16.msra.mxu1 %v12010_v32  ;;  %v12106_v32 = vcombine.low %v4138_v7, %v4146_v18  ;;  %v4234_v7 = vld [vmem:[#allocation25 + $0x1220] sm:$0xff] }
 0x7bd   :  { %10760 = vmatpush1.bf16.msra.mxu0 %v12012_v11  ;;  %10597 = vmatprep.subr.bf16.mxu1 %v12027_v45  ;;  %v12108_v11 = vcombine.low %v4139_v16, %v4147_v17  ;;  %v12123_v45 = vcombine.high %v4154_v9, %v4162_v50  ;;  %v4242_v18 = vld [vmem:[#allocation25 + $0x1260] sm:$0xff]  ;;  %v4235_v16 = vld [vmem:[#allocation25 + $0x1228] sm:$0xff] }
 0x7be   :  { %10761 = vmatprep.subr.bf16.mxu0 %v12029_v46  ;;  %v12125_v46 = vcombine.high %v4155_v20, %v4163_v10  ;;  %v4243_v17 = vld [vmem:[#allocation25 + $0x1268] sm:$0xff] }
 0x7c0   :  { %10598 = vmatpush1.bf16.msra.mxu1 %v12026_v40  ;;  %v12122_v40 = vcombine.low %v4154_v9, %v4162_v50  ;;  %v4250_v9 = vld [vmem:[#allocation25 + $0x12a0] sm:$0xff] }
 0x7c1   :  { %10762 = vmatpush1.bf16.msra.mxu0 %v12028_v27  ;;  %10599 = vmatprep.subr.bf16.mxu1 %v12043_v25  ;;  %v12124_v27 = vcombine.low %v4155_v20, %v4163_v10  ;;  %v12139_v25 = vcombine.high %v4170_v2, %v4178_v14  ;;  %v4258_v50 = vld [vmem:[#allocation25 + $0x12e0] sm:$0xff]  ;;  %v4251_v20 = vld [vmem:[#allocation25 + $0x12a8] sm:$0xff] }
 0x7c2   :  { %10763 = vmatprep.subr.bf16.mxu0 %v12045_v48  ;;  %v12141_v48 = vcombine.high %v4171_v22, %v4179_v43  ;;  %v4259_v10 = vld [vmem:[#allocation25 + $0x12e8] sm:$0xff]  ;;  %v4266_v2 = vld [vmem:[#allocation25 + $0x1320] sm:$0xff] }
 0x7c3   :  { %v4274_v14 = vld [vmem:[#allocation25 + $0x1360] sm:$0xff] }
 0x7c4   :  { %10600 = vmatpush1.bf16.msra.mxu1 %v12042_v44  ;;  %v4195_v44 = vld [vmem:[#allocation25 + $0x10e8] sm:$0xff] }
 0x7c5   :  { %10764 = vmatpush1.bf16.msra.mxu0 %v12044_v53  ;;  %10601 = vmatprep.subr.bf16.mxu1 %v12059_v56  ;;  %v12140_v53 = vcombine.low %v4171_v22, %v4179_v43  ;;  %v12155_v56 = vcombine.high %v4186_v54, %v4194_v58  ;;  %v12157_v59 = vcombine.high %v4187_v51, %v4195_v44  ;;  %v4267_v22 = vld [vmem:[#allocation25 + $0x1328] sm:$0xff] }
 0x7c6   :  { %10765 = vmatprep.subr.bf16.mxu0 %v12061_v4  ;;  %v4202_v4 = vld [vmem:[#allocation25 + $0x1120] sm:$0xff]  ;;  %v4275_v43 = vld [vmem:[#allocation25 + $0x1368] sm:$0xff] }
 0x7c8   :  { %10602 = vmatpush1.bf16.msra.mxu1 %v12058_v36  ;;  %v12154_v36 = vcombine.low %v4186_v54, %v4194_v58  ;;  %v4282_v54 = vld [vmem:[#allocation25 + $0x13a0] sm:$0xff] }
 0x7c9   :  { %10766 = vmatpush1.bf16.msra.mxu0 %v12060_v23  ;;  %10603 = vmatprep.subr.bf16.mxu1 %v12075_v28  ;;  %v12156_v23 = vcombine.low %v4187_v51, %v4195_v44  ;;  %v12171_v28 = vcombine.high %v4202_v4, %v4210_v6  ;;  %v4290_v58 = vld [vmem:[#allocation25 + $0x13e0] sm:$0xff]  ;;  %v4291_v51 = vld [vmem:[#allocation25 + $0x13e8] sm:$0xff]  ;;  %v12234_v44 = vcombine.low %v4266_v2, %v4274_v14 }
 0x7ca   :  { %10767 = vmatprep.subr.bf16.mxu0 %v12077_v42  ;;  %v12173_v42 = vcombine.high %v4203_v33, %v4211_v60 }
 0x7cc   :  { %10604 = vmatpush1.bf16.msra.mxu1 %v12074_v0  ;;  %v12170_v0 = vcombine.low %v4202_v4, %v4210_v6  ;;  %v4298_v6 = vld [vmem:[#allocation25 + $0x1420] sm:$0xff] }
 0x7cd   :  { %10768 = vmatpush1.bf16.msra.mxu0 %v12076_v1  ;;  %10605 = vmatprep.subr.bf16.mxu1 %v12091_v3  ;;  %v12172_v1 = vcombine.low %v4203_v33, %v4211_v60  ;;  %v12187_v3 = vcombine.high %v4218_v29, %v4226_v31  ;;  %v4299_v33 = vld [vmem:[#allocation25 + $0x1428] sm:$0xff] }
 0x7ce   :  { %10769 = vmatprep.subr.bf16.mxu0 %v12093_v12  ;;  %v12189_v12 = vcombine.high %v4219_v63, %v4227_v61  ;;  %v4307_v60 = vld [vmem:[#allocation25 + $0x1468] sm:$0xff] }
 0x7d0   :  { %10606 = vmatpush1.bf16.msra.mxu1 %v12090_v5  ;;  %v12186_v5 = vcombine.low %v4218_v29, %v4226_v31  ;;  %v4314_v29 = vld [vmem:[#allocation25 + $0x14a0] sm:$0xff] }
 0x7d1   :  { %10770 = vmatpush1.bf16.msra.mxu0 %v12092_v8  ;;  %10607 = vmatprep.subr.bf16.mxu1 %v12107_v26  ;;  %v12188_v8 = vcombine.low %v4219_v63, %v4227_v61  ;;  %v12203_v26 = vcombine.high %v4234_v7, %v4242_v18  ;;  %v4322_v31 = vld [vmem:[#allocation25 + $0x14e0] sm:$0xff]  ;;  %v4315_v63 = vld [vmem:[#allocation25 + $0x14a8] sm:$0xff] }
 0x7d2   :  { %10771 = vmatprep.subr.bf16.mxu0 %v12109_v30  ;;  %v12205_v30 = vcombine.high %v4235_v16, %v4243_v17  ;;  %v4323_v61 = vld [vmem:[#allocation25 + $0x14e8] sm:$0xff] }
 0x7d4   :  { %10608 = vmatpush1.bf16.msra.mxu1 %v12106_v32  ;;  %v12202_v32 = vcombine.low %v4234_v7, %v4242_v18  ;;  %v4330_v7 = vld [vmem:[#allocation25 + $0x1520] sm:$0xff] }
 0x7d5   :  { %10772 = vmatpush1.bf16.msra.mxu0 %v12108_v11  ;;  %10609 = vmatprep.subr.bf16.mxu1 %v12123_v45  ;;  %v12204_v11 = vcombine.low %v4235_v16, %v4243_v17  ;;  %v12219_v45 = vcombine.high %v4250_v9, %v4258_v50  ;;  %v4338_v18 = vld [vmem:[#allocation25 + $0x1560] sm:$0xff]  ;;  %v4331_v16 = vld [vmem:[#allocation25 + $0x1528] sm:$0xff] }
 0x7d6   :  { %10773 = vmatprep.subr.bf16.mxu0 %v12125_v46  ;;  %v12221_v46 = vcombine.high %v4251_v20, %v4259_v10  ;;  %v4339_v17 = vld [vmem:[#allocation25 + $0x1568] sm:$0xff] }
 0x7d8   :  { %10610 = vmatpush1.bf16.msra.mxu1 %v12122_v40  ;;  %v12218_v40 = vcombine.low %v4250_v9, %v4258_v50  ;;  %v4346_v9 = vld [vmem:[#allocation25 + $0x15a0] sm:$0xff] }
 0x7d9   :  { %10774 = vmatpush1.bf16.msra.mxu0 %v12124_v27  ;;  %10620 = vmatprep.subr.bf16.mxu1 %v12139_v25  ;;  %v12220_v27 = vcombine.low %v4251_v20, %v4259_v10  ;;  %v12235_v25 = vcombine.high %v4266_v2, %v4274_v14  ;;  %v4354_v50 = vld [vmem:[#allocation25 + $0x15e0] sm:$0xff]  ;;  %v4347_v20 = vld [vmem:[#allocation25 + $0x15a8] sm:$0xff] }
 0x7da   :  { %10784 = vmatprep.subr.bf16.mxu0 %v12141_v48  ;;  %v12237_v48 = vcombine.high %v4267_v22, %v4275_v43  ;;  %v4355_v10 = vld [vmem:[#allocation25 + $0x15e8] sm:$0xff]  ;;  %v4362_v2 = vld [vmem:[#allocation25 + $0x1620] sm:$0xff] }
 0x7db   :  { %10612 = vmatmul.mubr.bf16.vlgmr.msra.gmra.mrb[24].mxu1 %v13972_v15  ;;  %v4370_v14 = vld [vmem:[#allocation25 + $0x1660] sm:$0xff] }
 0x7dc   :  { %10776 = vmatmul.mubr.bf16.vlgmr.msra.gmra.mrb[28].mxu0 %v13972_v15  ;;  %10621 = vmatpush1.bf16.msra.mxu1 %v12138_v49  ;;  %v4283_v49 = vld [vmem:[#allocation25 + $0x13a8] sm:$0xff] }
 0x7dd   :  { %10652 = vmatprep.mubr.bf16.mxu1 %v14041_v13  ;;  %10785 = vmatpush1.bf16.msra.mxu0 %v12140_v53  ;;  %v12236_v53 = vcombine.low %v4267_v22, %v4275_v43  ;;  %v12253_v4 = vcombine.high %v4283_v49, %v4291_v51  ;;  %v4363_v22 = vld [vmem:[#allocation25 + $0x1628] sm:$0xff] }
 0x7de   :  { %10816 = vmatprep.mubr.bf16.mxu0 %v14041_v13  ;;  %10622 = vmatprep.subr.bf16.mxu1 %v12155_v56  ;;  %v12251_v56 = vcombine.high %v4282_v54, %v4290_v58  ;;  %v4371_v43 = vld [vmem:[#allocation25 + $0x1668] sm:$0xff] }
 0x7df   :  { %10786 = vmatprep.subr.bf16.mxu0 %v12157_v59  ;;  %v4306_v59 = vld [vmem:[#allocation25 + $0x1460] sm:$0xff] }
 0x7e0   :  { %10623 = vmatpush1.bf16.msra.mxu1 %v12154_v36  ;;  %v12250_v36 = vcombine.low %v4282_v54, %v4290_v58  ;;  %v4378_v54 = vld [vmem:[#allocation25 + $0x16a0] sm:$0xff] }
 0x7e1   :  { %10787 = vmatpush1.bf16.msra.mxu0 %v12156_v23  ;;  %10624 = vmatprep.subr.bf16.mxu1 %v12171_v28  ;;  %v12252_v23 = vcombine.low %v4283_v49, %v4291_v51  ;;  %v12267_v28 = vcombine.high %v4298_v6, %v4306_v59  ;;  %v4386_v58 = vld [vmem:[#allocation25 + $0x16e0] sm:$0xff]  ;;  %v4379_v49 = vld [vmem:[#allocation25 + $0x16a8] sm:$0xff] }
 0x7e2   :  { %10788 = vmatprep.subr.bf16.mxu0 %v12173_v42  ;;  %v12269_v42 = vcombine.high %v4299_v33, %v4307_v60  ;;  %v4387_v51 = vld [vmem:[#allocation25 + $0x16e8] sm:$0xff] }
 0x7e4   :  { %10625 = vmatpush1.bf16.msra.mxu1 %v12170_v0  ;;  %v12266_v0 = vcombine.low %v4298_v6, %v4306_v59  ;;  %v4394_v6 = vld [vmem:[#allocation25 + $0x1720] sm:$0xff] }
 0x7e5   :  { %10789 = vmatpush1.bf16.msra.mxu0 %v12172_v1  ;;  %10626 = vmatprep.subr.bf16.mxu1 %v12187_v3  ;;  %v12268_v1 = vcombine.low %v4299_v33, %v4307_v60  ;;  %v12283_v3 = vcombine.high %v4314_v29, %v4322_v31  ;;  %v4402_v59 = vld [vmem:[#allocation25 + $0x1760] sm:$0xff]  ;;  %v4395_v33 = vld [vmem:[#allocation25 + $0x1728] sm:$0xff] }
 0x7e6   :  { %10790 = vmatprep.subr.bf16.mxu0 %v12189_v12  ;;  %v12285_v12 = vcombine.high %v4315_v63, %v4323_v61  ;;  %v4403_v60 = vld [vmem:[#allocation25 + $0x1768] sm:$0xff] }
 0x7e8   :  { %10627 = vmatpush1.bf16.msra.mxu1 %v12186_v5  ;;  %v12282_v5 = vcombine.low %v4314_v29, %v4322_v31  ;;  %v4410_v29 = vld [vmem:[#allocation25 + $0x17a0] sm:$0xff] }
 0x7e9   :  { %10791 = vmatpush1.bf16.msra.mxu0 %v12188_v8  ;;  %10628 = vmatprep.subr.bf16.mxu1 %v12203_v26  ;;  %v12284_v8 = vcombine.low %v4315_v63, %v4323_v61  ;;  %v12299_v26 = vcombine.high %v4330_v7, %v4338_v18  ;;  %v4418_v31 = vld [vmem:[#allocation25 + $0x17e0] sm:$0xff]  ;;  %v4411_v63 = vld [vmem:[#allocation25 + $0x17a8] sm:$0xff] }
 0x7ea   :  { %10792 = vmatprep.subr.bf16.mxu0 %v12205_v30  ;;  %v12301_v30 = vcombine.high %v4331_v16, %v4339_v17  ;;  %v4419_v61 = vld [vmem:[#allocation25 + $0x17e8] sm:$0xff] }
 0x7ec   :  { %10629 = vmatpush1.bf16.msra.mxu1 %v12202_v32  ;;  %v12298_v32 = vcombine.low %v4330_v7, %v4338_v18  ;;  %v4426_v7 = vld [vmem:[#allocation25 + $0x1820] sm:$0xff] }
 0x7ed   :  { %10793 = vmatpush1.bf16.msra.mxu0 %v12204_v11  ;;  %10630 = vmatprep.subr.bf16.mxu1 %v12219_v45  ;;  %v12300_v11 = vcombine.low %v4331_v16, %v4339_v17  ;;  %v12315_v45 = vcombine.high %v4346_v9, %v4354_v50  ;;  %v4434_v18 = vld [vmem:[#allocation25 + $0x1860] sm:$0xff]  ;;  %v4427_v16 = vld [vmem:[#allocation25 + $0x1828] sm:$0xff] }
 0x7ee   :  { %10794 = vmatprep.subr.bf16.mxu0 %v12221_v46  ;;  %v12317_v46 = vcombine.high %v4347_v20, %v4355_v10  ;;  %v4435_v17 = vld [vmem:[#allocation25 + $0x1868] sm:$0xff] }
 0x7f0   :  { %10631 = vmatpush1.bf16.msra.mxu1 %v12218_v40  ;;  %v12314_v40 = vcombine.low %v4346_v9, %v4354_v50  ;;  %v4442_v9 = vld [vmem:[#allocation25 + $0x18a0] sm:$0xff] }
 0x7f1   :  { %10795 = vmatpush1.bf16.msra.mxu0 %v12220_v27  ;;  %10632 = vmatprep.subr.bf16.mxu1 %v12235_v25  ;;  %v12316_v27 = vcombine.low %v4347_v20, %v4355_v10  ;;  %v12331_v25 = vcombine.high %v4362_v2, %v4370_v14  ;;  %v4450_v50 = vld [vmem:[#allocation25 + $0x18e0] sm:$0xff]  ;;  %v12394_v20 = vcombine.low %v4426_v7, %v4434_v18  ;;  %v4443_v10 = vld [vmem:[#allocation25 + $0x18a8] sm:$0xff] }
 0x7f2   :  { %10796 = vmatprep.subr.bf16.mxu0 %v12237_v48  ;;  %v12333_v48 = vcombine.high %v4363_v22, %v4371_v43 }
 0x7f4   :  { %10633 = vmatpush1.bf16.msra.mxu1 %v12234_v44  ;;  %v12330_v44 = vcombine.low %v4362_v2, %v4370_v14  ;;  %v4466_v2 = vld [vmem:[#allocation25 + $0x1960] sm:$0xff] }
 0x7f5   :  { %10797 = vmatpush1.bf16.msra.mxu0 %v12236_v53  ;;  %10634 = vmatprep.subr.bf16.mxu1 %v12251_v56  ;;  %v12332_v53 = vcombine.low %v4363_v22, %v4371_v43  ;;  %v12347_v56 = vcombine.high %v4378_v54, %v4386_v58  ;;  %v4459_v22 = vld [vmem:[#allocation25 + $0x1928] sm:$0xff] }
 0x7f6   :  { %10798 = vmatprep.subr.bf16.mxu0 %v12253_v4  ;;  %v12349_v4 = vcombine.high %v4379_v49, %v4387_v51  ;;  %v4467_v43 = vld [vmem:[#allocation25 + $0x1968] sm:$0xff] }
 0x7f8   :  { %10635 = vmatpush1.bf16.msra.mxu1 %v12250_v36  ;;  %v12346_v36 = vcombine.low %v4378_v54, %v4386_v58  ;;  %v4474_v54 = vld [vmem:[#allocation25 + $0x19a0] sm:$0xff] }
 0x7f9   :  { %10799 = vmatpush1.bf16.msra.mxu0 %v12252_v23  ;;  %10636 = vmatprep.subr.bf16.mxu1 %v12267_v28  ;;  %v12348_v23 = vcombine.low %v4379_v49, %v4387_v51  ;;  %v12363_v28 = vcombine.high %v4394_v6, %v4402_v59  ;;  %v4482_v58 = vld [vmem:[#allocation25 + $0x19e0] sm:$0xff]  ;;  %v4475_v49 = vld [vmem:[#allocation25 + $0x19a8] sm:$0xff] }
 0x7fa   :  { %10800 = vmatprep.subr.bf16.mxu0 %v12269_v42  ;;  %v12365_v42 = vcombine.high %v4395_v33, %v4403_v60  ;;  %v4483_v51 = vld [vmem:[#allocation25 + $0x19e8] sm:$0xff] }
 0x7fc   :  { %10637 = vmatpush1.bf16.msra.mxu1 %v12266_v0  ;;  %v12362_v0 = vcombine.low %v4394_v6, %v4402_v59  ;;  %v4490_v6 = vld [vmem:[#allocation25 + $0x1a20] sm:$0xff] }
 0x7fd   :  { %10801 = vmatpush1.bf16.msra.mxu0 %v12268_v1  ;;  %10638 = vmatprep.subr.bf16.mxu1 %v12283_v3  ;;  %v12364_v1 = vcombine.low %v4395_v33, %v4403_v60  ;;  %v12379_v3 = vcombine.high %v4410_v29, %v4418_v31  ;;  %v4498_v59 = vld [vmem:[#allocation25 + $0x1a60] sm:$0xff]  ;;  %v4491_v33 = vld [vmem:[#allocation25 + $0x1a28] sm:$0xff] }
 0x7fe   :  { %10802 = vmatprep.subr.bf16.mxu0 %v12285_v12  ;;  %v12381_v12 = vcombine.high %v4411_v63, %v4419_v61  ;;  %v4499_v60 = vld [vmem:[#allocation25 + $0x1a68] sm:$0xff] }
 0x800   :  { %10639 = vmatpush1.bf16.msra.mxu1 %v12282_v5  ;;  %v12378_v5 = vcombine.low %v4410_v29, %v4418_v31  ;;  %v4506_v29 = vld [vmem:[#allocation25 + $0x1aa0] sm:$0xff] }
 0x801   :  { %10803 = vmatpush1.bf16.msra.mxu0 %v12284_v8  ;;  %10640 = vmatprep.subr.bf16.mxu1 %v12299_v26  ;;  %v12380_v8 = vcombine.low %v4411_v63, %v4419_v61  ;;  %v12395_v26 = vcombine.high %v4426_v7, %v4434_v18  ;;  %v4514_v31 = vld [vmem:[#allocation25 + $0x1ae0] sm:$0xff]  ;;  %v4507_v63 = vld [vmem:[#allocation25 + $0x1aa8] sm:$0xff] }
 0x802   :  { %10804 = vmatprep.subr.bf16.mxu0 %v12301_v30  ;;  %v12397_v30 = vcombine.high %v4427_v16, %v4435_v17  ;;  %v4515_v61 = vld [vmem:[#allocation25 + $0x1ae8] sm:$0xff]  ;;  %v4522_v7 = vld [vmem:[#allocation25 + $0x1b20] sm:$0xff] }
 0x803   :  { %v4530_v18 = vld [vmem:[#allocation25 + $0x1b60] sm:$0xff] }
 0x804   :  { %10641 = vmatpush1.bf16.msra.mxu1 %v12298_v32  ;;  %v4451_v32 = vld [vmem:[#allocation25 + $0x18e8] sm:$0xff] }
 0x805   :  { %10805 = vmatpush1.bf16.msra.mxu0 %v12300_v11  ;;  %10642 = vmatprep.subr.bf16.mxu1 %v12315_v45  ;;  %v12396_v11 = vcombine.low %v4427_v16, %v4435_v17  ;;  %v12411_v45 = vcombine.high %v4442_v9, %v4450_v50  ;;  %v12413_v14 = vcombine.high %v4443_v10, %v4451_v32  ;;  %v13063_v16 = vld [vmem:[#allocation26] sm:$0xff] }
 0x806   :  { %10806 = vmatprep.subr.bf16.mxu0 %v12317_v46  ;;  %v4458_v46 = vld [vmem:[#allocation25 + $0x1920] sm:$0xff]  ;;  %v4701_v17 = vrot.slane %v13063_v16, %v13964_v39 }
 0x808   :  { %10643 = vmatpush1.bf16.msra.mxu1 %v12314_v40  ;;  %v12410_v40 = vcombine.low %v4442_v9, %v4450_v50  ;;  %v12474_v9 = vcombine.low %v4506_v29, %v4514_v31  ;;  %v4713_v50 = vrot.slane %v13063_v16, %v13970_v24 }
 0x809   :  { %10807 = vmatpush1.bf16.msra.mxu0 %v12316_v27  ;;  %10644 = vmatprep.subr.bf16.mxu1 %v12331_v25  ;;  %v12412_v27 = vcombine.low %v4443_v10, %v4451_v32  ;;  %v12427_v25 = vcombine.high %v4458_v46, %v4466_v2  ;;  %v12491_v10 = vcombine.high %v4522_v7, %v4530_v18 }
 0x80a   :  { %10808 = vmatprep.subr.bf16.mxu0 %v12333_v48  ;;  %v12429_v48 = vcombine.high %v4459_v22, %v4467_v43 }
 0x80c   :  { %10645 = vmatpush1.bf16.msra.mxu1 %v12330_v44  ;;  %v12426_v44 = vcombine.low %v4458_v46, %v4466_v2  ;;  %v4546_v46 = vld [vmem:[#allocation25 + $0x1be0] sm:$0xff] }
 0x80d   :  { %10809 = vmatpush1.bf16.msra.mxu0 %v12332_v53  ;;  %10646 = vmatprep.subr.bf16.mxu1 %v12347_v56  ;;  %v12428_v53 = vcombine.low %v4459_v22, %v4467_v43  ;;  %v12443_v56 = vcombine.high %v4474_v54, %v4482_v58  ;;  %v4539_v43 = vld [vmem:[#allocation25 + $0x1ba8] sm:$0xff] }
 0x80e   :  { %10810 = vmatprep.subr.bf16.mxu0 %v12349_v4  ;;  %v12445_v4 = vcombine.high %v4475_v49, %v4483_v51 }
 0x810   :  { %10647 = vmatpush1.bf16.msra.mxu1 %v12346_v36  ;;  %v12442_v36 = vcombine.low %v4474_v54, %v4482_v58  ;;  %v12490_v58 = vcombine.low %v4522_v7, %v4530_v18  ;;  %v4586_v18 = vld [vmem:[#allocation25 + $0x1d20] sm:$0xff] }
 0x811   :  { %10811 = vmatpush1.bf16.msra.mxu0 %v12348_v23  ;;  %10648 = vmatprep.subr.bf16.mxu1 %v12363_v28  ;;  %v12444_v23 = vcombine.low %v4475_v49, %v4483_v51  ;;  %v12459_v28 = vcombine.high %v4490_v6, %v4498_v59 }
 0x812   :  { %10812 = vmatprep.subr.bf16.mxu0 %v12365_v42  ;;  %v12461_v42 = vcombine.high %v4491_v33, %v4499_v60 }
 0x814   :  { %10649 = vmatpush1.bf16.msra.mxu1 %v12362_v0  ;;  %v12458_v0 = vcombine.low %v4490_v6, %v4498_v59  ;;  %v4554_v59 = vld [vmem:[#allocation25 + $0x1c20] sm:$0xff] }
 0x815   :  { %10813 = vmatpush1.bf16.msra.mxu0 %v12364_v1  ;;  %10650 = vmatprep.subr.bf16.mxu1 %v12379_v3  ;;  %v12460_v1 = vcombine.low %v4491_v33, %v4499_v60  ;;  %v12475_v3 = vcombine.high %v4506_v29, %v4514_v31  ;;  %v4562_v33 = vld [vmem:[#allocation25 + $0x1c60] sm:$0xff]  ;;  %v4555_v60 = vld [vmem:[#allocation25 + $0x1c28] sm:$0xff] }
 0x816   :  { %10814 = vmatprep.subr.bf16.mxu0 %v12381_v12  ;;  %v12477_v12 = vcombine.high %v4507_v63, %v4515_v61  ;;  %v4570_v31 = vld [vmem:[#allocation25 + $0x1ca0] sm:$0xff] }
 0x818   :  { %10651 = vmatpush1.bf16.msra.mxu1 %v12378_v5  ;;  %v4523_v5 = vld [vmem:[#allocation25 + $0x1b28] sm:$0xff] }
 0x819   :  { %10815 = vmatpush1.bf16.msra.mxu0 %v12380_v8  ;;  %10661 = vmatprep.subr.bf16.mxu1 %v12395_v26  ;;  %v4531_v8 = vld [vmem:[#allocation25 + $0x1b68] sm:$0xff]  ;;  %v4709_v26 = vrot.slane %v13063_v16, %v13997_v57 }
 0x81a   :  { %10825 = vmatprep.subr.bf16.mxu0 %v12397_v30  ;;  %v4705_v30 = vrot.slane %v13063_v16, %v13967_v47  ;;  %v4594_v16 = vld [vmem:[#allocation25 + $0x1d60] sm:$0xff] }
 0x81b   :  { %10653 = vmatmul.mubr.bf16.vlgmr.msra.gmra.mrb[24].mxu1 %v14043_v34 }
 0x81c   :  { %10817 = vmatmul.mubr.bf16.vlgmr.msra.gmra.mrb[28].mxu0 %v14043_v34  ;;  %10662 = vmatpush1.bf16.msra.mxu1 %v12394_v20  ;;  %v12476_v20 = vcombine.low %v4507_v63, %v4515_v61  ;;  %v4578_v63 = vld [vmem:[#allocation25 + $0x1ce0] sm:$0xff]  ;;  %v4571_v61 = vld [vmem:[#allocation25 + $0x1ca8] sm:$0xff] }
 0x81d   :  { %10693 = vmatprep.mubr.bf16.mxu1 %v14047_v41  ;;  %10826 = vmatpush1.bf16.msra.mxu0 %v12396_v11  ;;  %v12493_v11 = vcombine.high %v4523_v5, %v4531_v8 }
 0x81e   :  { %10857 = vmatprep.mubr.bf16.mxu0 %v14047_v41  ;;  %10663 = vmatprep.subr.bf16.mxu1 %v12411_v45  ;;  %v4538_v45 = vld [vmem:[#allocation25 + $0x1ba0] sm:$0xff] }
 0x81f   :  { %10827 = vmatprep.subr.bf16.mxu0 %v12413_v14 }
 0x820   :  { %10664 = vmatpush1.bf16.msra.mxu1 %v12410_v40  ;;  %v4547_v40 = vld [vmem:[#allocation25 + $0x1be8] sm:$0xff] }
 0x821   :  { %10828 = vmatpush1.bf16.msra.mxu0 %v12412_v27  ;;  %10665 = vmatprep.subr.bf16.mxu1 %v12427_v25  ;;  %v12509_v6 = vcombine.high %v4539_v43, %v4547_v40 }
 0x822   :  { %10829 = vmatprep.subr.bf16.mxu0 %v12429_v48 }
 0x824   :  { %10666 = vmatpush1.bf16.msra.mxu1 %v12426_v44 }
 0x825   :  { %10830 = vmatpush1.bf16.msra.mxu0 %v12428_v53  ;;  %10667 = vmatprep.subr.bf16.mxu1 %v12443_v56  ;;  %v12492_v53 = vcombine.low %v4523_v5, %v4531_v8  ;;  %v12507_v56 = vcombine.high %v4538_v45, %v4546_v46  ;;  %v4587_v5 = vld [vmem:[#allocation25 + $0x1d28] sm:$0xff] }
 0x826   :  { %10831 = vmatprep.subr.bf16.mxu0 %v12445_v4  ;;  %v4595_v8 = vld [vmem:[#allocation25 + $0x1d68] sm:$0xff] }
 0x828   :  { %10668 = vmatpush1.bf16.msra.mxu1 %v12442_v36  ;;  %v4563_v36 = vld [vmem:[#allocation25 + $0x1c68] sm:$0xff] }
 0x829   :  { %10832 = vmatpush1.bf16.msra.mxu0 %v12444_v23  ;;  %10669 = vmatprep.subr.bf16.mxu1 %v12459_v28  ;;  %v12506_v23 = vcombine.low %v4538_v45, %v4546_v46  ;;  %v12508_v28 = vcombine.low %v4539_v43, %v4547_v40  ;;  %v12525_v29 = vcombine.high %v4555_v60, %v4563_v36  ;;  %v4610_v45 = vld [vmem:[#allocation25 + $0x1de0] sm:$0xff]  ;;  %v4603_v46 = vld [vmem:[#allocation25 + $0x1da8] sm:$0xff] }
 0x82a   :  { %10833 = vmatprep.subr.bf16.mxu0 %v12461_v42  ;;  %v12523_v42 = vcombine.high %v4554_v59, %v4562_v33 }
 0x82c   :  { %10670 = vmatpush1.bf16.msra.mxu1 %v12458_v0  ;;  %v4579_v0 = vld [vmem:[#allocation25 + $0x1ce8] sm:$0xff] }
 0x82d   :  { %10834 = vmatpush1.bf16.msra.mxu0 %v12460_v1  ;;  %10671 = vmatprep.subr.bf16.mxu1 %v12475_v3  ;;  %v12522_v1 = vcombine.low %v4554_v59, %v4562_v33  ;;  %v12524_v3 = vcombine.low %v4555_v60, %v4563_v36  ;;  %v12541_v7 = vcombine.high %v4571_v61, %v4579_v0 }
 0x82e   :  { %v10367_v32 = vpop.f32.mrb[20].mxu1  ;;  %10835 = vmatprep.subr.bf16.mxu0 %v12477_v12  ;;  %v12539_v12 = vcombine.high %v4570_v31, %v4578_v63 }
 0x82f   :  { %v12698_v2 = vadd.f32 %v10367_v32, %v4701_v17  ;;  %v10531_v14 = vpop.f32.mrb[24].mxu0  ;;  %v10369_v22 = vpop.f32.mrb[21].mxu1  ;;  %v12557_v32 = vcombine.high %v4587_v5, %v4595_v8 }
 0x830   :  { %v12700_v27 = vadd.f32 %v10531_v14, %v4709_v26  ;;  %v12699_v25 = vadd.f32 %v10369_v22, %v4705_v30  ;;  %v10533_v48 = vpop.f32.mrb[25].mxu0  ;;  %v10371_v54 = vpop.f32.mrb[22].mxu1  ;;  %10672 = vmatpush1.bf16.msra.mxu1 %v12474_v9  ;;  %v12538_v30 = vcombine.low %v4570_v31, %v4578_v63  ;;  %v12554_v14 = vcombine.low %v4586_v18, %v4594_v16 }
 0x831   :  { %13037 = vtanh.f32 %v12698_v2  ;;  %v12701_v49 = vadd.f32 %v10533_v48, %v4713_v50  ;;  %v10535_v51 = vpop.f32.mrb[26].mxu0  ;;  %10836 = vmatpush1.bf16.msra.mxu0 %v12476_v20  ;;  %v10372_v44 = vpop.f32.mrb[23].mxu1  ;;  %10673 = vmatprep.subr.bf16.mxu1 %v12491_v10  ;;  %v12540_v50 = vcombine.low %v4571_v61, %v4579_v0  ;;  %v12555_v20 = vcombine.high %v4586_v18, %v4594_v16  ;;  %v4611_v2 = vld [vmem:[#allocation25 + $0x1de8] sm:$0xff] }
 0x832   :  { %13039 = vtanh.f32 %v12700_v27  ;;  %v10536_v4 = vpop.f32.mrb[27].mxu0  ;;  %10837 = vmatprep.subr.bf16.mxu0 %v12493_v11  ;;  %v4602_v11 = vld [vmem:[#allocation25 + $0x1da0] sm:$0xff]  ;;  %v12556_v22 = vcombine.low %v4587_v5, %v4595_v8  ;;  %v12573_v40 = vcombine.high %v4603_v46, %v4611_v2  ;;  %v4619_v48 = vld [vmem:[#allocation25 + $0x1e28] sm:$0xff]  ;;  %v3660_v8 = vld [vmem:[#allocation25 + $0x30] sm:$0xff] }
 0x833   :  { %13041 = vtanh.f32 %v12699_v25  ;;  %v12571_v43 = vcombine.high %v4602_v11, %v4610_v45  ;;  %v4618_v27 = vld [vmem:[#allocation25 + $0x1e20] sm:$0xff]  ;;  %v4627_v54 = vld [vmem:[#allocation25 + $0x1e68] sm:$0xff] }
 0x834   :  { %13043 = vtanh.f32 %v12701_v49  ;;  %10674 = vmatpush1.bf16.msra.mxu1 %v12490_v58  ;;  %v4626_v25 = vld [vmem:[#allocation25 + $0x1e60] sm:$0xff]  ;;  %v12570_v58 = vcombine.low %v4602_v11, %v4610_v45  ;;  %v12572_v49 = vcombine.low %v4603_v46, %v4611_v2  ;;  %v12589_v44 = vcombine.high %v4619_v48, %v4627_v54  ;;  %v4635_v4 = vld [vmem:[#allocation25 + $0x1ea8] sm:$0xff]  ;;  %v3676_v11 = vld [vmem:[#allocation25 + $0xb0] sm:$0xff] }
 0x835   :  { %10838 = vmatpush1.bf16.msra.mxu0 %v12492_v53  ;;  %10675 = vmatprep.subr.bf16.mxu1 %v12507_v56  ;;  %v12587_v51 = vcombine.high %v4618_v27, %v4626_v25  ;;  %v4634_v53 = vld [vmem:[#allocation25 + $0x1ea0] sm:$0xff]  ;;  %v12586_v59 = vcombine.low %v4618_v27, %v4626_v25  ;;  %v12588_v33 = vcombine.low %v4619_v48, %v4627_v54  ;;  %v3684_v45 = vld [vmem:[#allocation25 + $0xf0] sm:$0xff]  ;;  %v3677_v2 = vld [vmem:[#allocation25 + $0xb8] sm:$0xff] }
 0x836   :  { %10839 = vmatprep.subr.bf16.mxu0 %v12509_v6  ;;  %v4642_v56 = vld [vmem:[#allocation25 + $0x1ee0] sm:$0xff]  ;;  %v4643_v6 = vld [vmem:[#allocation25 + $0x1ee8] sm:$0xff]  ;;  %v3700_v27 = vld [vmem:[#allocation25 + $0x170] sm:$0xff] }
 0x837   :  { %v12603_v60 = vcombine.high %v4634_v53, %v4642_v56  ;;  %v12605_v36 = vcombine.high %v4635_v4, %v4643_v6  ;;  %v12602_v31 = vcombine.low %v4634_v53, %v4642_v56  ;;  %v12604_v63 = vcombine.low %v4635_v4, %v4643_v6  ;;  %v3693_v48 = vld [vmem:[#allocation25 + $0x138] sm:$0xff]  ;;  %v3708_v53 = vld [vmem:[#allocation25 + $0x1b0] sm:$0xff] }
 0x838   :  { %10676 = vmatpush1.bf16.msra.mxu1 %v12506_v23  ;;  %v4650_v23 = vld [vmem:[#allocation25 + $0x1f20] sm:$0xff]  ;;  %v3701_v54 = vld [vmem:[#allocation25 + $0x178] sm:$0xff]  ;;  %v3716_v56 = vld [vmem:[#allocation25 + $0x1f0] sm:$0xff] }
 0x839   :  { %10840 = vmatpush1.bf16.msra.mxu0 %v12508_v28  ;;  %10677 = vmatprep.subr.bf16.mxu1 %v12523_v42  ;;  %v4658_v28 = vld [vmem:[#allocation25 + $0x1f60] sm:$0xff]  ;;  %v4651_v42 = vld [vmem:[#allocation25 + $0x1f28] sm:$0xff]  ;;  %v3709_v4 = vld [vmem:[#allocation25 + $0x1b8] sm:$0xff] }
 0x83a   :  { %10841 = vmatprep.subr.bf16.mxu0 %v12525_v29  ;;  %v4659_v29 = vld [vmem:[#allocation25 + $0x1f68] sm:$0xff]  ;;  %v12619_v61 = vcombine.high %v4650_v23, %v4658_v28  ;;  %v12618_v18 = vcombine.low %v4650_v23, %v4658_v28  ;;  %v3717_v6 = vld [vmem:[#allocation25 + $0x1f8] sm:$0xff]  ;;  %v3724_v23 = vld [vmem:[#allocation25 + $0x230] sm:$0xff] }
 0x83b   :  { %v13038_v17 = vpop.eup %13037  ;;  %v12621_v0 = vcombine.high %v4651_v42, %v4659_v29  ;;  %v12620_v16 = vcombine.low %v4651_v42, %v4659_v29  ;;  %v3732_v28 = vld [vmem:[#allocation25 + $0x270] sm:$0xff]  ;;  %v3725_v42 = vld [vmem:[#allocation25 + $0x238] sm:$0xff] }
 0x83c   :  { %v13040_v26 = vpop.eup %13039  ;;  %11214 = vst [vmem:[#allocation28 + $0x20] sm:$0xff] %v13038_v17  ;;  %10678 = vmatpush1.bf16.msra.mxu1 %v12522_v1  ;;  %v4666_v1 = vld [vmem:[#allocation25 + $0x1fa0] sm:$0xff]  ;;  %v3733_v29 = vld [vmem:[#allocation25 + $0x278] sm:$0xff] }
 0x83d   :  { %v13042_v9 = vpop.eup %13041  ;;  %11216 = vst [vmem:[#allocation28 + $0x30] sm:$0xff] %v13040_v26  ;;  %10842 = vmatpush1.bf16.msra.mxu0 %v12524_v3  ;;  %10679 = vmatprep.subr.bf16.mxu1 %v12539_v12  ;;  %v4674_v3 = vld [vmem:[#allocation25 + $0x1fe0] sm:$0xff]  ;;  %v4667_v12 = vld [vmem:[#allocation25 + $0x1fa8] sm:$0xff]  ;;  %v3668_v26 = vld [vmem:[#allocation25 + $0x70] sm:$0xff] }
 0x83e   :  { %v13044_v10 = vpop.eup %13043  ;;  %11215 = vst [vmem:[#allocation28 + $0x28] sm:$0xff] %v13042_v9  ;;  %10843 = vmatprep.subr.bf16.mxu0 %v12541_v7  ;;  %v4675_v7 = vld [vmem:[#allocation25 + $0x1fe8] sm:$0xff]  ;;  %v12635_v17 = vcombine.high %v4666_v1, %v4674_v3  ;;  %v3669_v9 = vld [vmem:[#allocation25 + $0x78] sm:$0xff]  ;;  %v11630_v46 = vcombine.low %v3660_v8, %v3668_v26 }
 0x83f   :  { %11217 = vst [vmem:[#allocation28 + $0x38] sm:$0xff] %v13044_v10  ;;  %v12637_v5 = vcombine.high %v4667_v12, %v4675_v7  ;;  %v11631_v10 = vcombine.high %v3660_v8, %v3668_v26  ;;  %v3764_v8 = vld [vmem:[#allocation25 + $0x370] sm:$0xff]  ;;  %v3757_v26 = vld [vmem:[#allocation25 + $0x338] sm:$0xff] }
 0x840   :  { %10680 = vmatpush1.bf16.msra.mxu1 %v12538_v30  ;;  %v3661_v30 = vld [vmem:[#allocation25 + $0x38] sm:$0xff] }
 0x841   :  { %10844 = vmatpush1.bf16.msra.mxu0 %v12540_v50  ;;  %10681 = vmatprep.subr.bf16.mxu1 %v12555_v20  ;;  %v12634_v50 = vcombine.low %v4666_v1, %v4674_v3  ;;  %v12636_v20 = vcombine.low %v4667_v12, %v4675_v7  ;;  %v3748_v1 = vld [vmem:[#allocation25 + $0x2f0] sm:$0xff]  ;;  %v3741_v3 = vld [vmem:[#allocation25 + $0x2b8] sm:$0xff]  ;;  %v11694_v7 = vcombine.low %v3724_v23, %v3732_v28 }
 0x842   :  { %10845 = vmatprep.subr.bf16.mxu0 %v12557_v32  ;;  %v11633_v32 = vcombine.high %v3661_v30, %v3669_v9  ;;  %v3749_v12 = vld [vmem:[#allocation25 + $0x2f8] sm:$0xff] }
 0x844   :  { %10682 = vmatpush1.bf16.msra.mxu1 %v12554_v14  ;;  %v3685_v14 = vld [vmem:[#allocation25 + $0xf8] sm:$0xff] }
 0x845   :  { %10846 = vmatpush1.bf16.msra.mxu0 %v12556_v22  ;;  %10683 = vmatprep.subr.bf16.mxu1 %v12571_v43  ;;  %v11632_v22 = vcombine.low %v3661_v30, %v3669_v9  ;;  %v11647_v43 = vcombine.high %v3676_v11, %v3684_v45  ;;  %v11649_v25 = vcombine.high %v3677_v2, %v3685_v14  ;;  %v3765_v30 = vld [vmem:[#allocation25 + $0x378] sm:$0xff] }
 0x846   :  { %10847 = vmatprep.subr.bf16.mxu0 %v12573_v40  ;;  %v3692_v40 = vld [vmem:[#allocation25 + $0x130] sm:$0xff] }
 0x848   :  { %10684 = vmatpush1.bf16.msra.mxu1 %v12570_v58  ;;  %v11646_v58 = vcombine.low %v3676_v11, %v3684_v45  ;;  %v3780_v11 = vld [vmem:[#allocation25 + $0x3f0] sm:$0xff]  ;;  %v3773_v45 = vld [vmem:[#allocation25 + $0x3b8] sm:$0xff] }
 0x849   :  { %10848 = vmatpush1.bf16.msra.mxu0 %v12572_v49  ;;  %10685 = vmatprep.subr.bf16.mxu1 %v12587_v51  ;;  %v11648_v49 = vcombine.low %v3677_v2, %v3685_v14  ;;  %v11663_v51 = vcombine.high %v3692_v40, %v3700_v27  ;;  %v11728_v14 = vcombine.low %v3757_v26, %v3765_v30 }
 0x84a   :  { %10849 = vmatprep.subr.bf16.mxu0 %v12589_v44  ;;  %v11665_v44 = vcombine.high %v3693_v48, %v3701_v54 }
 0x84c   :  { %10686 = vmatpush1.bf16.msra.mxu1 %v12586_v59  ;;  %v11662_v59 = vcombine.low %v3692_v40, %v3700_v27  ;;  %v3788_v40 = vld [vmem:[#allocation25 + $0x430] sm:$0xff] }
 0x84d   :  { %10850 = vmatpush1.bf16.msra.mxu0 %v12588_v33  ;;  %10687 = vmatprep.subr.bf16.mxu1 %v12603_v60  ;;  %v11664_v33 = vcombine.low %v3693_v48, %v3701_v54  ;;  %v11679_v60 = vcombine.high %v3708_v53, %v3716_v56  ;;  %v3796_v27 = vld [vmem:[#allocation25 + $0x470] sm:$0xff]  ;;  %v3797_v48 = vld [vmem:[#allocation25 + $0x478] sm:$0xff] }
 0x84e   :  { %10851 = vmatprep.subr.bf16.mxu0 %v12605_v36  ;;  %v11681_v36 = vcombine.high %v3709_v4, %v3717_v6 }
 0x850   :  { %10688 = vmatpush1.bf16.msra.mxu1 %v12602_v31  ;;  %v11680_v31 = vcombine.low %v3709_v4, %v3717_v6  ;;  %v3813_v4 = vld [vmem:[#allocation25 + $0x4f8] sm:$0xff]  ;;  %v11758_v6 = vcombine.low %v3788_v40, %v3796_v27 }
 0x851   :  { %10852 = vmatpush1.bf16.msra.mxu0 %v12604_v63  ;;  %10689 = vmatprep.subr.bf16.mxu1 %v12619_v61  ;;  %v11695_v63 = vcombine.high %v3724_v23, %v3732_v28  ;;  %v11697_v61 = vcombine.high %v3725_v42, %v3733_v29  ;;  %v3828_v23 = vld [vmem:[#allocation25 + $0x570] sm:$0xff]  ;;  %v3821_v28 = vld [vmem:[#allocation25 + $0x538] sm:$0xff] }
 0x852   :  { %10853 = vmatprep.subr.bf16.mxu0 %v12621_v0  ;;  %v3740_v0 = vld [vmem:[#allocation25 + $0x2b0] sm:$0xff] }
 0x853   :  { %v11710_v9 = vcombine.low %v3740_v0, %v3748_v1 }
 0x854   :  { %10690 = vmatpush1.bf16.msra.mxu1 %v12618_v18  ;;  %v11696_v18 = vcombine.low %v3725_v42, %v3733_v29  ;;  %v3829_v42 = vld [vmem:[#allocation25 + $0x578] sm:$0xff] }
 0x855   :  { %10854 = vmatpush1.bf16.msra.mxu0 %v12620_v16  ;;  %10691 = vmatprep.subr.bf16.mxu1 %v12635_v17  ;;  %v11711_v16 = vcombine.high %v3740_v0, %v3748_v1  ;;  %v11713_v17 = vcombine.high %v3741_v3, %v3749_v12  ;;  %v3844_v0 = vld [vmem:[#allocation25 + $0x5f0] sm:$0xff]  ;;  %v3837_v1 = vld [vmem:[#allocation25 + $0x5b8] sm:$0xff] }
 0x856   :  { %10855 = vmatprep.subr.bf16.mxu0 %v12637_v5  ;;  %v3756_v5 = vld [vmem:[#allocation25 + $0x330] sm:$0xff] }
 0x857   :  { %v11726_v2 = vcombine.low %v3756_v5, %v3764_v8 }
 0x858   :  { %10692 = vmatpush1.bf16.msra.mxu1 %v12634_v50  ;;  %v11712_v50 = vcombine.low %v3741_v3, %v3749_v12  ;;  %v3845_v3 = vld [vmem:[#allocation25 + $0x5f8] sm:$0xff] }
 0x859   :  { %10856 = vmatpush1.bf16.msra.mxu0 %v12636_v20  ;;  %10866 = vmatprep.subr.bf16.mxu1 %v11631_v10  ;;  %v11727_v20 = vcombine.high %v3756_v5, %v3764_v8  ;;  %v11729_v10 = vcombine.high %v3757_v26, %v3765_v30  ;;  %v3860_v5 = vld [vmem:[#allocation25 + $0x670] sm:$0xff]  ;;  %v3853_v8 = vld [vmem:[#allocation25 + $0x638] sm:$0xff] }
 0x85a   :  { %11030 = vmatprep.subr.bf16.mxu0 %v11633_v32  ;;  %v3772_v32 = vld [vmem:[#allocation25 + $0x3b0] sm:$0xff]  ;;  %v3861_v26 = vld [vmem:[#allocation25 + $0x678] sm:$0xff] }
 0x85b   :  { %10694 = vmatmul.mubr.bf16.vlgmr.msra.gmra.mrb[24].mxu1 %v14056_v38  ;;  %v11742_v54 = vcombine.low %v3772_v32, %v3780_v11 }
 0x85c   :  { %10858 = vmatmul.mubr.bf16.vlgmr.msra.gmra.mrb[28].mxu0 %v14056_v38  ;;  %10867 = vmatpush1.bf16.msra.mxu1 %v11630_v46  ;;  %v3781_v46 = vld [vmem:[#allocation25 + $0x3f8] sm:$0xff] }
 0x85d   :  { %10898 = vmatprep.mubr.bf16.mxu1 %v13940_v52  ;;  %11031 = vmatpush1.bf16.msra.mxu0 %v11632_v22  ;;  %v11743_v22 = vcombine.high %v3772_v32, %v3780_v11  ;;  %v3876_v32 = vld [vmem:[#allocation25 + $0x6f0] sm:$0xff]  ;;  %v3869_v11 = vld [vmem:[#allocation25 + $0x6b8] sm:$0xff] }
 0x85e   :  { %11062 = vmatprep.mubr.bf16.mxu0 %v13940_v52  ;;  %10868 = vmatprep.subr.bf16.mxu1 %v11647_v43  ;;  %v11678_v52 = vcombine.low %v3708_v53, %v3716_v56  ;;  %v11745_v43 = vcombine.high %v3773_v45, %v3781_v46  ;;  %v3812_v53 = vld [vmem:[#allocation25 + $0x4f0] sm:$0xff]  ;;  %v3805_v56 = vld [vmem:[#allocation25 + $0x4b8] sm:$0xff] }
 0x85f   :  { %11032 = vmatprep.subr.bf16.mxu0 %v11649_v25  ;;  %v3789_v25 = vld [vmem:[#allocation25 + $0x438] sm:$0xff] }
 0x860   :  { %10869 = vmatpush1.bf16.msra.mxu1 %v11646_v58  ;;  %v11744_v58 = vcombine.low %v3773_v45, %v3781_v46  ;;  %v3877_v45 = vld [vmem:[#allocation25 + $0x6f8] sm:$0xff] }
 0x861   :  { %11033 = vmatpush1.bf16.msra.mxu0 %v11648_v49  ;;  %10870 = vmatprep.subr.bf16.mxu1 %v11663_v51  ;;  %v11759_v49 = vcombine.high %v3788_v40, %v3796_v27  ;;  %v11761_v51 = vcombine.high %v3789_v25, %v3797_v48  ;;  %v3892_v40 = vld [vmem:[#allocation25 + $0x770] sm:$0xff]  ;;  %v3885_v27 = vld [vmem:[#allocation25 + $0x738] sm:$0xff] }
 0x862   :  { %11034 = vmatprep.subr.bf16.mxu0 %v11665_v44  ;;  %v3804_v44 = vld [vmem:[#allocation25 + $0x4b0] sm:$0xff] }
 0x863   :  { %v11774_v29 = vcombine.low %v3804_v44, %v3812_v53 }
 0x864   :  { %10871 = vmatpush1.bf16.msra.mxu1 %v11662_v59  ;;  %v11760_v59 = vcombine.low %v3789_v25, %v3797_v48  ;;  %v3893_v25 = vld [vmem:[#allocation25 + $0x778] sm:$0xff] }
 0x865   :  { %11035 = vmatpush1.bf16.msra.mxu0 %v11664_v33  ;;  %10872 = vmatprep.subr.bf16.mxu1 %v11679_v60  ;;  %v11775_v33 = vcombine.high %v3804_v44, %v3812_v53  ;;  %v11777_v60 = vcombine.high %v3805_v56, %v3813_v4  ;;  %v3908_v44 = vld [vmem:[#allocation25 + $0x7f0] sm:$0xff]  ;;  %v3901_v53 = vld [vmem:[#allocation25 + $0x7b8] sm:$0xff] }
 0x866   :  { %11036 = vmatprep.subr.bf16.mxu0 %v11681_v36  ;;  %v3820_v36 = vld [vmem:[#allocation25 + $0x530] sm:$0xff] }
 0x867   :  { %v11790_v12 = vcombine.low %v3820_v36, %v3828_v23 }
 0x868   :  { %10873 = vmatpush1.bf16.msra.mxu1 %v11678_v52  ;;  %v11776_v52 = vcombine.low %v3805_v56, %v3813_v4  ;;  %v3909_v56 = vld [vmem:[#allocation25 + $0x7f8] sm:$0xff] }
 0x869   :  { %11037 = vmatpush1.bf16.msra.mxu0 %v11680_v31  ;;  %10874 = vmatprep.subr.bf16.mxu1 %v11695_v63  ;;  %v11791_v31 = vcombine.high %v3820_v36, %v3828_v23  ;;  %v11793_v63 = vcombine.high %v3821_v28, %v3829_v42  ;;  %v3924_v36 = vld [vmem:[#allocation25 + $0x870] sm:$0xff]  ;;  %v3917_v23 = vld [vmem:[#allocation25 + $0x838] sm:$0xff] }
 0x86a   :  { %11038 = vmatprep.subr.bf16.mxu0 %v11697_v61  ;;  %v3836_v61 = vld [vmem:[#allocation25 + $0x5b0] sm:$0xff] }
 0x86b   :  { %v11806_v30 = vcombine.low %v3836_v61, %v3844_v0 }
 0x86c   :  { %10875 = vmatpush1.bf16.msra.mxu1 %v11694_v7  ;;  %v11792_v7 = vcombine.low %v3821_v28, %v3829_v42  ;;  %v3925_v28 = vld [vmem:[#allocation25 + $0x878] sm:$0xff] }
 0x86d   :  { %11039 = vmatpush1.bf16.msra.mxu0 %v11696_v18  ;;  %10876 = vmatprep.subr.bf16.mxu1 %v11711_v16  ;;  %v11807_v18 = vcombine.high %v3836_v61, %v3844_v0  ;;  %v11809_v16 = vcombine.high %v3837_v1, %v3845_v3  ;;  %v3940_v61 = vld [vmem:[#allocation25 + $0x8f0] sm:$0xff] }
 0x86e   :  { %11040 = vmatprep.subr.bf16.mxu0 %v11713_v17  ;;  %v3852_v17 = vld [vmem:[#allocation25 + $0x630] sm:$0xff] }
 0x86f   :  { %v11822_v46 = vcombine.low %v3852_v17, %v3860_v5 }
 0x870   :  { %10877 = vmatpush1.bf16.msra.mxu1 %v11710_v9  ;;  %v11808_v9 = vcombine.low %v3837_v1, %v3845_v3  ;;  %v3933_v1 = vld [vmem:[#allocation25 + $0x8b8] sm:$0xff] }
 0x871   :  { %11041 = vmatpush1.bf16.msra.mxu0 %v11712_v50  ;;  %10878 = vmatprep.subr.bf16.mxu1 %v11727_v20  ;;  %v11823_v50 = vcombine.high %v3852_v17, %v3860_v5  ;;  %v11825_v20 = vcombine.high %v3853_v8, %v3861_v26  ;;  %v3941_v3 = vld [vmem:[#allocation25 + $0x8f8] sm:$0xff] }
 0x872   :  { %11042 = vmatprep.subr.bf16.mxu0 %v11729_v10  ;;  %v3868_v10 = vld [vmem:[#allocation25 + $0x6b0] sm:$0xff]  ;;  %v11905_v17 = vcombine.high %v3933_v1, %v3941_v3  ;;  %v3949_v5 = vld [vmem:[#allocation25 + $0x938] sm:$0xff] }
 0x873   :  { %v11838_v48 = vcombine.low %v3868_v10, %v3876_v32 }
 0x874   :  { %10879 = vmatpush1.bf16.msra.mxu1 %v11726_v2  ;;  %v11824_v2 = vcombine.low %v3853_v8, %v3861_v26  ;;  %v3957_v8 = vld [vmem:[#allocation25 + $0x978] sm:$0xff] }
 0x875   :  { %11043 = vmatpush1.bf16.msra.mxu0 %v11728_v14  ;;  %10880 = vmatprep.subr.bf16.mxu1 %v11743_v22  ;;  %v11839_v14 = vcombine.high %v3868_v10, %v3876_v32  ;;  %v11841_v22 = vcombine.high %v3869_v11, %v3877_v45  ;;  %v3972_v10 = vld [vmem:[#allocation25 + $0x9f0] sm:$0xff]  ;;  %v3965_v32 = vld [vmem:[#allocation25 + $0x9b8] sm:$0xff] }
 0x876   :  { %11044 = vmatprep.subr.bf16.mxu0 %v11745_v43  ;;  %v3884_v43 = vld [vmem:[#allocation25 + $0x730] sm:$0xff] }
 0x877   :  { %v11854_v4 = vcombine.low %v3884_v43, %v3892_v40 }
 0x878   :  { %10881 = vmatpush1.bf16.msra.mxu1 %v11742_v54  ;;  %v11840_v54 = vcombine.low %v3869_v11, %v3877_v45  ;;  %v3973_v11 = vld [vmem:[#allocation25 + $0x9f8] sm:$0xff] }
 0x879   :  { %11045 = vmatpush1.bf16.msra.mxu0 %v11744_v58  ;;  %10882 = vmatprep.subr.bf16.mxu1 %v11759_v49  ;;  %v11855_v58 = vcombine.high %v3884_v43, %v3892_v40  ;;  %v11857_v49 = vcombine.high %v3885_v27, %v3893_v25  ;;  %v3981_v43 = vld [vmem:[#allocation25 + $0xa38] sm:$0xff] }
 0x87a   :  { %11046 = vmatprep.subr.bf16.mxu0 %v11761_v51  ;;  %v3900_v51 = vld [vmem:[#allocation25 + $0x7b0] sm:$0xff]  ;;  %v3989_v40 = vld [vmem:[#allocation25 + $0xa78] sm:$0xff] }
 0x87b   :  { %v11870_v42 = vcombine.low %v3900_v51, %v3908_v44 }
 0x87c   :  { %10883 = vmatpush1.bf16.msra.mxu1 %v11758_v6  ;;  %v11856_v6 = vcombine.low %v3885_v27, %v3893_v25  ;;  %v11936_v27 = vcombine.low %v3965_v32, %v3973_v11 }
 0x87d   :  { %11047 = vmatpush1.bf16.msra.mxu0 %v11760_v59  ;;  %10884 = vmatprep.subr.bf16.mxu1 %v11775_v33  ;;  %v11871_v59 = vcombine.high %v3900_v51, %v3908_v44  ;;  %v11873_v33 = vcombine.high %v3901_v53, %v3909_v56  ;;  %v4005_v51 = vld [vmem:[#allocation25 + $0xaf8] sm:$0xff] }
 0x87e   :  { %11048 = vmatprep.subr.bf16.mxu0 %v11777_v60  ;;  %v3916_v60 = vld [vmem:[#allocation25 + $0x830] sm:$0xff] }
 0x87f   :  { %v11886_v0 = vcombine.low %v3916_v60, %v3924_v36 }
 0x880   :  { %10885 = vmatpush1.bf16.msra.mxu1 %v11774_v29  ;;  %v11872_v29 = vcombine.low %v3901_v53, %v3909_v56  ;;  %v11952_v53 = vcombine.low %v3981_v43, %v3989_v40 }
 0x881   :  { %11049 = vmatpush1.bf16.msra.mxu0 %v11776_v52  ;;  %10886 = vmatprep.subr.bf16.mxu1 %v11791_v31  ;;  %v11887_v52 = vcombine.high %v3916_v60, %v3924_v36  ;;  %v11889_v31 = vcombine.high %v3917_v23, %v3925_v28  ;;  %v4021_v60 = vld [vmem:[#allocation25 + $0xb78] sm:$0xff] }
 0x882   :  { %11050 = vmatprep.subr.bf16.mxu0 %v11793_v63  ;;  %v3932_v63 = vld [vmem:[#allocation25 + $0x8b0] sm:$0xff] }
 0x883   :  { %v11902_v26 = vcombine.low %v3932_v63, %v3940_v61 }
 0x884   :  { %10887 = vmatpush1.bf16.msra.mxu1 %v11790_v12  ;;  %v11888_v12 = vcombine.low %v3917_v23, %v3925_v28 }
 0x885   :  { %11051 = vmatpush1.bf16.msra.mxu0 %v11792_v7  ;;  %10888 = vmatprep.subr.bf16.mxu1 %v11807_v18  ;;  %v11903_v7 = vcombine.high %v3932_v63, %v3940_v61  ;;  %v3948_v18 = vld [vmem:[#allocation25 + $0x930] sm:$0xff]  ;;  %v4037_v63 = vld [vmem:[#allocation25 + $0xbf8] sm:$0xff] }
 0x886   :  { %11052 = vmatprep.subr.bf16.mxu0 %v11809_v16  ;;  %v3956_v16 = vld [vmem:[#allocation25 + $0x970] sm:$0xff] }
 0x887   :  { %v11918_v45 = vcombine.low %v3948_v18, %v3956_v16 }
 0x888   :  { %10889 = vmatpush1.bf16.msra.mxu1 %v11806_v30  ;;  %v11904_v30 = vcombine.low %v3933_v1, %v3941_v3 }
 0x889   :  { %11053 = vmatpush1.bf16.msra.mxu0 %v11808_v9  ;;  %10890 = vmatprep.subr.bf16.mxu1 %v11823_v50  ;;  %v11919_v9 = vcombine.high %v3948_v18, %v3956_v16  ;;  %v11921_v50 = vcombine.high %v3949_v5, %v3957_v8  ;;  %v4045_v18 = vld [vmem:[#allocation25 + $0xc38] sm:$0xff] }
 0x88a   :  { %11054 = vmatprep.subr.bf16.mxu0 %v11825_v20  ;;  %v3964_v20 = vld [vmem:[#allocation25 + $0x9b0] sm:$0xff]  ;;  %v4053_v16 = vld [vmem:[#allocation25 + $0xc78] sm:$0xff] }
 0x88c   :  { %10891 = vmatpush1.bf16.msra.mxu1 %v11822_v46  ;;  %v11935_v46 = vcombine.high %v3964_v20, %v3972_v10 }
 0x88d   :  { %11055 = vmatpush1.bf16.msra.mxu0 %v11824_v2  ;;  %10892 = vmatprep.subr.bf16.mxu1 %v11839_v14  ;;  %v11937_v2 = vcombine.high %v3965_v32, %v3973_v11  ;;  %v3980_v14 = vld [vmem:[#allocation25 + $0xa30] sm:$0xff]  ;;  %v12016_v32 = vcombine.low %v4045_v18, %v4053_v16 }
 0x88e   :  { %11056 = vmatprep.subr.bf16.mxu0 %v11841_v22  ;;  %v3988_v22 = vld [vmem:[#allocation25 + $0xa70] sm:$0xff] }
 0x88f   :  { %v11951_v25 = vcombine.high %v3980_v14, %v3988_v22  ;;  %v11950_v44 = vcombine.low %v3980_v14, %v3988_v22  ;;  %v4085_v14 = vld [vmem:[#allocation25 + $0xd78] sm:$0xff] }
 0x890   :  { %10893 = vmatpush1.bf16.msra.mxu1 %v11838_v48  ;;  %v11953_v48 = vcombine.high %v3981_v43, %v3989_v40 }
 0x891   :  { %11057 = vmatpush1.bf16.msra.mxu0 %v11840_v54  ;;  %10894 = vmatprep.subr.bf16.mxu1 %v11855_v58  ;;  %v3996_v54 = vld [vmem:[#allocation25 + $0xab0] sm:$0xff] }
 0x892   :  { %11058 = vmatprep.subr.bf16.mxu0 %v11857_v49  ;;  %v4004_v58 = vld [vmem:[#allocation25 + $0xaf0] sm:$0xff]  ;;  %v3997_v49 = vld [vmem:[#allocation25 + $0xab8] sm:$0xff] }
 0x893   :  { %v11967_v56 = vcombine.high %v3996_v54, %v4004_v58  ;;  %v11966_v36 = vcombine.low %v3996_v54, %v4004_v58  ;;  %v11968_v23 = vcombine.low %v3997_v49, %v4005_v51  ;;  %v4101_v54 = vld [vmem:[#allocation25 + $0xdf8] sm:$0xff] }
 0x894   :  { %10895 = vmatpush1.bf16.msra.mxu1 %v11854_v4  ;;  %v11969_v4 = vcombine.high %v3997_v49, %v4005_v51 }
 0x895   :  { %11059 = vmatpush1.bf16.msra.mxu0 %v11856_v6  ;;  %10896 = vmatprep.subr.bf16.mxu1 %v11871_v59  ;;  %v4012_v6 = vld [vmem:[#allocation25 + $0xb30] sm:$0xff] }
 0x896   :  { %11060 = vmatprep.subr.bf16.mxu0 %v11873_v33  ;;  %v4020_v59 = vld [vmem:[#allocation25 + $0xb70] sm:$0xff]  ;;  %v4013_v33 = vld [vmem:[#allocation25 + $0xb38] sm:$0xff] }
 0x897   :  { %v11983_v28 = vcombine.high %v4012_v6, %v4020_v59  ;;  %v11982_v61 = vcombine.low %v4012_v6, %v4020_v59  ;;  %v4117_v6 = vld [vmem:[#allocation25 + $0xe78] sm:$0xff] }
 0x898   :  { %10897 = vmatpush1.bf16.msra.mxu1 %v11870_v42  ;;  %v11985_v42 = vcombine.high %v4013_v33, %v4021_v60 }
 0x899   :  { %11061 = vmatpush1.bf16.msra.mxu0 %v11872_v29  ;;  %10907 = vmatprep.subr.bf16.mxu1 %v11887_v52  ;;  %v4028_v29 = vld [vmem:[#allocation25 + $0xbb0] sm:$0xff] }
 0x89a   :  { %11071 = vmatprep.subr.bf16.mxu0 %v11889_v31  ;;  %v4036_v52 = vld [vmem:[#allocation25 + $0xbf0] sm:$0xff]  ;;  %v4029_v31 = vld [vmem:[#allocation25 + $0xbb8] sm:$0xff] }
 0x89b   :  { %10899 = vmatmul.mubr.bf16.vlgmr.msra.gmra.mrb[28].mxu1 %v13942_v55  ;;  %v11999_v1 = vcombine.high %v4028_v29, %v4036_v52  ;;  %v12001_v3 = vcombine.high %v4029_v31, %v4037_v63 }
 0x89c   :  { %11063 = vmatmul.mubr.bf16.vlgmr.msra.gmra.mrb[32].mxu0 %v13942_v55  ;;  %10908 = vmatpush1.bf16.msra.mxu1 %v11886_v0  ;;  %v11920_v55 = vcombine.low %v3949_v5, %v3957_v8  ;;  %v11984_v0 = vcombine.low %v4013_v33, %v4021_v60  ;;  %v12000_v5 = vcombine.low %v4029_v31, %v4037_v63 }
 0x89d   :  { %10939 = vmatprep.mubr.bf16.mxu1 %v13946_v62  ;;  %11072 = vmatpush1.bf16.msra.mxu0 %v11888_v12  ;;  %v4044_v12 = vld [vmem:[#allocation25 + $0xc30] sm:$0xff] }
 0x89e   :  { %11103 = vmatprep.mubr.bf16.mxu0 %v13946_v62  ;;  %10909 = vmatprep.subr.bf16.mxu1 %v11903_v7  ;;  %v11934_v62 = vcombine.low %v3964_v20, %v3972_v10  ;;  %v4052_v7 = vld [vmem:[#allocation25 + $0xc70] sm:$0xff]  ;;  %v4069_v20 = vld [vmem:[#allocation25 + $0xcf8] sm:$0xff] }
 0x89f   :  { %11073 = vmatprep.subr.bf16.mxu0 %v11905_v17  ;;  %v11998_v17 = vcombine.low %v4028_v29, %v4036_v52  ;;  %v12015_v8 = vcombine.high %v4044_v12, %v4052_v7  ;;  %v12014_v10 = vcombine.low %v4044_v12, %v4052_v7  ;;  %v4133_v29 = vld [vmem:[#allocation25 + $0xef8] sm:$0xff] }
 0x8a0   :  { %10910 = vmatpush1.bf16.msra.mxu1 %v11902_v26  ;;  %v12017_v26 = vcombine.high %v4045_v18, %v4053_v16  ;;  %v4149_v12 = vld [vmem:[#allocation25 + $0xf78] sm:$0xff] }
 0x8a1   :  { %11074 = vmatpush1.bf16.msra.mxu0 %v11904_v30  ;;  %10911 = vmatprep.subr.bf16.mxu1 %v11919_v9  ;;  %v4060_v30 = vld [vmem:[#allocation25 + $0xcb0] sm:$0xff] }
 0x8a2   :  { %11075 = vmatprep.subr.bf16.mxu0 %v11921_v50  ;;  %v4068_v9 = vld [vmem:[#allocation25 + $0xcf0] sm:$0xff]  ;;  %v4061_v50 = vld [vmem:[#allocation25 + $0xcb8] sm:$0xff] }
 0x8a3   :  { %v12031_v11 = vcombine.high %v4060_v30, %v4068_v9  ;;  %v12030_v22 = vcombine.low %v4060_v30, %v4068_v9  ;;  %v12032_v43 = vcombine.low %v4061_v50, %v4069_v20  ;;  %v4165_v30 = vld [vmem:[#allocation25 + $0xff8] sm:$0xff] }
 0x8a4   :  { %10912 = vmatpush1.bf16.msra.mxu1 %v11918_v45  ;;  %v12033_v45 = vcombine.high %v4061_v50, %v4069_v20 }
 0x8a5   :  { %11076 = vmatpush1.bf16.msra.mxu0 %v11920_v55  ;;  %10913 = vmatprep.subr.bf16.mxu1 %v11935_v46  ;;  %v4076_v55 = vld [vmem:[#allocation25 + $0xd30] sm:$0xff] }
 0x8a6   :  { %11077 = vmatprep.subr.bf16.mxu0 %v11937_v2  ;;  %v4084_v46 = vld [vmem:[#allocation25 + $0xd70] sm:$0xff]  ;;  %v4077_v2 = vld [vmem:[#allocation25 + $0xd38] sm:$0xff] }
 0x8a7   :  { %v12047_v40 = vcombine.high %v4076_v55, %v4084_v46  ;;  %v12046_v58 = vcombine.low %v4076_v55, %v4084_v46  ;;  %v12048_v49 = vcombine.low %v4077_v2, %v4085_v14  ;;  %v4181_v55 = vld [vmem:[#allocation25 + $0x1078] sm:$0xff] }
 0x8a8   :  { %10914 = vmatpush1.bf16.msra.mxu1 %v11934_v62  ;;  %v12049_v62 = vcombine.high %v4077_v2, %v4085_v14 }
 0x8a9   :  { %11078 = vmatpush1.bf16.msra.mxu0 %v11936_v27  ;;  %10915 = vmatprep.subr.bf16.mxu1 %v11951_v25  ;;  %v4092_v27 = vld [vmem:[#allocation25 + $0xdb0] sm:$0xff] }
 0x8aa   :  { %11079 = vmatprep.subr.bf16.mxu0 %v11953_v48  ;;  %v4100_v25 = vld [vmem:[#allocation25 + $0xdf0] sm:$0xff]  ;;  %v4093_v48 = vld [vmem:[#allocation25 + $0xdb8] sm:$0xff] }
 0x8ab   :  { %v12063_v51 = vcombine.high %v4092_v27, %v4100_v25  ;;  %v12062_v59 = vcombine.low %v4092_v27, %v4100_v25  ;;  %v12064_v33 = vcombine.low %v4093_v48, %v4101_v54  ;;  %v4189_v27 = vld [vmem:[#allocation25 + $0x10b8] sm:$0xff] }
 0x8ac   :  { %10916 = vmatpush1.bf16.msra.mxu1 %v11950_v44  ;;  %v12065_v44 = vcombine.high %v4093_v48, %v4101_v54  ;;  %v4197_v25 = vld [vmem:[#allocation25 + $0x10f8] sm:$0xff] }
 0x8ad   :  { %11080 = vmatpush1.bf16.msra.mxu0 %v11952_v53  ;;  %10917 = vmatprep.subr.bf16.mxu1 %v11967_v56  ;;  %v4108_v53 = vld [vmem:[#allocation25 + $0xe30] sm:$0xff] }
 0x8ae   :  { %11081 = vmatprep.subr.bf16.mxu0 %v11969_v4  ;;  %v4116_v56 = vld [vmem:[#allocation25 + $0xe70] sm:$0xff]  ;;  %v4109_v4 = vld [vmem:[#allocation25 + $0xe38] sm:$0xff] }
 0x8af   :  { %v12079_v60 = vcombine.high %v4108_v53, %v4116_v56  ;;  %v12078_v52 = vcombine.low %v4108_v53, %v4116_v56  ;;  %v12080_v31 = vcombine.low %v4109_v4, %v4117_v6  ;;  %v4213_v53 = vld [vmem:[#allocation25 + $0x1178] sm:$0xff] }
 0x8b0   :  { %10918 = vmatpush1.bf16.msra.mxu1 %v11966_v36  ;;  %v12081_v36 = vcombine.high %v4109_v4, %v4117_v6  ;;  %v12160_v4 = vcombine.low %v4189_v27, %v4197_v25 }
 0x8b1   :  { %11082 = vmatpush1.bf16.msra.mxu0 %v11968_v23  ;;  %10919 = vmatprep.subr.bf16.mxu1 %v11983_v28  ;;  %v4124_v23 = vld [vmem:[#allocation25 + $0xeb0] sm:$0xff] }
 0x8b2   :  { %11083 = vmatprep.subr.bf16.mxu0 %v11985_v42  ;;  %v4132_v28 = vld [vmem:[#allocation25 + $0xef0] sm:$0xff]  ;;  %v4125_v42 = vld [vmem:[#allocation25 + $0xeb8] sm:$0xff] }
 0x8b3   :  { %v12095_v63 = vcombine.high %v4124_v23, %v4132_v28  ;;  %v12094_v7 = vcombine.low %v4124_v23, %v4132_v28  ;;  %v12096_v18 = vcombine.low %v4125_v42, %v4133_v29  ;;  %v4229_v23 = vld [vmem:[#allocation25 + $0x11f8] sm:$0xff] }
 0x8b4   :  { %10920 = vmatpush1.bf16.msra.mxu1 %v11982_v61  ;;  %v12097_v61 = vcombine.high %v4125_v42, %v4133_v29 }
 0x8b5   :  { %11084 = vmatpush1.bf16.msra.mxu0 %v11984_v0  ;;  %10921 = vmatprep.subr.bf16.mxu1 %v11999_v1  ;;  %v4140_v0 = vld [vmem:[#allocation25 + $0xf30] sm:$0xff] }
 0x8b6   :  { %11085 = vmatprep.subr.bf16.mxu0 %v12001_v3  ;;  %v4148_v1 = vld [vmem:[#allocation25 + $0xf70] sm:$0xff]  ;;  %v4141_v3 = vld [vmem:[#allocation25 + $0xf38] sm:$0xff] }
 0x8b7   :  { %v12111_v16 = vcombine.high %v4140_v0, %v4148_v1  ;;  %v12110_v9 = vcombine.low %v4140_v0, %v4148_v1  ;;  %v12112_v50 = vcombine.low %v4141_v3, %v4149_v12 }
 0x8b8   :  { %10922 = vmatpush1.bf16.msra.mxu1 %v11998_v17  ;;  %v12113_v17 = vcombine.high %v4141_v3, %v4149_v12  ;;  %v4252_v12 = vld [vmem:[#allocation25 + $0x12b0] sm:$0xff] }
 0x8b9   :  { %11086 = vmatpush1.bf16.msra.mxu0 %v12000_v5  ;;  %10923 = vmatprep.subr.bf16.mxu1 %v12015_v8  ;;  %v4156_v5 = vld [vmem:[#allocation25 + $0xfb0] sm:$0xff] }
 0x8ba   :  { %11087 = vmatprep.subr.bf16.mxu0 %v12017_v26  ;;  %v4164_v8 = vld [vmem:[#allocation25 + $0xff0] sm:$0xff]  ;;  %v4157_v26 = vld [vmem:[#allocation25 + $0xfb8] sm:$0xff] }
 0x8bb   :  { %v12127_v20 = vcombine.high %v4156_v5, %v4164_v8  ;;  %v12126_v46 = vcombine.low %v4156_v5, %v4164_v8  ;;  %v12128_v2 = vcombine.low %v4157_v26, %v4165_v30 }
 0x8bc   :  { %10924 = vmatpush1.bf16.msra.mxu1 %v12014_v10  ;;  %v12129_v10 = vcombine.high %v4157_v26, %v4165_v30  ;;  %v4268_v30 = vld [vmem:[#allocation25 + $0x1330] sm:$0xff] }
 0x8bd   :  { %11088 = vmatpush1.bf16.msra.mxu0 %v12016_v32  ;;  %10925 = vmatprep.subr.bf16.mxu1 %v12031_v11  ;;  %v4172_v32 = vld [vmem:[#allocation25 + $0x1030] sm:$0xff] }
 0x8be   :  { %11089 = vmatprep.subr.bf16.mxu0 %v12033_v45  ;;  %v4180_v11 = vld [vmem:[#allocation25 + $0x1070] sm:$0xff]  ;;  %v4173_v45 = vld [vmem:[#allocation25 + $0x1038] sm:$0xff] }
 0x8bf   :  { %v12143_v14 = vcombine.high %v4172_v32, %v4180_v11  ;;  %v12144_v48 = vcombine.low %v4173_v45, %v4181_v55 }
 0x8c0   :  { %10926 = vmatpush1.bf16.msra.mxu1 %v12030_v22  ;;  %v12145_v22 = vcombine.high %v4173_v45, %v4181_v55  ;;  %v4284_v55 = vld [vmem:[#allocation25 + $0x13b0] sm:$0xff] }
 0x8c1   :  { %11090 = vmatpush1.bf16.msra.mxu0 %v12032_v43  ;;  %10927 = vmatprep.subr.bf16.mxu1 %v12047_v40  ;;  %v4188_v43 = vld [vmem:[#allocation25 + $0x10b0] sm:$0xff] }
 0x8c2   :  { %11091 = vmatprep.subr.bf16.mxu0 %v12049_v62  ;;  %v4196_v40 = vld [vmem:[#allocation25 + $0x10f0] sm:$0xff]  ;;  %v12142_v62 = vcombine.low %v4172_v32, %v4180_v11 }
 0x8c3   :  { %v12159_v54 = vcombine.high %v4188_v43, %v4196_v40  ;;  %v12158_v56 = vcombine.low %v4188_v43, %v4196_v40 }
 0x8c4   :  { %10928 = vmatpush1.bf16.msra.mxu1 %v12046_v58  ;;  %v4204_v58 = vld [vmem:[#allocation25 + $0x1130] sm:$0xff] }
 0x8c5   :  { %11092 = vmatpush1.bf16.msra.mxu0 %v12048_v49  ;;  %10929 = vmatprep.subr.bf16.mxu1 %v12063_v51  ;;  %v4212_v49 = vld [vmem:[#allocation25 + $0x1170] sm:$0xff]  ;;  %v12161_v51 = vcombine.high %v4189_v27, %v4197_v25 }
 0x8c6   :  { %11093 = vmatprep.subr.bf16.mxu0 %v12065_v44  ;;  %v4205_v44 = vld [vmem:[#allocation25 + $0x1138] sm:$0xff]  ;;  %v12175_v6 = vcombine.high %v4204_v58, %v4212_v49  ;;  %v12174_v28 = vcombine.low %v4204_v58, %v4212_v49  ;;  %v4300_v27 = vld [vmem:[#allocation25 + $0x1430] sm:$0xff] }
 0x8c7   :  { %v4308_v25 = vld [vmem:[#allocation25 + $0x1470] sm:$0xff] }
 0x8c8   :  { %10930 = vmatpush1.bf16.msra.mxu1 %v12062_v59  ;;  %v12177_v59 = vcombine.high %v4205_v44, %v4213_v53 }
 0x8c9   :  { %11094 = vmatpush1.bf16.msra.mxu0 %v12064_v33  ;;  %10931 = vmatprep.subr.bf16.mxu1 %v12079_v60  ;;  %v4220_v33 = vld [vmem:[#allocation25 + $0x11b0] sm:$0xff] }
 0x8ca   :  { %11095 = vmatprep.subr.bf16.mxu0 %v12081_v36  ;;  %v4228_v60 = vld [vmem:[#allocation25 + $0x11f0] sm:$0xff]  ;;  %v4221_v36 = vld [vmem:[#allocation25 + $0x11b8] sm:$0xff] }
 0x8cb   :  { %v12191_v42 = vcombine.high %v4220_v33, %v4228_v60  ;;  %v12193_v29 = vcombine.high %v4221_v36, %v4229_v23  ;;  %v12192_v0 = vcombine.low %v4221_v36, %v4229_v23  ;;  %v4332_v23 = vld [vmem:[#allocation25 + $0x1530] sm:$0xff] }
 0x8cc   :  { %10932 = vmatpush1.bf16.msra.mxu1 %v12078_v52  ;;  %v4236_v52 = vld [vmem:[#allocation25 + $0x1230] sm:$0xff] }
 0x8cd   :  { %11096 = vmatpush1.bf16.msra.mxu0 %v12080_v31  ;;  %10933 = vmatprep.subr.bf16.mxu1 %v12095_v63  ;;  %v4244_v31 = vld [vmem:[#allocation25 + $0x1270] sm:$0xff]  ;;  %v4237_v63 = vld [vmem:[#allocation25 + $0x1238] sm:$0xff] }
 0x8ce   :  { %11097 = vmatprep.subr.bf16.mxu0 %v12097_v61  ;;  %v4245_v61 = vld [vmem:[#allocation25 + $0x1278] sm:$0xff]  ;;  %v12207_v1 = vcombine.high %v4236_v52, %v4244_v31 }
 0x8cf   :  { %v12209_v3 = vcombine.high %v4237_v63, %v4245_v61  ;;  %v12208_v5 = vcombine.low %v4237_v63, %v4245_v61  ;;  %v4348_v61 = vld [vmem:[#allocation25 + $0x15b0] sm:$0xff] }
 0x8d0   :  { %10934 = vmatpush1.bf16.msra.mxu1 %v12094_v7  ;;  %v4260_v7 = vld [vmem:[#allocation25 + $0x12f0] sm:$0xff] }
 0x8d1   :  { %11098 = vmatpush1.bf16.msra.mxu0 %v12096_v18  ;;  %10935 = vmatprep.subr.bf16.mxu1 %v12111_v16  ;;  %v4253_v18 = vld [vmem:[#allocation25 + $0x12b8] sm:$0xff]  ;;  %v12223_v8 = vcombine.high %v4252_v12, %v4260_v7 }
 0x8d2   :  { %11099 = vmatprep.subr.bf16.mxu0 %v12113_v17  ;;  %v4261_v16 = vld [vmem:[#allocation25 + $0x12f8] sm:$0xff]  ;;  %v12206_v17 = vcombine.low %v4236_v52, %v4244_v31 }
 0x8d3   :  { %v12225_v26 = vcombine.high %v4253_v18, %v4261_v16  ;;  %v12224_v32 = vcombine.low %v4253_v18, %v4261_v16  ;;  %v4364_v16 = vld [vmem:[#allocation25 + $0x1630] sm:$0xff] }
 0x8d4   :  { %10936 = vmatpush1.bf16.msra.mxu1 %v12110_v9  ;;  %v4276_v9 = vld [vmem:[#allocation25 + $0x1370] sm:$0xff] }
 0x8d5   :  { %11100 = vmatpush1.bf16.msra.mxu0 %v12112_v50  ;;  %10937 = vmatprep.subr.bf16.mxu1 %v12127_v20  ;;  %v4269_v50 = vld [vmem:[#allocation25 + $0x1338] sm:$0xff]  ;;  %v12239_v11 = vcombine.high %v4268_v30, %v4276_v9 }
 0x8d6   :  { %11101 = vmatprep.subr.bf16.mxu0 %v12129_v10  ;;  %v4277_v20 = vld [vmem:[#allocation25 + $0x1378] sm:$0xff]  ;;  %v12222_v10 = vcombine.low %v4252_v12, %v4260_v7 }
 0x8d7   :  { %v12241_v45 = vcombine.high %v4269_v50, %v4277_v20  ;;  %v12240_v43 = vcombine.low %v4269_v50, %v4277_v20  ;;  %v4380_v20 = vld [vmem:[#allocation25 + $0x16b0] sm:$0xff] }
 0x8d8   :  { %10938 = vmatpush1.bf16.msra.mxu1 %v12126_v46  ;;  %v4292_v46 = vld [vmem:[#allocation25 + $0x13f0] sm:$0xff] }
 0x8d9   :  { %11102 = vmatpush1.bf16.msra.mxu0 %v12128_v2  ;;  %10948 = vmatprep.subr.bf16.mxu1 %v12143_v14  ;;  %v4285_v2 = vld [vmem:[#allocation25 + $0x13b8] sm:$0xff]  ;;  %v12255_v40 = vcombine.high %v4284_v55, %v4292_v46  ;;  %v12254_v58 = vcombine.low %v4284_v55, %v4292_v46 }
 0x8da   :  { %11112 = vmatprep.subr.bf16.mxu0 %v12145_v22  ;;  %v4293_v14 = vld [vmem:[#allocation25 + $0x13f8] sm:$0xff]  ;;  %v12238_v22 = vcombine.low %v4268_v30, %v4276_v9 }
 0x8db   :  { %10940 = vmatmul.mubr.bf16.vlgmr.msra.gmra.mrb[28].mxu1 %v13972_v15  ;;  %v12256_v49 = vcombine.low %v4285_v2, %v4293_v14 }
 0x8dc   :  { %11104 = vmatmul.mubr.bf16.vlgmr.msra.gmra.mrb[32].mxu0 %v13972_v15  ;;  %10949 = vmatpush1.bf16.msra.mxu1 %v12142_v62  ;;  %v12176_v15 = vcombine.low %v4205_v44, %v4213_v53  ;;  %v12257_v62 = vcombine.high %v4285_v2, %v4293_v14  ;;  %v4316_v53 = vld [vmem:[#allocation25 + $0x14b0] sm:$0xff] }
 0x8dd   :  { %10980 = vmatprep.mubr.bf16.mxu1 %v14041_v13  ;;  %11113 = vmatpush1.bf16.msra.mxu0 %v12144_v48  ;;  %v4301_v48 = vld [vmem:[#allocation25 + $0x1438] sm:$0xff]  ;;  %v4396_v14 = vld [vmem:[#allocation25 + $0x1730] sm:$0xff] }
 0x8de   :  { %11144 = vmatprep.mubr.bf16.mxu0 %v14041_v13  ;;  %10950 = vmatprep.subr.bf16.mxu1 %v12159_v54  ;;  %v12190_v13 = vcombine.low %v4220_v33, %v4228_v60  ;;  %v4309_v54 = vld [vmem:[#allocation25 + $0x1478] sm:$0xff] }
 0x8df   :  { %11114 = vmatprep.subr.bf16.mxu0 %v12161_v51  ;;  %v12271_v51 = vcombine.high %v4300_v27, %v4308_v25  ;;  %v12273_v44 = vcombine.high %v4301_v48, %v4309_v54  ;;  %v12272_v33 = vcombine.low %v4301_v48, %v4309_v54  ;;  %v4412_v54 = vld [vmem:[#allocation25 + $0x17b0] sm:$0xff] }
 0x8e0   :  { %10951 = vmatpush1.bf16.msra.mxu1 %v12158_v56  ;;  %v4324_v56 = vld [vmem:[#allocation25 + $0x14f0] sm:$0xff] }
 0x8e1   :  { %11115 = vmatpush1.bf16.msra.mxu0 %v12160_v4  ;;  %10952 = vmatprep.subr.bf16.mxu1 %v12175_v6  ;;  %v4317_v4 = vld [vmem:[#allocation25 + $0x14b8] sm:$0xff]  ;;  %v12287_v60 = vcombine.high %v4316_v53, %v4324_v56 }
 0x8e2   :  { %11116 = vmatprep.subr.bf16.mxu0 %v12177_v59  ;;  %v4325_v6 = vld [vmem:[#allocation25 + $0x14f8] sm:$0xff]  ;;  %v12270_v59 = vcombine.low %v4300_v27, %v4308_v25 }
 0x8e3   :  { %v12289_v36 = vcombine.high %v4317_v4, %v4325_v6  ;;  %v12288_v52 = vcombine.low %v4317_v4, %v4325_v6  ;;  %v4428_v6 = vld [vmem:[#allocation25 + $0x1830] sm:$0xff] }
 0x8e4   :  { %10953 = vmatpush1.bf16.msra.mxu1 %v12174_v28  ;;  %v4340_v28 = vld [vmem:[#allocation25 + $0x1570] sm:$0xff] }
 0x8e5   :  { %11117 = vmatpush1.bf16.msra.mxu0 %v12176_v15  ;;  %10954 = vmatprep.subr.bf16.mxu1 %v12191_v42  ;;  %v4333_v15 = vld [vmem:[#allocation25 + $0x1538] sm:$0xff]  ;;  %v12303_v31 = vcombine.high %v4332_v23, %v4340_v28 }
 0x8e6   :  { %11118 = vmatprep.subr.bf16.mxu0 %v12193_v29  ;;  %v4341_v42 = vld [vmem:[#allocation25 + $0x1578] sm:$0xff]  ;;  %v12286_v29 = vcombine.low %v4316_v53, %v4324_v56 }
 0x8e7   :  { %v12305_v63 = vcombine.high %v4333_v15, %v4341_v42  ;;  %v12304_v12 = vcombine.low %v4333_v15, %v4341_v42  ;;  %v4444_v42 = vld [vmem:[#allocation25 + $0x18b0] sm:$0xff] }
 0x8e8   :  { %10955 = vmatpush1.bf16.msra.mxu1 %v12190_v13  ;;  %v4356_v13 = vld [vmem:[#allocation25 + $0x15f0] sm:$0xff] }
 0x8e9   :  { %11119 = vmatpush1.bf16.msra.mxu0 %v12192_v0  ;;  %10956 = vmatprep.subr.bf16.mxu1 %v12207_v1  ;;  %v4349_v0 = vld [vmem:[#allocation25 + $0x15b8] sm:$0xff]  ;;  %v12319_v7 = vcombine.high %v4348_v61, %v4356_v13 }
 0x8ea   :  { %11120 = vmatprep.subr.bf16.mxu0 %v12209_v3  ;;  %v4357_v1 = vld [vmem:[#allocation25 + $0x15f8] sm:$0xff]  ;;  %v12302_v3 = vcombine.low %v4332_v23, %v4340_v28 }
 0x8eb   :  { %v12321_v18 = vcombine.high %v4349_v0, %v4357_v1  ;;  %v12320_v30 = vcombine.low %v4349_v0, %v4357_v1  ;;  %v4460_v0 = vld [vmem:[#allocation25 + $0x1930] sm:$0xff] }
 0x8ec   :  { %10957 = vmatpush1.bf16.msra.mxu1 %v12206_v17  ;;  %v4372_v17 = vld [vmem:[#allocation25 + $0x1670] sm:$0xff] }
 0x8ed   :  { %11121 = vmatpush1.bf16.msra.mxu0 %v12208_v5  ;;  %10958 = vmatprep.subr.bf16.mxu1 %v12223_v8  ;;  %v4365_v5 = vld [vmem:[#allocation25 + $0x1638] sm:$0xff]  ;;  %v12335_v9 = vcombine.high %v4364_v16, %v4372_v17  ;;  %v4468_v1 = vld [vmem:[#allocation25 + $0x1970] sm:$0xff] }
 0x8ee   :  { %11122 = vmatprep.subr.bf16.mxu0 %v12225_v26  ;;  %v4373_v8 = vld [vmem:[#allocation25 + $0x1678] sm:$0xff]  ;;  %v12318_v26 = vcombine.low %v4348_v61, %v4356_v13 }
 0x8ef   :  { %v12337_v50 = vcombine.high %v4365_v5, %v4373_v8  ;;  %v12336_v55 = vcombine.low %v4365_v5, %v4373_v8  ;;  %v4476_v8 = vld [vmem:[#allocation25 + $0x19b0] sm:$0xff] }
 0x8f0   :  { %10959 = vmatpush1.bf16.msra.mxu1 %v12222_v10  ;;  %v4388_v10 = vld [vmem:[#allocation25 + $0x16f0] sm:$0xff] }
 0x8f1   :  { %11123 = vmatpush1.bf16.msra.mxu0 %v12224_v32  ;;  %10960 = vmatprep.subr.bf16.mxu1 %v12239_v11  ;;  %v4381_v32 = vld [vmem:[#allocation25 + $0x16b8] sm:$0xff]  ;;  %v12351_v46 = vcombine.high %v4380_v20, %v4388_v10 }
 0x8f2   :  { %11124 = vmatprep.subr.bf16.mxu0 %v12241_v45  ;;  %v4389_v11 = vld [vmem:[#allocation25 + $0x16f8] sm:$0xff]  ;;  %v12334_v45 = vcombine.low %v4364_v16, %v4372_v17  ;;  %v12431_v17 = vcombine.high %v4460_v0, %v4468_v1 }
 0x8f3   :  { %v12353_v2 = vcombine.high %v4381_v32, %v4389_v11  ;;  %v12352_v27 = vcombine.low %v4381_v32, %v4389_v11  ;;  %v4492_v32 = vld [vmem:[#allocation25 + $0x1a30] sm:$0xff] }
 0x8f4   :  { %10961 = vmatpush1.bf16.msra.mxu1 %v12238_v22  ;;  %v4404_v22 = vld [vmem:[#allocation25 + $0x1770] sm:$0xff] }
 0x8f5   :  { %11125 = vmatpush1.bf16.msra.mxu0 %v12240_v43  ;;  %10962 = vmatprep.subr.bf16.mxu1 %v12255_v40  ;;  %v4397_v43 = vld [vmem:[#allocation25 + $0x1738] sm:$0xff]  ;;  %v12367_v25 = vcombine.high %v4396_v14, %v4404_v22  ;;  %v4500_v11 = vld [vmem:[#allocation25 + $0x1a70] sm:$0xff] }
 0x8f6   :  { %11126 = vmatprep.subr.bf16.mxu0 %v12257_v62  ;;  %v4405_v40 = vld [vmem:[#allocation25 + $0x1778] sm:$0xff]  ;;  %v12350_v62 = vcombine.low %v4380_v20, %v4388_v10 }
 0x8f7   :  { %v12369_v48 = vcombine.high %v4397_v43, %v4405_v40  ;;  %v12368_v53 = vcombine.low %v4397_v43, %v4405_v40  ;;  %v4516_v43 = vld [vmem:[#allocation25 + $0x1af0] sm:$0xff]  ;;  %v4509_v40 = vld [vmem:[#allocation25 + $0x1ab8] sm:$0xff] }
 0x8f8   :  { %10963 = vmatpush1.bf16.msra.mxu1 %v12254_v58  ;;  %v4420_v58 = vld [vmem:[#allocation25 + $0x17f0] sm:$0xff] }
 0x8f9   :  { %11127 = vmatpush1.bf16.msra.mxu0 %v12256_v49  ;;  %10964 = vmatprep.subr.bf16.mxu1 %v12271_v51  ;;  %v4413_v49 = vld [vmem:[#allocation25 + $0x17b8] sm:$0xff]  ;;  %v12383_v56 = vcombine.high %v4412_v54, %v4420_v58 }
 0x8fa   :  { %11128 = vmatprep.subr.bf16.mxu0 %v12273_v44  ;;  %v4421_v51 = vld [vmem:[#allocation25 + $0x17f8] sm:$0xff]  ;;  %v12366_v44 = vcombine.low %v4396_v14, %v4404_v22  ;;  %v4508_v22 = vld [vmem:[#allocation25 + $0x1ab0] sm:$0xff] }
 0x8fb   :  { %v12385_v4 = vcombine.high %v4413_v49, %v4421_v51  ;;  %v12384_v23 = vcombine.low %v4413_v49, %v4421_v51  ;;  %v4524_v49 = vld [vmem:[#allocation25 + $0x1b30] sm:$0xff] }
 0x8fc   :  { %10965 = vmatpush1.bf16.msra.mxu1 %v12270_v59  ;;  %v4436_v59 = vld [vmem:[#allocation25 + $0x1870] sm:$0xff] }
 0x8fd   :  { %11129 = vmatpush1.bf16.msra.mxu0 %v12272_v33  ;;  %10966 = vmatprep.subr.bf16.mxu1 %v12287_v60  ;;  %v4429_v33 = vld [vmem:[#allocation25 + $0x1838] sm:$0xff]  ;;  %v12399_v28 = vcombine.high %v4428_v6, %v4436_v59  ;;  %v4532_v51 = vld [vmem:[#allocation25 + $0x1b70] sm:$0xff] }
 0x8fe   :  { %11130 = vmatprep.subr.bf16.mxu0 %v12289_v36  ;;  %v4437_v60 = vld [vmem:[#allocation25 + $0x1878] sm:$0xff]  ;;  %v12382_v36 = vcombine.low %v4412_v54, %v4420_v58  ;;  %v12479_v54 = vcombine.high %v4508_v22, %v4516_v43 }
 0x8ff   :  { %v12401_v15 = vcombine.high %v4429_v33, %v4437_v60  ;;  %v12400_v61 = vcombine.low %v4429_v33, %v4437_v60 }
 0x900   :  { %10967 = vmatpush1.bf16.msra.mxu1 %v12286_v29  ;;  %v4452_v29 = vld [vmem:[#allocation25 + $0x18f0] sm:$0xff] }
 0x901   :  { %11131 = vmatpush1.bf16.msra.mxu0 %v12288_v52  ;;  %10968 = vmatprep.subr.bf16.mxu1 %v12303_v31  ;;  %v12398_v52 = vcombine.low %v4428_v6, %v4436_v59  ;;  %v4445_v31 = vld [vmem:[#allocation25 + $0x18b8] sm:$0xff]  ;;  %v12415_v13 = vcombine.high %v4444_v42, %v4452_v29  ;;  %v12478_v59 = vcombine.low %v4508_v22, %v4516_v43 }
 0x902   :  { %11132 = vmatprep.subr.bf16.mxu0 %v12305_v63  ;;  %v4453_v63 = vld [vmem:[#allocation25 + $0x18f8] sm:$0xff] }
 0x903   :  { %v12416_v16 = vcombine.low %v4445_v31, %v4453_v63  ;;  %v4589_v43 = vld [vmem:[#allocation25 + $0x1d38] sm:$0xff] }
 0x904   :  { %10969 = vmatpush1.bf16.msra.mxu1 %v12302_v3  ;;  %v12417_v3 = vcombine.high %v4445_v31, %v4453_v63  ;;  %v4549_v31 = vld [vmem:[#allocation25 + $0x1bf8] sm:$0xff] }
 0x905   :  { %11133 = vmatpush1.bf16.msra.mxu0 %v12304_v12  ;;  %10970 = vmatprep.subr.bf16.mxu1 %v12319_v7  ;;  %v4461_v12 = vld [vmem:[#allocation25 + $0x1938] sm:$0xff] }
 0x906   :  { %11134 = vmatprep.subr.bf16.mxu0 %v12321_v18  ;;  %v4469_v7 = vld [vmem:[#allocation25 + $0x1978] sm:$0xff]  ;;  %v12414_v18 = vcombine.low %v4444_v42, %v4452_v29 }
 0x907   :  { %v12433_v5 = vcombine.high %v4461_v12, %v4469_v7 }
 0x908   :  { %10971 = vmatpush1.bf16.msra.mxu1 %v12318_v26  ;;  %v4484_v26 = vld [vmem:[#allocation25 + $0x19f0] sm:$0xff] }
 0x909   :  { %11135 = vmatpush1.bf16.msra.mxu0 %v12320_v30  ;;  %10972 = vmatprep.subr.bf16.mxu1 %v12335_v9  ;;  %v4477_v30 = vld [vmem:[#allocation25 + $0x19b8] sm:$0xff]  ;;  %v12447_v20 = vcombine.high %v4476_v8, %v4484_v26 }
 0x90a   :  { %11136 = vmatprep.subr.bf16.mxu0 %v12337_v50  ;;  %v4485_v9 = vld [vmem:[#allocation25 + $0x19f8] sm:$0xff]  ;;  %v12430_v50 = vcombine.low %v4460_v0, %v4468_v1  ;;  %v12494_v0 = vcombine.low %v4524_v49, %v4532_v51 }
 0x90b   :  { %v12449_v10 = vcombine.high %v4477_v30, %v4485_v9 }
 0x90c   :  { %10973 = vmatpush1.bf16.msra.mxu1 %v12334_v45  ;;  %v4493_v45 = vld [vmem:[#allocation25 + $0x1a38] sm:$0xff] }
 0x90d   :  { %11137 = vmatpush1.bf16.msra.mxu0 %v12336_v55  ;;  %10974 = vmatprep.subr.bf16.mxu1 %v12351_v46  ;;  %v4501_v55 = vld [vmem:[#allocation25 + $0x1a78] sm:$0xff]  ;;  %v12448_v46 = vcombine.low %v4477_v30, %v4485_v9 }
 0x90e   :  { %11138 = vmatprep.subr.bf16.mxu0 %v12353_v2  ;;  %v12463_v2 = vcombine.high %v4492_v32, %v4500_v11  ;;  %v12465_v14 = vcombine.high %v4493_v45, %v4501_v55 }
 0x910   :  { %10975 = vmatpush1.bf16.msra.mxu1 %v12350_v62  ;;  %v4517_v62 = vld [vmem:[#allocation25 + $0x1af8] sm:$0xff] }
 0x911   :  { %11139 = vmatpush1.bf16.msra.mxu0 %v12352_v27  ;;  %10976 = vmatprep.subr.bf16.mxu1 %v12367_v25  ;;  %v12462_v27 = vcombine.low %v4492_v32, %v4500_v11  ;;  %v14114_v25 = vld [vmem:[#allocation26 + $0x8] sm:$0xff]  ;;  %v12481_v58 = vcombine.high %v4509_v40, %v4517_v62  ;;  %v12480_v60 = vcombine.low %v4509_v40, %v4517_v62  ;;  %v4573_v32 = vld [vmem:[#allocation25 + $0x1cb8] sm:$0xff] }
 0x912   :  { %11140 = vmatprep.subr.bf16.mxu0 %v12369_v48  ;;  %v12464_v48 = vcombine.low %v4493_v45, %v4501_v55  ;;  %v4721_v6 = vrot.slane %v14114_v25, %v13811_v21  ;;  %v4729_v33 = vrot.slane %v14114_v25, %v13845_v37  ;;  %v4581_v11 = vld [vmem:[#allocation25 + $0x1cf8] sm:$0xff] }
 0x913   :  { %v4597_v40 = vld [vmem:[#allocation25 + $0x1d78] sm:$0xff] }
 0x914   :  { %10977 = vmatpush1.bf16.msra.mxu1 %v12366_v44  ;;  %v4717_v44 = vrot.slane %v14114_v25, %v13808_v19 }
 0x915   :  { %11141 = vmatpush1.bf16.msra.mxu0 %v12368_v53  ;;  %10978 = vmatprep.subr.bf16.mxu1 %v12383_v56  ;;  %v4525_v53 = vld [vmem:[#allocation25 + $0x1b38] sm:$0xff] }
 0x916   :  { %11142 = vmatprep.subr.bf16.mxu0 %v12385_v4  ;;  %v4533_v56 = vld [vmem:[#allocation25 + $0x1b78] sm:$0xff]  ;;  %v4725_v4 = vrot.slane %v14114_v25, %v13842_v35 }
 0x917   :  { %v12497_v19 = vcombine.high %v4525_v53, %v4533_v56  ;;  %v4541_v35 = vld [vmem:[#allocation25 + $0x1bb8] sm:$0xff] }
 0x918   :  { %10979 = vmatpush1.bf16.msra.mxu1 %v12382_v36  ;;  %v12495_v36 = vcombine.high %v4524_v49, %v4532_v51  ;;  %v12512_v9 = vcombine.low %v4541_v35, %v4549_v31  ;;  %v12561_v51 = vcombine.high %v4589_v43, %v4597_v40 }
 0x919   :  { %11143 = vmatpush1.bf16.msra.mxu0 %v12384_v23  ;;  %10989 = vmatprep.subr.bf16.mxu1 %v12399_v28  ;;  %v4540_v28 = vld [vmem:[#allocation25 + $0x1bb0] sm:$0xff] }
 0x91a   :  { %11153 = vmatprep.subr.bf16.mxu0 %v12401_v15  ;;  %v4548_v15 = vld [vmem:[#allocation25 + $0x1bf0] sm:$0xff] }
 0x91b   :  { %10981 = vmatmul.mubr.bf16.vlgmr.msra.gmra.mrb[28].mxu1 %v14043_v34  ;;  %v12510_v30 = vcombine.low %v4540_v28, %v4548_v15 }
 0x91c   :  { %11145 = vmatmul.mubr.bf16.vlgmr.msra.gmra.mrb[32].mxu0 %v14043_v34  ;;  %10990 = vmatpush1.bf16.msra.mxu1 %v12398_v52  ;;  %v12432_v34 = vcombine.low %v4461_v12, %v4469_v7  ;;  %v12496_v12 = vcombine.low %v4525_v53, %v4533_v56  ;;  %v12511_v7 = vcombine.high %v4540_v28, %v4548_v15  ;;  %v4612_v53 = vld [vmem:[#allocation25 + $0x1df0] sm:$0xff]  ;;  %v4605_v56 = vld [vmem:[#allocation25 + $0x1db8] sm:$0xff] }
 0x91d   :  { %11021 = vmatprep.mubr.bf16.mxu1 %v14047_v41  ;;  %11154 = vmatpush1.bf16.msra.mxu0 %v12400_v61  ;;  %v4629_v28 = vld [vmem:[#allocation25 + $0x1e78] sm:$0xff] }
 0x91e   :  { %11185 = vmatprep.mubr.bf16.mxu0 %v14047_v41  ;;  %10991 = vmatprep.subr.bf16.mxu1 %v12415_v13  ;;  %v12446_v41 = vcombine.low %v4476_v8, %v4484_v26  ;;  %v4557_v8 = vld [vmem:[#allocation25 + $0x1c38] sm:$0xff] }
 0x91f   :  { %11155 = vmatprep.subr.bf16.mxu0 %v12417_v3  ;;  %v4565_v26 = vld [vmem:[#allocation25 + $0x1c78] sm:$0xff] }
 0x920   :  { %10992 = vmatpush1.bf16.msra.mxu1 %v12414_v18  ;;  %v12528_v55 = vcombine.low %v4557_v8, %v4565_v26 }
 0x921   :  { %11156 = vmatpush1.bf16.msra.mxu0 %v12416_v16  ;;  %10993 = vmatprep.subr.bf16.mxu1 %v12431_v17  ;;  %v12513_v16 = vcombine.high %v4541_v35, %v4549_v31  ;;  %v4556_v17 = vld [vmem:[#allocation25 + $0x1c30] sm:$0xff] }
 0x922   :  { %11157 = vmatprep.subr.bf16.mxu0 %v12433_v5  ;;  %v4564_v5 = vld [vmem:[#allocation25 + $0x1c70] sm:$0xff] }
 0x923   :  { %v12526_v45 = vcombine.low %v4556_v17, %v4564_v5  ;;  %v4636_v35 = vld [vmem:[#allocation25 + $0x1eb0] sm:$0xff] }
 0x924   :  { %10994 = vmatpush1.bf16.msra.mxu1 %v12430_v50  ;;  %v12527_v50 = vcombine.high %v4556_v17, %v4564_v5  ;;  %v4644_v31 = vld [vmem:[#allocation25 + $0x1ef0] sm:$0xff] }
 0x925   :  { %11158 = vmatpush1.bf16.msra.mxu0 %v12432_v34  ;;  %10995 = vmatprep.subr.bf16.mxu1 %v12447_v20  ;;  %v12529_v34 = vcombine.high %v4557_v8, %v4565_v26  ;;  %v4572_v20 = vld [vmem:[#allocation25 + $0x1cb0] sm:$0xff] }
 0x926   :  { %11159 = vmatprep.subr.bf16.mxu0 %v12449_v10  ;;  %v4580_v10 = vld [vmem:[#allocation25 + $0x1cf0] sm:$0xff] }
 0x927   :  { %v4668_v8 = vld [vmem:[#allocation25 + $0x1fb0] sm:$0xff] }
 0x928   :  { %10996 = vmatpush1.bf16.msra.mxu1 %v12446_v41  ;;  %v12543_v41 = vcombine.high %v4572_v20, %v4580_v10  ;;  %v4676_v26 = vld [vmem:[#allocation25 + $0x1ff0] sm:$0xff] }
 0x929   :  { %11160 = vmatpush1.bf16.msra.mxu0 %v12448_v46  ;;  %10997 = vmatprep.subr.bf16.mxu1 %v12463_v2  ;;  %v12545_v46 = vcombine.high %v4573_v32, %v4581_v11  ;;  %v4588_v2 = vld [vmem:[#allocation25 + $0x1d30] sm:$0xff] }
 0x92a   :  { %11161 = vmatprep.subr.bf16.mxu0 %v12465_v14  ;;  %v4596_v14 = vld [vmem:[#allocation25 + $0x1d70] sm:$0xff] }
 0x92c   :  { %10998 = vmatpush1.bf16.msra.mxu1 %v12462_v27  ;;  %v12542_v27 = vcombine.low %v4572_v20, %v4580_v10  ;;  %v12639_v20 = vcombine.high %v4668_v8, %v4676_v26 }
 0x92d   :  { %11162 = vmatpush1.bf16.msra.mxu0 %v12464_v48  ;;  %10999 = vmatprep.subr.bf16.mxu1 %v12479_v54  ;;  %v12544_v54 = vcombine.low %v4573_v32, %v4581_v11  ;;  %v12638_v32 = vcombine.low %v4668_v8, %v4676_v26 }
 0x92e   :  { %v10695_v23 = vpop.f32.mrb[24].mxu1  ;;  %11163 = vmatprep.subr.bf16.mxu0 %v12481_v58  ;;  %v12559_v58 = vcombine.high %v4588_v2, %v4596_v14 }
 0x92f   :  { %v12702_v42 = vadd.f32 %v10695_v23, %v4717_v44  ;;  %v10859_v29 = vpop.f32.mrb[28].mxu0  ;;  %v10697_v52 = vpop.f32.mrb[25].mxu1  ;;  %v4604_v44 = vld [vmem:[#allocation25 + $0x1db0] sm:$0xff] }
 0x930   :  { %v12704_v63 = vadd.f32 %v10859_v29, %v4725_v4  ;;  %v12703_v21 = vadd.f32 %v10697_v52, %v4721_v6  ;;  %v10861_v61 = vpop.f32.mrb[29].mxu0  ;;  %v10699_v13 = vpop.f32.mrb[26].mxu1  ;;  %11000 = vmatpush1.bf16.msra.mxu1 %v12478_v59  ;;  %v4613_v4 = vld [vmem:[#allocation25 + $0x1df8] sm:$0xff]  ;;  %v12558_v6 = vcombine.low %v4588_v2, %v4596_v14  ;;  %v12560_v59 = vcombine.low %v4589_v43, %v4597_v40  ;;  %v4628_v23 = vld [vmem:[#allocation25 + $0x1e70] sm:$0xff] }
 0x931   :  { %13045 = vtanh.f32 %v12702_v42  ;;  %v12705_v37 = vadd.f32 %v10861_v61, %v4729_v33  ;;  %v10863_v1 = vpop.f32.mrb[30].mxu0  ;;  %11164 = vmatpush1.bf16.msra.mxu0 %v12480_v60  ;;  %v10700_v3 = vpop.f32.mrb[27].mxu1  ;;  %11001 = vmatprep.subr.bf16.mxu1 %v12495_v36  ;;  %v12575_v33 = vcombine.high %v4604_v44, %v4612_v53  ;;  %v12577_v60 = vcombine.high %v4605_v56, %v4613_v4  ;;  %v4620_v36 = vld [vmem:[#allocation25 + $0x1e30] sm:$0xff] }
 0x932   :  { %13047 = vtanh.f32 %v12704_v63  ;;  %v10864_v18 = vpop.f32.mrb[31].mxu0  ;;  %11165 = vmatprep.subr.bf16.mxu0 %v12497_v19  ;;  %v4621_v19 = vld [vmem:[#allocation25 + $0x1e38] sm:$0xff]  ;;  %v12574_v15 = vcombine.low %v4604_v44, %v4612_v53  ;;  %v12576_v42 = vcombine.low %v4605_v56, %v4613_v4  ;;  %v12591_v29 = vcombine.high %v4620_v36, %v4628_v23  ;;  %v4652_v1 = vld [vmem:[#allocation25 + $0x1f30] sm:$0xff] }
 0x933   :  { %13049 = vtanh.f32 %v12703_v21  ;;  %v12593_v52 = vcombine.high %v4621_v19, %v4629_v28  ;;  %v4637_v63 = vld [vmem:[#allocation25 + $0x1eb8] sm:$0xff]  ;;  %v12590_v61 = vcombine.low %v4620_v36, %v4628_v23  ;;  %v12592_v13 = vcombine.low %v4621_v19, %v4629_v28  ;;  %v4660_v3 = vld [vmem:[#allocation25 + $0x1f70] sm:$0xff] }
 0x934   :  { %13051 = vtanh.f32 %v12705_v37  ;;  %11002 = vmatpush1.bf16.msra.mxu1 %v12494_v0  ;;  %v4645_v21 = vld [vmem:[#allocation25 + $0x1ef8] sm:$0xff]  ;;  %v12607_v0 = vcombine.high %v4636_v35, %v4644_v31  ;;  %v12606_v18 = vcombine.low %v4636_v35, %v4644_v31  ;;  %v12623_v17 = vcombine.high %v4652_v1, %v4660_v3 }
 0x935   :  { %11166 = vmatpush1.bf16.msra.mxu0 %v12496_v12  ;;  %11003 = vmatprep.subr.bf16.mxu1 %v12511_v7  ;;  %v12609_v37 = vcombine.high %v4637_v63, %v4645_v21  ;;  %v4653_v12 = vld [vmem:[#allocation25 + $0x1f38] sm:$0xff] }
 0x936   :  { %11167 = vmatprep.subr.bf16.mxu0 %v12513_v16  ;;  %v4661_v7 = vld [vmem:[#allocation25 + $0x1f78] sm:$0xff]  ;;  %v12608_v16 = vcombine.low %v4637_v63, %v4645_v21 }
 0x937   :  { %v12625_v5 = vcombine.high %v4653_v12, %v4661_v7 }
 0x938   :  { %11004 = vmatpush1.bf16.msra.mxu1 %v12510_v30  ;;  %v4669_v30 = vld [vmem:[#allocation25 + $0x1fb8] sm:$0xff] }
 0x939   :  { %11168 = vmatpush1.bf16.msra.mxu0 %v12512_v9  ;;  %11005 = vmatprep.subr.bf16.mxu1 %v12527_v50  ;;  %v4677_v9 = vld [vmem:[#allocation25 + $0x1ff8] sm:$0xff]  ;;  %v12622_v50 = vcombine.low %v4652_v1, %v4660_v3 }
 0x93a   :  { %11169 = vmatprep.subr.bf16.mxu0 %v12529_v34  ;;  %v12624_v34 = vcombine.low %v4653_v12, %v4661_v7  ;;  %v12641_v10 = vcombine.high %v4669_v30, %v4677_v9  ;;  %v12640_v11 = vcombine.low %v4669_v30, %v4677_v9 }
 0x93b   :  { %v13046_v22 = vpop.eup %13045 }
 0x93c   :  { %v13048_v62 = vpop.eup %13047  ;;  %11218 = vst [vmem:[#allocation28 + $0x40] sm:$0xff] %v13046_v22  ;;  %11006 = vmatpush1.bf16.msra.mxu1 %v12526_v45  ;;  %v4733_v45 = vrot.slane %v14114_v25, %v13964_v39 }
 0x93d   :  { %v13050_v48 = vpop.eup %13049  ;;  %11220 = vst [vmem:[#allocation28 + $0x50] sm:$0xff] %v13048_v62  ;;  %11170 = vmatpush1.bf16.msra.mxu0 %v12528_v55  ;;  %11007 = vmatprep.subr.bf16.mxu1 %v12543_v41  ;;  %v4741_v55 = vrot.slane %v14114_v25, %v13997_v57  ;;  %v4737_v41 = vrot.slane %v14114_v25, %v13967_v47 }
 0x93e   :  { %v13052_v49 = vpop.eup %13051  ;;  %11219 = vst [vmem:[#allocation28 + $0x48] sm:$0xff] %v13050_v48  ;;  %11171 = vmatprep.subr.bf16.mxu0 %v12545_v46  ;;  %v4745_v46 = vrot.slane %v14114_v25, %v13970_v24 }
 0x93f   :  { %11221 = vst [vmem:[#allocation28 + $0x58] sm:$0xff] %v13052_v49 }
 0x940   :  { %11008 = vmatpush1.bf16.msra.mxu1 %v12542_v27 }
 0x941   :  { %11172 = vmatpush1.bf16.msra.mxu0 %v12544_v54  ;;  %11009 = vmatprep.subr.bf16.mxu1 %v12559_v58 }
 0x942   :  { %11173 = vmatprep.subr.bf16.mxu0 %v12561_v51 }
 0x944   :  { %11010 = vmatpush1.bf16.msra.mxu1 %v12558_v6 }
 0x945   :  { %11174 = vmatpush1.bf16.msra.mxu0 %v12560_v59  ;;  %11011 = vmatprep.subr.bf16.mxu1 %v12575_v33 }
 0x946   :  { %11175 = vmatprep.subr.bf16.mxu0 %v12577_v60 }
 0x948   :  { %11012 = vmatpush1.bf16.msra.mxu1 %v12574_v15 }
 0x949   :  { %11176 = vmatpush1.bf16.msra.mxu0 %v12576_v42  ;;  %11013 = vmatprep.subr.bf16.mxu1 %v12591_v29 }
 0x94a   :  { %11177 = vmatprep.subr.bf16.mxu0 %v12593_v52 }
 0x94c   :  { %11014 = vmatpush1.bf16.msra.mxu1 %v12590_v61 }
 0x94d   :  { %11178 = vmatpush1.bf16.msra.mxu0 %v12592_v13  ;;  %11015 = vmatprep.subr.bf16.mxu1 %v12607_v0 }
 0x94e   :  { %11179 = vmatprep.subr.bf16.mxu0 %v12609_v37 }
 0x950   :  { %11016 = vmatpush1.bf16.msra.mxu1 %v12606_v18 }
 0x951   :  { %11180 = vmatpush1.bf16.msra.mxu0 %v12608_v16  ;;  %11017 = vmatprep.subr.bf16.mxu1 %v12623_v17 }
 0x952   :  { %11181 = vmatprep.subr.bf16.mxu0 %v12625_v5 }
 0x954   :  { %11018 = vmatpush1.bf16.msra.mxu1 %v12622_v50 }
 0x955   :  { %11182 = vmatpush1.bf16.msra.mxu0 %v12624_v34  ;;  %11019 = vmatprep.subr.bf16.mxu1 %v12639_v20 }
 0x956   :  { %11183 = vmatprep.subr.bf16.mxu0 %v12641_v10 }
 0x958   :  { %11020 = vmatpush1.bf16.msra.mxu1 %v12638_v32 }
 0x959   :  { %11184 = vmatpush1.bf16.msra.mxu0 %v12640_v11 }
 0x95b   :  { %11022 = vmatmul.mubr.bf16.vlgmr.msra.gmra.mrb[28].mxu1 %v14056_v38 }
 0x95c   :  { %11186 = vmatmul.mubr.bf16.vlgmr.msra.gmra.mrb[32].mxu0 %v14056_v38 }
 0xa2e   :  { %v11023_v2 = vpop.f32.mrb[28].mxu1 }
 0xa2f   :  { %v12706_v14 = vadd.f32 %v11023_v2, %v4733_v45  ;;  %v11187_v22 = vpop.f32.mrb[32].mxu0  ;;  %v11025_v43 = vpop.f32.mrb[29].mxu1 }
 0xa30   :  { %v12708_v40 = vadd.f32 %v11187_v22, %v4741_v55  ;;  %v12707_v62 = vadd.f32 %v11025_v43, %v4737_v41  ;;  %v11189_v27 = vpop.f32.mrb[33].mxu0  ;;  %v11027_v38 = vpop.f32.mrb[30].mxu1 }
 0xa31   :  { %13053 = vtanh.f32 %v12706_v14  ;;  %v12709_v48 = vadd.f32 %v11189_v27, %v4745_v46  ;;  %v11191_v39 = vpop.f32.mrb[34].mxu0  ;;  %v11028_v54 = vpop.f32.mrb[31].mxu1 }
 0xa32   :  { %13055 = vtanh.f32 %v12708_v40  ;;  %v11192_v57 = vpop.f32.mrb[35].mxu0 }
 0xa33   :  { %13057 = vtanh.f32 %v12707_v62 }
 0xa34   :  { %13059 = vtanh.f32 %v12709_v48 }
 0xa3b   :  { %v13054_v47 = vpop.eup %13053 }
 0xa3c   :  { %v13056_v24 = vpop.eup %13055  ;;  %11222 = vst [vmem:[#allocation28 + $0x60] sm:$0xff] %v13054_v47 }
 0xa3d   :  { %v13058_v25 = vpop.eup %13057  ;;  %11224 = vst [vmem:[#allocation28 + $0x70] sm:$0xff] %v13056_v24 }
 0xa3e   :  { %v13060_v58 = vpop.eup %13059  ;;  %11223 = vst [vmem:[#allocation28 + $0x68] sm:$0xff] %v13058_v25 }
 0xa3f   :  { %11225 = vst [vmem:[#allocation28 + $0x78] sm:$0xff] %v13060_v58 }
 0xa40   :  { %13427 = shalt.err (!%p13424_p6)
}
 0xa41   :  { %s13428_s10 = scalar_lea.hbm %s14163_s17, 2048 }
 0xa42   :  { %p13429_p7 = scmp.ne.s32.totalorder %s14163_s17, %s13428_s10  ;;  %p13432_p8 = scmp.lt.u32.totalorder %s13428_s10, %s14163_s17 }
 0xa44   :  { %p13434_p9 = pnand %p13432_p8, %p13429_p7 }
 0xa46   :  { %13437 = shalt.err (!%p13434_p9)
}
 0xa47   :  { %11235 = dma.vmem_to_hbm [thread:$0]  %s11233_s28, 2048, %s14163_s17, [#allocation4]  }
 0xa48   :  { %13456 = dma.done.wait [#allocation4], 2048  }
 0xa49   :  { %13457 = vsyncadd [#allocation4], 4294965248 }
 0xa4a   :  { %11239 = vsyncpa [#allocation3], 1 }
 0xa4b   :  { %11240 = vsyncpa [#allocation6], 1 }
 0xa4c   :  { %11241 = vsyncpa [#allocation9], 1 }
 0xa4d   :  { %11242 = vsyncpa [#allocation12], 1 }
 0xa4e   :  { %11243 = vsyncpa [#allocation15], 1 }
 0xa4f   :  { %11244 = vsyncpa [#allocation18], 1 }
 0xa50   :  { %11245 = vsyncpa [#allocation21], 1 }
 0xa51   :  { %11246 = vsyncpa [#allocation24], 1 }
 0xa52   :  { %11247 = vsyncpa [#allocation27], 1 }
 0xa53   :  { %11248 = vsyncpa [#allocation4], 1 }

</bundles_post_ra>
